<compile_context>
chip_gen: v5e
topology: v5e:2x2
jax: 0.10.0
libtpu: 0.0.40
codegen_flags: <defaults>
</compile_context>

<pallas_src>
import functools

import jax
import jax.numpy as jnp
from jax.experimental import pallas as pl
from jax.experimental.pallas import tpu as pltpu


# ---------------------------------------------------------------------------
# in-kernel helpers (traced inside the Pallas body)
# ---------------------------------------------------------------------------
def _softmax_over_axis(x, axis):
    m = jnp.max(x, axis=axis, keepdims=True)
    e = jnp.exp(x - m)
    return e / jnp.sum(e, axis=axis, keepdims=True)


def _squash_last(s, eps=1e-8):
    # norm / (1 + norm**2 + eps) * s   (norm over last dim, keepdim) — matches torch squash
    norm = jnp.sqrt(jnp.sum(s * s, axis=-1, keepdims=True))
    return norm / (1.0 + norm * norm + eps) * s


# ---------------------------------------------------------------------------
# Pallas kernel: one block of Bt batch elements per grid step
# ---------------------------------------------------------------------------
def densecaps_kernel(xT_ref, wt_ref, bT_ref, c0_ref, v_ref, cT_ref, *, routing_iters):
    # xT_ref : (Bt, in_dim, R)            current batch block, x transposed (R on lanes)
    # wt_ref : (in_dim, nc, out_dim, R)   shared weights, grid-constant
    # bT_ref : (nc, R)                    routing logits (parameter), transposed
    # c0_ref : (nc, R)                    softmax(b) — batch invariant, hoisted to wrapper
    # v_ref  : (Bt, nc, out_dim)          output capsules
    # cT_ref : (Bt, nc, R)                final coupling coefficients (lane-dense store)
    Bt, in_dim, R = xT_ref.shape
    _, nc, out_dim, _ = wt_ref.shape

    xT = xT_ref[...]          # (Bt, in_dim, R)
    wt = wt_ref[...]          # (in_dim, nc, out_dim, R)

    # u_hat[b, k, o, r] = sum_i x[b, r, i] * W[r, i, k*out_dim + o]
    # Lane-dense accumulation, unrolled over the tiny contraction dim in_dim.
    u_hat = xT[:, 0, :][:, None, None, :] * wt[0][None]          # (Bt, nc, out_dim, R)
    for i in range(1, in_dim):
        u_hat = u_hat + xT[:, i, :][:, None, None, :] * wt[i][None]

    # initial coupling (batch-invariant softmax hoisted out of the kernel)
    c = jnp.broadcast_to(c0_ref[...][None], (Bt, nc, R))          # (Bt, nc, R)
    s = jnp.sum(c[:, :, None, :] * u_hat, axis=-1)                # (Bt, nc, out_dim)
    v = _squash_last(s)

    # dynamic routing (static trip count -> unrolled at trace time)
    bB = jnp.broadcast_to(bT_ref[...][None], (Bt, nc, R))
    for _ in range(routing_iters):
        bB = bB + jnp.sum(u_hat * v[:, :, :, None], axis=2)       # (Bt, nc, R)
        c = _softmax_over_axis(bB, axis=1)                        # softmax over nc
        s = jnp.sum(c[:, :, None, :] * u_hat, axis=-1)            # (Bt, nc, out_dim)
        v = _squash_last(s)

    v_ref[...] = v
    cT_ref[...] = c


# ---------------------------------------------------------------------------
# wrapper
# ---------------------------------------------------------------------------
def densecaps_v2(x, W, b_logits, *, nc, out_dim, routing_iters=3, block_b=8):
    B, R, in_dim = x.shape
    assert W.shape == (R, in_dim, nc * out_dim)
    assert b_logits.shape == (R, nc)

    # Batch blocking: whole batch per step if small, else Bt elements per step.
    Bt = min(B, block_b)
    n_blocks = -(-B // Bt)                 # cdiv
    B_pad = n_blocks * Bt
    xp = x if B_pad == B else jnp.pad(x, ((0, B_pad - B), (0, 0), (0, 0)))

    # Glue layout transforms (plain JAX / XLA, outside the kernel): put R on lanes.
    xT = jnp.transpose(xp, (0, 2, 1)).astype(jnp.float32)                      # (B_pad, in_dim, R)
    wt = jnp.transpose(W.reshape(R, in_dim, nc, out_dim), (1, 2, 3, 0))        # (in_dim, nc, out_dim, R)
    wt = wt.astype(jnp.float32)
    bT = jnp.transpose(b_logits, (1, 0)).astype(jnp.float32)                   # (nc, R)
    c0T = jnp.transpose(jax.nn.softmax(b_logits, axis=-1), (1, 0))             # (nc, R), hoisted softmax
    c0T = c0T.astype(jnp.float32)

    kernel = functools.partial(densecaps_kernel, routing_iters=routing_iters)

    v, cT = pl.pallas_call(
        kernel,
        out_shape=(
            jax.ShapeDtypeStruct((B_pad, nc, out_dim), jnp.float32),
            jax.ShapeDtypeStruct((B_pad, nc, R), jnp.float32),
        ),
        grid=(n_blocks,),
        in_specs=[
            pl.BlockSpec((Bt, in_dim, R), lambda i: (i, 0, 0)),
            pl.BlockSpec((in_dim, nc, out_dim, R), lambda i: (0, 0, 0, 0)),
            pl.BlockSpec((nc, R), lambda i: (0, 0)),
            pl.BlockSpec((nc, R), lambda i: (0, 0)),
        ],
        out_specs=(
            pl.BlockSpec((Bt, nc, out_dim), lambda i: (i, 0, 0)),
            pl.BlockSpec((Bt, nc, R), lambda i: (i, 0, 0)),
        ),
        compiler_params=pltpu.CompilerParams(
            dimension_semantics=("parallel",),   # batch blocks are independent (v7x 2-TC)
        ),
    )(xT, wt, bT, c0T)

    # Back to the module's output layout: v (B, nc, out_dim), c (B, R, nc).
    c = jnp.transpose(cT, (0, 2, 1))[:B]
    return v[:B], c


# ---------------------------------------------------------------------------
# pure-JAX reference (mirrors the PyTorch forward exactly)
# ---------------------------------------------------------------------------
def densecaps_v2_ref(x, W, b_logits, *, nc, out_dim, routing_iters=3):
    B, R, _ = x.shape
    u_hat = jnp.einsum("bri,rio->bro", x, W).reshape(B, R, nc, out_dim)
    c = jax.nn.softmax(b_logits, axis=-1)                       # (R, nc)
    s = jnp.sum(c[None, :, :, None] * u_hat, axis=1)            # (B, nc, out_dim)
    v = _squash_last(s)
    bB = jnp.broadcast_to(b_logits, (B, R, nc))
    for _ in range(routing_iters):
        bB = bB + jnp.sum(u_hat * v[:, None, :, :], axis=-1)    # (B, R, nc)
        c = jax.nn.softmax(bB, axis=-1)                         # (B, R, nc)
        s = jnp.sum(c[..., None] * u_hat, axis=1)               # (B, nc, out_dim)
        v = _squash_last(s)
    return v, c


if __name__ == "__main__":
    # Small shapes consistent with the module: nc=10, num_routes=64, in_dim=8,
    # out_dim=16, batch=2, routing_iters=3.
    B, R, IN_DIM, NC, OUT_DIM, R_IT = 2, 64, 8, 10, 16, 3

    key = jax.random.PRNGKey(0)
    kx, kw, kbias = jax.random.split(key, 3)

    # Deterministic parameter init (matches __init__ shapes):
    #   W ~ N(0, 1)  (reset_params), bias ~ U[0,1)*0.01 (unused in forward), b = 0
    W = jax.random.normal(kw, (R, IN_DIM, NC * OUT_DIM), dtype=jnp.float32)
    bias = jax.random.uniform(kbias, (1, 1, NC, OUT_DIM), dtype=jnp.float32) * 0.01  # unused in forward
    b_logits = jnp.zeros((R, NC), dtype=jnp.float32)

    x = jax.random.normal(kx, (B, R, IN_DIM), dtype=jnp.float32)

    v, c = densecaps_v2(x, W, b_logits, nc=NC, out_dim=OUT_DIM, routing_iters=R_IT)
    v = jax.block_until_ready(v)
    c = jax.block_until_ready(c)

    v_ref, c_ref = densecaps_v2_ref(x, W, b_logits, nc=NC, out_dim=OUT_DIM,
                                    routing_iters=R_IT)

    assert v.shape == (B, NC, OUT_DIM)
    assert c.shape == (B, R, NC)
    assert jnp.allclose(v, v_ref, rtol=1e-5, atol=1e-5)
    assert jnp.allclose(c, c_ref, rtol=1e-5, atol=1e-5)

    print("KERNEL_OK")
</pallas_src>

<mosaic_0001>
module attributes {stable_mosaic.version = 11 : i64} {
  func.func @densecaps_kernel(%arg0: i32, %arg1: memref<2x8x64xf32, #tpu.memory_space<vmem>>, %arg2: memref<8x10x16x64xf32, #tpu.memory_space<vmem>>, %arg3: memref<10x64xf32, #tpu.memory_space<vmem>>, %arg4: memref<10x64xf32, #tpu.memory_space<vmem>>, %arg5: memref<2x10x16xf32, #tpu.memory_space<vmem>>, %arg6: memref<2x10x64xf32, #tpu.memory_space<vmem>>) attributes {dimension_semantics = [#tpu.dimension_semantics<parallel>], iteration_bounds = array<i64: 1>, scalar_prefetch = 0 : i64, scratch_operands = 0 : i64, tpu.core_type = #tpu.core_type<tc>, window_params = [{transform_indices = @transform_0, window_bounds = array<i64: 2, 8, 64>}, {pipeline_mode = #tpu.pipeline_mode<synchronous>, transform_indices = @transform_1, window_bounds = array<i64: 8, 10, 16, 64>}, {pipeline_mode = #tpu.pipeline_mode<synchronous>, transform_indices = @transform_2, window_bounds = array<i64: 10, 64>}, {pipeline_mode = #tpu.pipeline_mode<synchronous>, transform_indices = @transform_3, window_bounds = array<i64: 10, 64>}, {transform_indices = @transform_4, window_bounds = array<i64: 2, 10, 16>}, {transform_indices = @transform_5, window_bounds = array<i64: 2, 10, 64>}]} {
    %c0 = arith.constant 0 : index
    %c0_0 = arith.constant 0 : index
    %c0_1 = arith.constant 0 : index
    %0 = vector.load %arg1[%c0, %c0_0, %c0_1] : memref<2x8x64xf32, #tpu.memory_space<vmem>>, vector<2x8x64xf32>
    %c0_2 = arith.constant 0 : index
    %c0_3 = arith.constant 0 : index
    %c0_4 = arith.constant 0 : index
    %c0_5 = arith.constant 0 : index
    %1 = vector.load %arg2[%c0_2, %c0_3, %c0_4, %c0_5] : memref<8x10x16x64xf32, #tpu.memory_space<vmem>>, vector<8x10x16x64xf32>
    %2 = vector.extract_strided_slice %0 {offsets = [0, 0, 0], sizes = [2, 1, 64], strides = [1, 1, 1]} : vector<2x8x64xf32> to vector<2x1x64xf32>
    %3 = vector.shape_cast %2 : vector<2x1x64xf32> to vector<2x64xf32>
    %4 = vector.shape_cast %3 : vector<2x64xf32> to vector<2x1x1x64xf32>
    %5 = vector.extract_strided_slice %1 {offsets = [0, 0, 0, 0], sizes = [1, 10, 16, 64], strides = [1, 1, 1, 1]} : vector<8x10x16x64xf32> to vector<1x10x16x64xf32>
    %6 = vector.shape_cast %5 : vector<1x10x16x64xf32> to vector<10x16x64xf32>
    %7 = vector.shape_cast %6 : vector<10x16x64xf32> to vector<1x10x16x64xf32>
    %8 = vector.broadcast %4 : vector<2x1x1x64xf32> to vector<2x10x16x64xf32>
    %9 = vector.broadcast %7 : vector<1x10x16x64xf32> to vector<2x10x16x64xf32>
    %10 = arith.mulf %8, %9 : vector<2x10x16x64xf32>
    %11 = vector.extract_strided_slice %0 {offsets = [0, 1, 0], sizes = [2, 1, 64], strides = [1, 1, 1]} : vector<2x8x64xf32> to vector<2x1x64xf32>
    %12 = vector.shape_cast %11 : vector<2x1x64xf32> to vector<2x64xf32>
    %13 = vector.shape_cast %12 : vector<2x64xf32> to vector<2x1x1x64xf32>
    %14 = vector.extract_strided_slice %1 {offsets = [1, 0, 0, 0], sizes = [1, 10, 16, 64], strides = [1, 1, 1, 1]} : vector<8x10x16x64xf32> to vector<1x10x16x64xf32>
    %15 = vector.shape_cast %14 : vector<1x10x16x64xf32> to vector<10x16x64xf32>
    %16 = vector.shape_cast %15 : vector<10x16x64xf32> to vector<1x10x16x64xf32>
    %17 = vector.broadcast %13 : vector<2x1x1x64xf32> to vector<2x10x16x64xf32>
    %18 = vector.broadcast %16 : vector<1x10x16x64xf32> to vector<2x10x16x64xf32>
    %19 = arith.mulf %17, %18 : vector<2x10x16x64xf32>
    %20 = arith.addf %10, %19 : vector<2x10x16x64xf32>
    %21 = vector.extract_strided_slice %0 {offsets = [0, 2, 0], sizes = [2, 1, 64], strides = [1, 1, 1]} : vector<2x8x64xf32> to vector<2x1x64xf32>
    %22 = vector.shape_cast %21 : vector<2x1x64xf32> to vector<2x64xf32>
    %23 = vector.shape_cast %22 : vector<2x64xf32> to vector<2x1x1x64xf32>
    %24 = vector.extract_strided_slice %1 {offsets = [2, 0, 0, 0], sizes = [1, 10, 16, 64], strides = [1, 1, 1, 1]} : vector<8x10x16x64xf32> to vector<1x10x16x64xf32>
    %25 = vector.shape_cast %24 : vector<1x10x16x64xf32> to vector<10x16x64xf32>
    %26 = vector.shape_cast %25 : vector<10x16x64xf32> to vector<1x10x16x64xf32>
    %27 = vector.broadcast %23 : vector<2x1x1x64xf32> to vector<2x10x16x64xf32>
    %28 = vector.broadcast %26 : vector<1x10x16x64xf32> to vector<2x10x16x64xf32>
    %29 = arith.mulf %27, %28 : vector<2x10x16x64xf32>
    %30 = arith.addf %20, %29 : vector<2x10x16x64xf32>
    %31 = vector.extract_strided_slice %0 {offsets = [0, 3, 0], sizes = [2, 1, 64], strides = [1, 1, 1]} : vector<2x8x64xf32> to vector<2x1x64xf32>
    %32 = vector.shape_cast %31 : vector<2x1x64xf32> to vector<2x64xf32>
    %33 = vector.shape_cast %32 : vector<2x64xf32> to vector<2x1x1x64xf32>
    %34 = vector.extract_strided_slice %1 {offsets = [3, 0, 0, 0], sizes = [1, 10, 16, 64], strides = [1, 1, 1, 1]} : vector<8x10x16x64xf32> to vector<1x10x16x64xf32>
    %35 = vector.shape_cast %34 : vector<1x10x16x64xf32> to vector<10x16x64xf32>
    %36 = vector.shape_cast %35 : vector<10x16x64xf32> to vector<1x10x16x64xf32>
    %37 = vector.broadcast %33 : vector<2x1x1x64xf32> to vector<2x10x16x64xf32>
    %38 = vector.broadcast %36 : vector<1x10x16x64xf32> to vector<2x10x16x64xf32>
    %39 = arith.mulf %37, %38 : vector<2x10x16x64xf32>
    %40 = arith.addf %30, %39 : vector<2x10x16x64xf32>
    %41 = vector.extract_strided_slice %0 {offsets = [0, 4, 0], sizes = [2, 1, 64], strides = [1, 1, 1]} : vector<2x8x64xf32> to vector<2x1x64xf32>
    %42 = vector.shape_cast %41 : vector<2x1x64xf32> to vector<2x64xf32>
    %43 = vector.shape_cast %42 : vector<2x64xf32> to vector<2x1x1x64xf32>
    %44 = vector.extract_strided_slice %1 {offsets = [4, 0, 0, 0], sizes = [1, 10, 16, 64], strides = [1, 1, 1, 1]} : vector<8x10x16x64xf32> to vector<1x10x16x64xf32>
    %45 = vector.shape_cast %44 : vector<1x10x16x64xf32> to vector<10x16x64xf32>
    %46 = vector.shape_cast %45 : vector<10x16x64xf32> to vector<1x10x16x64xf32>
    %47 = vector.broadcast %43 : vector<2x1x1x64xf32> to vector<2x10x16x64xf32>
    %48 = vector.broadcast %46 : vector<1x10x16x64xf32> to vector<2x10x16x64xf32>
    %49 = arith.mulf %47, %48 : vector<2x10x16x64xf32>
    %50 = arith.addf %40, %49 : vector<2x10x16x64xf32>
    %51 = vector.extract_strided_slice %0 {offsets = [0, 5, 0], sizes = [2, 1, 64], strides = [1, 1, 1]} : vector<2x8x64xf32> to vector<2x1x64xf32>
    %52 = vector.shape_cast %51 : vector<2x1x64xf32> to vector<2x64xf32>
    %53 = vector.shape_cast %52 : vector<2x64xf32> to vector<2x1x1x64xf32>
    %54 = vector.extract_strided_slice %1 {offsets = [5, 0, 0, 0], sizes = [1, 10, 16, 64], strides = [1, 1, 1, 1]} : vector<8x10x16x64xf32> to vector<1x10x16x64xf32>
    %55 = vector.shape_cast %54 : vector<1x10x16x64xf32> to vector<10x16x64xf32>
    %56 = vector.shape_cast %55 : vector<10x16x64xf32> to vector<1x10x16x64xf32>
    %57 = vector.broadcast %53 : vector<2x1x1x64xf32> to vector<2x10x16x64xf32>
    %58 = vector.broadcast %56 : vector<1x10x16x64xf32> to vector<2x10x16x64xf32>
    %59 = arith.mulf %57, %58 : vector<2x10x16x64xf32>
    %60 = arith.addf %50, %59 : vector<2x10x16x64xf32>
    %61 = vector.extract_strided_slice %0 {offsets = [0, 6, 0], sizes = [2, 1, 64], strides = [1, 1, 1]} : vector<2x8x64xf32> to vector<2x1x64xf32>
    %62 = vector.shape_cast %61 : vector<2x1x64xf32> to vector<2x64xf32>
    %63 = vector.shape_cast %62 : vector<2x64xf32> to vector<2x1x1x64xf32>
    %64 = vector.extract_strided_slice %1 {offsets = [6, 0, 0, 0], sizes = [1, 10, 16, 64], strides = [1, 1, 1, 1]} : vector<8x10x16x64xf32> to vector<1x10x16x64xf32>
    %65 = vector.shape_cast %64 : vector<1x10x16x64xf32> to vector<10x16x64xf32>
    %66 = vector.shape_cast %65 : vector<10x16x64xf32> to vector<1x10x16x64xf32>
    %67 = vector.broadcast %63 : vector<2x1x1x64xf32> to vector<2x10x16x64xf32>
    %68 = vector.broadcast %66 : vector<1x10x16x64xf32> to vector<2x10x16x64xf32>
    %69 = arith.mulf %67, %68 : vector<2x10x16x64xf32>
    %70 = arith.addf %60, %69 : vector<2x10x16x64xf32>
    %71 = vector.extract_strided_slice %0 {offsets = [0, 7, 0], sizes = [2, 1, 64], strides = [1, 1, 1]} : vector<2x8x64xf32> to vector<2x1x64xf32>
    %72 = vector.shape_cast %71 : vector<2x1x64xf32> to vector<2x64xf32>
    %73 = vector.shape_cast %72 : vector<2x64xf32> to vector<2x1x1x64xf32>
    %74 = vector.extract_strided_slice %1 {offsets = [7, 0, 0, 0], sizes = [1, 10, 16, 64], strides = [1, 1, 1, 1]} : vector<8x10x16x64xf32> to vector<1x10x16x64xf32>
    %75 = vector.shape_cast %74 : vector<1x10x16x64xf32> to vector<10x16x64xf32>
    %76 = vector.shape_cast %75 : vector<10x16x64xf32> to vector<1x10x16x64xf32>
    %77 = vector.broadcast %73 : vector<2x1x1x64xf32> to vector<2x10x16x64xf32>
    %78 = vector.broadcast %76 : vector<1x10x16x64xf32> to vector<2x10x16x64xf32>
    %79 = arith.mulf %77, %78 : vector<2x10x16x64xf32>
    %80 = arith.addf %70, %79 : vector<2x10x16x64xf32>
    %c0_6 = arith.constant 0 : index
    %c0_7 = arith.constant 0 : index
    %81 = vector.load %arg4[%c0_6, %c0_7] : memref<10x64xf32, #tpu.memory_space<vmem>>, vector<10x64xf32>
    %82 = vector.shape_cast %81 : vector<10x64xf32> to vector<1x10x64xf32>
    %83 = vector.shape_cast %82 : vector<1x10x64xf32> to vector<1x10x64xf32>
    %84 = vector.broadcast %83 : vector<1x10x64xf32> to vector<2x10x64xf32>
    %85 = vector.shape_cast %84 : vector<2x10x64xf32> to vector<2x10x1x64xf32>
    %86 = vector.broadcast %85 : vector<2x10x1x64xf32> to vector<2x10x16x64xf32>
    %87 = arith.mulf %86, %80 : vector<2x10x16x64xf32>
    %cst = arith.constant dense<0.000000e+00> : vector<2x10x16xf32>
    %88 = vector.multi_reduction <add>, %87, %cst [3] : vector<2x10x16x64xf32> to vector<2x10x16xf32>
    %89 = arith.mulf %88, %88 : vector<2x10x16xf32>
    %cst_8 = arith.constant dense<0.000000e+00> : vector<2x10xf32>
    %90 = vector.multi_reduction <add>, %89, %cst_8 [2] : vector<2x10x16xf32> to vector<2x10xf32>
    %91 = vector.shape_cast %90 : vector<2x10xf32> to vector<2x10x1xf32>
    %92 = math.sqrt %91 : vector<2x10x1xf32>
    %93 = arith.mulf %92, %92 : vector<2x10x1xf32>
    %cst_9 = arith.constant 1.000000e+00 : f32
    %94 = vector.broadcast %cst_9 : f32 to vector<2x10x1xf32>
    %95 = arith.addf %94, %93 : vector<2x10x1xf32>
    %cst_10 = arith.constant 9.99999993E-9 : f32
    %96 = vector.broadcast %cst_10 : f32 to vector<2x10x1xf32>
    %97 = arith.addf %95, %96 : vector<2x10x1xf32>
    %98 = arith.divf %92, %97 : vector<2x10x1xf32>
    %99 = vector.broadcast %98 : vector<2x10x1xf32> to vector<2x10x16xf32>
    %100 = arith.mulf %99, %88 : vector<2x10x16xf32>
    %c0_11 = arith.constant 0 : index
    %c0_12 = arith.constant 0 : index
    %101 = vector.load %arg3[%c0_11, %c0_12] : memref<10x64xf32, #tpu.memory_space<vmem>>, vector<10x64xf32>
    %102 = vector.shape_cast %101 : vector<10x64xf32> to vector<1x10x64xf32>
    %103 = vector.shape_cast %102 : vector<1x10x64xf32> to vector<1x10x64xf32>
    %104 = vector.broadcast %103 : vector<1x10x64xf32> to vector<2x10x64xf32>
    %105 = vector.shape_cast %100 : vector<2x10x16xf32> to vector<2x10x16x1xf32>
    %106 = vector.broadcast %105 : vector<2x10x16x1xf32> to vector<2x10x16x64xf32>
    %107 = arith.mulf %80, %106 : vector<2x10x16x64xf32>
    %cst_13 = arith.constant dense<0.000000e+00> : vector<2x10x64xf32>
    %108 = vector.multi_reduction <add>, %107, %cst_13 [2] : vector<2x10x16x64xf32> to vector<2x10x64xf32>
    %109 = arith.addf %104, %108 : vector<2x10x64xf32>
    %cst_14 = arith.constant dense<0xFF800000> : vector<2x64xf32>
    %110 = vector.multi_reduction <maximumf>, %109, %cst_14 [1] : vector<2x10x64xf32> to vector<2x64xf32>
    %111 = vector.shape_cast %110 : vector<2x64xf32> to vector<2x1x64xf32>
    %112 = vector.broadcast %111 : vector<2x1x64xf32> to vector<2x10x64xf32>
    %113 = arith.subf %109, %112 : vector<2x10x64xf32>
    %114 = math.exp %113 : vector<2x10x64xf32>
    %cst_15 = arith.constant dense<0.000000e+00> : vector<2x64xf32>
    %115 = vector.multi_reduction <add>, %114, %cst_15 [1] : vector<2x10x64xf32> to vector<2x64xf32>
    %116 = vector.shape_cast %115 : vector<2x64xf32> to vector<2x1x64xf32>
    %117 = vector.broadcast %116 : vector<2x1x64xf32> to vector<2x10x64xf32>
    %118 = arith.divf %114, %117 : vector<2x10x64xf32>
    %119 = vector.shape_cast %118 : vector<2x10x64xf32> to vector<2x10x1x64xf32>
    %120 = vector.broadcast %119 : vector<2x10x1x64xf32> to vector<2x10x16x64xf32>
    %121 = arith.mulf %120, %80 : vector<2x10x16x64xf32>
    %cst_16 = arith.constant dense<0.000000e+00> : vector<2x10x16xf32>
    %122 = vector.multi_reduction <add>, %121, %cst_16 [3] : vector<2x10x16x64xf32> to vector<2x10x16xf32>
    %123 = arith.mulf %122, %122 : vector<2x10x16xf32>
    %cst_17 = arith.constant dense<0.000000e+00> : vector<2x10xf32>
    %124 = vector.multi_reduction <add>, %123, %cst_17 [2] : vector<2x10x16xf32> to vector<2x10xf32>
    %125 = vector.shape_cast %124 : vector<2x10xf32> to vector<2x10x1xf32>
    %126 = math.sqrt %125 : vector<2x10x1xf32>
    %127 = arith.mulf %126, %126 : vector<2x10x1xf32>
    %cst_18 = arith.constant 1.000000e+00 : f32
    %128 = vector.broadcast %cst_18 : f32 to vector<2x10x1xf32>
    %129 = arith.addf %128, %127 : vector<2x10x1xf32>
    %cst_19 = arith.constant 9.99999993E-9 : f32
    %130 = vector.broadcast %cst_19 : f32 to vector<2x10x1xf32>
    %131 = arith.addf %129, %130 : vector<2x10x1xf32>
    %132 = arith.divf %126, %131 : vector<2x10x1xf32>
    %133 = vector.broadcast %132 : vector<2x10x1xf32> to vector<2x10x16xf32>
    %134 = arith.mulf %133, %122 : vector<2x10x16xf32>
    %135 = vector.shape_cast %134 : vector<2x10x16xf32> to vector<2x10x16x1xf32>
    %136 = vector.broadcast %135 : vector<2x10x16x1xf32> to vector<2x10x16x64xf32>
    %137 = arith.mulf %80, %136 : vector<2x10x16x64xf32>
    %cst_20 = arith.constant dense<0.000000e+00> : vector<2x10x64xf32>
    %138 = vector.multi_reduction <add>, %137, %cst_20 [2] : vector<2x10x16x64xf32> to vector<2x10x64xf32>
    %139 = arith.addf %109, %138 : vector<2x10x64xf32>
    %cst_21 = arith.constant dense<0xFF800000> : vector<2x64xf32>
    %140 = vector.multi_reduction <maximumf>, %139, %cst_21 [1] : vector<2x10x64xf32> to vector<2x64xf32>
    %141 = vector.shape_cast %140 : vector<2x64xf32> to vector<2x1x64xf32>
    %142 = vector.broadcast %141 : vector<2x1x64xf32> to vector<2x10x64xf32>
    %143 = arith.subf %139, %142 : vector<2x10x64xf32>
    %144 = math.exp %143 : vector<2x10x64xf32>
    %cst_22 = arith.constant dense<0.000000e+00> : vector<2x64xf32>
    %145 = vector.multi_reduction <add>, %144, %cst_22 [1] : vector<2x10x64xf32> to vector<2x64xf32>
    %146 = vector.shape_cast %145 : vector<2x64xf32> to vector<2x1x64xf32>
    %147 = vector.broadcast %146 : vector<2x1x64xf32> to vector<2x10x64xf32>
    %148 = arith.divf %144, %147 : vector<2x10x64xf32>
    %149 = vector.shape_cast %148 : vector<2x10x64xf32> to vector<2x10x1x64xf32>
    %150 = vector.broadcast %149 : vector<2x10x1x64xf32> to vector<2x10x16x64xf32>
    %151 = arith.mulf %150, %80 : vector<2x10x16x64xf32>
    %cst_23 = arith.constant dense<0.000000e+00> : vector<2x10x16xf32>
    %152 = vector.multi_reduction <add>, %151, %cst_23 [3] : vector<2x10x16x64xf32> to vector<2x10x16xf32>
    %153 = arith.mulf %152, %152 : vector<2x10x16xf32>
    %cst_24 = arith.constant dense<0.000000e+00> : vector<2x10xf32>
    %154 = vector.multi_reduction <add>, %153, %cst_24 [2] : vector<2x10x16xf32> to vector<2x10xf32>
    %155 = vector.shape_cast %154 : vector<2x10xf32> to vector<2x10x1xf32>
    %156 = math.sqrt %155 : vector<2x10x1xf32>
    %157 = arith.mulf %156, %156 : vector<2x10x1xf32>
    %cst_25 = arith.constant 1.000000e+00 : f32
    %158 = vector.broadcast %cst_25 : f32 to vector<2x10x1xf32>
    %159 = arith.addf %158, %157 : vector<2x10x1xf32>
    %cst_26 = arith.constant 9.99999993E-9 : f32
    %160 = vector.broadcast %cst_26 : f32 to vector<2x10x1xf32>
    %161 = arith.addf %159, %160 : vector<2x10x1xf32>
    %162 = arith.divf %156, %161 : vector<2x10x1xf32>
    %163 = vector.broadcast %162 : vector<2x10x1xf32> to vector<2x10x16xf32>
    %164 = arith.mulf %163, %152 : vector<2x10x16xf32>
    %165 = vector.shape_cast %164 : vector<2x10x16xf32> to vector<2x10x16x1xf32>
    %166 = vector.broadcast %165 : vector<2x10x16x1xf32> to vector<2x10x16x64xf32>
    %167 = arith.mulf %80, %166 : vector<2x10x16x64xf32>
    %cst_27 = arith.constant dense<0.000000e+00> : vector<2x10x64xf32>
    %168 = vector.multi_reduction <add>, %167, %cst_27 [2] : vector<2x10x16x64xf32> to vector<2x10x64xf32>
    %169 = arith.addf %139, %168 : vector<2x10x64xf32>
    %cst_28 = arith.constant dense<0xFF800000> : vector<2x64xf32>
    %170 = vector.multi_reduction <maximumf>, %169, %cst_28 [1] : vector<2x10x64xf32> to vector<2x64xf32>
    %171 = vector.shape_cast %170 : vector<2x64xf32> to vector<2x1x64xf32>
    %172 = vector.broadcast %171 : vector<2x1x64xf32> to vector<2x10x64xf32>
    %173 = arith.subf %169, %172 : vector<2x10x64xf32>
    %174 = math.exp %173 : vector<2x10x64xf32>
    %cst_29 = arith.constant dense<0.000000e+00> : vector<2x64xf32>
    %175 = vector.multi_reduction <add>, %174, %cst_29 [1] : vector<2x10x64xf32> to vector<2x64xf32>
    %176 = vector.shape_cast %175 : vector<2x64xf32> to vector<2x1x64xf32>
    %177 = vector.broadcast %176 : vector<2x1x64xf32> to vector<2x10x64xf32>
    %178 = arith.divf %174, %177 : vector<2x10x64xf32>
    %179 = vector.shape_cast %178 : vector<2x10x64xf32> to vector<2x10x1x64xf32>
    %180 = vector.broadcast %179 : vector<2x10x1x64xf32> to vector<2x10x16x64xf32>
    %181 = arith.mulf %180, %80 : vector<2x10x16x64xf32>
    %cst_30 = arith.constant dense<0.000000e+00> : vector<2x10x16xf32>
    %182 = vector.multi_reduction <add>, %181, %cst_30 [3] : vector<2x10x16x64xf32> to vector<2x10x16xf32>
    %183 = arith.mulf %182, %182 : vector<2x10x16xf32>
    %cst_31 = arith.constant dense<0.000000e+00> : vector<2x10xf32>
    %184 = vector.multi_reduction <add>, %183, %cst_31 [2] : vector<2x10x16xf32> to vector<2x10xf32>
    %185 = vector.shape_cast %184 : vector<2x10xf32> to vector<2x10x1xf32>
    %186 = math.sqrt %185 : vector<2x10x1xf32>
    %187 = arith.mulf %186, %186 : vector<2x10x1xf32>
    %cst_32 = arith.constant 1.000000e+00 : f32
    %188 = vector.broadcast %cst_32 : f32 to vector<2x10x1xf32>
    %189 = arith.addf %188, %187 : vector<2x10x1xf32>
    %cst_33 = arith.constant 9.99999993E-9 : f32
    %190 = vector.broadcast %cst_33 : f32 to vector<2x10x1xf32>
    %191 = arith.addf %189, %190 : vector<2x10x1xf32>
    %192 = arith.divf %186, %191 : vector<2x10x1xf32>
    %193 = vector.broadcast %192 : vector<2x10x1xf32> to vector<2x10x16xf32>
    %194 = arith.mulf %193, %182 : vector<2x10x16xf32>
    %c0_34 = arith.constant 0 : index
    %c0_35 = arith.constant 0 : index
    %c0_36 = arith.constant 0 : index
    %195 = vector.load %arg5[%c0_34, %c0_35, %c0_36] : memref<2x10x16xf32, #tpu.memory_space<vmem>>, vector<2x10x16xf32>
    tpu.vector_store %arg5[%c0_34, %c0_35, %c0_36], %194 {strides = array<i32>} : memref<2x10x16xf32, #tpu.memory_space<vmem>>, vector<2x10x16xf32>,
    %c0_37 = arith.constant 0 : index
    %c0_38 = arith.constant 0 : index
    %c0_39 = arith.constant 0 : index
    %196 = vector.load %arg6[%c0_37, %c0_38, %c0_39] : memref<2x10x64xf32, #tpu.memory_space<vmem>>, vector<2x10x64xf32>
    tpu.vector_store %arg6[%c0_37, %c0_38, %c0_39], %178 {strides = array<i32>} : memref<2x10x64xf32, #tpu.memory_space<vmem>>, vector<2x10x64xf32>,
    return
  }
  func.func @transform_0(%arg0: i32) -> (i32, i32, i32) {
    %c0_i32 = arith.constant 0 : i32
    %c0_i32_0 = arith.constant 0 : i32
    %c0_i32_1 = arith.constant 0 : i32
    return %arg0, %c0_i32, %c0_i32_0 : i32, i32, i32
  }
  func.func @transform_1(%arg0: i32) -> (i32, i32, i32, i32) {
    %c0_i32 = arith.constant 0 : i32
    %c0_i32_0 = arith.constant 0 : i32
    %c0_i32_1 = arith.constant 0 : i32
    %c0_i32_2 = arith.constant 0 : i32
    %c0_i32_3 = arith.constant 0 : i32
    return %c0_i32, %c0_i32_0, %c0_i32_1, %c0_i32_2 : i32, i32, i32, i32
  }
  func.func @transform_2(%arg0: i32) -> (i32, i32) {
    %c0_i32 = arith.constant 0 : i32
    %c0_i32_0 = arith.constant 0 : i32
    %c0_i32_1 = arith.constant 0 : i32
    return %c0_i32, %c0_i32_0 : i32, i32
  }
  func.func @transform_3(%arg0: i32) -> (i32, i32) {
    %c0_i32 = arith.constant 0 : i32
    %c0_i32_0 = arith.constant 0 : i32
    %c0_i32_1 = arith.constant 0 : i32
    return %c0_i32, %c0_i32_0 : i32, i32
  }
  func.func @transform_4(%arg0: i32) -> (i32, i32, i32) {
    %c0_i32 = arith.constant 0 : i32
    %c0_i32_0 = arith.constant 0 : i32
    %c0_i32_1 = arith.constant 0 : i32
    return %arg0, %c0_i32, %c0_i32_0 : i32, i32, i32
  }
  func.func @transform_5(%arg0: i32) -> (i32, i32, i32) {
    %c0_i32 = arith.constant 0 : i32
    %c0_i32_0 = arith.constant 0 : i32
    %c0_i32_1 = arith.constant 0 : i32
    return %arg0, %c0_i32, %c0_i32_0 : i32, i32, i32
  }
}

</mosaic_0001>

<bundles_post_ra>
// kernel: tpu_custom_call.1
= control target key start
LH: loop header
LB: loop body
LE: loop exit
PB: predicated region body
PF: predicated region fallthrough
CT: control target
= control target key end

     0   :  { %11 = vsyncpa [#allocation3], 0  ;;  %s8942_s0 = inlined_call_operand.hbm [shape: f32[2,8,64], index: 0, kind: input, shape index: {}]   ;;  %s8943_s1 = inlined_call_operand.hbm [shape: f32[8,10,16,64], index: 1, kind: input, shape index: {}]   ;;  %s8944_s2 = inlined_call_operand.hbm [shape: f32[10,64], index: 2, kind: input, shape index: {}]   ;;  %s8945_s3 = inlined_call_operand.hbm [shape: f32[10,64], index: 3, kind: input, shape index: {}]   ;;  %s8946_s4 = inlined_call_operand.vmem [shape: f32[2,10,16], index: 4, kind: output, shape index: {0}]   ;;  %s8947_s5 = inlined_call_operand.vmem [shape: f32[2,10,64], index: 5, kind: output, shape index: {1}]  }
   0x1   :  { %12 = vsyncpa [#allocation5], 0 }
   0x2   :  { %13 = vsyncpa [#allocation8], 0  ;;  %s31_s20 = sshll.u32 %s8943_s1, 4  ;;  %s5538_s21 = smov [#allocation4]   ;;  %s32_s20 = int_to_ptr.hbm [resolvable:$true] %s31_s20 }
   0x3   :  { %s33_s22 = sshll.u32 %s5538_s21, 4  ;;  %s18_s25 = sshll.u32 %s8942_s0, 4  ;;  %s34_s22 = int_to_ptr.vmem [resolvable:$true] %s33_s22  ;;  %s19_s25 = int_to_ptr.hbm [resolvable:$true] %s18_s25 }
   0x4   :  { %s5539_s26 = smov 128   ;;  %s5540_s27 = smov 8  }
   0x5   :  { %39 = dma.hbm_to_vmem [thread:$0]  %s32_s20, 20480, %s34_s22, [#allocation5], %s5539_s26, %s5539_s26, %s5540_s27  }
   0x6   :  { %s5541_s28 = smov [#allocation2]   ;;  %s44_s7 = sshll.u32 %s8944_s2, 4  ;;  %s45_s7 = int_to_ptr.hbm [resolvable:$true] %s44_s7 }
   0x7   :  { %s20_s29 = sshll.u32 %s5541_s28, 4  ;;  %s57_s9 = sshll.u32 %s8945_s3, 4  ;;  %s21_s29 = int_to_ptr.vmem [resolvable:$true] %s20_s29  ;;  %s58_s9 = int_to_ptr.hbm [resolvable:$true] %s57_s9 }
   0x8   :  { %26 = dma.hbm_to_vmem [thread:$0]  %s19_s25, 256, %s21_s29, [#allocation3], %s5539_s26, %s5539_s26, %s5540_s27  }
   0x9   :  { %s5542_s10 = smov [#allocation6]   ;;  %s5543_s0 = smov [#allocation7]  }
   0xa   :  { %s46_s11 = sshll.u32 %s5542_s10, 4  ;;  %s59_s12 = sshll.u32 %s5543_s0, 4  ;;  %s47_s11 = int_to_ptr.vmem [resolvable:$true] %s46_s11  ;;  %s60_s12 = int_to_ptr.vmem [resolvable:$true] %s59_s12 }
   0xb   :  { %52 = dma.hbm_to_vmem [thread:$0]  %s45_s7, 256, %s47_s11, [#allocation5], %s5539_s26, %s5539_s26, %s5540_s27  }
   0xc   :  { %65 = dma.hbm_to_vmem [thread:$0]  %s58_s9, 256, %s60_s12, [#allocation8], %s5539_s26, %s5539_s26, %s5540_s27  }
   0xd   :  { %5532 = dma.done.wait [#allocation3], 256  }
   0xe   :  { %5533 = vsyncadd [#allocation3], 4294967040 }
   0xf   :  { %5534 = dma.done.wait [#allocation5], 20736  }
  0x10   :  { %5535 = vsyncadd [#allocation5], 4294946560 }
  0x11   :  { %5536 = dma.done.wait [#allocation8], 256  }
  0x12   :  { %5537 = vsyncadd [#allocation8], 4294967040  ;;  %v82_v0 = vld [vmem:[#allocation2] sm:$0xff]  ;;  %v88_v1 = vld [vmem:[#allocation4 + $0x20] sm:$0xff]  ;;  %vm932_vm0 = vcmask 523264   ;;  %vm1138_vm1 = vcmask 130112  }
  0x13   :  { %v108_v2 = vld [vmem:[#allocation4 + $0xc0] sm:$0xff]  ;;  %v5586_v5 = vperm.slane %v82_v0, 0  ;;  %v5588_v6 = vperm.slane %v82_v0, 1  ;;  %v5590_v7 = vperm.slane %v82_v0, 2  ;;  %v5592_v11 = vperm.slane %v82_v0, 3  ;;  %v5603_v18 = vld [vmem:[#allocation7] sm:$0xff] }
  0x14   :  { %v128_v3 = vld [vmem:[#allocation4 + $0x160] sm:$0xff]  ;;  %v5594_v12 = vperm.slane %v82_v0, 4  ;;  %v5596_v13 = vperm.slane %v82_v0, 5  ;;  %v5601_v17 = vperm.slane %v82_v0, 6  ;;  %v86_v19 = vld [vmem:[#allocation4 + $0x10] sm:$0xff]  ;;  %v5606_v23 = vperm.slane %v82_v0, 7 }
  0x15   :  { %v148_v4 = vld [vmem:[#allocation4 + $0x200] sm:$0xff]  ;;  %v250_v14 = vmul.f32 %v5586_v5, %v88_v1  ;;  %v292_v15 = vmul.f32 %v5588_v6, %v108_v2  ;;  %v374_v16 = vmul.f32 %v5590_v7, %v128_v3  ;;  %v106_v20 = vld [vmem:[#allocation4 + $0xb0] sm:$0xff]  ;;  %v865_v28 = vrot.slane %v5603_v18, 2  ;;  %v89_v57 = vld [vmem:[#allocation4 + $0x28] sm:$0xff] }
  0x16   :  { %v168_v8 = vld [vmem:[#allocation4 + $0x2a0] sm:$0xff]  ;;  %v456_v22 = vmul.f32 %v5592_v11, %v148_v4  ;;  %v126_v24 = vld [vmem:[#allocation4 + $0x150] sm:$0xff]  ;;  %v248_v31 = vmul.f32 %v5586_v5, %v86_v19  ;;  %v290_v34 = vmul.f32 %v5588_v6, %v106_v20  ;;  %v864_v48 = vrot.slane %v5603_v18, 1  ;;  %v109_v62 = vld [vmem:[#allocation4 + $0xc8] sm:$0xff] }
  0x17   :  { %v188_v9 = vld [vmem:[#allocation4 + $0x340] sm:$0xff]  ;;  %v146_v25 = vld [vmem:[#allocation4 + $0x1f0] sm:$0xff]  ;;  %v332_v26 = vadd.f32 %v292_v15, %v250_v14  ;;  %v538_v27 = vmul.f32 %v5594_v12, %v168_v8  ;;  %v372_v35 = vmul.f32 %v5590_v7, %v126_v24  ;;  %v5622_v41 = vperm.slane %v865_v28, 0  ;;  %v129_v63 = vld [vmem:[#allocation4 + $0x168] sm:$0xff] }
  0x18   :  { %v208_v10 = vld [vmem:[#allocation4 + $0x3e0] sm:$0xff]  ;;  %v166_v29 = vld [vmem:[#allocation4 + $0x290] sm:$0xff]  ;;  %v620_v32 = vmul.f32 %v5596_v13, %v188_v9  ;;  %v454_v44 = vmul.f32 %v5592_v11, %v146_v25  ;;  %v330_v45 = vadd.f32 %v290_v34, %v248_v31  ;;  %v5644_v61 = vperm.slane %v864_v48, 0  ;;  %v149_v8 = vld [vmem:[#allocation4 + $0x208] sm:$0xff] }
  0x19   :  { %v228_v21 = vld [vmem:[#allocation4 + $0x480] sm:$0xff]  ;;  %v186_v30 = vld [vmem:[#allocation4 + $0x330] sm:$0xff]  ;;  %v702_v33 = vmul.f32 %v5601_v17, %v208_v10  ;;  %v414_v39 = vadd.f32 %v374_v16, %v332_v26  ;;  %9206 = vst [vmem:[#allocation12_spill] sm:$0xff] %v5622_v41  ;;  %v536_v46 = vmul.f32 %v5594_v12, %v166_v29  ;;  %v169_v15 = vld [vmem:[#allocation4 + $0x2a8] sm:$0xff]  ;;  %v251_v16 = vmul.f32 %v5586_v5, %v89_v57 }
  0x1a   :  { %v5615_v36 = vld [vmem:[#allocation4] sm:$0xff]  ;;  %v784_v40 = vmul.f32 %v5606_v23, %v228_v21  ;;  %v206_v42 = vld [vmem:[#allocation4 + $0x3d0] sm:$0xff]  ;;  %v618_v47 = vmul.f32 %v5596_v13, %v186_v30  ;;  %v412_v58 = vadd.f32 %v372_v35, %v330_v45  ;;  %9207 = vst [vmem:[#allocation13_spill] sm:$0xff] %v5644_v61  ;;  %v189_v21 = vld [vmem:[#allocation4 + $0x348] sm:$0xff]  ;;  %v375_v24 = vmul.f32 %v5590_v7, %v129_v63 }
  0x1b   :  { %v5617_v37 = vld [vmem:[#allocation4 + $0xa0] sm:$0xff]  ;;  %v226_v43 = vld [vmem:[#allocation4 + $0x470] sm:$0xff]  ;;  %v496_v51 = vadd.f32 %v456_v22, %v414_v39  ;;  %v246_v54 = vmul.f32 %v5586_v5, %v5615_v36  ;;  %v700_v59 = vmul.f32 %v5601_v17, %v206_v42  ;;  %v293_v22 = vmul.f32 %v5588_v6, %v109_v62  ;;  %v5659_v25 = vld [vmem:[#allocation4 + $0x18] sm:$0xff] }
  0x1c   :  { %v5619_v38 = vld [vmem:[#allocation4 + $0x140] sm:$0xff]  ;;  %v288_v55 = vmul.f32 %v5588_v6, %v5617_v37  ;;  %v782_v60 = vmul.f32 %v5606_v23, %v226_v43  ;;  %v494_v9 = vadd.f32 %v454_v44, %v412_v58  ;;  %v5661_v26 = vld [vmem:[#allocation4 + $0xb8] sm:$0xff]  ;;  %v5666_v29 = vperm.slane %v5603_v18, 0  ;;  %v209_v35 = vld [vmem:[#allocation4 + $0x3e8] sm:$0xff] }
  0x1d   :  { %v5628_v49 = vld [vmem:[#allocation4 + $0x1e0] sm:$0xff]  ;;  %v370_v56 = vmul.f32 %v5590_v7, %v5619_v38  ;;  %v578_v0 = vadd.f32 %v538_v27, %v496_v51  ;;  %v457_v30 = vmul.f32 %v5592_v11, %v149_v8  ;;  %v5669_v31 = vld [vmem:[#allocation4 + $0x158] sm:$0xff]  ;;  %v333_v39 = vadd.f32 %v293_v22, %v251_v16  ;;  %v229_v45 = vld [vmem:[#allocation4 + $0x488] sm:$0xff] }
  0x1e   :  { %v5630_v50 = vld [vmem:[#allocation4 + $0x280] sm:$0xff]  ;;  %v328_v2 = vadd.f32 %v288_v55, %v246_v54  ;;  %v452_v3 = vmul.f32 %v5592_v11, %v5628_v49  ;;  %v576_v27 = vadd.f32 %v536_v46, %v494_v9  ;;  %v539_v42 = vmul.f32 %v5594_v12, %v169_v15  ;;  %v5672_v43 = vld [vmem:[#allocation4 + $0x1f8] sm:$0xff]  ;;  %v5695_v9 = vld [vmem:[#allocation4 + $0xa8] sm:$0xff] }
  0x1f   :  { %v5632_v52 = vld [vmem:[#allocation4 + $0x320] sm:$0xff]  ;;  %v534_v4 = vmul.f32 %v5594_v12, %v5630_v50  ;;  %v660_v19 = vadd.f32 %v620_v32, %v578_v0  ;;  %v621_v46 = vmul.f32 %v5596_v13, %v189_v21  ;;  %v249_v48 = vmul.f32 %v5586_v5, %v5659_v25  ;;  %v5683_v57 = vld [vmem:[#allocation4 + $0x338] sm:$0xff]  ;;  %v5697_v15 = vld [vmem:[#allocation4 + $0x148] sm:$0xff] }
  0x20   :  { %v5634_v53 = vld [vmem:[#allocation4 + $0x3c0] sm:$0xff]  ;;  %v616_v10 = vmul.f32 %v5596_v13, %v5632_v52  ;;  %v410_v20 = vadd.f32 %v370_v56, %v328_v2  ;;  %v658_v44 = vadd.f32 %v618_v47, %v576_v27  ;;  %v291_v51 = vmul.f32 %v5588_v6, %v5661_v26  ;;  %v5681_v56 = vld [vmem:[#allocation4 + $0x298] sm:$0xff]  ;;  %v5690_v2 = vld [vmem:[#allocation4 + $0x8] sm:$0xff] }
  0x21   :  { %v5646_v1 = vld [vmem:[#allocation4 + $0x460] sm:$0xff]  ;;  %v698_v14 = vmul.f32 %v5601_v17, %v5634_v53  ;;  %v742_v32 = vadd.f32 %v702_v33, %v660_v19  ;;  %v415_v55 = vadd.f32 %v375_v24, %v333_v39  ;;  %v373_v47 = vmul.f32 %v5590_v7, %v5669_v31  ;;  %v5701_v16 = vld [vmem:[#allocation4 + $0x3d8] sm:$0xff]  ;;  %v5718_v39 = vld [vmem:[#allocation4 + $0x328] sm:$0xff] }
  0x22   :  { %v780_v28 = vmul.f32 %v5606_v23, %v5646_v1  ;;  %v492_v34 = vadd.f32 %v452_v3, %v410_v20  ;;  %v740_v58 = vadd.f32 %v700_v59, %v658_v44  ;;  %v703_v62 = vmul.f32 %v5601_v17, %v209_v35  ;;  %v5703_v19 = vld [vmem:[#allocation4 + $0x478] sm:$0xff]  ;;  %v5716_v35 = vld [vmem:[#allocation4 + $0x288] sm:$0xff]  ;;  %9210 = vst [vmem:[#allocation16_spill] sm:$0xff] %v5718_v39 }
  0x23   :  { %v5679_v54 = vadd.f32 %v784_v40, %v742_v32  ;;  %v331_v63 = vadd.f32 %v291_v51, %v249_v48  ;;  %v455_v0 = vmul.f32 %v5592_v11, %v5672_v43  ;;  %v785_v8 = vmul.f32 %v5606_v23, %v229_v45 }
  0x24   :  { %v574_v33 = vadd.f32 %v534_v4, %v492_v34  ;;  %v497_v4 = vadd.f32 %v457_v30, %v415_v55  ;;  %v5699_v59 = vadd.f32 %v782_v60, %v740_v58  ;;  %v537_v21 = vmul.f32 %v5594_v12, %v5681_v56  ;;  %v5710_v30 = vld [vmem:[#allocation4 + $0x1e8] sm:$0xff]  ;;  %v112_v55 = vld [vmem:[#allocation4 + $0xe0] sm:$0xff] }
  0x25   :  { %9208 = vst [vmem:[#allocation14_spill] sm:$0xff] %v5679_v54  ;;  %v896_v40 = vmul.f32 %v5622_v41, %v5679_v54  ;;  %v413_v20 = vadd.f32 %v373_v47, %v331_v63  ;;  %v247_v60 = vmul.f32 %v5586_v5, %v5690_v2  ;;  %v289_v44 = vmul.f32 %v5588_v6, %v5695_v9  ;;  %v5731_v63 = vld [vmem:[#allocation4 + $0x3c8] sm:$0xff]  ;;  %v131_v54 = vld [vmem:[#allocation4 + $0x178] sm:$0xff] }
  0x26   :  { %v656_v3 = vadd.f32 %v616_v10, %v574_v33  ;;  %9209 = vst [vmem:[#allocation15_spill] sm:$0xff] %v5699_v59  ;;  %v619_v10 = vmul.f32 %v5596_v13, %v5683_v57  ;;  %v579_v27 = vadd.f32 %v539_v42, %v497_v4  ;;  %v894_v32 = vmul.f32 %v5644_v61, %v5699_v59  ;;  %v92_v33 = vld [vmem:[#allocation4 + $0x40] sm:$0xff] }
  0x27   :  { %v945_v22 = vsel %vm932_vm0, %v896_v40, 0.0  ;;  %v495_v34 = vadd.f32 %v455_v0, %v413_v20  ;;  %v701_v48 = vmul.f32 %v5601_v17, %v5701_v16  ;;  %v783_v51 = vmul.f32 %v5606_v23, %v5703_v19  ;;  %9212 = vst [vmem:[#allocation18_spill] sm:$0xff] %v5731_v63 }
  0x28   :  { %v738_v24 = vadd.f32 %v698_v14, %v656_v3  ;;  %946 = vadd.xlane.f32.xlu2 %v945_v22  ;;  %v371_v14 = vmul.f32 %v5590_v7, %v5697_v15  ;;  %v661_v45 = vadd.f32 %v621_v46, %v579_v27  ;;  %v939_v47 = vsel %vm932_vm0, %v894_v32, 0.0  ;;  %v152_v22 = vld [vmem:[#allocation4 + $0x220] sm:$0xff] }
  0x29   :  { %v577_v58 = vadd.f32 %v537_v21, %v495_v34  ;;  %v329_v0 = vadd.f32 %v289_v44, %v247_v60  ;;  %v453_v40 = vmul.f32 %v5592_v11, %v5710_v30  ;;  %940 = vadd.xlane.f32.xlu1 %v939_v47  ;;  %v535_v4 = vmul.f32 %v5594_v12, %v5716_v35  ;;  %v172_v60 = vld [vmem:[#allocation4 + $0x2c0] sm:$0xff] }
  0x2a   :  { %v5724_v42 = vadd.f32 %v780_v28, %v738_v24  ;;  %v132_v28 = vld [vmem:[#allocation4 + $0x180] sm:$0xff]  ;;  %v743_v3 = vadd.f32 %v703_v62, %v661_v45  ;;  %v617_v20 = vmul.f32 %v5596_v13, %v5718_v39  ;;  %v5741_v24 = vld [vmem:[#allocation4 + $0x468] sm:$0xff]  ;;  %v254_v34 = vmul.f32 %v5586_v5, %v92_v33  ;;  %v111_v33 = vld [vmem:[#allocation4 + $0xd8] sm:$0xff] }
  0x2b   :  { %v659_v21 = vadd.f32 %v619_v10, %v577_v58  ;;  %9213 = vst [vmem:[#allocation19_spill] sm:$0xff] %v5741_v24  ;;  %v411_v27 = vadd.f32 %v371_v14, %v329_v0  ;;  %v192_v32 = vld [vmem:[#allocation4 + $0x360] sm:$0xff]  ;;  %v296_v44 = vmul.f32 %v5588_v6, %v112_v55  ;;  %v699_v45 = vmul.f32 %v5601_v17, %v5731_v63  ;;  %v5752_v0 = vld [vmem:[#allocation4 + $0x38] sm:$0xff]  ;;  %v5912_v63 = vld [vmem:[#allocation4 + $0x2c8] sm:$0xff] }
  0x2c   :  { %9211 = vst [vmem:[#allocation17_spill] sm:$0xff] %v5724_v42  ;;  %v892_v46 = vmul.f32 %v5666_v29, %v5724_v42  ;;  %v5746_v62 = vadd.f32 %v785_v8, %v743_v3  ;;  %v378_v42 = vmul.f32 %v5590_v7, %v132_v28  ;;  %v460_v14 = vmul.f32 %v5592_v11, %v152_v22  ;;  %v5917_v39 = vld [vmem:[#allocation4 + $0x368] sm:$0xff] }
  0x2d   :  { %v741_v10 = vadd.f32 %v701_v48, %v659_v21  ;;  %v493_v58 = vadd.f32 %v453_v40, %v411_v27  ;;  %v336_v59 = vadd.f32 %v296_v44, %v254_v34  ;;  %9215 = vst [vmem:[#allocation21_spill] sm:$0xff] %v5752_v0  ;;  %v781_v8 = vmul.f32 %v5606_v23, %v5741_v24  ;;  %v232_v21 = vld [vmem:[#allocation4 + $0x4a0] sm:$0xff]  ;;  %v5763_v34 = vld [vmem:[#allocation4 + $0x218] sm:$0xff]  ;;  %v5902_v24 = vld [vmem:[#allocation4 + $0x4b0] sm:$0xff] }
  0x2e   :  { %v933_v47 = vsel %vm932_vm0, %v892_v46, 0.0  ;;  %9214 = vst [vmem:[#allocation20_spill] sm:$0xff] %v5746_v62  ;;  %v897_v55 = vmul.f32 %v5622_v41, %v5746_v62  ;;  %v212_v46 = vld [vmem:[#allocation4 + $0x400] sm:$0xff]  ;;  %v542_v3 = vmul.f32 %v5594_v12, %v172_v60  ;;  %v624_v28 = vmul.f32 %v5596_v13, %v192_v32  ;;  %v5773_v32 = vld [vmem:[#allocation4 + $0x358] sm:$0xff] }
  0x2f   :  { %934 = vadd.xlane.f32.xlu0 %v933_v47  ;;  %v5760_v48 = vadd.f32 %v783_v51, %v741_v10  ;;  %v575_v40 = vadd.f32 %v535_v4, %v493_v58  ;;  %v418_v22 = vadd.f32 %v378_v42, %v336_v59  ;;  %v867_v27 = vrot.slane %v5603_v18, 4  ;;  %9217 = vst [vmem:[#allocation23_spill] sm:$0xff] %v5763_v34  ;;  %v171_v47 = vld [vmem:[#allocation4 + $0x2b8] sm:$0xff]  ;;  %v5775_v10 = vld [vmem:[#allocation4 + $0x30] sm:$0xff] }
  0x30   :  { %v948_v44 = vsel %vm932_vm0, %v897_v55, 0.0  ;;  %v253_v62 = vmul.f32 %v5586_v5, %v5752_v0  ;;  %v295_v41 = vmul.f32 %v5588_v6, %v111_v33  ;;  %v377_v60 = vmul.f32 %v5590_v7, %v131_v54  ;;  %9218 = vst [vmem:[#allocation24_spill] sm:$0xff] %v5773_v32  ;;  %v5782_v33 = vld [vmem:[#allocation4 + $0xd0] sm:$0xff] }
  0x31   :  { %9216 = vst [vmem:[#allocation22_spill] sm:$0xff] %v5760_v48  ;;  %949 = vadd.xlane.f32.xlu2 %v948_v44  ;;  %v895_v51 = vmul.f32 %v5644_v61, %v5760_v48  ;;  %v657_v4 = vadd.f32 %v617_v20, %v575_v40  ;;  %v500_v59 = vadd.f32 %v460_v14, %v418_v22  ;;  %v5778_v55 = vperm.slane %v867_v27, 0  ;;  %v5784_v44 = vld [vmem:[#allocation4 + $0x170] sm:$0xff]  ;;  %v5787_v40 = vld [vmem:[#allocation4 + $0x3f8] sm:$0xff] }
  0x32   :  { %v706_v42 = vmul.f32 %v5601_v17, %v212_v46  ;;  %9219 = vst [vmem:[#allocation25_spill] sm:$0xff] %v5775_v10  ;;  %v788_v58 = vmul.f32 %v5606_v23, %v232_v21  ;;  %v335_v0 = vadd.f32 %v295_v41, %v253_v62  ;;  %v459_v54 = vmul.f32 %v5592_v11, %v5763_v34  ;;  %v5789_v22 = vld [vmem:[#allocation4 + $0x498] sm:$0xff]  ;;  %v5795_v48 = vld [vmem:[#allocation4 + $0x210] sm:$0xff] }
  0x33   :  { %9220 = vst [vmem:[#allocation26_spill] sm:$0xff] %v5778_v55  ;;  %v942_v20 = vsel %vm932_vm0, %v895_v51, 0.0  ;;  %v739_v14 = vadd.f32 %v699_v45, %v657_v4  ;;  %v582_v46 = vadd.f32 %v542_v3, %v500_v59  ;;  %v541_v21 = vmul.f32 %v5594_v12, %v171_v47  ;;  %v5801_v4 = vld [vmem:[#allocation4 + $0x2b0] sm:$0xff]  ;;  %v5833_v61 = vld [vmem:[#allocation4 + $0x238] sm:$0xff] }
  0x34   :  { %9221 = vst [vmem:[#allocation27_spill] sm:$0xff] %v5782_v33  ;;  %943 = vadd.xlane.f32.xlu1 %v942_v20  ;;  %v417_v27 = vadd.f32 %v377_v60, %v335_v0  ;;  %v623_v41 = vmul.f32 %v5596_v13, %v5773_v32  ;;  %v866_v62 = vrot.slane %v5603_v18, 3  ;;  %v252_v51 = vmul.f32 %v5586_v5, %v5775_v10  ;;  %v5803_v59 = vld [vmem:[#allocation4 + $0x350] sm:$0xff]  ;;  %v5809_v60 = vld [vmem:[#allocation4 + $0x58] sm:$0xff] }
  0x35   :  { %9222 = vst [vmem:[#allocation28_spill] sm:$0xff] %v5784_v44  ;;  %v5799_v45 = vadd.f32 %v781_v8, %v739_v14  ;;  %v664_v3 = vadd.f32 %v624_v28, %v582_v46  ;;  %v294_v0 = vmul.f32 %v5588_v6, %v5782_v33  ;;  %v376_v47 = vmul.f32 %v5590_v7, %v5784_v44  ;;  %v5817_v14 = vld [vmem:[#allocation4 + $0xf8] sm:$0xff]  ;;  %v5821_v33 = vld [vmem:[#allocation4 + $0x3f0] sm:$0xff] }
  0x36   :  { %9223 = vst [vmem:[#allocation29_spill] sm:$0xff] %v5787_v40  ;;  %v499_v20 = vadd.f32 %v459_v54, %v417_v27  ;;  %v705_v32 = vmul.f32 %v5601_v17, %v5787_v40  ;;  %v787_v8 = vmul.f32 %v5606_v23, %v5789_v22  ;;  %v5815_v28 = vperm.slane %v866_v62, 0  ;;  %v5823_v44 = vld [vmem:[#allocation4 + $0x490] sm:$0xff]  ;;  %v5827_v27 = vld [vmem:[#allocation4 + $0x198] sm:$0xff] }
  0x37   :  { %9224 = vst [vmem:[#allocation30_spill] sm:$0xff] %v5789_v22  ;;  %v893_v46 = vmul.f32 %v5666_v29, %v5799_v45  ;;  %v746_v34 = vadd.f32 %v706_v42, %v664_v3  ;;  %v334_v10 = vadd.f32 %v294_v0, %v252_v51  ;;  %v458_v54 = vmul.f32 %v5592_v11, %v5795_v48 }
  0x38   :  { %9225 = vst [vmem:[#allocation31_spill] sm:$0xff] %v5795_v48  ;;  %v581_v40 = vadd.f32 %v541_v21, %v499_v20  ;;  %v540_v62 = vmul.f32 %v5594_v12, %v5801_v4  ;;  %v622_v22 = vmul.f32 %v5596_v13, %v5803_v59  ;;  %v257_v42 = vmul.f32 %v5586_v5, %v5809_v60  ;;  %v5842_v48 = vld [vmem:[#allocation4 + $0x378] sm:$0xff] }
  0x39   :  { %9226 = vst [vmem:[#allocation32_spill] sm:$0xff] %v5799_v45  ;;  %v936_v3 = vsel %vm932_vm0, %v893_v46, 0.0  ;;  %v5838_v51 = vadd.f32 %v788_v58, %v746_v34  ;;  %v416_v0 = vadd.f32 %v376_v47, %v334_v10  ;;  %v5840_v45 = vld [vmem:[#allocation4 + $0x2d8] sm:$0xff]  ;;  %v299_v21 = vmul.f32 %v5588_v6, %v5817_v14  ;;  %v5852_v58 = vld [vmem:[#allocation4 + $0x50] sm:$0xff] }
  0x3a   :  { %9227 = vst [vmem:[#allocation33_spill] sm:$0xff] %v5801_v4  ;;  %937 = vadd.xlane.f32.xlu0 %v936_v3  ;;  %v663_v20 = vadd.f32 %v623_v41, %v581_v40  ;;  %v381_v34 = vmul.f32 %v5590_v7, %v5827_v27  ;;  %v5856_v46 = vld [vmem:[#allocation4 + $0x418] sm:$0xff]  ;;  %v463_v40 = vmul.f32 %v5592_v11, %v5833_v61  ;;  %v5860_v41 = vld [vmem:[#allocation4 + $0xf0] sm:$0xff]  ;;  %vm9181_vm2 = vcmask 123904  }
  0x3b   :  { %9228 = vst [vmem:[#allocation34_spill] sm:$0xff] %v5803_v59  ;;  %v704_v59 = vmul.f32 %v5601_v17, %v5821_v33  ;;  %v900_v10 = vmul.f32 %v5778_v55, %v5838_v51  ;;  %v498_v47 = vadd.f32 %v458_v54, %v416_v0  ;;  %v5862_v3 = vld [vmem:[#allocation4 + $0x190] sm:$0xff]  ;;  %v868_v54 = vrot.slane %v5603_v18, 5 }
  0x3c   :  { %9229 = vst [vmem:[#allocation35_spill] sm:$0xff] %v5809_v60  ;;  %v786_v60 = vmul.f32 %v5606_v23, %v5823_v44  ;;  %v5874_v4 = vld [vmem:[#allocation4 + $0x2d0] sm:$0xff]  ;;  %vm1197_vm3 = vcmask 1041409   ;;  %vm1199_vm4 = vcmask 1042434   ;;  %vm1201_vm5 = vcmask 1043459  }
  0x3d   :  { %9230 = vst [vmem:[#allocation36_spill] sm:$0xff] %v5815_v28  ;;  %v580_v0 = vadd.f32 %v540_v62, %v498_v47  ;;  %v5888_v62 = vld [vmem:[#allocation4 + $0x48] sm:$0xff]  ;;  %vm1203_vm6 = vcmask 1044484   ;;  %vm1205_vm7 = vcmask 1045509   ;;  %vm1207_vm8 = vcmask 1046534  }
  0x3e   :  { %9231 = vst [vmem:[#allocation37_spill] sm:$0xff] %v5817_v14  ;;  %v339_v14 = vadd.f32 %v299_v21, %v257_v42  ;;  %v957_v42 = vsel %vm932_vm0, %v900_v10, 0.0  ;;  %v298_v10 = vmul.f32 %v5588_v6, %v5860_v41  ;;  %vm1209_vm9 = vcmask 1047559  }
  0x3f   :  { %9232 = vst [vmem:[#allocation38_spill] sm:$0xff] %v5821_v33  ;;  %v5864_v33 = vld [vmem:[#allocation4 + $0x4b8] sm:$0xff]  ;;  %958 = vadd.xlane.f32.xlu2 %v957_v42  ;;  %vm9180_vm10 = vcmask 130048  }
  0x40   :  { %9233 = vst [vmem:[#allocation39_spill] sm:$0xff] %v5823_v44  ;;  %v745_v44 = vadd.f32 %v705_v32, %v663_v20  ;;  %v421_v21 = vadd.f32 %v381_v34, %v339_v14  ;;  %v256_v32 = vmul.f32 %v5586_v5, %v5852_v58  ;;  %v380_v14 = vmul.f32 %v5590_v7, %v5862_v3 }
  0x41   :  { %9234 = vst [vmem:[#allocation40_spill] sm:$0xff] %v5827_v27  ;;  %v545_v27 = vmul.f32 %v5594_v12, %v5840_v45  ;;  %v662_v34 = vadd.f32 %v622_v22, %v580_v0  ;;  %v791_v42 = vmul.f32 %v5606_v23, %v5864_v33 }
  0x42   :  { %9235 = vst [vmem:[#allocation41_spill] sm:$0xff] %v5833_v61  ;;  %v5872_v61 = vld [vmem:[#allocation4 + $0x230] sm:$0xff]  ;;  %v5878_v20 = vadd.f32 %v787_v8, %v745_v44  ;;  %v503_v47 = vadd.f32 %v463_v40, %v421_v21  ;;  %v5892_v44 = vperm.slane %v868_v54, 0  ;;  %v5894_v8 = vld [vmem:[#allocation4 + $0xe8] sm:$0xff]  ;;  %v544_v40 = vmul.f32 %v5594_v12, %v5874_v4 }
  0x43   :  { %9236 = vst [vmem:[#allocation42_spill] sm:$0xff] %v5838_v51  ;;  %v627_v51 = vmul.f32 %v5596_v13, %v5842_v48  ;;  %v462_v22 = vmul.f32 %v5592_v11, %v5872_v61  ;;  %v744_v54 = vadd.f32 %v704_v59, %v662_v34 }
  0x44   :  { %9237 = vst [vmem:[#allocation43_spill] sm:$0xff] %v5840_v45  ;;  %v709_v45 = vmul.f32 %v5601_v17, %v5856_v46  ;;  %v585_v0 = vadd.f32 %v545_v27, %v503_v47  ;;  %v5923_v27 = vld [vmem:[#allocation4 + $0x70] sm:$0xff] }
  0x45   :  { %9238 = vst [vmem:[#allocation44_spill] sm:$0xff] %v5842_v48  ;;  %v5882_v48 = vld [vmem:[#allocation4 + $0x370] sm:$0xff]  ;;  %v5925_v34 = vadd.f32 %v786_v60, %v744_v54 }
  0x46   :  { %9239 = vst [vmem:[#allocation45_spill] sm:$0xff] %v5852_v58  ;;  %v899_v58 = vmul.f32 %v5815_v28, %v5878_v20  ;;  %v626_v21 = vmul.f32 %v5596_v13, %v5882_v48  ;;  %v667_v47 = vadd.f32 %v627_v51, %v585_v0  ;;  %v543_v51 = vmul.f32 %v5594_v12, %v5912_v63 }
  0x47   :  { %9240 = vst [vmem:[#allocation46_spill] sm:$0xff] %v5856_v46  ;;  %v5896_v46 = vld [vmem:[#allocation4 + $0x188] sm:$0xff]  ;;  %v898_v54 = vmul.f32 %v5815_v28, %v5925_v34 }
  0x48   :  { %9241 = vst [vmem:[#allocation47_spill] sm:$0xff] %v5860_v41  ;;  %v5900_v41 = vld [vmem:[#allocation4 + $0x410] sm:$0xff]  ;;  %v379_v59 = vmul.f32 %v5590_v7, %v5896_v46  ;;  %v749_v0 = vadd.f32 %v709_v45, %v667_v47  ;;  %v5994_v28 = vld [vmem:[#allocation4 + $0x388] sm:$0xff] }
  0x49   :  { %9242 = vst [vmem:[#allocation48_spill] sm:$0xff] %v5862_v3  ;;  %v338_v3 = vadd.f32 %v298_v10, %v256_v32  ;;  %v954_v32 = vsel %vm932_vm0, %v899_v58, 0.0  ;;  %v790_v58 = vmul.f32 %v5606_v23, %v5902_v24  ;;  %v951_v47 = vsel %vm932_vm0, %v898_v54, 0.0  ;;  %v5972_v54 = vld [vmem:[#allocation4 + $0x108] sm:$0xff] }
  0x4a   :  { %9243 = vst [vmem:[#allocation49_spill] sm:$0xff] %v5864_v33  ;;  %v5910_v33 = vld [vmem:[#allocation4 + $0x228] sm:$0xff]  ;;  %955 = vadd.xlane.f32.xlu1 %v954_v32  ;;  %v625_v32 = vmul.f32 %v5596_v13, %v5917_v39  ;;  %952 = vadd.xlane.f32.xlu0 %v951_v47 }
  0x4b   :  { %9244 = vst [vmem:[#allocation50_spill] sm:$0xff] %v5872_v61  ;;  %v420_v10 = vadd.f32 %v380_v14, %v338_v3  ;;  %v5931_v3 = vld [vmem:[#allocation4 + $0x110] sm:$0xff]  ;;  %v461_v60 = vmul.f32 %v5592_v11, %v5910_v33 }
  0x4c   :  { %9245 = vst [vmem:[#allocation51_spill] sm:$0xff] %v5874_v4  ;;  %v297_v4 = vmul.f32 %v5588_v6, %v5894_v8  ;;  %v5933_v14 = vld [vmem:[#allocation4 + $0x1b0] sm:$0xff] }
  0x4d   :  { %9246 = vst [vmem:[#allocation52_spill] sm:$0xff] %v5878_v20  ;;  %v255_v20 = vmul.f32 %v5586_v5, %v5888_v62  ;;  %v502_v61 = vadd.f32 %v462_v22, %v420_v10  ;;  %v260_v22 = vmul.f32 %v5586_v5, %v5923_v27  ;;  %v384_v45 = vmul.f32 %v5590_v7, %v5933_v14 }
  0x4e   :  { %9247 = vst [vmem:[#allocation53_spill] sm:$0xff] %v5882_v48  ;;  %v708_v48 = vmul.f32 %v5601_v17, %v5900_v41 }
  0x4f   :  { %9248 = vst [vmem:[#allocation54_spill] sm:$0xff] %v5888_v62  ;;  %v337_v62 = vadd.f32 %v297_v4, %v255_v20  ;;  %v584_v10 = vadd.f32 %v544_v40, %v502_v61  ;;  %v5951_v20 = vld [vmem:[#allocation4 + $0x2f0] sm:$0xff] }
  0x50   :  { %9249 = vst [vmem:[#allocation55_spill] sm:$0xff] %v5892_v44  ;;  %v548_v47 = vmul.f32 %v5594_v12, %v5951_v20 }
  0x51   :  { %9250 = vst [vmem:[#allocation56_spill] sm:$0xff] %v5894_v8  ;;  %v5935_v8 = vld [vmem:[#allocation4 + $0x408] sm:$0xff]  ;;  %v419_v4 = vadd.f32 %v379_v59, %v337_v62  ;;  %v666_v40 = vadd.f32 %v626_v21, %v584_v10 }
  0x52   :  { %9251 = vst [vmem:[#allocation57_spill] sm:$0xff] %v5896_v46  ;;  %v5937_v46 = vld [vmem:[#allocation4 + $0x4a8] sm:$0xff] }
  0x53   :  { %9252 = vst [vmem:[#allocation58_spill] sm:$0xff] %v5900_v41  ;;  %v5953_v41 = vld [vmem:[#allocation4 + $0x390] sm:$0xff]  ;;  %v789_v61 = vmul.f32 %v5606_v23, %v5937_v46  ;;  %v5966_v62 = vld [vmem:[#allocation4 + $0x68] sm:$0xff]  ;;  %v501_v59 = vadd.f32 %v461_v60, %v419_v4  ;;  %v748_v60 = vadd.f32 %v708_v48, %v666_v40 }
  0x54   :  { %9253 = vst [vmem:[#allocation59_spill] sm:$0xff] %v5902_v24  ;;  %v5947_v24 = vld [vmem:[#allocation4 + $0x250] sm:$0xff]  ;;  %v630_v21 = vmul.f32 %v5596_v13, %v5953_v41  ;;  %v5985_v4 = vld [vmem:[#allocation4 + $0x248] sm:$0xff] }
  0x55   :  { %9254 = vst [vmem:[#allocation60_spill] sm:$0xff] %v5912_v63  ;;  %v302_v63 = vmul.f32 %v5588_v6, %v5931_v3 }
  0x56   :  { %9255 = vst [vmem:[#allocation61_spill] sm:$0xff] %v5917_v39  ;;  %v707_v39 = vmul.f32 %v5601_v17, %v5935_v8 }
  0x57   :  { %9256 = vst [vmem:[#allocation62_spill] sm:$0xff] %v5923_v27  ;;  %v5968_v27 = vld [vmem:[#allocation4 + $0x430] sm:$0xff] }
  0x58   :  { %9257 = vst [vmem:[#allocation63_spill] sm:$0xff] %v5925_v34  ;;  %v5960_v34 = vadd.f32 %v791_v42, %v749_v0  ;;  %v5974_v42 = vld [vmem:[#allocation4 + $0x1a8] sm:$0xff] }
  0x59   :  { %9258 = vst [vmem:[#allocation64_spill] sm:$0xff] %v5931_v3  ;;  %v342_v3 = vadd.f32 %v302_v63, %v260_v22  ;;  %v870_v63 = vrot.slane %v5603_v18, 7  ;;  %v583_v22 = vadd.f32 %v543_v51, %v501_v59  ;;  %v383_v48 = vmul.f32 %v5590_v7, %v5974_v42  ;;  %v6004_v59 = vld [vmem:[#allocation4 + $0x60] sm:$0xff] }
  0x5a   :  { %9259 = vst [vmem:[#allocation65_spill] sm:$0xff] %v5933_v14  ;;  %v466_v14 = vmul.f32 %v5592_v11, %v5947_v24  ;;  %v903_v0 = vmul.f32 %v5892_v44, %v5960_v34 }
  0x5b   :  { %9260 = vst [vmem:[#allocation66_spill] sm:$0xff] %v5935_v8  ;;  %v5978_v8 = vld [vmem:[#allocation4 + $0x4d0] sm:$0xff]  ;;  %v424_v10 = vadd.f32 %v384_v45, %v342_v3  ;;  %v6000_v3 = vadd.f32 %v790_v58, %v748_v60  ;;  %v665_v51 = vadd.f32 %v625_v32, %v583_v22  ;;  %v6014_v58 = vld [vmem:[#allocation4 + $0x1a0] sm:$0xff]  ;;  %v6018_v22 = vld [vmem:[#allocation4 + $0x428] sm:$0xff] }
  0x5c   :  { %9261 = vst [vmem:[#allocation67_spill] sm:$0xff] %v5937_v46  ;;  %v966_v46 = vsel %vm932_vm0, %v903_v0, 0.0  ;;  %v794_v40 = vmul.f32 %v5606_v23, %v5978_v8  ;;  %v6006_v0 = vld [vmem:[#allocation4 + $0x100] sm:$0xff] }
  0x5d   :  { %9262 = vst [vmem:[#allocation68_spill] sm:$0xff] %v5947_v24  ;;  %v5987_v24 = vld [vmem:[#allocation4 + $0x2e8] sm:$0xff]  ;;  %967 = vadd.xlane.f32.xlu2 %v966_v46  ;;  %v506_v45 = vadd.f32 %v466_v14, %v424_v10  ;;  %v902_v14 = vmul.f32 %v5892_v44, %v6000_v3  ;;  %v747_v32 = vadd.f32 %v707_v39, %v665_v51  ;;  %v6022_v10 = vld [vmem:[#allocation4 + $0x240] sm:$0xff] }
  0x5e   :  { %9263 = vst [vmem:[#allocation69_spill] sm:$0xff] %v5951_v20  ;;  %v712_v20 = vmul.f32 %v5601_v17, %v5968_v27  ;;  %v547_v46 = vmul.f32 %v5594_v12, %v5987_v24 }
  0x5f   :  { %9264 = vst [vmem:[#allocation70_spill] sm:$0xff] %v5953_v41  ;;  %v301_v41 = vmul.f32 %v5588_v6, %v5972_v54  ;;  %v588_v60 = vadd.f32 %v548_v47, %v506_v45  ;;  %v963_v39 = vsel %vm932_vm0, %v902_v14, 0.0  ;;  %v6032_v47 = vadd.f32 %v789_v61, %v747_v32  ;;  %v6034_v45 = vld [vmem:[#allocation4 + $0x2e0] sm:$0xff]  ;;  %v6044_v14 = vld [vmem:[#allocation4 + $0x88] sm:$0xff] }
  0x60   :  { %9265 = vst [vmem:[#allocation71_spill] sm:$0xff] %v5960_v34  ;;  %v259_v34 = vmul.f32 %v5586_v5, %v5966_v62  ;;  %964 = vadd.xlane.f32.xlu1 %v963_v39  ;;  %v6046_v61 = vld [vmem:[#allocation4 + $0x128] sm:$0xff]  ;;  %v546_v44 = vmul.f32 %v5594_v12, %v6034_v45 }
  0x61   :  { %9266 = vst [vmem:[#allocation72_spill] sm:$0xff] %v5966_v62  ;;  %v670_v51 = vadd.f32 %v630_v21, %v588_v60  ;;  %v901_v21 = vmul.f32 %v5778_v55, %v6032_v47 }
  0x62   :  { %9267 = vst [vmem:[#allocation73_spill] sm:$0xff] %v5968_v27  ;;  %v6008_v27 = vperm.slane %v870_v63, 0  ;;  %v341_v62 = vadd.f32 %v301_v41, %v259_v34  ;;  %v629_v63 = vmul.f32 %v5596_v13, %v5994_v28  ;;  %v6024_v41 = vld [vmem:[#allocation4 + $0x4c8] sm:$0xff] }
  0x63   :  { %9268 = vst [vmem:[#allocation74_spill] sm:$0xff] %v5972_v54  ;;  %v465_v54 = vmul.f32 %v5592_v11, %v5985_v4  ;;  %v752_v32 = vadd.f32 %v712_v20, %v670_v51  ;;  %v793_v60 = vmul.f32 %v5606_v23, %v6024_v41  ;;  %v6064_v20 = vld [vmem:[#allocation4 + $0x268] sm:$0xff]  ;;  %v960_v51 = vsel %vm932_vm0, %v901_v21, 0.0  ;;  %v6083_v21 = vld [vmem:[#allocation4 + $0x80] sm:$0xff] }
  0x64   :  { %9269 = vst [vmem:[#allocation75_spill] sm:$0xff] %v5974_v42  ;;  %v423_v34 = vadd.f32 %v383_v48, %v341_v62  ;;  %v382_v62 = vmul.f32 %v5590_v7, %v6014_v58  ;;  %v711_v48 = vmul.f32 %v5601_v17, %v6018_v22  ;;  %v464_v42 = vmul.f32 %v5592_v11, %v6022_v10 }
  0x65   :  { %9270 = vst [vmem:[#allocation76_spill] sm:$0xff] %v5978_v8  ;;  %v869_v8 = vrot.slane %v5603_v18, 6  ;;  %961 = vadd.xlane.f32.xlu0 %v960_v51 }
  0x66   :  { %9271 = vst [vmem:[#allocation77_spill] sm:$0xff] %v5985_v4  ;;  %v505_v18 = vadd.f32 %v465_v54, %v423_v34  ;;  %v6054_v54 = vld [vmem:[#allocation4 + $0x420] sm:$0xff]  ;;  %v6056_v34 = vld [vmem:[#allocation4 + $0x1c8] sm:$0xff] }
  0x67   :  { %9272 = vst [vmem:[#allocation78_spill] sm:$0xff] %v5987_v24  ;;  %v258_v24 = vmul.f32 %v5586_v5, %v6004_v59  ;;  %v6052_v39 = vperm.slane %v869_v8, 0  ;;  %v6067_v8 = vadd.f32 %v794_v40, %v752_v32  ;;  %v387_v40 = vmul.f32 %v5590_v7, %v6056_v34 }
  0x68   :  { %9273 = vst [vmem:[#allocation79_spill] sm:$0xff] %v5994_v28  ;;  %v6036_v28 = vld [vmem:[#allocation4 + $0x380] sm:$0xff] }
  0x69   :  { %9274 = vst [vmem:[#allocation80_spill] sm:$0xff] %v6000_v3  ;;  %v300_v3 = vmul.f32 %v5588_v6, %v6006_v0  ;;  %v906_v32 = vmul.f32 %v6008_v27, %v6067_v8 }
  0x6a   :  { %9275 = vst [vmem:[#allocation81_spill] sm:$0xff] %v6004_v59  ;;  %v6145_v59 = vld [vmem:[#allocation4 + $0x2f8] sm:$0xff] }
  0x6b   :  { %9276 = vst [vmem:[#allocation82_spill] sm:$0xff] %v6006_v0  ;;  %v340_v4 = vadd.f32 %v300_v3, %v258_v24  ;;  %v587_v24 = vadd.f32 %v547_v46, %v505_v18  ;;  %v6058_v3 = vld [vmem:[#allocation4 + $0x4c0] sm:$0xff]  ;;  %v263_v46 = vmul.f32 %v5586_v5, %v6044_v14 }
  0x6c   :  { %9277 = vst [vmem:[#allocation83_spill] sm:$0xff] %v6014_v58  ;;  %v6101_v58 = vld [vmem:[#allocation7 + $0x8] sm:$0x3]  ;;  %v6141_v0 = vld [vmem:[#allocation4 + $0x4e0] sm:$0xff] }
  0x6d   :  { %9278 = vst [vmem:[#allocation84_spill] sm:$0xff] %v6018_v22  ;;  %v422_v22 = vadd.f32 %v382_v62, %v340_v4  ;;  %v305_v4 = vmul.f32 %v5588_v6, %v6046_v61  ;;  %v669_v62 = vadd.f32 %v629_v63, %v587_v24  ;;  %v6093_v63 = vld [vmem:[#allocation4 + $0x1c0] sm:$0xff] }
  0x6e   :  { %9279 = vst [vmem:[#allocation85_spill] sm:$0xff] %v6022_v10  ;;  %v6071_v10 = vld [vmem:[#allocation4 + $0x3a8] sm:$0xff] }
  0x6f   :  { %9280 = vst [vmem:[#allocation86_spill] sm:$0xff] %v6024_v41  ;;  %v6069_v41 = vld [vmem:[#allocation4 + $0x308] sm:$0xff]  ;;  %v504_v18 = vadd.f32 %v464_v42, %v422_v22  ;;  %v469_v42 = vmul.f32 %v5592_v11, %v6064_v20  ;;  %v6091_v22 = vld [vmem:[#allocation4 + $0x120] sm:$0xff]  ;;  %v751_v24 = vadd.f32 %v711_v48, %v669_v62 }
  0x70   :  { %9281 = vst [vmem:[#allocation87_spill] sm:$0xff] %v6032_v47  ;;  %v628_v47 = vmul.f32 %v5596_v13, %v6036_v28  ;;  %v6108_v48 = vld [vmem:[#allocation4 + $0x300] sm:$0xff] }
  0x71   :  { %9282 = vst [vmem:[#allocation88_spill] sm:$0xff] %v6034_v45  ;;  %v6079_v45 = vld [vmem:[#allocation4 + $0x448] sm:$0xff]  ;;  %v586_v51 = vadd.f32 %v546_v44, %v504_v18  ;;  %v262_v44 = vmul.f32 %v5586_v5, %v6083_v21  ;;  %v6112_v62 = vadd.f32 %v793_v60, %v751_v24  ;;  %v6127_v60 = vperm.slane %v6101_v58, 0  ;;  %v6131_v24 = vld [vmem:[#allocation4 + $0x1b8] sm:$0xff] }
  0x72   :  { %9283 = vst [vmem:[#allocation89_spill] sm:$0xff] %v6036_v28  ;;  %v710_v28 = vmul.f32 %v5601_v17, %v6054_v54 }
  0x73   :  { %9284 = vst [vmem:[#allocation90_spill] sm:$0xff] %v6044_v14  ;;  %v792_v14 = vmul.f32 %v5606_v23, %v6058_v3  ;;  %v668_v18 = vadd.f32 %v628_v47, %v586_v51  ;;  %v905_v51 = vmul.f32 %v6052_v39, %v6112_v62 }
  0x74   :  { %9285 = vst [vmem:[#allocation91_spill] sm:$0xff] %v6046_v61  ;;  %v345_v61 = vadd.f32 %v305_v4, %v263_v46  ;;  %v6103_v46 = vld [vmem:[#allocation4 + $0x260] sm:$0xff]  ;;  %v975_v4 = vsel %vm932_vm0, %v906_v32, 0.0  ;;  %v6122_v32 = vld [vmem:[#allocation4 + $0x118] sm:$0xff] }
  0x75   :  { %9286 = vst [vmem:[#allocation92_spill] sm:$0xff] %v6052_v39  ;;  %976 = vadd.xlane.f32.xlu2 %v975_v4  ;;  %v468_v47 = vmul.f32 %v5592_v11, %v6103_v46  ;;  %v750_v4 = vadd.f32 %v710_v28, %v668_v18  ;;  %v303_v28 = vmul.f32 %v5588_v6, %v6122_v32 }
  0x76   :  { %9287 = vst [vmem:[#allocation93_spill] sm:$0xff] %v6054_v54  ;;  %v6095_v54 = vld [vmem:[#allocation4 + $0x4e8] sm:$0xff] }
  0x77   :  { %9288 = vst [vmem:[#allocation94_spill] sm:$0xff] %v6056_v34  ;;  %v551_v34 = vmul.f32 %v5594_v12, %v6069_v41 }
  0x78   :  { %9289 = vst [vmem:[#allocation95_spill] sm:$0xff] %v6058_v3  ;;  %v715_v3 = vmul.f32 %v5601_v17, %v6079_v45 }
  0x79   :  { %9290 = vst [vmem:[#allocation96_spill] sm:$0xff] %v6064_v20  ;;  %v427_v20 = vadd.f32 %v387_v40, %v345_v61  ;;  %v386_v61 = vmul.f32 %v5590_v7, %v6093_v63  ;;  %v6120_v40 = vld [vmem:[#allocation4 + $0x78] sm:$0xff] }
  0x7a   :  { %9291 = vst [vmem:[#allocation97_spill] sm:$0xff] %v6067_v8  ;;  %v633_v8 = vmul.f32 %v5596_v13, %v6071_v10 }
  0x7b   :  { %9292 = vst [vmem:[#allocation98_spill] sm:$0xff] %v6069_v41  ;;  %v304_v41 = vmul.f32 %v5588_v6, %v6091_v22 }
  0x7c   :  { %9293 = vst [vmem:[#allocation99_spill] sm:$0xff] %v6071_v10  ;;  %v6114_v10 = vld [vmem:[#allocation4 + $0x3a0] sm:$0xff] }
  0x7d   :  { %9294 = vst [vmem:[#allocation100_spill] sm:$0xff] %v6079_v45  ;;  %v509_v45 = vadd.f32 %v469_v42, %v427_v20  ;;  %v550_v20 = vmul.f32 %v5594_v12, %v6108_v48  ;;  %v6139_v42 = vld [vmem:[#allocation4 + $0x258] sm:$0xff] }
  0x7e   :  { %9295 = vst [vmem:[#allocation101_spill] sm:$0xff] %v6083_v21  ;;  %v797_v21 = vmul.f32 %v5606_v23, %v6095_v54 }
  0x7f   :  { %9296 = vst [vmem:[#allocation102_spill] sm:$0xff] %v6091_v22  ;;  %v344_v22 = vadd.f32 %v304_v41, %v262_v44  ;;  %v972_v41 = vsel %vm932_vm0, %v905_v51, 0.0  ;;  %v6152_v44 = vadd.f32 %v792_v14, %v750_v4 }
  0x80   :  { %9297 = vst [vmem:[#allocation103_spill] sm:$0xff] %v6093_v63  ;;  %v6135_v63 = vld [vmem:[#allocation4 + $0x440] sm:$0xff]  ;;  %973 = vadd.xlane.f32.xlu1 %v972_v41 }
  0x81   :  { %9298 = vst [vmem:[#allocation104_spill] sm:$0xff] %v6095_v54  ;;  %v591_v54 = vadd.f32 %v551_v34, %v509_v45  ;;  %v426_v18 = vadd.f32 %v386_v61, %v344_v22  ;;  %v385_v45 = vmul.f32 %v5590_v7, %v6131_v24  ;;  %v83_v34 = vld [vmem:[#allocation2 + $0x8] sm:$0xff]  ;;  %v714_v55 = vmul.f32 %v5601_v17, %v6135_v63 }
  0x82   :  { %9299 = vst [vmem:[#allocation105_spill] sm:$0xff] %v6103_v46  ;;  %v632_v46 = vmul.f32 %v5596_v13, %v6114_v10  ;;  %v904_v14 = vmul.f32 %v6052_v39, %v6152_v44  ;;  %v796_v22 = vmul.f32 %v5606_v23, %v6141_v0  ;;  %v549_v61 = vmul.f32 %v5594_v12, %v6145_v59 }
  0x83   :  { %9300 = vst [vmem:[#allocation106_spill] sm:$0xff] %v6108_v48  ;;  %v6154_v48 = vld [vmem:[#allocation4 + $0x398] sm:$0xff]  ;;  %v508_v51 = vadd.f32 %v468_v47, %v426_v18  ;;  %v6177_v47 = vperm.slane %v83_v34, 2 }
  0x84   :  { %9301 = vst [vmem:[#allocation107_spill] sm:$0xff] %v6112_v62  ;;  %v261_v62 = vmul.f32 %v5586_v5, %v6120_v40 }
  0x85   :  { %9302 = vst [vmem:[#allocation108_spill] sm:$0xff] %v6114_v10  ;;  %v673_v10 = vadd.f32 %v633_v8, %v591_v54  ;;  %v631_v54 = vmul.f32 %v5596_v13, %v6154_v48  ;;  %v6170_v8 = vperm.slane %v83_v34, 0 }
  0x86   :  { %9303 = vst [vmem:[#allocation109_spill] sm:$0xff] %v6120_v40  ;;  %v343_v40 = vadd.f32 %v303_v28, %v261_v62  ;;  %v969_v62 = vsel %vm932_vm0, %v904_v14, 0.0  ;;  %v590_v28 = vadd.f32 %v550_v20, %v508_v51  ;;  %v390_v14 = vmul.f32 %v6177_v47, %v5619_v38  ;;  %v6205_v38 = vld [vmem:[#allocation4 + $0x138] sm:$0xff] }
  0x87   :  { %9304 = vst [vmem:[#allocation110_spill] sm:$0xff] %v6122_v32  ;;  %v467_v32 = vmul.f32 %v5592_v11, %v6139_v42  ;;  %v755_v4 = vadd.f32 %v715_v3, %v673_v10  ;;  %970 = vadd.xlane.f32.xlu0 %v969_v62  ;;  %v266_v10 = vmul.f32 %v6170_v8, %v5615_v36  ;;  %v6183_v3 = vperm.slane %v83_v34, 3 }
  0x88   :  { %9305 = vst [vmem:[#allocation111_spill] sm:$0xff] %v6127_v60  ;;  %v425_v41 = vadd.f32 %v385_v45, %v343_v40  ;;  %v672_v40 = vadd.f32 %v632_v46, %v590_v28  ;;  %v6185_v45 = vld [vmem:[#allocation4 + $0x4d8] sm:$0xff]  ;;  %v6191_v51 = vperm.slane %v83_v34, 4  ;;  %v6203_v28 = vperm.slane %v83_v34, 6 }
  0x89   :  { %9306 = vst [vmem:[#allocation112_spill] sm:$0xff] %v6135_v63  ;;  %v6173_v63 = vld [vmem:[#allocation4 + $0x438] sm:$0xff]  ;;  %v6179_v18 = vadd.f32 %v797_v21, %v755_v4  ;;  %v472_v46 = vmul.f32 %v6183_v3, %v5628_v49 }
  0x8a   :  { %9307 = vst [vmem:[#allocation113_spill] sm:$0xff] %v6141_v0  ;;  %v507_v0 = vadd.f32 %v467_v32, %v425_v41  ;;  %v713_v36 = vmul.f32 %v5601_v17, %v6173_v63  ;;  %v6199_v4 = vld [vmem:[#allocation4 + $0x98] sm:$0xff]  ;;  %v754_v41 = vadd.f32 %v714_v55, %v672_v40 }
  0x8b   :  { %9308 = vst [vmem:[#allocation114_spill] sm:$0xff] %v6152_v44  ;;  %v6175_v44 = vperm.slane %v83_v34, 1  ;;  %v909_v21 = vmul.f32 %v6127_v60, %v6179_v18  ;;  %v6218_v40 = vld [vmem:[#allocation4 + $0x278] sm:$0xff] }
  0x8c   :  { %9309 = vst [vmem:[#allocation115_spill] sm:$0xff] %v6154_v48  ;;  %v589_v32 = vadd.f32 %v549_v61, %v507_v0  ;;  %v6207_v48 = vld [vmem:[#allocation4 + $0x1d8] sm:$0xff]  ;;  %v6214_v49 = vadd.f32 %v796_v22, %v754_v41  ;;  %v6234_v41 = vld [vmem:[#allocation4 + $0x90] sm:$0xff] }
  0x8d   :  { %9310 = vst [vmem:[#allocation116_spill] sm:$0xff] %v6173_v63  ;;  %v308_v20 = vmul.f32 %v6175_v44, %v5617_v37  ;;  %v6201_v37 = vperm.slane %v83_v34, 5  ;;  %v984_v0 = vsel %vm932_vm0, %v909_v21, 0.0  ;;  %v6212_v63 = vperm.slane %v83_v34, 7  ;;  %v6222_v21 = vld [vmem:[#allocation4 + $0x318] sm:$0xff] }
  0x8e   :  { %9311 = vst [vmem:[#allocation117_spill] sm:$0xff] %v6179_v18  ;;  %v671_v61 = vadd.f32 %v631_v54, %v589_v32  ;;  %v795_v18 = vmul.f32 %v5606_v23, %v6185_v45  ;;  %985 = vadd.xlane.f32.xlu2 %v984_v0  ;;  %v307_v54 = vmul.f32 %v5588_v6, %v6205_v38 }
  0x8f   :  { %v348_v62 = vadd.f32 %v308_v20, %v266_v10  ;;  %9312 = vst [vmem:[#allocation118_spill] sm:$0xff] %v6205_v38  ;;  %v554_v10 = vmul.f32 %v6191_v51, %v5630_v50  ;;  %v265_v20 = vmul.f32 %v5586_v5, %v6199_v4  ;;  %v389_v34 = vmul.f32 %v5590_v7, %v6207_v48  ;;  %v6275_v38 = vld [vmem:[#allocation4 + $0x450] sm:$0xff] }
  0x90   :  { %9313 = vst [vmem:[#allocation119_spill] sm:$0xff] %v6207_v48  ;;  %v753_v39 = vadd.f32 %v713_v36, %v671_v61  ;;  %v908_v22 = vmul.f32 %v6127_v60, %v6214_v49  ;;  %v636_v50 = vmul.f32 %v6201_v37, %v5632_v52  ;;  %v718_v32 = vmul.f32 %v6203_v28, %v5634_v53  ;;  %v6236_v36 = vld [vmem:[#allocation4 + $0x130] sm:$0xff]  ;;  %v6242_v61 = vld [vmem:[#allocation4 + $0x3b8] sm:$0xff] }
  0x91   :  { %9314 = vst [vmem:[#allocation120_spill] sm:$0xff] %v6214_v49  ;;  %v430_v55 = vadd.f32 %v390_v14, %v348_v62  ;;  %v800_v0 = vmul.f32 %v6212_v63, %v5646_v1  ;;  %v6244_v48 = vld [vmem:[#allocation4 + $0x458] sm:$0xff]  ;;  %v471_v52 = vmul.f32 %v5592_v11, %v6218_v40  ;;  %v6254_v60 = vld [vmem:[#allocation4 + $0x270] sm:$0xff] }
  0x92   :  { %9315 = vst [vmem:[#allocation121_spill] sm:$0xff] %v6218_v40  ;;  %v6238_v62 = vadd.f32 %v795_v18, %v753_v39  ;;  %v981_v53 = vsel %vm932_vm0, %v908_v22, 0.0  ;;  %v553_v39 = vmul.f32 %v5594_v12, %v6222_v21  ;;  %v871_v18 = vrot.slane %v6101_v58, 1  ;;  %v6260_v40 = vld [vmem:[#allocation4 + $0x310] sm:$0xff] }
  0x93   :  { %9316 = vst [vmem:[#allocation122_spill] sm:$0xff] %v6222_v21  ;;  %v512_v14 = vadd.f32 %v472_v46, %v430_v55  ;;  %v347_v46 = vadd.f32 %v307_v54, %v265_v20  ;;  %v6248_v55 = vld [vmem:[#allocation4 + $0x1d0] sm:$0xff]  ;;  %982 = vadd.xlane.f32.xlu1 %v981_v53  ;;  %v6258_v20 = vld [vmem:[#allocation4 + $0x4f8] sm:$0xff]  ;;  %v264_v22 = vmul.f32 %v5586_v5, %v6234_v41 }
  0x94   :  { %9317 = vst [vmem:[#allocation123_spill] sm:$0xff] %v6238_v62  ;;  %v907_v1 = vmul.f32 %v6008_v27, %v6238_v62  ;;  %v635_v58 = vmul.f32 %v5596_v13, %v6242_v61  ;;  %v717_v53 = vmul.f32 %v5601_v17, %v6244_v48  ;;  %v388_v62 = vmul.f32 %v5590_v7, %v6248_v55  ;;  %v6273_v21 = vld [vmem:[#allocation4 + $0x3b0] sm:$0xff] }
  0x95   :  { %9318 = vst [vmem:[#allocation124_spill] sm:$0xff] %v6244_v48  ;;  %v594_v49 = vadd.f32 %v554_v10, %v512_v14  ;;  %v429_v54 = vadd.f32 %v389_v34, %v347_v46  ;;  %v306_v10 = vmul.f32 %v5588_v6, %v6236_v36  ;;  %v470_v6 = vmul.f32 %v5592_v11, %v6254_v60 }
  0x96   :  { %v978_v34 = vsel %vm932_vm0, %v907_v1, 0.0  ;;  %v6281_v48 = vperm.slane %v871_v18, 0  ;;  %v552_v7 = vmul.f32 %v5594_v12, %v6260_v40  ;;  %v311_v11 = vmul.f32 %v6175_v44, %v5661_v26 }
  0x97   :  { %v676_v14 = vadd.f32 %v636_v50, %v594_v49  ;;  %v511_v46 = vadd.f32 %v471_v52, %v429_v54  ;;  %v346_v5 = vadd.f32 %v306_v10, %v264_v22  ;;  %979 = vadd.xlane.f32.xlu0 %v978_v34  ;;  %v799_v50 = vmul.f32 %v5606_v23, %v6258_v20  ;;  %v6285_v52 = vld [vmem:[#allocation4 + $0x4f0] sm:$0xff] }
  0x98   :  { %v269_v22 = vmul.f32 %v6170_v8, %v5659_v25  ;;  %v716_v18 = vmul.f32 %v5601_v17, %v6275_v38  ;;  %v393_v12 = vmul.f32 %v6177_v47, %v5669_v31  ;;  %v475_v25 = vmul.f32 %v6183_v3, %v5672_v43  ;;  %v5401_v34 = vld [vmem:[#allocation4 + $0x10] sm:$0xff] }
  0x99   :  { %v758_v49 = vadd.f32 %v718_v32, %v676_v14  ;;  %v593_v1 = vadd.f32 %v553_v39, %v511_v46  ;;  %v428_v54 = vadd.f32 %v388_v62, %v346_v5  ;;  %v634_v32 = vmul.f32 %v5596_v13, %v6273_v21  ;;  %v5402_v5 = vld [vmem:[#allocation4 + $0xb0] sm:$0xff] }
  0x9a   :  { %v351_v62 = vadd.f32 %v311_v11, %v269_v22  ;;  %v557_v13 = vmul.f32 %v6191_v51, %v5681_v56  ;;  %v268_v17 = vmul.f32 %v5401_v34, %v6170_v8 }
  0x9b   :  { %v6291_v10 = vadd.f32 %v800_v0, %v758_v49  ;;  %v675_v39 = vadd.f32 %v635_v58, %v593_v1  ;;  %v510_v14 = vadd.f32 %v470_v6, %v428_v54  ;;  %v798_v0 = vmul.f32 %v5606_v23, %v6285_v52  ;;  %v5403_v1 = vld [vmem:[#allocation4 + $0x150] sm:$0xff] }
  0x9c   :  { %v433_v58 = vadd.f32 %v393_v12, %v351_v62  ;;  %v310_v6 = vmul.f32 %v5402_v5, %v6175_v44  ;;  %v639_v49 = vmul.f32 %v6201_v37, %v5683_v57  ;;  %v392_v23 = vmul.f32 %v5403_v1, %v6177_v47  ;;  %v5404_v54 = vld [vmem:[#allocation4 + $0x1f0] sm:$0xff] }
  0x9d   :  { %9319 = vst [vmem:[#allocation125_spill] sm:$0xff] %v6291_v10  ;;  %v912_v26 = vmul.f32 %v5666_v29, %v6291_v10  ;;  %v757_v46 = vadd.f32 %v717_v53, %v675_v39  ;;  %v592_v31 = vadd.f32 %v552_v7, %v510_v14  ;;  %v474_v56 = vmul.f32 %v5404_v54, %v6183_v3  ;;  %v5405_v14 = vld [vmem:[#allocation4 + $0x290] sm:$0xff] }
  0x9e   :  { %v515_v7 = vadd.f32 %v475_v25, %v433_v58  ;;  %v350_v11 = vadd.f32 %v310_v6, %v268_v17  ;;  %v721_v12 = vmul.f32 %v6203_v28, %v5701_v16  ;;  %v803_v39 = vmul.f32 %v6212_v63, %v5703_v19  ;;  %v5406_v25 = vld [vmem:[#allocation4 + $0x330] sm:$0xff] }
  0x9f   :  { %v993_v43 = vsel %vm932_vm0, %v912_v26, 0.0  ;;  %v6314_v22 = vadd.f32 %v799_v50, %v757_v46  ;;  %v674_v53 = vadd.f32 %v634_v32, %v592_v31  ;;  %v556_v57 = vmul.f32 %v5405_v14, %v6191_v51  ;;  %v5407_v46 = vld [vmem:[#allocation4 + $0x3d0] sm:$0xff] }
  0xa0   :  { %994 = vadd.xlane.f32.xlu2 %v993_v43  ;;  %v267_v62 = vmul.f32 %v6170_v8, %v5690_v2  ;;  %v597_v34 = vadd.f32 %v557_v13, %v515_v7  ;;  %v432_v32 = vadd.f32 %v392_v23, %v350_v11  ;;  %v638_v17 = vmul.f32 %v5406_v25, %v6201_v37  ;;  %v5408_v13 = vld [vmem:[#allocation4 + $0x470] sm:$0xff]  ;;  %v5410_v11 = vld [vmem:[#allocation4 + $0xc8] sm:$0xff] }
  0xa1   :  { %9320 = vst [vmem:[#allocation126_spill] sm:$0xff] %v6314_v22  ;;  %v911_v26 = vmul.f32 %v6281_v48, %v6314_v22  ;;  %v756_v50 = vadd.f32 %v716_v18, %v674_v53  ;;  %v720_v16 = vmul.f32 %v5407_v46, %v6203_v28  ;;  %v309_v19 = vmul.f32 %v6175_v44, %v5695_v9  ;;  %v9322_v53 = vld [vmem:[#allocation16_spill] sm:$0xff] }
  0xa2   :  { %v391_v31 = vmul.f32 %v6177_v47, %v5697_v15  ;;  %v679_v5 = vadd.f32 %v639_v49, %v597_v34  ;;  %v514_v18 = vadd.f32 %v474_v56, %v432_v32  ;;  %v802_v6 = vmul.f32 %v5408_v13, %v6212_v63  ;;  %v9325_v32 = vld [vmem:[#allocation19_spill] sm:$0xff]  ;;  %v5413_v13 = vld [vmem:[#allocation4 + $0x2a8] sm:$0xff] }
  0xa3   :  { %v990_v2 = vsel %vm932_vm0, %v911_v26, 0.0  ;;  %v6332_v58 = vadd.f32 %v798_v0, %v756_v50  ;;  %v349_v43 = vadd.f32 %v309_v19, %v267_v62  ;;  %v473_v1 = vmul.f32 %v6183_v3, %v5710_v30  ;;  %v5409_v0 = vld [vmem:[#allocation4 + $0x28] sm:$0xff] }
  0xa4   :  { %991 = vadd.xlane.f32.xlu1 %v990_v2  ;;  %v555_v9 = vmul.f32 %v6191_v51, %v5716_v35  ;;  %v761_v23 = vadd.f32 %v721_v12, %v679_v5  ;;  %v596_v54 = vadd.f32 %v556_v57, %v514_v18  ;;  %v271_v49 = vmul.f32 %v5409_v0, %v6170_v8  ;;  %v5411_v62 = vld [vmem:[#allocation4 + $0x168] sm:$0xff]  ;;  %v9324_v12 = vld [vmem:[#allocation18_spill] sm:$0xff]  ;;  %v5416_v0 = vld [vmem:[#allocation4 + $0x160] sm:$0xff] }
  0xa5   :  { %9321 = vst [vmem:[#allocation127_spill] sm:$0xff] %v6332_v58  ;;  %v910_v15 = vmul.f32 %v6281_v48, %v6332_v58  ;;  %v431_v56 = vadd.f32 %v391_v31, %v349_v43  ;;  %v637_v7 = vmul.f32 %v6201_v37, %v9322_v53  ;;  %v313_v14 = vmul.f32 %v5410_v11, %v6175_v44  ;;  %v5412_v19 = vld [vmem:[#allocation4 + $0x208] sm:$0xff] }
  0xa6   :  { %v395_v30 = vmul.f32 %v5411_v62, %v6177_v47  ;;  %v6347_v26 = vadd.f32 %v803_v39, %v761_v23  ;;  %v678_v50 = vadd.f32 %v638_v17, %v596_v54  ;;  %v719_v57 = vmul.f32 %v6203_v28, %v9324_v12  ;;  %v9326_v2 = vld [vmem:[#allocation13_spill] sm:$0xff]  ;;  %v5414_v17 = vld [vmem:[#allocation4 + $0x20] sm:$0xff] }
  0xa7   :  { %v987_v35 = vsel %vm932_vm0, %v910_v15, 0.0  ;;  %v513_v34 = vadd.f32 %v473_v1, %v431_v56  ;;  %v801_v25 = vmul.f32 %v6212_v63, %v9325_v32  ;;  %v353_v46 = vadd.f32 %v313_v14, %v271_v49  ;;  %v5415_v1 = vld [vmem:[#allocation4 + $0xc0] sm:$0xff]  ;;  %v5417_v11 = vld [vmem:[#allocation4 + $0x348] sm:$0xff] }
  0xa8   :  { %9323 = vst [vmem:[#allocation16_spill] sm:$0xff] %v6347_v26  ;;  %988 = vadd.xlane.f32.xlu0 %v987_v35  ;;  %v477_v31 = vmul.f32 %v5412_v19, %v6183_v3  ;;  %v915_v5 = vmul.f32 %v9326_v2, %v6347_v26  ;;  %v760_v18 = vadd.f32 %v720_v16, %v678_v50  ;;  %v5418_v14 = vld [vmem:[#allocation4 + $0x3e8] sm:$0xff]  ;;  %v5419_v50 = vld [vmem:[#allocation4 + $0x200] sm:$0xff] }
  0xa9   :  { %v559_v39 = vmul.f32 %v5413_v13, %v6191_v51  ;;  %v270_v43 = vmul.f32 %v5414_v17, %v6170_v8  ;;  %v595_v15 = vadd.f32 %v555_v9, %v513_v34  ;;  %v435_v23 = vadd.f32 %v395_v30, %v353_v46  ;;  %v5420_v32 = vld [vmem:[#allocation4 + $0x488] sm:$0xff]  ;;  %v5421_v46 = vld [vmem:[#allocation4 + $0x2a0] sm:$0xff] }
  0xaa   :  { %v312_v54 = vmul.f32 %v5415_v1, %v6175_v44  ;;  %v394_v49 = vmul.f32 %v5416_v0, %v6177_v47  ;;  %v1002_v56 = vsel %vm932_vm0, %v915_v5, 0.0  ;;  %v6361_v53 = vadd.f32 %v802_v6, %v760_v18  ;;  %v9328_v5 = vld [vmem:[#allocation25_spill] sm:$0xff]  ;;  %v9330_v1 = vld [vmem:[#allocation28_spill] sm:$0xff]  ;;  %v9331_v0 = vld [vmem:[#allocation31_spill] sm:$0xff] }
  0xab   :  { %v641_v16 = vmul.f32 %v5417_v11, %v6201_v37  ;;  %v723_v62 = vmul.f32 %v5418_v14, %v6203_v28  ;;  %1003 = vadd.xlane.f32.xlu2 %v1002_v56  ;;  %v677_v35 = vadd.f32 %v637_v7, %v595_v15  ;;  %v517_v9 = vadd.f32 %v477_v31, %v435_v23  ;;  %v9329_v31 = vld [vmem:[#allocation27_spill] sm:$0xff]  ;;  %v5422_v23 = vld [vmem:[#allocation4 + $0x340] sm:$0xff] }
  0xac   :  { %9327 = vst [vmem:[#allocation18_spill] sm:$0xff] %v6361_v53  ;;  %v352_v30 = vadd.f32 %v312_v54, %v270_v43  ;;  %v476_v12 = vmul.f32 %v5419_v50, %v6183_v3  ;;  %v914_v34 = vmul.f32 %v9326_v2, %v6361_v53  ;;  %v805_v6 = vmul.f32 %v5420_v32, %v6212_v63  ;;  %v5423_v14 = vld [vmem:[#allocation4 + $0x3e0] sm:$0xff]  ;;  %v9333_v50 = vld [vmem:[#allocation33_spill] sm:$0xff] }
  0xad   :  { %v558_v19 = vmul.f32 %v5421_v46, %v6191_v51  ;;  %v272_v18 = vmul.f32 %v6170_v8, %v9328_v5  ;;  %v759_v13 = vadd.f32 %v719_v57, %v677_v35  ;;  %v599_v17 = vadd.f32 %v559_v39, %v517_v9  ;;  %v5424_v9 = vld [vmem:[#allocation4 + $0x480] sm:$0xff] }
  0xae   :  { %v434_v7 = vadd.f32 %v394_v49, %v352_v30  ;;  %v314_v43 = vmul.f32 %v6175_v44, %v9329_v31  ;;  %v999_v15 = vsel %vm932_vm0, %v914_v34, 0.0  ;;  %v640_v2 = vmul.f32 %v5422_v23, %v6201_v37  ;;  %v5425_v32 = vld [vmem:[#allocation4 + $0x40] sm:$0xff] }
  0xaf   :  { %v396_v54 = vmul.f32 %v6177_v47, %v9330_v1  ;;  %v478_v56 = vmul.f32 %v6183_v3, %v9331_v0  ;;  %1000 = vadd.xlane.f32.xlu1 %v999_v15  ;;  %v6380_v11 = vadd.f32 %v801_v25, %v759_v13  ;;  %v681_v57 = vadd.f32 %v641_v16, %v599_v17  ;;  %v9335_v17 = vld [vmem:[#allocation38_spill] sm:$0xff]  ;;  %v5426_v31 = vld [vmem:[#allocation4 + $0xe0] sm:$0xff] }
  0xb0   :  { %v516_v39 = vadd.f32 %v476_v12, %v434_v7  ;;  %v354_v49 = vadd.f32 %v314_v43, %v272_v18  ;;  %v722_v35 = vmul.f32 %v5423_v14, %v6203_v28  ;;  %v804_v30 = vmul.f32 %v5424_v9, %v6212_v63  ;;  %v9334_v12 = vld [vmem:[#allocation34_spill] sm:$0xff]  ;;  %v5427_v15 = vld [vmem:[#allocation4 + $0x180] sm:$0xff] }
  0xb1   :  { %9332 = vst [vmem:[#allocation19_spill] sm:$0xff] %v6380_v11  ;;  %v560_v34 = vmul.f32 %v6191_v51, %v9333_v50  ;;  %v274_v46 = vmul.f32 %v5425_v32, %v6170_v8  ;;  %v913_v5 = vmul.f32 %v5666_v29, %v6380_v11  ;;  %v763_v25 = vadd.f32 %v723_v62, %v681_v57  ;;  %v5429_v14 = vld [vmem:[#allocation4 + $0x2c0] sm:$0xff] }
  0xb2   :  { %v598_v13 = vadd.f32 %v558_v19, %v516_v39  ;;  %v436_v16 = vadd.f32 %v396_v54, %v354_v49  ;;  %v642_v18 = vmul.f32 %v6201_v37, %v9334_v12  ;;  %v724_v7 = vmul.f32 %v6203_v28, %v9335_v17  ;;  %v9337_v19 = vld [vmem:[#allocation39_spill] sm:$0xff]  ;;  %v5428_v39 = vld [vmem:[#allocation4 + $0x220] sm:$0xff] }
  0xb3   :  { %v316_v43 = vmul.f32 %v5426_v31, %v6175_v44  ;;  %v398_v23 = vmul.f32 %v5427_v15, %v6177_v47  ;;  %v996_v1 = vsel %vm932_vm0, %v913_v5, 0.0  ;;  %v6396_v0 = vadd.f32 %v805_v6, %v763_v25  ;;  %v9338_v50 = vld [vmem:[#allocation12_spill] sm:$0xff]  ;;  %v9339_v6 = vld [vmem:[#allocation21_spill] sm:$0xff]  ;;  %v5432_v17 = vld [vmem:[#allocation4 + $0x178] sm:$0xff] }
  0xb4   :  { %v680_v29 = vadd.f32 %v640_v2, %v598_v13  ;;  %v518_v62 = vadd.f32 %v478_v56, %v436_v16  ;;  %997 = vadd.xlane.f32.xlu0 %v996_v1  ;;  %v806_v54 = vmul.f32 %v6212_v63, %v9337_v19  ;;  %v480_v49 = vmul.f32 %v5428_v39, %v6183_v3  ;;  %v5430_v25 = vld [vmem:[#allocation4 + $0x360] sm:$0xff]  ;;  %v5431_v16 = vld [vmem:[#allocation4 + $0xd8] sm:$0xff] }
  0xb5   :  { %9336 = vst [vmem:[#allocation13_spill] sm:$0xff] %v6396_v0  ;;  %v356_v57 = vadd.f32 %v316_v43, %v274_v46  ;;  %v562_v9 = vmul.f32 %v5429_v14, %v6191_v51  ;;  %v917_v32 = vmul.f32 %v9338_v50, %v6396_v0  ;;  %v273_v2 = vmul.f32 %v6170_v8, %v9339_v6 }
  0xb6   :  { %v762_v12 = vadd.f32 %v722_v35, %v680_v29  ;;  %v600_v5 = vadd.f32 %v560_v34, %v518_v62  ;;  %v644_v13 = vmul.f32 %v5430_v25, %v6201_v37  ;;  %v315_v46 = vmul.f32 %v5431_v16, %v6175_v44  ;;  %v5433_v35 = vld [vmem:[#allocation4 + $0x400] sm:$0xff]  ;;  %v9344_v16 = vld [vmem:[#allocation57_spill] sm:$0xff] }
  0xb7   :  { %v438_v56 = vadd.f32 %v398_v23, %v356_v57  ;;  %v397_v31 = vmul.f32 %v5432_v17, %v6177_v47  ;;  %v1008_v43 = vsel %vm932_vm0, %v917_v32, 0.0  ;;  %v726_v34 = vmul.f32 %v5433_v35, %v6203_v28  ;;  %v5434_v23 = vld [vmem:[#allocation4 + $0x4a0] sm:$0xff]  ;;  %v9341_v57 = vld [vmem:[#allocation23_spill] sm:$0xff] }
  0xb8   :  { %v6410_v15 = vadd.f32 %v804_v30, %v762_v12  ;;  %v682_v1 = vadd.f32 %v642_v18, %v600_v5  ;;  %1009 = vadd.xlane.f32.xlu1 %v1008_v43  ;;  %v808_v62 = vmul.f32 %v5434_v23, %v6212_v63  ;;  %v355_v19 = vadd.f32 %v315_v46, %v273_v2  ;;  %v5435_v32 = vld [vmem:[#allocation4 + $0x2b8] sm:$0xff]  ;;  %v9342_v18 = vld [vmem:[#allocation54_spill] sm:$0xff]  ;;  %v9347_v43 = vld [vmem:[#allocation29_spill] sm:$0xff] }
  0xb9   :  { %v520_v29 = vadd.f32 %v480_v49, %v438_v56  ;;  %v479_v39 = vmul.f32 %v6183_v3, %v9341_v57  ;;  %v561_v30 = vmul.f32 %v5435_v32, %v6191_v51  ;;  %v275_v12 = vmul.f32 %v6170_v8, %v9342_v18  ;;  %v9343_v49 = vld [vmem:[#allocation56_spill] sm:$0xff]  ;;  %v9349_v57 = vld [vmem:[#allocation30_spill] sm:$0xff]  ;;  %v9351_v32 = vld [vmem:[#allocation35_spill] sm:$0xff] }
  0xba   :  { %9340 = vst [vmem:[#allocation25_spill] sm:$0xff] %v6410_v15  ;;  %v916_v14 = vmul.f32 %v9338_v50, %v6410_v15  ;;  %v764_v6 = vadd.f32 %v724_v7, %v682_v1  ;;  %v437_v25 = vadd.f32 %v397_v31, %v355_v19  ;;  %v317_v56 = vmul.f32 %v6175_v44, %v9343_v49  ;;  %v9346_v50 = vld [vmem:[#allocation24_spill] sm:$0xff] }
  0xbb   :  { %v602_v5 = vadd.f32 %v562_v9, %v520_v29  ;;  %v399_v2 = vmul.f32 %v6177_v47, %v9344_v16  ;;  %v643_v7 = vmul.f32 %v6201_v37, %v9346_v50  ;;  %v725_v1 = vmul.f32 %v6203_v28, %v9347_v43  ;;  %v9348_v23 = vld [vmem:[#allocation36_spill] sm:$0xff]  ;;  %v9355_v50 = vld [vmem:[#allocation41_spill] sm:$0xff] }
  0xbc   :  { %v1005_v46 = vsel %vm932_vm0, %v916_v14, 0.0  ;;  %v6426_v17 = vadd.f32 %v806_v54, %v764_v6  ;;  %v519_v9 = vadd.f32 %v479_v39, %v437_v25  ;;  %v357_v31 = vadd.f32 %v317_v56, %v275_v12  ;;  %v9350_v14 = vld [vmem:[#allocation60_spill] sm:$0xff]  ;;  %v9352_v39 = vld [vmem:[#allocation37_spill] sm:$0xff] }
  0xbd   :  { %1006 = vadd.xlane.f32.xlu0 %v1005_v46  ;;  %v684_v35 = vadd.f32 %v644_v13, %v602_v5  ;;  %v481_v29 = vmul.f32 %v6183_v3, %v5910_v33  ;;  %v807_v54 = vmul.f32 %v6212_v63, %v9349_v57  ;;  %v563_v6 = vmul.f32 %v6191_v51, %v9350_v14  ;;  %v9353_v5 = vld [vmem:[#allocation61_spill] sm:$0xff]  ;;  %v9354_v56 = vld [vmem:[#allocation40_spill] sm:$0xff]  ;;  %v9359_v14 = vld [vmem:[#allocation43_spill] sm:$0xff] }
  0xbe   :  { %9345 = vst [vmem:[#allocation27_spill] sm:$0xff] %v6426_v17  ;;  %v918_v19 = vmul.f32 %v9348_v23, %v6426_v17  ;;  %v277_v18 = vmul.f32 %v6170_v8, %v9351_v32  ;;  %v601_v16 = vadd.f32 %v561_v30, %v519_v9  ;;  %v439_v13 = vadd.f32 %v399_v2, %v357_v31  ;;  %v9358_v31 = vld [vmem:[#allocation67_spill] sm:$0xff] }
  0xbf   :  { %v766_v49 = vadd.f32 %v726_v34, %v684_v35  ;;  %v319_v12 = vmul.f32 %v6175_v44, %v9352_v39  ;;  %v645_v25 = vmul.f32 %v6201_v37, %v9353_v5  ;;  %v401_v46 = vmul.f32 %v6177_v47, %v9354_v56  ;;  %v9357_v35 = vld [vmem:[#allocation66_spill] sm:$0xff]  ;;  %v9360_v39 = vld [vmem:[#allocation45_spill] sm:$0xff] }
  0xc0   :  { %v1011_v33 = vsel %vm932_vm0, %v918_v19, 0.0  ;;  %v483_v43 = vmul.f32 %v6183_v3, %v9355_v50  ;;  %v683_v34 = vadd.f32 %v643_v7, %v601_v16  ;;  %v521_v30 = vadd.f32 %v481_v29, %v439_v13  ;;  %v9361_v56 = vld [vmem:[#allocation26_spill] sm:$0xff]  ;;  %v9362_v29 = vld [vmem:[#allocation44_spill] sm:$0xff] }
  0xc1   :  { %1012 = vadd.xlane.f32.xlu2 %v1011_v33  ;;  %v6451_v57 = vadd.f32 %v808_v62, %v766_v49  ;;  %v359_v2 = vadd.f32 %v319_v12, %v277_v18  ;;  %v727_v9 = vmul.f32 %v6203_v28, %v9357_v35  ;;  %v809_v19 = vmul.f32 %v6212_v63, %v9358_v31  ;;  %v9363_v16 = vld [vmem:[#allocation46_spill] sm:$0xff]  ;;  %v9364_v12 = vld [vmem:[#allocation47_spill] sm:$0xff]  ;;  %v9365_v35 = vld [vmem:[#allocation48_spill] sm:$0xff] }
  0xc2   :  { %v565_v32 = vmul.f32 %v6191_v51, %v9359_v14  ;;  %v276_v5 = vmul.f32 %v6170_v8, %v9360_v39  ;;  %v765_v62 = vadd.f32 %v725_v1, %v683_v34  ;;  %v603_v49 = vadd.f32 %v563_v6, %v521_v30  ;;  %v9367_v6 = vld [vmem:[#allocation49_spill] sm:$0xff]  ;;  %v9368_v30 = vld [vmem:[#allocation50_spill] sm:$0xff] }
  0xc3   :  { %9356 = vst [vmem:[#allocation28_spill] sm:$0xff] %v6451_v57  ;;  %v920_v33 = vmul.f32 %v9361_v56, %v6451_v57  ;;  %v441_v7 = vadd.f32 %v401_v46, %v359_v2  ;;  %v647_v18 = vmul.f32 %v6201_v37, %v9362_v29  ;;  %v729_v13 = vmul.f32 %v6203_v28, %v9363_v16  ;;  %v9369_v29 = vld [vmem:[#allocation51_spill] sm:$0xff] }
  0xc4   :  { %v318_v50 = vmul.f32 %v6175_v44, %v9364_v12  ;;  %v400_v31 = vmul.f32 %v6177_v47, %v9365_v35  ;;  %v6472_v39 = vadd.f32 %v807_v54, %v765_v62  ;;  %v685_v57 = vadd.f32 %v645_v25, %v603_v49  ;;  %v9370_v54 = vld [vmem:[#allocation81_spill] sm:$0xff] }
  0xc5   :  { %v1017_v14 = vsel %vm932_vm0, %v920_v33, 0.0  ;;  %v523_v1 = vadd.f32 %v483_v43, %v441_v7  ;;  %v811_v46 = vmul.f32 %v6212_v63, %v9367_v6  ;;  %v482_v2 = vmul.f32 %v6183_v3, %v9368_v30  ;;  %v9371_v62 = vld [vmem:[#allocation53_spill] sm:$0xff]  ;;  %v9372_v7 = vld [vmem:[#allocation82_spill] sm:$0xff] }
  0xc6   :  { %9366 = vst [vmem:[#allocation31_spill] sm:$0xff] %v6472_v39  ;;  %1018 = vadd.xlane.f32.xlu1 %v1017_v14  ;;  %v358_v34 = vadd.f32 %v318_v50, %v276_v5  ;;  %v564_v16 = vmul.f32 %v6191_v51, %v9369_v29  ;;  %v919_v12 = vmul.f32 %v9348_v23, %v6472_v39  ;;  %v9373_v50 = vld [vmem:[#allocation83_spill] sm:$0xff]  ;;  %v9377_v29 = vld [vmem:[#allocation85_spill] sm:$0xff] }
  0xc7   :  { %v767_v35 = vadd.f32 %v727_v9, %v685_v57  ;;  %v605_v33 = vadd.f32 %v565_v32, %v523_v1  ;;  %v278_v25 = vmul.f32 %v6170_v8, %v9370_v54  ;;  %v646_v49 = vmul.f32 %v6201_v37, %v9371_v62  ;;  %v9375_v57 = vld [vmem:[#allocation58_spill] sm:$0xff] }
  0xc8   :  { %v440_v43 = vadd.f32 %v400_v31, %v358_v34  ;;  %v320_v5 = vmul.f32 %v6175_v44, %v9372_v7  ;;  %v402_v14 = vmul.f32 %v6177_v47, %v9373_v50  ;;  %v1014_v6 = vsel %vm932_vm0, %v919_v12, 0.0  ;;  %v9376_v31 = vld [vmem:[#allocation59_spill] sm:$0xff]  ;;  %v9378_v12 = vld [vmem:[#allocation88_spill] sm:$0xff] }
  0xc9   :  { %v6491_v30 = vadd.f32 %v809_v19, %v767_v35  ;;  %v687_v23 = vadd.f32 %v647_v18, %v605_v33  ;;  %v728_v9 = vmul.f32 %v6203_v28, %v9375_v57  ;;  %1015 = vadd.xlane.f32.xlu0 %v1014_v6  ;;  %v810_v1 = vmul.f32 %v6212_v63, %v9376_v31  ;;  %v9379_v18 = vld [vmem:[#allocation62_spill] sm:$0xff]  ;;  %v9381_v6 = vld [vmem:[#allocation65_spill] sm:$0xff] }
  0xca   :  { %v522_v32 = vadd.f32 %v482_v2, %v440_v43  ;;  %v360_v34 = vadd.f32 %v320_v5, %v278_v25  ;;  %v484_v54 = vmul.f32 %v6183_v3, %v9377_v29  ;;  %v566_v19 = vmul.f32 %v6191_v51, %v9378_v12  ;;  %v9380_v2 = vld [vmem:[#allocation64_spill] sm:$0xff]  ;;  %v9386_v12 = vld [vmem:[#allocation55_spill] sm:$0xff] }
  0xcb   :  { %9374 = vst [vmem:[#allocation33_spill] sm:$0xff] %v6491_v30  ;;  %v921_v62 = vmul.f32 %v9361_v56, %v6491_v30  ;;  %v769_v7 = vadd.f32 %v729_v13, %v687_v23  ;;  %v280_v35 = vmul.f32 %v6170_v8, %v9379_v18  ;;  %v322_v43 = vmul.f32 %v6175_v44, %v9380_v2  ;;  %v9383_v56 = vld [vmem:[#allocation89_spill] sm:$0xff]  ;;  %v9387_v2 = vld [vmem:[#allocation95_spill] sm:$0xff] }
  0xcc   :  { %v604_v33 = vadd.f32 %v564_v16, %v522_v32  ;;  %v442_v50 = vadd.f32 %v402_v14, %v360_v34  ;;  %v404_v25 = vmul.f32 %v6177_v47, %v9381_v6  ;;  %v648_v13 = vmul.f32 %v6201_v37, %v9383_v56  ;;  %v9384_v23 = vld [vmem:[#allocation93_spill] sm:$0xff]  ;;  %v9385_v32 = vld [vmem:[#allocation68_spill] sm:$0xff] }
  0xcd   :  { %v1020_v5 = vsel %vm932_vm0, %v921_v62, 0.0  ;;  %v6510_v57 = vadd.f32 %v811_v46, %v769_v7  ;;  %v730_v31 = vmul.f32 %v6203_v28, %v9384_v23  ;;  %v362_v14 = vadd.f32 %v322_v43, %v280_v35  ;;  %v9388_v62 = vld [vmem:[#allocation69_spill] sm:$0xff]  ;;  %v9389_v6 = vld [vmem:[#allocation72_spill] sm:$0xff] }
  0xce   :  { %1021 = vadd.xlane.f32.xlu2 %v1020_v5  ;;  %v686_v29 = vadd.f32 %v646_v49, %v604_v33  ;;  %v524_v16 = vadd.f32 %v484_v54, %v442_v50  ;;  %v486_v34 = vmul.f32 %v6183_v3, %v9385_v32  ;;  %v812_v46 = vmul.f32 %v6212_v63, %v9387_v2  ;;  %v9390_v54 = vld [vmem:[#allocation74_spill] sm:$0xff]  ;;  %v9392_v32 = vld [vmem:[#allocation75_spill] sm:$0xff] }
  0xcf   :  { %9382 = vst [vmem:[#allocation34_spill] sm:$0xff] %v6510_v57  ;;  %v923_v18 = vmul.f32 %v9386_v12, %v6510_v57  ;;  %v568_v7 = vmul.f32 %v6191_v51, %v9388_v62  ;;  %v279_v56 = vmul.f32 %v6170_v8, %v9389_v6  ;;  %v444_v49 = vadd.f32 %v404_v25, %v362_v14  ;;  %v9391_v50 = vld [vmem:[#allocation70_spill] sm:$0xff]  ;;  %v9393_v57 = vld [vmem:[#allocation77_spill] sm:$0xff]  ;;  %v9396_v14 = vld [vmem:[#allocation76_spill] sm:$0xff] }
  0xd0   :  { %v768_v23 = vadd.f32 %v728_v9, %v686_v29  ;;  %v606_v5 = vadd.f32 %v566_v19, %v524_v16  ;;  %v321_v35 = vmul.f32 %v6175_v44, %v9390_v54  ;;  %v650_v43 = vmul.f32 %v6201_v37, %v9391_v50  ;;  %v9395_v29 = vld [vmem:[#allocation73_spill] sm:$0xff]  ;;  %v9397_v6 = vld [vmem:[#allocation78_spill] sm:$0xff] }
  0xd1   :  { %v1026_v33 = vsel %vm932_vm0, %v923_v18, 0.0  ;;  %v403_v2 = vmul.f32 %v6177_v47, %v9392_v32  ;;  %v485_v62 = vmul.f32 %v6183_v3, %v9393_v57  ;;  %v526_v19 = vadd.f32 %v486_v34, %v444_v49  ;;  %v9398_v50 = vld [vmem:[#allocation109_spill] sm:$0xff]  ;;  %v9399_v34 = vld [vmem:[#allocation79_spill] sm:$0xff] }
  0xd2   :  { %1027 = vadd.xlane.f32.xlu1 %v1026_v33  ;;  %v6535_v30 = vadd.f32 %v810_v1, %v768_v23  ;;  %v688_v9 = vadd.f32 %v648_v13, %v606_v5  ;;  %v361_v25 = vadd.f32 %v321_v35, %v279_v56  ;;  %v732_v16 = vmul.f32 %v6203_v28, %v9395_v29  ;;  %v9400_v5 = vld [vmem:[#allocation84_spill] sm:$0xff]  ;;  %v9401_v35 = vld [vmem:[#allocation110_spill] sm:$0xff] }
  0xd3   :  { %v814_v18 = vmul.f32 %v6212_v63, %v9396_v14  ;;  %v567_v54 = vmul.f32 %v6191_v51, %v9397_v6  ;;  %v281_v32 = vmul.f32 %v6170_v8, %v9398_v50  ;;  %v608_v23 = vadd.f32 %v568_v7, %v526_v19  ;;  %v9403_v7 = vld [vmem:[#allocation86_spill] sm:$0xff]  ;;  %v9404_v50 = vld [vmem:[#allocation92_spill] sm:$0xff] }
  0xd4   :  { %9394 = vst [vmem:[#allocation38_spill] sm:$0xff] %v6535_v30  ;;  %v922_v57 = vmul.f32 %v9386_v12, %v6535_v30  ;;  %v770_v1 = vadd.f32 %v730_v31, %v688_v9  ;;  %v443_v13 = vadd.f32 %v403_v2, %v361_v25  ;;  %v649_v56 = vmul.f32 %v6201_v37, %v9399_v34 }
  0xd5   :  { %v731_v49 = vmul.f32 %v6203_v28, %v9400_v5  ;;  %v323_v33 = vmul.f32 %v6175_v44, %v9401_v35  ;;  %v405_v29 = vmul.f32 %v6177_v47, %v6131_v24  ;;  %v690_v12 = vadd.f32 %v650_v43, %v608_v23  ;;  %v9408_v5 = vld [vmem:[#allocation94_spill] sm:$0xff] }
  0xd6   :  { %v1023_v14 = vsel %vm932_vm0, %v922_v57, 0.0  ;;  %v6556_v6 = vadd.f32 %v812_v46, %v770_v1  ;;  %v525_v31 = vadd.f32 %v485_v62, %v443_v13  ;;  %v813_v2 = vmul.f32 %v6212_v63, %v9403_v7  ;;  %v9405_v46 = vld [vmem:[#allocation90_spill] sm:$0xff]  ;;  %v9406_v1 = vld [vmem:[#allocation115_spill] sm:$0xff] }
  0xd7   :  { %1024 = vadd.xlane.f32.xlu0 %v1023_v14  ;;  %v363_v9 = vadd.f32 %v323_v33, %v281_v32  ;;  %v487_v19 = vmul.f32 %v6183_v3, %v6139_v42  ;;  %v569_v25 = vmul.f32 %v6191_v51, %v6145_v59  ;;  %v772_v34 = vadd.f32 %v732_v16, %v690_v12  ;;  %v9407_v13 = vld [vmem:[#allocation91_spill] sm:$0xff]  ;;  %v9410_v16 = vld [vmem:[#allocation116_spill] sm:$0xff] }
  0xd8   :  { %9402 = vst [vmem:[#allocation39_spill] sm:$0xff] %v6556_v6  ;;  %v924_v24 = vmul.f32 %v9404_v50, %v6556_v6  ;;  %v607_v57 = vadd.f32 %v567_v54, %v525_v31  ;;  %v283_v43 = vmul.f32 %v6170_v8, %v9405_v46  ;;  %v651_v23 = vmul.f32 %v6201_v37, %v9406_v1  ;;  %v9411_v31 = vld [vmem:[#allocation96_spill] sm:$0xff]  ;;  %v9414_v1 = vld [vmem:[#allocation102_spill] sm:$0xff] }
  0xd9   :  { %v445_v62 = vadd.f32 %v405_v29, %v363_v9  ;;  %v325_v32 = vmul.f32 %v6175_v44, %v9407_v13  ;;  %v407_v42 = vmul.f32 %v6177_v47, %v9408_v5  ;;  %v6575_v35 = vadd.f32 %v814_v18, %v772_v34  ;;  %v6583_v9 = vpop.xlane.xlu1 %940  ;;  %v9412_v34 = vld [vmem:[#allocation98_spill] sm:$0xff] }
  0xda   :  { %v1029_v59 = vsel %vm932_vm0, %v924_v24, 0.0  ;;  %v689_v33 = vadd.f32 %v649_v56, %v607_v57  ;;  %v733_v54 = vmul.f32 %v6203_v28, %v9410_v16  ;;  %v815_v29 = vmul.f32 %v6212_v63, %v6185_v45  ;;  %v9413_v57 = vld [vmem:[#allocation101_spill] sm:$0xff] }
  0xdb   :  { %9409 = vst [vmem:[#allocation12_spill] sm:$0xff] %v6575_v35  ;;  %1030 = vadd.xlane.f32.xlu2 %v1029_v59  ;;  %v527_v14 = vadd.f32 %v487_v19, %v445_v62  ;;  %v365_v12 = vadd.f32 %v325_v32, %v283_v43  ;;  %v489_v7 = vmul.f32 %v6183_v3, %v9411_v31  ;;  %v9415_v43 = vld [vmem:[#allocation103_spill] sm:$0xff] }
  0xdc   :  { %v926_v24 = vmul.f32 %v6008_v27, %v6575_v35  ;;  %v771_v18 = vadd.f32 %v731_v49, %v689_v33  ;;  %v571_v56 = vmul.f32 %v6191_v51, %v9412_v34  ;;  %v282_v46 = vmul.f32 %v6170_v8, %v9413_v57  ;;  %v9417_v59 = vld [vmem:[#allocation99_spill] sm:$0xff]  ;;  %v9418_v33 = vld [vmem:[#allocation100_spill] sm:$0xff]  ;;  %v6604_v34 = vpop.xlane.xlu0 %934  ;;  %v9421_v57 = vld [vmem:[#allocation106_spill] sm:$0xff] }
  0xdd   :  { %v609_v19 = vadd.f32 %v569_v25, %v527_v14  ;;  %v447_v62 = vadd.f32 %v407_v42, %v365_v12  ;;  %v324_v45 = vmul.f32 %v6175_v44, %v9414_v1  ;;  %v406_v13 = vmul.f32 %v6177_v47, %v9415_v43  ;;  %v9419_v14 = vld [vmem:[#allocation105_spill] sm:$0xff] }
  0xde   :  { %v1035_v32 = vsel %vm932_vm0, %v926_v24, 0.0  ;;  %v6596_v5 = vadd.f32 %v813_v2, %v771_v18  ;;  %v653_v49 = vmul.f32 %v6201_v37, %v9417_v59  ;;  %v735_v16 = vmul.f32 %v6203_v28, %v9418_v33  ;;  %v9420_v2 = vld [vmem:[#allocation104_spill] sm:$0xff] }
  0xdf   :  { %1036 = vadd.xlane.f32.xlu1 %v1035_v32  ;;  %v691_v31 = vadd.f32 %v651_v23, %v609_v19  ;;  %v529_v25 = vadd.f32 %v489_v7, %v447_v62  ;;  %v364_v42 = vadd.f32 %v324_v45, %v282_v46  ;;  %v488_v12 = vmul.f32 %v6183_v3, %v9419_v14  ;;  %v9422_v45 = vld [vmem:[#allocation108_spill] sm:$0xff] }
  0xe0   :  { %9416 = vst [vmem:[#allocation21_spill] sm:$0xff] %v6596_v5  ;;  %v925_v24 = vmul.f32 %v9404_v50, %v6596_v5  ;;  %v817_v18 = vmul.f32 %v6212_v63, %v9420_v2  ;;  %v570_v1 = vmul.f32 %v6191_v51, %v9421_v57  ;;  %v284_v43 = vmul.f32 %v6170_v8, %v6234_v41  ;;  %v9426_v57 = vld [vmem:[#allocation118_spill] sm:$0xff] }
  0xe1   :  { %v773_v23 = vadd.f32 %v733_v54, %v691_v31  ;;  %v611_v7 = vadd.f32 %v571_v56, %v529_v25  ;;  %v446_v46 = vadd.f32 %v406_v13, %v364_v42  ;;  %v326_v19 = vmul.f32 %v6175_v44, %v6236_v36  ;;  %v6625_v13 = vpop.xlane.xlu2 %946  ;;  %v9424_v36 = vld [vmem:[#allocation112_spill] sm:$0xff] }
  0xe2   :  { %v1032_v62 = vsel %vm932_vm0, %v925_v24, 0.0  ;;  %v652_v50 = vmul.f32 %v6201_v37, %v9422_v45  ;;  %v408_v32 = vmul.f32 %v6177_v47, %v6248_v55  ;;  %v490_v59 = vmul.f32 %v6183_v3, %v6254_v60 }
  0xe3   :  { %1033 = vadd.xlane.f32.xlu0 %v1032_v62  ;;  %v6623_v33 = vadd.f32 %v815_v29, %v773_v23  ;;  %v693_v41 = vadd.f32 %v653_v49, %v611_v7  ;;  %v528_v54 = vadd.f32 %v488_v12, %v446_v46  ;;  %v366_v56 = vadd.f32 %v326_v19, %v284_v43  ;;  %v6635_v49 = vpop.xlane.xlu1 %943  ;;  %v9425_v12 = vld [vmem:[#allocation113_spill] sm:$0xff]  ;;  %v9427_v43 = vld [vmem:[#allocation119_spill] sm:$0xff] }
  0xe4   :  { %v734_v31 = vmul.f32 %v6203_v28, %v9424_v36  ;;  %v572_v25 = vmul.f32 %v6191_v51, %v6260_v40  ;;  %v285_v55 = vmul.f32 %v6170_v8, %v6199_v4  ;;  %v816_v24 = vmul.f32 %v6212_v63, %v9425_v12  ;;  %v9429_v7 = vld [vmem:[#allocation121_spill] sm:$0xff]  ;;  %v9430_v19 = vld [vmem:[#allocation111_spill] sm:$0xff] }
  0xe5   :  { %9423 = vst [vmem:[#allocation23_spill] sm:$0xff] %v6623_v33  ;;  %v927_v60 = vmul.f32 %v6008_v27, %v6623_v33  ;;  %v775_v42 = vadd.f32 %v735_v16, %v693_v41  ;;  %v610_v29 = vadd.f32 %v570_v1, %v528_v54  ;;  %v448_v14 = vadd.f32 %v408_v32, %v366_v56 }
  0xe6   :  { %v654_v2 = vmul.f32 %v6201_v37, %v6273_v21  ;;  %v327_v40 = vmul.f32 %v6175_v44, %v9426_v57  ;;  %v409_v8 = vmul.f32 %v6177_v47, %v9427_v43  ;;  %v491_v46 = vmul.f32 %v6183_v3, %v9429_v7  ;;  %v6654_v47 = vpop.xlane.xlu0 %937 }
  0xe7   :  { %v1038_v4 = vsel %vm932_vm0, %v927_v60, 0.0  ;;  %v6646_v27 = vadd.f32 %v817_v18, %v775_v42  ;;  %v692_v16 = vadd.f32 %v652_v50, %v610_v29  ;;  %v530_v1 = vadd.f32 %v490_v59, %v448_v14  ;;  %v9431_v18 = vld [vmem:[#allocation122_spill] sm:$0xff] }
  0xe8   :  { %1039 = vadd.xlane.f32.xlu2 %v1038_v4  ;;  %v367_v23 = vadd.f32 %v327_v40, %v285_v55  ;;  %v736_v44 = vmul.f32 %v6203_v28, %v6275_v38  ;;  %v573_v50 = vmul.f32 %v6191_v51, %v9431_v18  ;;  %v818_v3 = vmul.f32 %v6212_v63, %v6285_v52  ;;  %v9433_v55 = vld [vmem:[#allocation124_spill] sm:$0xff] }
  0xe9   :  { %9428 = vst [vmem:[#allocation54_spill] sm:$0xff] %v6646_v27  ;;  %v929_v21 = vmul.f32 %v9430_v19, %v6646_v27  ;;  %v774_v62 = vadd.f32 %v734_v31, %v692_v16  ;;  %v612_v45 = vadd.f32 %v572_v25, %v530_v1  ;;  %v655_v36 = vmul.f32 %v6201_v37, %v6242_v61  ;;  %v6667_v25 = vpop.xlane.xlu2 %949 }
  0xea   :  { %v449_v32 = vadd.f32 %v409_v8, %v367_v23  ;;  %v737_v60 = vmul.f32 %v6203_v28, %v9433_v55  ;;  %v819_v37 = vmul.f32 %v6212_v63, %v6258_v20  ;;  %v9092_v7 = vlaneseq }
  0xeb   :  { %v1044_v59 = vsel %vm932_vm0, %v929_v21, 0.0  ;;  %v6659_v41 = vadd.f32 %v816_v24, %v774_v62  ;;  %v694_v54 = vadd.f32 %v654_v2, %v612_v45  ;;  %v6674_v52 = vpop.xlane.xlu1 %955 }
  0xec   :  { %1045 = vadd.xlane.f32.xlu1 %v1044_v59  ;;  %v531_v56 = vadd.f32 %v491_v46, %v449_v32 }
  0xed   :  { %9432 = vst [vmem:[#allocation56_spill] sm:$0xff] %v6659_v41  ;;  %v928_v38 = vmul.f32 %v9430_v19, %v6659_v41  ;;  %v776_v31 = vadd.f32 %v736_v44, %v694_v54  ;;  %v6709_v19 = vand.u32 127, %v9092_v7 }
  0xee   :  { %v613_v51 = vadd.f32 %v573_v50, %v531_v56  ;;  %v6681_v2 = vpop.xlane.xlu0 %952 }
  0xef   :  { %v1041_v42 = vsel %vm932_vm0, %v928_v38, 0.0  ;;  %v6672_v29 = vadd.f32 %v818_v3, %v776_v31  ;;  %9436 = vst [vmem:[#allocation29_spill] sm:$0xff] %v6709_v19  ;;  %v6718_v44 = vadd.s32 4294967288, %v6709_v19 }
  0xf0   :  { %1042 = vadd.xlane.f32.xlu0 %v1041_v42  ;;  %v695_v14 = vadd.f32 %v655_v36, %v613_v51 }
  0xf1   :  { %9434 = vst [vmem:[#allocation57_spill] sm:$0xff] %v6672_v29  ;;  %v930_v61 = vmul.f32 %v6281_v48, %v6672_v29  ;;  %v6687_v40 = vpop.xlane.xlu2 %958 }
  0xf2   :  { %v777_v12 = vadd.f32 %v737_v60, %v695_v14  ;;  %9437 = vst [vmem:[#allocation36_spill] sm:$0xff] %v6718_v44 }
  0xf3   :  { %v1047_v24 = vsel %vm932_vm0, %v930_v61, 0.0  ;;  %v6690_v63 = vpop.xlane.xlu1 %964 }
  0xf4   :  { %1048 = vadd.xlane.f32.xlu2 %v1047_v24  ;;  %v6683_v28 = vadd.f32 %v819_v37, %v777_v12  ;;  %v1063_v27 = vmul.f32 %v6690_v63, %v6690_v63 }
  0xf6   :  { %9435 = vst [vmem:[#allocation24_spill] sm:$0xff] %v6683_v28  ;;  %v931_v57 = vmul.f32 %v6281_v48, %v6683_v28  ;;  %v6692_v20 = vpop.xlane.xlu0 %961 }
  0xf8   :  { %v1050_v43 = vsel %vm932_vm0, %v931_v57, 0.0 }
  0xf9   :  { %1051 = vadd.xlane.f32.xlu0 %v1050_v43  ;;  %v6694_v8 = vpop.xlane.xlu2 %967 }
  0xfb   :  { %v6696_v4 = vpop.xlane.xlu1 %973 }
  0xfe   :  { %v6698_v16 = vpop.xlane.xlu0 %970 }
 0x101   :  { %v6700_v1 = vpop.xlane.xlu2 %976 }
 0x102   :  { %v1067_v58 = vmul.f32 %v6700_v1, %v6700_v1 }
 0x106   :  { %v6702_v23 = vpop.xlane.xlu1 %982 }
 0x107   :  { %v1069_v62 = vmul.f32 %v6702_v23, %v6702_v23 }
 0x109   :  { %v6706_v46 = vpop.xlane.xlu2 %985  ;;  %v1161_v50 = vperm.slane %v1069_v62, %v6709_v19 }
 0x10a   :  { %v6704_v48 = vpop.xlane.xlu0 %979  ;;  %v1070_v21 = vmul.f32 %v6706_v46, %v6706_v46 }
 0x10c   :  { %v1162_v18 = vperm.slane %v1070_v21, %v6718_v44 }
 0x10e   :  { %v1163_v36 = vsel %vm1138_vm1, %v1162_v18, %v1161_v50 }
 0x113   :  { %v6734_v55 = vpop.xlane.xlu2 %994 }
 0x114   :  { %v1073_v62 = vmul.f32 %v6734_v55, %v6734_v55 }
 0x117   :  { %v6715_v45 = vpop.xlane.xlu1 %991 }
 0x118   :  { %v1072_v32 = vmul.f32 %v6715_v45, %v6715_v45 }
 0x11a   :  { %v1165_v54 = vperm.slane %v1072_v32, %v6718_v44 }
 0x11b   :  { %v6724_v59 = vpop.xlane.xlu0 %988 }
 0x11c   :  { %v1071_v3 = vmul.f32 %v6724_v59, %v6724_v59 }
 0x11e   :  { %v1164_v56 = vperm.slane %v1071_v3, %v6709_v19  ;;  %v6740_v14 = vpop.xlane.xlu2 %1003 }
 0x11f   :  { %v1076_v32 = vmul.f32 %v6740_v14, %v6740_v14 }
 0x120   :  { %v1166_v38 = vsel %vm1138_vm1, %v1165_v54, %v1164_v56 }
 0x121   :  { %v1211_v31 = vsel %vm1197_vm3, %v1166_v38, %v1163_v36 }
 0x122   :  { %v1229_v51 = vsel %vm9181_vm2, %v1211_v31, 0.0  ;;  %v6736_v60 = vpop.xlane.xlu1 %1000  ;;  %v1167_v31 = vperm.slane %v1073_v62, %v6709_v19 }
 0x123   :  { %1230 = vadd.xlane.f32.xlu2 %v1229_v51  ;;  %v1075_v18 = vmul.f32 %v6736_v60, %v6736_v60  ;;  %v1171_v51 = vperm.slane %v1076_v32, %v6718_v44 }
 0x125   :  { %v1170_v7 = vperm.slane %v1075_v18, %v6709_v19 }
 0x127   :  { %v6738_v42 = vpop.xlane.xlu0 %997 }
 0x128   :  { %v1074_v50 = vmul.f32 %v6738_v42, %v6738_v42 }
 0x12a   :  { %v1168_v35 = vperm.slane %v1074_v50, %v6718_v44 }
 0x12b   :  { %v6742_v37 = vpop.xlane.xlu1 %1009 }
 0x12c   :  { %v1078_v3 = vmul.f32 %v6742_v37, %v6742_v37  ;;  %v1169_v17 = vsel %vm1138_vm1, %v1168_v35, %v1167_v31 }
 0x12e   :  { %v1174_v33 = vperm.slane %v1078_v3, %v6718_v44 }
 0x130   :  { %v6744_v61 = vpop.xlane.xlu0 %1006 }
 0x131   :  { %v1077_v56 = vmul.f32 %v6744_v61, %v6744_v61 }
 0x133   :  { %v1173_v6 = vperm.slane %v1077_v56, %v6709_v19  ;;  %v1172_v56 = vsel %vm1138_vm1, %v1171_v51, %v1170_v7 }
 0x134   :  { %v6746_v12 = vpop.xlane.xlu2 %1012  ;;  %v1212_v7 = vsel %vm1197_vm3, %v1172_v56, %v1169_v17 }
 0x135   :  { %v1079_v36 = vmul.f32 %v6746_v12, %v6746_v12  ;;  %v1175_v0 = vsel %vm1138_vm1, %v1174_v33, %v1173_v6 }
 0x137   :  { %v1176_v62 = vperm.slane %v1079_v36, %v6709_v19 }
 0x139   :  { %v6748_v24 = vpop.xlane.xlu1 %1018 }
 0x13a   :  { %v1081_v5 = vmul.f32 %v6748_v24, %v6748_v24 }
 0x13c   :  { %v6750_v57 = vpop.xlane.xlu0 %1015  ;;  %v1179_v15 = vperm.slane %v1081_v5, %v6709_v19 }
 0x13d   :  { %v1080_v38 = vmul.f32 %v6750_v57, %v6750_v57 }
 0x13f   :  { %v1177_v32 = vperm.slane %v1080_v38, %v6718_v44 }
 0x141   :  { %v6752_v43 = vpop.xlane.xlu2 %1021  ;;  %v1178_v10 = vsel %vm1138_vm1, %v1177_v32, %v1176_v62 }
 0x142   :  { %v1082_v30 = vmul.f32 %v6752_v43, %v6752_v43 }
 0x144   :  { %v1180_v36 = vperm.slane %v1082_v30, %v6718_v44  ;;  %v1213_v30 = vsel %vm1199_vm4, %v1175_v0, %v1212_v7  ;;  %v1054_v7 = vmul.f32 %v6654_v47, %v6654_v47 }
 0x145   :  { %v6754_v21 = vpop.xlane.xlu1 %1027  ;;  %v1214_v51 = vsel %vm1201_vm5, %v1178_v10, %v1213_v30  ;;  %v1057_v30 = vmul.f32 %v6625_v13, %v6625_v13 }
 0x146   :  { %9438 = vst [vmem:[#allocation30_spill] sm:$0xff] %v6754_v21  ;;  %v1084_v18 = vmul.f32 %v6754_v21, %v6754_v21  ;;  %v1181_v33 = vsel %vm1138_vm1, %v1180_v36, %v1179_v15  ;;  %v1056_v36 = vmul.f32 %v6635_v49, %v6635_v49 }
 0x148   :  { %v1183_v26 = vperm.slane %v1084_v18, %v6718_v44 }
 0x14a   :  { %v6764_v54 = vpop.xlane.xlu0 %1024 }
 0x14b   :  { %9439 = vst [vmem:[#allocation60_spill] sm:$0xff] %v6764_v54  ;;  %v1083_v50 = vmul.f32 %v6764_v54, %v6764_v54 }
 0x14d   :  { %v1182_v28 = vperm.slane %v1083_v50, %v6709_v19  ;;  %v1215_v50 = vsel %vm1203_vm6, %v1181_v33, %v1214_v51  ;;  %v1141_v51 = vperm.slane %v1056_v36, %v6718_v44 }
 0x14e   :  { %v6784_v39 = vpop.xlane.xlu2 %1030 }
 0x14f   :  { %9440 = vst [vmem:[#allocation35_spill] sm:$0xff] %v6784_v39  ;;  %v1085_v3 = vmul.f32 %v6784_v39, %v6784_v39  ;;  %v1184_v62 = vsel %vm1138_vm1, %v1183_v26, %v1182_v28  ;;  %v1152_v39 = vperm.slane %v1063_v27, %v6709_v19 }
 0x150   :  { %v1216_v15 = vsel %vm1205_vm7, %v1184_v62, %v1215_v50  ;;  %v1137_v62 = vperm.slane %v1054_v7, %v6718_v44  ;;  %v1059_v50 = vmul.f32 %v6681_v2, %v6681_v2 }
 0x151   :  { %v1185_v35 = vperm.slane %v1085_v3, %v6709_v19  ;;  %v1055_v3 = vmul.f32 %v6583_v9, %v6583_v9 }
 0x152   :  { %v6799_v38 = vpop.xlane.xlu1 %1036 }
 0x153   :  { %9441 = vst [vmem:[#allocation37_spill] sm:$0xff] %v6799_v38  ;;  %v1087_v5 = vmul.f32 %v6799_v38, %v6799_v38  ;;  %v1140_v33 = vperm.slane %v1055_v3, %v6709_v19 }
 0x155   :  { %v1188_v18 = vperm.slane %v1087_v5, %v6709_v19  ;;  %v1053_v5 = vmul.f32 %v6604_v34, %v6604_v34 }
 0x156   :  { %v6804_v53 = vpop.xlane.xlu0 %1033 }
 0x157   :  { %9442 = vst [vmem:[#allocation61_spill] sm:$0xff] %v6804_v53  ;;  %v1086_v6 = vmul.f32 %v6804_v53, %v6804_v53 }
 0x159   :  { %v1186_v31 = vperm.slane %v1086_v6, %v6718_v44 }
 0x15b   :  { %v6817_v17 = vpop.xlane.xlu2 %1039  ;;  %v1187_v32 = vsel %vm1138_vm1, %v1186_v31, %v1185_v35  ;;  %v1058_v31 = vmul.f32 %v6667_v25, %v6667_v25 }
 0x15c   :  { %9443 = vst [vmem:[#allocation40_spill] sm:$0xff] %v6817_v17  ;;  %v1088_v0 = vmul.f32 %v6817_v17, %v6817_v17  ;;  %v1217_v26 = vsel %vm1207_vm8, %v1187_v32, %v1216_v15  ;;  %v1061_v32 = vmul.f32 %v6687_v40, %v6687_v40  ;;  %v1062_v15 = vmul.f32 %v6692_v20, %v6692_v20 }
 0x15d   :  { %v1144_v3 = vperm.slane %v1058_v31, %v6718_v44  ;;  %v1064_v31 = vmul.f32 %v6694_v8, %v6694_v8 }
 0x15e   :  { %v1189_v10 = vperm.slane %v1088_v0, %v6718_v44  ;;  %v1149_v29 = vperm.slane %v1061_v32, %v6709_v19  ;;  %v1150_v41 = vperm.slane %v1062_v15, %v6718_v44 }
 0x15f   :  { %v6851_v0 = vpop.xlane.xlu1 %1045  ;;  %v1153_v53 = vperm.slane %v1064_v31, %v6718_v44 }
 0x160   :  { %v1190_v28 = vsel %vm1138_vm1, %v1189_v10, %v1188_v18  ;;  %v1060_v18 = vmul.f32 %v6674_v52, %v6674_v52 }
 0x161   :  { %v1218_v56 = vsel %vm1209_vm9, %v1190_v28, %v1217_v26  ;;  %v1143_v26 = vperm.slane %v1057_v30, %v6709_v19  ;;  %v1135_v28 = vperm.slane %v1053_v5, %v6709_v19  ;;  %v1146_v5 = vperm.slane %v1059_v50, %v6709_v19 }
 0x162   :  { %v1232_v35 = vsel %vm9180_vm10, %v1218_v56, 0.0  ;;  %v1090_v56 = vmul.f32 %v6851_v0, %v6851_v0  ;;  %v1147_v30 = vperm.slane %v1060_v18, %v6718_v44 }
 0x163   :  { %v6836_v6 = vpop.xlane.xlu0 %1042  ;;  %1233 = vadd.xlane.f32.xlu0 %v1232_v35  ;;  %v1142_v35 = vsel %vm1138_vm1, %v1141_v51, %v1140_v33  ;;  %v1139_v11 = vsel %vm1138_vm1, %v1137_v62, %v1135_v28  ;;  %v1066_v33 = vmul.f32 %v6696_v4, %v6696_v4  ;;  %v1065_v51 = vmul.f32 %v6698_v16, %v6698_v16 }
 0x164   :  { %v1089_v36 = vmul.f32 %v6836_v6, %v6836_v6  ;;  %v1068_v62 = vmul.f32 %v6704_v48, %v6704_v48  ;;  %v1192_v18 = vperm.slane %v1090_v56, %v6718_v44  ;;  %v1145_v22 = vsel %vm1138_vm1, %v1144_v3, %v1143_v26 }
 0x165   :  { %v1198_v17 = vsel %vm1197_vm3, %v1142_v35, %v1139_v11  ;;  %v1148_v38 = vsel %vm1138_vm1, %v1147_v30, %v1146_v5  ;;  %v1151_v56 = vsel %vm1138_vm1, %v1150_v41, %v1149_v29  ;;  %v1155_v21 = vperm.slane %v1065_v51, %v6709_v19 }
 0x166   :  { %v1191_v50 = vperm.slane %v1089_v36, %v6709_v19  ;;  %v1158_v36 = vperm.slane %v1067_v58, %v6709_v19  ;;  %v1159_v26 = vperm.slane %v1068_v62, %v6718_v44  ;;  %v1200_v35 = vsel %vm1199_vm4, %v1145_v22, %v1198_v17 }
 0x167   :  { %v6857_v10 = vpop.xlane.xlu2 %1048  ;;  %v1202_v30 = vsel %vm1201_vm5, %v1148_v38, %v1200_v35  ;;  %v1154_v58 = vsel %vm1138_vm1, %v1153_v53, %v1152_v39 }
 0x168   :  { %v1091_v7 = vmul.f32 %v6857_v10, %v6857_v10  ;;  %v1193_v11 = vsel %vm1138_vm1, %v1192_v18, %v1191_v50  ;;  %v1204_v29 = vsel %vm1203_vm6, %v1151_v56, %v1202_v30  ;;  %v1160_v31 = vsel %vm1138_vm1, %v1159_v26, %v1158_v36 }
 0x16a   :  { %v1194_v15 = vperm.slane %v1091_v7, %v6709_v19  ;;  %v1156_v7 = vperm.slane %v1066_v33, %v6718_v44  ;;  %v1206_v33 = vsel %vm1205_vm7, %v1154_v58, %v1204_v29  ;;  %v1423_v58 = vperm.slane %v6706_v46, %v6718_v44 }
 0x16b   :  { %v1422_v29 = vperm.slane %v6702_v23, %v6709_v19 }
 0x16c   :  { %v6886_v32 = vpop.xlane.xlu0 %1051  ;;  %v1157_v5 = vsel %vm1138_vm1, %v1156_v7, %v1155_v21 }
 0x16d   :  { %v1092_v28 = vmul.f32 %v6886_v32, %v6886_v32 }
 0x16f   :  { %v1195_v54 = vperm.slane %v1092_v28, %v6718_v44 }
 0x171   :  { %v1196_v3 = vsel %vm1138_vm1, %v1195_v54, %v1194_v15  ;;  %v1208_v54 = vsel %vm1207_vm8, %v1157_v5, %v1206_v33  ;;  %v1426_v5 = vperm.slane %v6715_v45, %v6718_v44  ;;  %v1425_v33 = vperm.slane %v6724_v59, %v6709_v19 }
 0x172   :  { %v1219_v27 = vsel %vm1197_vm3, %v1196_v3, %v1193_v11  ;;  %v1210_v22 = vsel %vm1209_vm9, %v1160_v31, %v1208_v54  ;;  %v9444_v11 = vlaneseq }
 0x173   :  { %v1235_v41 = vsel %vm9181_vm2, %v1219_v27, 0.0  ;;  %v1225_v17 = vsel %vm9180_vm10, %v1210_v22, 0.0  ;;  %v1427_v46 = vsel %vm1138_vm1, %v1426_v5, %v1425_v33 }
 0x174   :  { %1236 = vadd.xlane.f32.xlu1 %v1235_v41  ;;  %v6919_v3 = vshrl.u32 %v9444_v11, 7 }
 0x176   :  { %9445 = vst [vmem:[#allocation41_spill] sm:$0xff] %v6919_v3  ;;  %5232 = vset.pattern.permute.xlu0 %v6919_v3  ;;  %5230 = vset.pattern.permute.xlu2 %v6919_v3  ;;  %v6924_v27 = vadd.s32 8, %v6919_v3 }
 0x178   :  { %9446 = vst [vmem:[#allocation66_spill] sm:$0xff] %v6924_v27  ;;  %5231 = vset.pattern.permute.xlu1 %v6924_v27 }
 0x17c   :  { %1226 = vadd.xlane.f32.xlu1 %v1225_v17 }
 0x196   :  { %v1231_v38 = vpop.xlane.xlu2 %1230 }
 0x197   :  { %5301 = vrsqrt.f32 %v1231_v38  ;;  %vm1257_vm11 = vcmp.eq.f32.partialorder %v1231_v38, inf  ;;  %v1260_v15 = vand.u32 2147483648, %v1231_v38  ;;  %vm1259_vm12 = vcmp.eq.f32.partialorder %v1231_v38, 0.0 }
 0x19d   :  { %v5302_v51 = vpop.eup %5301 }
 0x19e   :  { %v1251_v53 = vmul.f32 %v5302_v51, %v1231_v38 }
 0x1a0   :  { %v1252_v39 = vmul.f32 %v5302_v51, %v1251_v53 }
 0x1a2   :  { %v1253_v62 = vmul.f32 0.5, %v1252_v39 }
 0x1a4   :  { %v1254_v18 = vsub.f32 1.5, %v1253_v62 }
 0x1a6   :  { %v1255_v50 = vmul.f32 %v5302_v51, %v1254_v18  ;;  %v1424_v51 = vsel %vm1138_vm1, %v1423_v58, %v1422_v29 }
 0x1a7   :  { %v1465_v45 = vsel %vm1197_vm3, %v1427_v46, %v1424_v51 }
 0x1a8   :  { %v1256_v21 = vmul.f32 %v1255_v50, %v1231_v38 }
 0x1aa   :  { %v1258_v28 = vsel %vm1257_vm11, %v1231_v38, %v1256_v21 }
 0x1ab   :  { %v1261_v56 = vsel %vm1259_vm12, %v1260_v15, %v1258_v28 }
 0x1ac   :  { %v1287_v36 = vmul.f32 %v1261_v56, %v1261_v56 }
 0x1ae   :  { %v1291_v7 = vadd.f32 1.0, %v1287_v36 }
 0x1b0   :  { %v1295_v26 = vadd.f32 1e-08, %v1291_v7 }
 0x1b2   :  { %5303 = vrcp.f32 %v1295_v26  ;;  %v1324_v31 = vand.u32 2147483648, %v1295_v26  ;;  %v1322_v22 = vand.u32 2147483647, %v1295_v26  ;;  %vm1318_vm14 = vweird.f32 %v1295_v26 }
 0x1b4   :  { %v1325_v38 = vor.u32 1.1754944e-38, %v1324_v31  ;;  %vm1323_vm11 = vcmp.eq.f32.partialorder %v1322_v22, 8.507059e+37 }
 0x1b8   :  { %v5304_v35 = vpop.eup %5303 }
 0x1b9   :  { %v1314_v30 = vmul.f32 %v5304_v35, %v1295_v26  ;;  %vm1319_vm13 = vweird.f32 %v5304_v35 }
 0x1ba   :  { %vm1320_vm15 = vmor %vm1318_vm14, %vm1319_vm13 }
 0x1bb   :  { %v1315_v41 = vsub.f32 1.0, %v1314_v30 }
 0x1bd   :  { %v1316_v54 = vmul.f32 %v5304_v35, %v1315_v41 }
 0x1bf   :  { %v1317_v17 = vadd.f32 %v5304_v35, %v1316_v54 }
 0x1c1   :  { %v1321_v53 = vsel %vm1320_vm15, %v5304_v35, %v1317_v17 }
 0x1c2   :  { %v1326_v23 = vsel %vm1323_vm11, %v1325_v38, %v1321_v53 }
 0x1c3   :  { %v1327_v39 = vmul.f32 %v1326_v23, %v1261_v56 }
 0x1c5   :  { %v1479_v62 = vmul.f32 %v1465_v45, %v1327_v39 }
 0x1c7   :  { %v1588_v18 = vperm.slane %v1479_v62, 0  ;;  %v1601_v59 = vperm.slane %v1479_v62, 1 }
 0x1c9   :  { %1593 = vperm.xlu2 %5230, %v1588_v18   ;;  %1606 = vperm.xlu0 %5232, %v1601_v59  }
 0x1ca   :  { %1599 = vperm.xlu1 %5231, %v1588_v18  }
 0x1d1   :  { %5233 = vset.pattern.permute.xlu2 %v6924_v27 }
 0x1d6   :  { %v6940_v36 = vpop.xlane.xlu0 %1233 }
 0x1d9   :  { %1612 = vperm.xlu2 %5233, %v1601_v59  }
 0x1e1   :  { %5234 = vset.pattern.permute.xlu2 %v6919_v3 }
 0x1e7   :  { %v1237_v50 = vpop.xlane.xlu1 %1236 }
 0x1e8   :  { %5305 = vrsqrt.f32 %v1237_v50  ;;  %vm1281_vm12 = vcmp.eq.f32.partialorder %v1237_v50, inf  ;;  %v1284_v29 = vand.u32 2147483648, %v1237_v50  ;;  %vm1283_vm13 = vcmp.eq.f32.partialorder %v1237_v50, 0.0 }
 0x1ee   :  { %v5306_v21 = vpop.eup %5305 }
 0x1ef   :  { %v1275_v15 = vmul.f32 %v5306_v21, %v1237_v50  ;;  %v1227_v28 = vpop.xlane.xlu1 %1226 }
 0x1f0   :  { %5307 = vrsqrt.f32 %v1227_v28  ;;  %vm1245_vm14 = vcmp.eq.f32.partialorder %v1227_v28, inf  ;;  %v1248_v39 = vand.u32 2147483648, %v1227_v28  ;;  %vm1247_vm15 = vcmp.eq.f32.partialorder %v1227_v28, 0.0 }
 0x1f1   :  { %v1276_v56 = vmul.f32 %v5306_v21, %v1275_v15  ;;  %5309 = vrsqrt.f32 %v6940_v36 }
 0x1f3   :  { %v1277_v7 = vmul.f32 0.5, %v1276_v56 }
 0x1f5   :  { %v1278_v26 = vsub.f32 1.5, %v1277_v7 }
 0x1f6   :  { %v5308_v11 = vpop.eup %5307 }
 0x1f7   :  { %v1239_v35 = vmul.f32 %v5308_v11, %v1227_v28  ;;  %v1279_v30 = vmul.f32 %v5306_v21, %v1278_v26  ;;  %v5310_v33 = vpop.eup %5309 }
 0x1f8   :  { %v1263_v38 = vmul.f32 %v5310_v33, %v6940_v36 }
 0x1f9   :  { %v1240_v41 = vmul.f32 %v5308_v11, %v1239_v35  ;;  %v1280_v58 = vmul.f32 %v1279_v30, %v1237_v50  ;;  %v1404_v35 = vperm.slane %v6625_v13, %v6709_v19  ;;  %v1455_v30 = vperm.slane %v6857_v10, %v6709_v19 }
 0x1fa   :  { %v1264_v45 = vmul.f32 %v5310_v33, %v1263_v38  ;;  %v1399_v13 = vperm.slane %v6654_v47, %v6718_v44  ;;  %v1453_v10 = vperm.slane %v6851_v0, %v6718_v44 }
 0x1fb   :  { %v1241_v5 = vmul.f32 0.5, %v1240_v41  ;;  %v1282_v31 = vsel %vm1281_vm12, %v1237_v50, %v1280_v58  ;;  %v1456_v58 = vperm.slane %v6886_v32, %v6718_v44 }
 0x1fc   :  { %v1285_v54 = vsel %vm1283_vm13, %v1284_v29, %v1282_v31  ;;  %v1265_v50 = vmul.f32 0.5, %v1264_v45  ;;  %v1401_v31 = vperm.slane %v6583_v9, %v6709_v19 }
 0x1fd   :  { %v1242_v22 = vsub.f32 1.5, %v1241_v5  ;;  %v1289_v17 = vmul.f32 %v1285_v54, %v1285_v54 }
 0x1fe   :  { %v1266_v26 = vsub.f32 1.5, %v1265_v50  ;;  %v1407_v50 = vperm.slane %v6681_v2, %v6709_v19 }
 0x1ff   :  { %v1243_v51 = vmul.f32 %v5308_v11, %v1242_v22  ;;  %v1293_v46 = vadd.f32 1.0, %v1289_v17  ;;  %v1402_v22 = vperm.slane %v6635_v49, %v6718_v44  ;;  %v1452_v17 = vperm.slane %v6836_v6, %v6709_v19 }
 0x201   :  { %v1244_v53 = vmul.f32 %v1243_v51, %v1227_v28  ;;  %v1297_v23 = vadd.f32 1e-08, %v1293_v46  ;;  %v1398_v51 = vperm.slane %v6604_v34, %v6709_v19  ;;  %v1457_v46 = vsel %vm1138_vm1, %v1456_v58, %v1455_v30 }
 0x202   :  { %v1403_v0 = vsel %vm1138_vm1, %v1402_v22, %v1401_v31  ;;  %v1410_v34 = vperm.slane %v6687_v40, %v6709_v19 }
 0x203   :  { %v1246_v62 = vsel %vm1245_vm14, %v1227_v28, %v1244_v53  ;;  %5311 = vrcp.f32 %v1297_v23  ;;  %v1405_v28 = vperm.slane %v6667_v25, %v6718_v44  ;;  %v1354_v41 = vand.u32 2147483648, %v1297_v23 }
 0x204   :  { %v6944_v18 = vsel %vm1247_vm15, %v1248_v39, %v1246_v62  ;;  %v1352_v5 = vand.u32 2147483647, %v1297_v23  ;;  %v1267_v25 = vmul.f32 %v5310_v33, %v1266_v26  ;;  %vm1348_vm12 = vweird.f32 %v1297_v23 }
 0x205   :  { %v1286_v59 = vmul.f32 %v6944_v18, %v6944_v18  ;;  %v1406_v9 = vsel %vm1138_vm1, %v1405_v28, %v1404_v35  ;;  %v1355_v49 = vor.u32 1.1754944e-38, %v1354_v41  ;;  %v1400_v6 = vsel %vm1138_vm1, %v1399_v13, %v1398_v51 }
 0x206   :  { %vm1353_vm14 = vcmp.eq.f32.partialorder %v1352_v5, 8.507059e+37  ;;  %v1268_v53 = vmul.f32 %v1267_v25, %v6940_v36  ;;  %v1454_v39 = vsel %vm1138_vm1, %v1453_v10, %v1452_v17  ;;  %vm1269_vm15 = vcmp.eq.f32.partialorder %v6940_v36, inf }
 0x207   :  { %v1290_v21 = vadd.f32 1.0, %v1286_v59  ;;  %v1408_v59 = vperm.slane %v6674_v52, %v6718_v44  ;;  %v1458_v28 = vsel %vm1197_vm3, %v1403_v0, %v1400_v6  ;;  %v1414_v41 = vperm.slane %v6694_v8, %v6718_v44 }
 0x208   :  { %v1270_v26 = vsel %vm1269_vm15, %v6940_v36, %v1268_v53  ;;  %v1417_v8 = vperm.slane %v6696_v4, %v6718_v44  ;;  %v1459_v13 = vsel %vm1199_vm4, %v1406_v9, %v1458_v28  ;;  %v1420_v25 = vperm.slane %v6704_v48, %v6718_v44  ;;  %v9451_v28 = vld [vmem:[#allocation35_spill] sm:$0xff] }
 0x209   :  { %v5312_v15 = vpop.eup %5311  ;;  %v6948_v56 = vadd.f32 1e-08, %v1290_v21  ;;  %v1411_v21 = vperm.slane %v6692_v20, %v6718_v44  ;;  %v1409_v30 = vsel %vm1138_vm1, %v1408_v59, %v1407_v50  ;;  %v1431_v59 = vperm.slane %v6736_v60, %v6709_v19 }
 0x20a   :  { %v1344_v7 = vmul.f32 %v5312_v15, %v1297_v23  ;;  %vm1349_vm11 = vweird.f32 %v5312_v15  ;;  %v1460_v10 = vsel %vm1201_vm5, %v1409_v30, %v1459_v13  ;;  %v1429_v50 = vperm.slane %v6738_v42, %v6718_v44 }
 0x20b   :  { %5313 = vrcp.f32 %v6948_v56  ;;  %vm1350_vm13 = vmor %vm1348_vm12, %vm1349_vm11  ;;  %vm1303_vm12 = vweird.f32 %v6948_v56  ;;  %v1309_v52 = vand.u32 2147483648, %v6948_v56  ;;  %v1307_v2 = vand.u32 2147483647, %v6948_v56 }
 0x20c   :  { %v1345_v11 = vsub.f32 1.0, %v1344_v7  ;;  %v1412_v31 = vsel %vm1138_vm1, %v1411_v21, %v1410_v34  ;;  %v1435_v21 = vperm.slane %v6742_v37, %v6718_v44  ;;  %v1438_v60 = vperm.slane %v6750_v57, %v6718_v44 }
 0x20d   :  { %v1310_v22 = vor.u32 1.1754944e-38, %v1309_v52  ;;  %vm1308_vm15 = vcmp.eq.f32.partialorder %v1307_v2, 8.507059e+37  ;;  %v1446_v30 = vperm.slane %v9451_v28, %v6709_v19 }
 0x20e   :  { %v1346_v29 = vmul.f32 %v5312_v15, %v1345_v11 }
 0x210   :  { %v1347_v32 = vadd.f32 %v5312_v15, %v1346_v29  ;;  %v1413_v29 = vperm.slane %v6690_v63, %v6709_v19  ;;  %v1419_v63 = vperm.slane %v6700_v1, %v6709_v19 }
 0x211   :  { %v5314_v38 = vpop.eup %5313 }
 0x212   :  { %v1299_v47 = vmul.f32 %v5314_v38, %v6948_v56  ;;  %v1351_v33 = vsel %vm1350_vm13, %v5312_v15, %v1347_v32  ;;  %v1473_v15 = vsel %vm1197_vm3, %v1457_v46, %v1454_v39  ;;  %vm1304_vm11 = vweird.f32 %v5314_v38 }
 0x213   :  { %v1356_v23 = vsel %vm1353_vm14, %v1355_v49, %v1351_v33  ;;  %vm1271_vm13 = vcmp.eq.f32.partialorder %v6940_v36, 0.0  ;;  %vm6998_vm14 = vmor %vm1303_vm12, %vm1304_vm11  ;;  %v1415_v32 = vsel %vm1138_vm1, %v1414_v41, %v1413_v29  ;;  %v1421_v51 = vsel %vm1138_vm1, %v1420_v25, %v1419_v63  ;;  %v9452_v41 = vld [vmem:[#allocation61_spill] sm:$0xff]  ;;  %v9454_v63 = vld [vmem:[#allocation40_spill] sm:$0xff] }
 0x214   :  { %v1300_v45 = vsub.f32 1.0, %v1299_v47  ;;  %v1357_v62 = vmul.f32 %v1356_v23, %v1285_v54  ;;  %v1272_v54 = vand.u32 2147483648, %v6940_v36  ;;  %v1416_v36 = vperm.slane %v6698_v16, %v6709_v19 }
 0x215   :  { %v1461_v16 = vsel %vm1203_vm6, %v1412_v31, %v1460_v10  ;;  %v1447_v58 = vperm.slane %v9452_v41, %v6718_v44  ;;  %v1450_v25 = vperm.slane %v9454_v63, %v6718_v44 }
 0x216   :  { %v1301_v7 = vmul.f32 %v5314_v38, %v1300_v45  ;;  %v1481_v40 = vmul.f32 %v1473_v15, %v1357_v62  ;;  %v7004_v5 = vsel %vm1271_vm13, %v1272_v54, %v1270_v26  ;;  %v1462_v9 = vsel %vm1205_vm7, %v1415_v32, %v1461_v16  ;;  %v9449_v54 = vld [vmem:[#allocation30_spill] sm:$0xff] }
 0x217   :  { %v1288_v17 = vmul.f32 %v7004_v5, %v7004_v5  ;;  %v1428_v45 = vperm.slane %v6734_v55, %v6709_v19  ;;  %v1432_v62 = vperm.slane %v6740_v14, %v6718_v44  ;;  %v1434_v15 = vperm.slane %v6744_v61, %v6709_v19 }
 0x218   :  { %v1302_v11 = vadd.f32 %v5314_v38, %v1301_v7  ;;  %v1731_v35 = vperm.slane %v1481_v40, 1  ;;  %v1718_v20 = vperm.slane %v1481_v40, 0  ;;  %v1437_v55 = vperm.slane %v6746_v12, %v6709_v19 }
 0x219   :  { %v1292_v48 = vadd.f32 1.0, %v1288_v17  ;;  %v1433_v42 = vsel %vm1138_vm1, %v1432_v62, %v1431_v59  ;;  %v1430_v14 = vsel %vm1138_vm1, %v1429_v50, %v1428_v45  ;;  %v1436_v37 = vsel %vm1138_vm1, %v1435_v21, %v1434_v15 }
 0x21a   :  { %v1306_v56 = vsel %vm6998_vm14, %v5314_v38, %v1302_v11  ;;  %1736 = vperm.xlu0 %5232, %v1731_v35   ;;  %1729 = vperm.xlu1 %5231, %v1718_v20   ;;  %v1418_v38 = vsel %vm1138_vm1, %v1417_v8, %v1416_v36  ;;  %v1440_v61 = vperm.slane %v6748_v24, %v6709_v19  ;;  %v9450_v11 = vld [vmem:[#allocation60_spill] sm:$0xff] }
 0x21b   :  { %1723 = vperm.xlu2 %5234, %v1718_v20   ;;  %v1311_v4 = vsel %vm1308_vm15, %v1310_v22, %v1306_v56  ;;  %v1463_v49 = vsel %vm1207_vm8, %v1418_v38, %v1462_v9  ;;  %v1296_v33 = vadd.f32 1e-08, %v1292_v48  ;;  %v1439_v26 = vsel %vm1138_vm1, %v1438_v60, %v1437_v55  ;;  %v9453_v22 = vld [vmem:[#allocation37_spill] sm:$0xff] }
 0x21c   :  { %v1312_v1 = vmul.f32 %v1311_v4, %v6944_v18  ;;  %v1464_v46 = vsel %vm1209_vm9, %v1421_v51, %v1463_v49  ;;  %v1441_v12 = vperm.slane %v6752_v43, %v6718_v44  ;;  %v1444_v57 = vperm.slane %v9449_v54, %v6718_v44 }
 0x21d   :  { %5315 = vrcp.f32 %v1296_v33  ;;  %v1339_v52 = vand.u32 2147483648, %v1296_v33  ;;  %v1443_v2 = vperm.slane %v9450_v11, %v6709_v19  ;;  %vm1333_vm12 = vweird.f32 %v1296_v33 }
 0x21e   :  { %v7032_v47 = vmul.f32 %v1464_v46, %v1312_v1  ;;  %v1466_v24 = vsel %vm1197_vm3, %v1433_v42, %v1430_v14  ;;  %v1442_v31 = vsel %vm1138_vm1, %v1441_v12, %v1440_v61  ;;  %v1449_v13 = vperm.slane %v9453_v22, %v6709_v19  ;;  %v9455_v12 = vld [vmem:[#allocation22_spill] sm:$0xff] }
 0x21f   :  { %v1467_v43 = vsel %vm1199_vm4, %v1436_v37, %v1466_v24  ;;  %v1340_v8 = vor.u32 1.1754944e-38, %v1339_v52  ;;  %v1445_v36 = vsel %vm1138_vm1, %v1444_v57, %v1443_v2  ;;  %v1448_v10 = vsel %vm1138_vm1, %v1447_v58, %v1446_v30  ;;  %v9456_v52 = vld [vmem:[#allocation126_spill] sm:$0xff]  ;;  %v9458_v24 = vld [vmem:[#allocation127_spill] sm:$0xff]  ;;  %v9460_v58 = vld [vmem:[#allocation32_spill] sm:$0xff] }
 0x220   :  { %v1497_v0 = vperm.slane %v7032_v47, 1  ;;  %v1484_v18 = vperm.slane %v7032_v47, 0  ;;  %v1510_v34 = vperm.slane %v7032_v47, 2  ;;  %v1536_v39 = vperm.slane %v7032_v47, 4  ;;  %v9457_v2 = vld [vmem:[#allocation14_spill] sm:$0xff]  ;;  %v9459_v30 = vld [vmem:[#allocation15_spill] sm:$0xff] }
 0x221   :  { %v1523_v20 = vperm.slane %v7032_v47, 3  ;;  %v1468_v56 = vsel %vm1201_vm5, %v1439_v26, %v1467_v43  ;;  %v1451_v38 = vsel %vm1138_vm1, %v1450_v25, %v1449_v13  ;;  %v1562_v1 = vperm.slane %v7032_v47, 6  ;;  %v9464_v13 = vld [vmem:[#allocation87_spill] sm:$0xff]  ;;  %v9465_v25 = vld [vmem:[#allocation17_spill] sm:$0xff] }
 0x222   :  { %5237 = vset.pattern.permute.xlu0 %v6924_v27  ;;  %5238 = vset.pattern.permute.xlu1 %v6919_v3  ;;  %v1469_v4 = vsel %vm1203_vm6, %v1442_v31, %v1468_v56  ;;  %v1549_v49 = vperm.slane %v7032_v47, 5  ;;  %v9462_v31 = vld [vmem:[#allocation117_spill] sm:$0xff]  ;;  %vm2009_vm15 = vcmask 517120  }
 0x223   :  { %5235 = vset.pattern.permute.xlu2 %v6924_v27  ;;  %v5316_v6 = vpop.eup %5315  ;;  %v1470_v32 = vsel %vm1205_vm7, %v1445_v36, %v1469_v4  ;;  %v9463_v36 = vld [vmem:[#allocation20_spill] sm:$0xff] }
 0x224   :  { %v1329_v53 = vmul.f32 %v5316_v6, %v1296_v33  ;;  %vm1334_vm11 = vweird.f32 %v5316_v6  ;;  %v1471_v16 = vsel %vm1207_vm8, %v1448_v10, %v1470_v32  ;;  %v9466_v4 = vld [vmem:[#allocation52_spill] sm:$0xff] }
 0x225   :  { %vm1335_vm13 = vmor %vm1333_vm12, %vm1334_vm11  ;;  %v1472_v9 = vsel %vm1209_vm9, %v1451_v38, %v1471_v16  ;;  %v9467_v16 = vld [vmem:[#allocation120_spill] sm:$0xff] }
 0x226   :  { %v1330_v23 = vsub.f32 1.0, %v1329_v53 }
 0x228   :  { %v1331_v7 = vmul.f32 %v5316_v6, %v1330_v23 }
 0x22a   :  { %1502 = vperm.xlu1 %5238, %v1497_v0   ;;  %1495 = vperm.xlu0 %5237, %v1484_v18   ;;  %v1332_v40 = vadd.f32 %v5316_v6, %v1331_v7 }
 0x22b   :  { %1742 = vperm.xlu2 %5235, %v1731_v35   ;;  %v1337_v35 = vand.u32 2147483647, %v1296_v33  ;;  %v1575_v33 = vperm.slane %v7032_v47, 7 }
 0x22c   :  { %v1336_v29 = vsel %vm1335_vm13, %v5316_v6, %v1332_v40  ;;  %v1594_v6 = vpop.permute.xlu2 %1593 }
 0x22d   :  { %vm1338_vm14 = vcmp.eq.f32.partialorder %v1337_v35, 8.507059e+37  ;;  %v1760_v38 = vmul.f32 %v1594_v6, %v9467_v16 }
 0x22e   :  { %v1341_v17 = vsel %vm1338_vm14, %v1340_v8, %v1336_v29  ;;  %v9461_v29 = vld [vmem:[#allocation63_spill] sm:$0xff] }
 0x22f   :  { %v1342_v51 = vmul.f32 %v1341_v17, %v7004_v5 }
 0x231   :  { %v7102_v48 = vmul.f32 %v1472_v9, %v1342_v51 }
 0x232   :  { %5241 = vset.pattern.permute.xlu1 %v6924_v27  ;;  %5242 = vset.pattern.permute.xlu0 %v6919_v3 }
 0x233   :  { %5236 = vset.pattern.permute.xlu2 %v6919_v3  ;;  %v1627_v46 = vperm.slane %v7102_v48, 1  ;;  %v1666_v5 = vperm.slane %v7102_v48, 4  ;;  %v1640_v53 = vperm.slane %v7102_v48, 2  ;;  %v1653_v47 = vperm.slane %v7102_v48, 3 }
 0x234   :  { %v1613_v23 = vpop.permute.xlu2 %1612  ;;  %v1679_v59 = vperm.slane %v7102_v48, 5  ;;  %v1705_v37 = vperm.slane %v7102_v48, 7 }
 0x235   :  { %v1763_v11 = vmul.f32 %v1613_v23, %v9456_v52 }
 0x237   :  { %v1866_v51 = vsel %vm932_vm0, %v1763_v11, 0.0 }
 0x23a   :  { %1521 = vperm.xlu1 %5241, %v1510_v34   ;;  %1541 = vperm.xlu0 %5242, %v1536_v39  }
 0x23b   :  { %1489 = vperm.xlu2 %5236, %v1484_v18   ;;  %v1614_v18 = vperm.slane %v7102_v48, 0  ;;  %v1607_v7 = vpop.permute.xlu0 %1606 }
 0x23c   :  { %v1762_v28 = vmul.f32 %v1607_v7, %v9458_v24 }
 0x242   :  { %1534 = vperm.xlu1 %5241, %v1523_v20   ;;  %5245 = vset.pattern.permute.xlu0 %v6924_v27 }
 0x243   :  { %5239 = vset.pattern.permute.xlu2 %v6924_v27 }
 0x24a   :  { %5244 = vset.pattern.permute.xlu1 %v6919_v3  ;;  %1573 = vperm.xlu0 %5245, %v1562_v1  }
 0x24b   :  { %1508 = vperm.xlu2 %5239, %v1497_v0   ;;  %v1692_v0 = vperm.slane %v7102_v48, 6 }
 0x252   :  { %1554 = vperm.xlu1 %5244, %v1549_v49   ;;  %1638 = vperm.xlu0 %5245, %v1627_v46  }
 0x253   :  { %5240 = vset.pattern.permute.xlu2 %v6919_v3 }
 0x25a   :  { %1567 = vperm.xlu1 %5244, %v1562_v1   ;;  %5252 = vset.pattern.permute.xlu0 %v6919_v3  ;;  %v9468_v1 = vld [vmem:[#allocation42_spill] sm:$0xff] }
 0x25b   :  { %1515 = vperm.xlu2 %5240, %v1510_v34  }
 0x262   :  { %5247 = vset.pattern.permute.xlu1 %v6924_v27  ;;  %1671 = vperm.xlu0 %5252, %v1666_v5  }
 0x263   :  { %1528 = vperm.xlu2 %5240, %v1523_v20  }
 0x26a   :  { %1586 = vperm.xlu1 %5247, %v1575_v33   ;;  %5255 = vset.pattern.permute.xlu0 %v6924_v27 }
 0x26b   :  { %5243 = vset.pattern.permute.xlu2 %v6924_v27 }
 0x272   :  { %5248 = vset.pattern.permute.xlu1 %v6919_v3  ;;  %1703 = vperm.xlu0 %5255, %v1692_v0  }
 0x273   :  { %1547 = vperm.xlu2 %5243, %v1536_v39   ;;  %v1600_v39 = vpop.permute.xlu1 %1599 }
 0x274   :  { %v1761_v8 = vmul.f32 %v1600_v39, %v9462_v31 }
 0x275   :  { %v7125_v34 = vpop.permute.xlu2 %1723 }
 0x27a   :  { %1619 = vperm.xlu1 %5248, %v1614_v18  }
 0x27b   :  { %1560 = vperm.xlu2 %5243, %v1549_v49  }
 0x282   :  { %1632 = vperm.xlu1 %5248, %v1627_v46   ;;  %v1865_v46 = vsel %vm932_vm0, %v1762_v28, 0.0 }
 0x283   :  { %5246 = vset.pattern.permute.xlu2 %v6919_v3  ;;  %v1867_v11 = vadd.f32 %v1866_v51, %v1865_v46 }
 0x285   :  { %v7128_v45 = vpop.permute.xlu2 %1742 }
 0x28a   :  { %5251 = vset.pattern.permute.xlu1 %v6924_v27 }
 0x28b   :  { %1580 = vperm.xlu2 %5246, %v1575_v33  }
 0x28c   :  { %v7131_v62 = vpop.permute.xlu1 %1729  ;;  %v7136_v42 = vpop.permute.xlu0 %1736 }
 0x292   :  { %1651 = vperm.xlu1 %5251, %v1640_v53  }
 0x293   :  { %5249 = vset.pattern.permute.xlu2 %v6924_v27 }
 0x295   :  { %v1490_v50 = vpop.permute.xlu2 %1489 }
 0x296   :  { %v1744_v10 = vmul.f32 %v1490_v50, %v9465_v25 }
 0x298   :  { %v1784_v39 = vsel %vm932_vm0, %v1744_v10, 0.0 }
 0x29a   :  { %1664 = vperm.xlu1 %5251, %v1653_v47  }
 0x29b   :  { %1625 = vperm.xlu2 %5249, %v1614_v18  }
 0x29c   :  { %v1503_v21 = vpop.permute.xlu1 %1502  ;;  %v1496_v61 = vpop.permute.xlu0 %1495 }
 0x29d   :  { %v1746_v41 = vmul.f32 %v1503_v21, %v9459_v30  ;;  %v1745_v43 = vmul.f32 %v1496_v61, %v9460_v58  ;;  %v9470_v61 = vld [vmem:[#allocation114_spill] sm:$0xff] }
 0x29f   :  { %v1785_v33 = vsel %vm932_vm0, %v1745_v43, 0.0 }
 0x2a2   :  { %5254 = vset.pattern.permute.xlu1 %v6919_v3 }
 0x2a3   :  { %5250 = vset.pattern.permute.xlu2 %v6919_v3 }
 0x2a5   :  { %v1509_v15 = vpop.permute.xlu2 %1508 }
 0x2a6   :  { %v1747_v54 = vmul.f32 %v1509_v15, %v9455_v12  ;;  %v9469_v15 = vld [vmem:[#allocation80_spill] sm:$0xff] }
 0x2a8   :  { %v1794_v17 = vsel %vm932_vm0, %v1747_v54, 0.0 }
 0x2aa   :  { %1684 = vperm.xlu1 %5254, %v1679_v59  }
 0x2ab   :  { %1645 = vperm.xlu2 %5250, %v1640_v53   ;;  %v1857_v53 = vsel %vm932_vm0, %v1761_v8, 0.0 }
 0x2ac   :  { %v1522_v55 = vpop.permute.xlu1 %1521  ;;  %v1542_v57 = vpop.permute.xlu0 %1541 }
 0x2ad   :  { %v1749_v22 = vmul.f32 %v1522_v55, %v9463_v36  ;;  %v1752_v9 = vmul.f32 %v1542_v57, %v9468_v1  ;;  %v1786_v55 = vadd.f32 %v1785_v33, %v1784_v39  ;;  %v1856_v57 = vsel %vm932_vm0, %v1760_v38, 0.0 }
 0x2af   :  { %v1803_v6 = vsel %vm932_vm0, %v1749_v22, 0.0  ;;  %v1787_v10 = vrot.slane %v1786_v55, 4 }
 0x2b2   :  { %1697 = vperm.xlu1 %5254, %v1692_v0  }
 0x2b3   :  { %1658 = vperm.xlu2 %5250, %v1653_v47  }
 0x2b4   :  { %v1535_v14 = vpop.permute.xlu1 %1534 }
 0x2b5   :  { %v1516_v60 = vpop.permute.xlu2 %1515  ;;  %v1751_v32 = vmul.f32 %v1535_v14, %v9466_v4 }
 0x2b6   :  { %v1748_v35 = vmul.f32 %v1516_v60, %v9457_v2  ;;  %v1820_v60 = vsel %vm932_vm0, %v1752_v9, 0.0 }
 0x2b7   :  { %v1812_v50 = vsel %vm932_vm0, %v1751_v32, 0.0 }
 0x2b8   :  { %v1802_v49 = vsel %vm932_vm0, %v1748_v35, 0.0 }
 0x2ba   :  { %5257 = vset.pattern.permute.xlu1 %v6924_v27 }
 0x2bb   :  { %5253 = vset.pattern.permute.xlu2 %v6924_v27 }
 0x2bc   :  { %v1574_v21 = vpop.permute.xlu0 %1573 }
 0x2bd   :  { %v1529_v40 = vpop.permute.xlu2 %1528 }
 0x2be   :  { %v1750_v56 = vmul.f32 %v1529_v40, %v9461_v29 }
 0x2c0   :  { %v1811_v0 = vsel %vm932_vm0, %v1750_v56, 0.0  ;;  %v9472_v56 = vld [vmem:[#allocation107_spill] sm:$0xff] }
 0x2c1   :  { %v1813_v14 = vadd.f32 %v1812_v50, %v1811_v0  ;;  %v1757_v8 = vmul.f32 %v1574_v21, %v9472_v56 }
 0x2c2   :  { %1716 = vperm.xlu1 %5257, %v1705_v37  }
 0x2c3   :  { %1677 = vperm.xlu2 %5253, %v1666_v5   ;;  %v1793_v5 = vsel %vm932_vm0, %v1746_v41, 0.0  ;;  %v1858_v41 = vadd.f32 %v1857_v53, %v1856_v57  ;;  %v1788_v53 = vadd.f32 %v1787_v10, %v1786_v55  ;;  %v9474_v10 = vld [vmem:[#allocation97_spill] sm:$0xff] }
 0x2c4   :  { %v1555_v26 = vpop.permute.xlu1 %1554  ;;  %v1795_v23 = vadd.f32 %v1794_v17, %v1793_v5  ;;  %v1814_v17 = vrot.slane %v1813_v14, 4  ;;  %v1839_v5 = vsel %vm932_vm0, %v1757_v8, 0.0 }
 0x2c5   :  { %v1754_v7 = vmul.f32 %v1555_v26, %v9469_v15  ;;  %v1859_v51 = vrot.slane %v1858_v41, 4 }
 0x2c6   :  { %v1796_v43 = vrot.slane %v1795_v23, 4 }
 0x2c7   :  { %v1829_v26 = vsel %vm932_vm0, %v1754_v7, 0.0  ;;  %v1860_v50 = vadd.f32 %v1859_v51, %v1858_v41 }
 0x2c8   :  { %v1797_v46 = vadd.f32 %v1796_v43, %v1795_v23 }
 0x2c9   :  { %v1861_v8 = vrot.slane %v1860_v50, 2 }
 0x2ca   :  { %5258 = vset.pattern.permute.xlu1 %v6919_v3  ;;  %v1798_v21 = vrot.slane %v1797_v46, 2 }
 0x2cb   :  { %1690 = vperm.xlu2 %5253, %v1679_v59   ;;  %v1804_v59 = vadd.f32 %v1803_v6, %v1802_v49  ;;  %v1868_v49 = vrot.slane %v1867_v11, 4  ;;  %v1815_v6 = vadd.f32 %v1814_v17, %v1813_v14 }
 0x2cc   :  { %v1568_v18 = vpop.permute.xlu1 %1567 }
 0x2cd   :  { %v1548_v20 = vpop.permute.xlu2 %1547  ;;  %v1756_v40 = vmul.f32 %v1568_v18, %v9470_v61  ;;  %v1805_v22 = vrot.slane %v1804_v59, 4  ;;  %v1816_v57 = vrot.slane %v1815_v6, 2 }
 0x2ce   :  { %v1753_v63 = vmul.f32 %v1548_v20, %v9464_v13  ;;  %v9471_v20 = vld [vmem:[#allocation71_spill] sm:$0xff] }
 0x2cf   :  { %v1838_v32 = vsel %vm932_vm0, %v1756_v40, 0.0  ;;  %v1806_v0 = vadd.f32 %v1805_v22, %v1804_v59  ;;  %v9473_v22 = vld [vmem:[#allocation123_spill] sm:$0xff] }
 0x2d0   :  { %v1821_v47 = vsel %vm932_vm0, %v1753_v63, 0.0  ;;  %v1840_v18 = vadd.f32 %v1839_v5, %v1838_v32  ;;  %v1862_v32 = vadd.f32 %v1861_v8, %v1860_v50 }
 0x2d1   :  { %v1822_v35 = vadd.f32 %v1821_v47, %v1820_v60  ;;  %v1869_v47 = vadd.f32 %v1868_v49, %v1867_v11  ;;  %v1807_v60 = vrot.slane %v1806_v0, 2  ;;  %v1817_v11 = vadd.f32 %v1816_v57, %v1815_v6 }
 0x2d2   :  { %v1841_v40 = vrot.slane %v1840_v18, 4  ;;  %v1863_v6 = vrot.slane %v1862_v32, 1 }
 0x2d3   :  { %5256 = vset.pattern.permute.xlu2 %v6919_v3  ;;  %v1823_v38 = vrot.slane %v1822_v35, 4  ;;  %v9487_v3 = vld [vmem:[#allocation27_spill] sm:$0xff] }
 0x2d4   :  { %v1842_v59 = vadd.f32 %v1841_v40, %v1840_v18 }
 0x2d5   :  { %v1561_v54 = vpop.permute.xlu2 %1560  ;;  %v1824_v39 = vadd.f32 %v1823_v38, %v1822_v35 }
 0x2d6   :  { %v1755_v28 = vmul.f32 %v1561_v54, %v9471_v20  ;;  %v1789_v54 = vrot.slane %v1788_v53, 2  ;;  %v1843_v51 = vrot.slane %v1842_v59, 2 }
 0x2d7   :  { %v1825_v43 = vrot.slane %v1824_v39, 2 }
 0x2d8   :  { %v1830_v63 = vsel %vm932_vm0, %v1755_v28, 0.0  ;;  %v1870_v28 = vrot.slane %v1869_v47, 2  ;;  %v1790_v14 = vadd.f32 %v1789_v54, %v1788_v53  ;;  %v1844_v54 = vadd.f32 %v1843_v51, %v1842_v59 }
 0x2d9   :  { %v1831_v9 = vadd.f32 %v1830_v63, %v1829_v26  ;;  %v1799_v26 = vadd.f32 %v1798_v21, %v1797_v46  ;;  %v1826_v63 = vadd.f32 %v1825_v43, %v1824_v39  ;;  %v1864_v43 = vadd.f32 %v1863_v6, %v1862_v32 }
 0x2da   :  { %v1871_v41 = vadd.f32 %v1870_v28, %v1869_v47 }
 0x2db   :  { %v1832_v33 = vrot.slane %v1831_v9, 4  ;;  %1710 = vperm.xlu2 %5256, %v1705_v37   ;;  %v1808_v37 = vadd.f32 %v1807_v60, %v1806_v0  ;;  %v1818_v0 = vrot.slane %v1817_v11, 1  ;;  %v1827_v53 = vrot.slane %v1826_v63, 1 }
 0x2dc   :  { %v1587_v23 = vpop.permute.xlu1 %1586  ;;  %v1872_v21 = vrot.slane %v1871_v41, 1 }
 0x2dd   :  { %v1833_v7 = vadd.f32 %v1832_v33, %v1831_v9  ;;  %v1759_v55 = vmul.f32 %v1587_v23, %v9473_v22  ;;  %v1800_v9 = vrot.slane %v1799_v26, 1  ;;  %v1809_v38 = vrot.slane %v1808_v37, 1 }
 0x2de   :  { %v1791_v33 = vrot.slane %v1790_v14, 1  ;;  %v1819_v57 = vadd.f32 %v1818_v0, %v1817_v11  ;;  %v1873_v23 = vadd.f32 %v1872_v21, %v1871_v41  ;;  %v1828_v28 = vadd.f32 %v1827_v53, %v1826_v63  ;;  %v7193_v63 = vld [vmem:[#allocation6] sm:$0xff] }
 0x2df   :  { %v1834_v48 = vrot.slane %v1833_v7, 2  ;;  %v1848_v5 = vsel %vm932_vm0, %v1759_v55, 0.0  ;;  %v1801_v60 = vadd.f32 %v1800_v9, %v1799_v26  ;;  %v1810_v40 = vadd.f32 %v1809_v38, %v1808_v37  ;;  %v7189_v37 = vld [vmem:[#allocation6 + $0x8] sm:$0x3] }
 0x2e0   :  { %v1792_v50 = vadd.f32 %v1791_v33, %v1790_v14  ;;  %v1991_v59 = vsel %vm1197_vm3, %v1873_v23, %v1864_v43 }
 0x2e1   :  { %v1835_v49 = vadd.f32 %v1834_v48, %v1833_v7 }
 0x2e2   :  { %v1984_v8 = vsel %vm1197_vm3, %v1801_v60, %v1792_v50 }
 0x2e3   :  { %v1836_v47 = vrot.slane %v1835_v49, 1 }
 0x2e5   :  { %v1581_v35 = vpop.permute.xlu2 %1580  ;;  %v1837_v48 = vadd.f32 %v1836_v47, %v1835_v49  ;;  %v7196_v49 = vadd.f32 %v1991_v59, %v7189_v37 }
 0x2e6   :  { %v1758_v17 = vmul.f32 %v1581_v35, %v9474_v10  ;;  %v1985_v35 = vsel %vm1199_vm4, %v1810_v40, %v1984_v8 }
 0x2e7   :  { %9475 = vst [vmem:[#allocation67_spill] sm:$0xff] %v7196_v49  ;;  %v2010_v0 = vsel %vm2009_vm15, %v7196_v49, -inf }
 0x2e8   :  { %v1847_v46 = vsel %vm932_vm0, %v1758_v17, 0.0  ;;  %v1845_v17 = vrot.slane %v1844_v54, 1 }
 0x2e9   :  { %v1849_v18 = vadd.f32 %v1848_v5, %v1847_v46  ;;  %v1986_v5 = vsel %vm1201_vm5, %v1819_v57, %v1985_v35 }
 0x2ea   :  { %v1987_v9 = vsel %vm1203_vm6, %v1828_v28, %v1986_v5  ;;  %v1846_v41 = vadd.f32 %v1845_v17, %v1844_v54 }
 0x2eb   :  { %v1850_v39 = vrot.slane %v1849_v18, 4  ;;  %v1988_v14 = vsel %vm1205_vm7, %v1837_v48, %v1987_v9  ;;  %v1639_v48 = vpop.permute.xlu0 %1638 }
 0x2ec   :  { %v1989_v38 = vsel %vm1207_vm8, %v1846_v41, %v1988_v14  ;;  %v1620_v33 = vpop.permute.xlu1 %1619  ;;  %v9477_v14 = vld [vmem:[#allocation56_spill] sm:$0xff]  ;;  %v9478_v41 = vld [vmem:[#allocation54_spill] sm:$0xff] }
 0x2ed   :  { %v1851_v7 = vadd.f32 %v1850_v39, %v1849_v18 }
 0x2ef   :  { %v1852_v55 = vrot.slane %v1851_v7, 2 }
 0x2f1   :  { %v1853_v26 = vadd.f32 %v1852_v55, %v1851_v7 }
 0x2f3   :  { %v1854_v11 = vrot.slane %v1853_v26, 1 }
 0x2f4   :  { %v1633_v47 = vpop.permute.xlu1 %1632 }
 0x2f5   :  { %v1855_v32 = vadd.f32 %v1854_v11, %v1853_v26  ;;  %v1626_v39 = vpop.permute.xlu2 %1625  ;;  %v1780_v11 = vmul.f32 %v7125_v34, %v9477_v14 }
 0x2f7   :  { %v1990_v51 = vsel %vm1209_vm9, %v1855_v32, %v1989_v38  ;;  %v1781_v32 = vmul.f32 %v7131_v62, %v9478_v41  ;;  %v9479_v38 = vld [vmem:[#allocation57_spill] sm:$0xff]  ;;  %v1946_v34 = vsel %vm932_vm0, %v1780_v11, 0.0 }
 0x2f8   :  { %v7201_v46 = vadd.f32 %v1990_v51, %v7193_v63  ;;  %v1782_v51 = vmul.f32 %v7136_v42, %v9479_v38  ;;  %v9484_v62 = vld [vmem:[#allocation125_spill] sm:$0xff] }
 0x2fa   :  { %9476 = vst [vmem:[#allocation43_spill] sm:$0xff] %v7201_v46  ;;  %v2008_v18 = vsel %vm932_vm0, %v7201_v46, -inf  ;;  %v1955_v42 = vsel %vm932_vm0, %v1782_v51, 0.0 }
 0x2fb   :  { %v2011_v21 = vmax.f32 %v2008_v18, %v2010_v0  ;;  %v9480_v0 = vld [vmem:[#allocation19_spill] sm:$0xff] }
 0x2fc   :  { %v1765_v18 = vmul.f32 %v1626_v39, %v9480_v0 }
 0x2fd   :  { %v2012_v53 = vrot.slane %v2011_v21, 4 }
 0x2fe   :  { %v1875_v39 = vsel %vm932_vm0, %v1765_v18, 0.0 }
 0x2ff   :  { %v2013_v6 = vmax.f32 %v2011_v21, %v2012_v53  ;;  %v9481_v21 = vld [vmem:[#allocation18_spill] sm:$0xff] }
 0x300   :  { %v1766_v53 = vmul.f32 %v1633_v47, %v9481_v21 }
 0x301   :  { %v2014_v60 = vrot.slane %v2013_v6, 2 }
 0x302   :  { %v1883_v47 = vsel %vm932_vm0, %v1766_v53, 0.0 }
 0x303   :  { %v2015_v40 = vmax.f32 %v2013_v6, %v2014_v60  ;;  %v9482_v60 = vld [vmem:[#allocation24_spill] sm:$0xff] }
 0x304   :  { %v1652_v23 = vpop.permute.xlu1 %1651 }
 0x305   :  { %v2016_v54 = vrot.slane %v2015_v40, 1  ;;  %v1646_v28 = vpop.permute.xlu2 %1645 }
 0x307   :  { %v2017_v50 = vmax.f32 %v2015_v40, %v2016_v54  ;;  %v1783_v40 = vmul.f32 %v7128_v45, %v9482_v60  ;;  %v9483_v54 = vld [vmem:[#allocation16_spill] sm:$0xff]  ;;  %v9489_v60 = vld [vmem:[#allocation33_spill] sm:$0xff] }
 0x309   :  { %v2027_v57 = vsub.f32 %v7201_v46, %v2017_v50  ;;  %v2028_v7 = vsub.f32 %v7196_v49, %v2017_v50  ;;  %v1767_v50 = vmul.f32 %v1639_v48, %v9483_v54  ;;  %v9485_v46 = vld [vmem:[#allocation25_spill] sm:$0xff] }
 0x30a   :  { %v1768_v45 = vmul.f32 %v1646_v28, %v9485_v46  ;;  %v9486_v49 = vld [vmem:[#allocation13_spill] sm:$0xff]  ;;  %v9490_v28 = vld [vmem:[#allocation28_spill] sm:$0xff] }
 0x30b   :  { %v2031_v43 = vmul.f32 1.442695, %v2027_v57  ;;  %v2033_v8 = vmul.f32 1.442695, %v2028_v7  ;;  %v1672_v57 = vpop.permute.xlu0 %1671  ;;  %v1769_v48 = vmul.f32 %v1652_v23, %v9486_v49  ;;  %v1884_v51 = vsel %vm932_vm0, %v1767_v50, 0.0 }
 0x30c   :  { %v1665_v17 = vpop.permute.xlu1 %1664  ;;  %v1885_v44 = vadd.f32 %v1884_v51, %v1883_v47  ;;  %v1772_v46 = vmul.f32 %v1672_v57, %v9490_v28 }
 0x30d   :  { %5317 = vpow2.f32 %v2031_v43  ;;  %v1659_v26 = vpop.permute.xlu2 %1658  ;;  %v1947_v43 = vsel %vm932_vm0, %v1781_v32, 0.0  ;;  %v1956_v32 = vsel %vm932_vm0, %v1783_v40, 0.0 }
 0x30e   :  { %5319 = vpow2.f32 %v2033_v8  ;;  %v1764_v8 = vmul.f32 %v1620_v33, %v9484_v62  ;;  %v1948_v33 = vadd.f32 %v1947_v43, %v1946_v34  ;;  %v1957_v18 = vadd.f32 %v1956_v32, %v1955_v42 }
 0x30f   :  { %v1886_v42 = vrot.slane %v1885_v44, 4 }
 0x310   :  { %v1874_v53 = vsel %vm932_vm0, %v1764_v8, 0.0  ;;  %v1949_v43 = vrot.slane %v1948_v33, 4  ;;  %v1958_v8 = vrot.slane %v1957_v18, 4 }
 0x311   :  { %v1876_v23 = vadd.f32 %v1875_v39, %v1874_v53  ;;  %v9491_v39 = vld [vmem:[#allocation38_spill] sm:$0xff] }
 0x312   :  { %v1950_v28 = vadd.f32 %v1949_v43, %v1948_v33 }
 0x313   :  { %v7209_v55 = vpop.eup %5317  ;;  %v1704_v50 = vpop.permute.xlu0 %1703 }
 0x314   :  { %v7211_v35 = vpop.eup %5319  ;;  %v2039_v5 = vsel %vm932_vm0, %v7209_v55, 0.0 }
 0x315   :  { %v2040_v9 = vsel %vm2009_vm15, %v7211_v35, 0.0 }
 0x316   :  { %v2041_v59 = vadd.f32 %v2040_v9, %v2039_v5 }
 0x318   :  { %v2042_v6 = vrot.slane %v2041_v59, 4 }
 0x31a   :  { %v2043_v7 = vadd.f32 %v2042_v6, %v2041_v59  ;;  %v1770_v59 = vmul.f32 %v1659_v26, %v9487_v3  ;;  %v9488_v6 = vld [vmem:[#allocation31_spill] sm:$0xff]  ;;  %v1892_v26 = vsel %vm932_vm0, %v1768_v45, 0.0  ;;  %v1910_v45 = vsel %vm932_vm0, %v1772_v46, 0.0 }
 0x31b   :  { %v1771_v11 = vmul.f32 %v1665_v17, %v9488_v6  ;;  %v1893_v17 = vsel %vm932_vm0, %v1769_v48, 0.0  ;;  %v9492_v48 = vld [vmem:[#allocation21_spill] sm:$0xff]  ;;  %v9494_v6 = vld [vmem:[#allocation34_spill] sm:$0xff]  ;;  %v1959_v46 = vadd.f32 %v1958_v8, %v1957_v18 }
 0x31c   :  { %v1685_v5 = vpop.permute.xlu1 %1684  ;;  %v2044_v9 = vrot.slane %v2043_v7, 2  ;;  %v1901_v40 = vsel %vm932_vm0, %v1770_v59, 0.0  ;;  %v1894_v47 = vadd.f32 %v1893_v17, %v1892_v26  ;;  %v1777_v59 = vmul.f32 %v1704_v50, %v9492_v48 }
 0x31d   :  { %v1678_v27 = vpop.permute.xlu2 %1677  ;;  %v1902_v34 = vsel %vm932_vm0, %v1771_v11, 0.0  ;;  %v1877_v11 = vrot.slane %v1876_v23, 4 }
 0x31e   :  { %v2045_v19 = vadd.f32 %v2044_v9, %v2043_v7  ;;  %v1773_v38 = vmul.f32 %v1678_v27, %v9489_v60  ;;  %v1903_v57 = vadd.f32 %v1902_v34, %v1901_v40  ;;  %v1774_v9 = vmul.f32 %v1685_v5, %v9491_v39 }
 0x31f   :  { %v1895_v17 = vrot.slane %v1894_v47, 4  ;;  %v1929_v50 = vsel %vm932_vm0, %v1777_v59, 0.0  ;;  %v1878_v48 = vadd.f32 %v1877_v11, %v1876_v23 }
 0x320   :  { %v2046_v49 = vrot.slane %v2045_v19, 1  ;;  %v1911_v27 = vsel %vm932_vm0, %v1773_v38, 0.0  ;;  %v1887_v38 = vadd.f32 %v1886_v42, %v1885_v44  ;;  %v1904_v5 = vrot.slane %v1903_v57, 4 }
 0x321   :  { %v1912_v53 = vadd.f32 %v1911_v27, %v1910_v45  ;;  %v1919_v40 = vsel %vm932_vm0, %v1774_v9, 0.0  ;;  %v1951_v45 = vrot.slane %v1950_v28, 2  ;;  %v1896_v43 = vadd.f32 %v1895_v17, %v1894_v47 }
 0x322   :  { %v7247_v7 = vadd.f32 %v2046_v49, %v2045_v19  ;;  %v9493_v19 = vld [vmem:[#allocation39_spill] sm:$0xff]  ;;  %v1888_v33 = vrot.slane %v1887_v38, 2  ;;  %v1905_v42 = vadd.f32 %v1904_v5, %v1903_v57 }
 0x323   :  { %v1952_v23 = vadd.f32 %v1951_v45, %v1950_v28 }
 0x324   :  { %v1698_v32 = vpop.permute.xlu1 %1697  ;;  %5321 = vrcp.f32 %v7247_v7  ;;  %v2068_v8 = vand.u32 2147483648, %v7247_v7  ;;  %v2066_v11 = vand.u32 2147483647, %v7247_v7  ;;  %vm2062_vm12 = vweird.f32 %v7247_v7 }
 0x325   :  { %v1691_v51 = vpop.permute.xlu2 %1690  ;;  %v1776_v49 = vmul.f32 %v1698_v32, %v9493_v19  ;;  %v1913_v32 = vrot.slane %v1912_v53, 4  ;;  %v1879_v19 = vrot.slane %v1878_v48, 2 }
 0x326   :  { %v1775_v60 = vmul.f32 %v1691_v51, %v9494_v6  ;;  %vm2067_vm14 = vcmp.eq.f32.partialorder %v2066_v11, 8.507059e+37 }
 0x327   :  { %v1928_v26 = vsel %vm932_vm0, %v1776_v49, 0.0  ;;  %v1960_v49 = vrot.slane %v1959_v46, 2  ;;  %v1914_v6 = vadd.f32 %v1913_v32, %v1912_v53  ;;  %v1953_v53 = vrot.slane %v1952_v23, 1 }
 0x328   :  { %v1920_v34 = vsel %vm932_vm0, %v1775_v60, 0.0  ;;  %v1930_v27 = vadd.f32 %v1929_v50, %v1928_v26  ;;  %v1889_v26 = vadd.f32 %v1888_v33, %v1887_v38  ;;  %v1880_v50 = vadd.f32 %v1879_v19, %v1878_v48  ;;  %v9495_v48 = vld [vmem:[#allocation23_spill] sm:$0xff] }
 0x329   :  { %v1921_v39 = vadd.f32 %v1920_v34, %v1919_v40  ;;  %v1897_v40 = vrot.slane %v1896_v43, 2  ;;  %v1906_v34 = vrot.slane %v1905_v42, 2  ;;  %v1915_v47 = vrot.slane %v1914_v6, 2 }
 0x32a   :  { %v5322_v3 = vpop.eup %5321  ;;  %v1931_v18 = vrot.slane %v1930_v27, 4  ;;  %v1961_v5 = vadd.f32 %v1960_v49, %v1959_v46  ;;  %v1890_v28 = vrot.slane %v1889_v26, 1  ;;  %v1881_v33 = vrot.slane %v1880_v50, 1 }
 0x32b   :  { %v1922_v51 = vrot.slane %v1921_v39, 4  ;;  %v2058_v44 = vmul.f32 %v5322_v3, %v7247_v7  ;;  %vm2063_vm11 = vweird.f32 %v5322_v3  ;;  %v1898_v45 = vadd.f32 %v1897_v40, %v1896_v43 }
 0x32c   :  { %v1932_v17 = vadd.f32 %v1931_v18, %v1930_v27  ;;  %vm2064_vm13 = vmor %vm2062_vm12, %vm2063_vm11  ;;  %v1916_v18 = vadd.f32 %v1915_v47, %v1914_v6  ;;  %v1962_v49 = vrot.slane %v1961_v5, 1  ;;  %v1891_v11 = vadd.f32 %v1890_v28, %v1889_v26 }
 0x32d   :  { %v2059_v9 = vsub.f32 1.0, %v2058_v44  ;;  %v1923_v60 = vadd.f32 %v1922_v51, %v1921_v39  ;;  %v2069_v39 = vor.u32 1.1754944e-38, %v2068_v8  ;;  %v1907_v51 = vadd.f32 %v1906_v34, %v1905_v42 }
 0x32e   :  { %v1933_v46 = vrot.slane %v1932_v17, 2  ;;  %v1899_v40 = vrot.slane %v1898_v45, 1  ;;  %v1882_v47 = vadd.f32 %v1881_v33, %v1880_v50  ;;  %v1963_v50 = vadd.f32 %v1962_v49, %v1961_v5 }
 0x32f   :  { %v2060_v59 = vmul.f32 %v5322_v3, %v2059_v9  ;;  %v1924_v57 = vrot.slane %v1923_v60, 2  ;;  %v1908_v34 = vrot.slane %v1907_v51, 1 }
 0x330   :  { %v1992_v33 = vsel %vm1197_vm3, %v1891_v11, %v1882_v47 }
 0x331   :  { %v2061_v24 = vadd.f32 %v5322_v3, %v2060_v59  ;;  %v1925_v8 = vadd.f32 %v1924_v57, %v1923_v60  ;;  %v1917_v57 = vrot.slane %v1916_v18, 1 }
 0x333   :  { %v2065_v32 = vsel %vm2064_vm13, %v5322_v3, %v2061_v24  ;;  %v9496_v3 = vld [vmem:[#allocation12_spill] sm:$0xff] }
 0x334   :  { %v1717_v44 = vpop.permute.xlu1 %1716  ;;  %v2070_v38 = vsel %vm2067_vm14, %v2069_v39, %v2065_v32  ;;  %v1926_v32 = vrot.slane %v1925_v8, 1 }
 0x335   :  { %v1711_v9 = vpop.permute.xlu2 %1710  ;;  %v1779_v19 = vmul.f32 %v1717_v44, %v9495_v48  ;;  %v7266_v7 = vmul.f32 %v7211_v35, %v2070_v38  ;;  %v7269_v27 = vmul.f32 %v7209_v55, %v2070_v38  ;;  %v1934_v44 = vadd.f32 %v1933_v46, %v1932_v17 }
 0x336   :  { %v1778_v24 = vmul.f32 %v1711_v9, %v9496_v3  ;;  %v1927_v17 = vadd.f32 %v1926_v32, %v1925_v8 }
 0x337   :  { %v1938_v43 = vsel %vm932_vm0, %v1779_v19, 0.0  ;;  %v2117_v42 = vperm.slane %v7266_v7, 0  ;;  %v2109_v59 = vperm.slane %v7269_v27, 0  ;;  %v1900_v19 = vadd.f32 %v1899_v40, %v1898_v45 }
 0x338   :  { %v1937_v35 = vsel %vm932_vm0, %v1778_v24, 0.0  ;;  %v1909_v24 = vadd.f32 %v1908_v34, %v1907_v51 }
 0x339   :  { %v1939_v39 = vadd.f32 %v1938_v43, %v1937_v35  ;;  %v2165_v55 = vmul.f32 %v2117_v42, %v9467_v16  ;;  %v2150_v6 = vmul.f32 %v2109_v59, %v9460_v58  ;;  %v2149_v60 = vmul.f32 %v2109_v59, %v9465_v25 }
 0x33a   :  { %v1954_v35 = vadd.f32 %v1953_v53, %v1952_v23  ;;  %v1918_v58 = vadd.f32 %v1917_v57, %v1916_v18  ;;  %v1935_v59 = vrot.slane %v1934_v44, 1 }
 0x33b   :  { %v1940_v38 = vrot.slane %v1939_v39, 4  ;;  %v2237_v9 = vsel %vm932_vm0, %v2165_v55, 0.0  ;;  %v2192_v26 = vsel %vm932_vm0, %v2150_v6, 0.0  ;;  %v2189_v28 = vsel %vm932_vm0, %v2149_v60, 0.0 }
 0x33c   :  { %2238 = vadd.xlane.f32.xlu0 %v2237_v9  ;;  %2193 = vadd.xlane.f32.xlu2 %v2192_v26  ;;  %v1993_v55 = vsel %vm1199_vm4, %v1900_v19, %v1992_v33  ;;  %v2166_v6 = vmul.f32 %v2117_v42, %v9462_v31  ;;  %v1936_v51 = vadd.f32 %v1935_v59, %v1934_v44 }
 0x33d   :  { %v1941_v43 = vadd.f32 %v1940_v38, %v1939_v39  ;;  %2190 = vadd.xlane.f32.xlu1 %v2189_v28  ;;  %v1994_v60 = vsel %vm1201_vm5, %v1909_v24, %v1993_v55  ;;  %v1999_v34 = vsel %vm1197_vm3, %v1963_v50, %v1954_v35 }
 0x33e   :  { %v1995_v40 = vsel %vm1203_vm6, %v1918_v58, %v1994_v60  ;;  %v2240_v5 = vsel %vm932_vm0, %v2166_v6, 0.0  ;;  %v7291_v8 = vadd.f32 %v1999_v34, %v7189_v37 }
 0x33f   :  { %v1942_v46 = vrot.slane %v1941_v43, 2  ;;  %v1996_v23 = vsel %vm1205_vm7, %v1927_v17, %v1995_v40 }
 0x340   :  { %9497 = vst [vmem:[#allocation45_spill] sm:$0xff] %v7291_v8  ;;  %v1997_v49 = vsel %vm1207_vm8, %v1936_v51, %v1996_v23  ;;  %v2019_v58 = vsel %vm2009_vm15, %v7291_v8, -inf }
 0x341   :  { %v1943_v45 = vadd.f32 %v1942_v46, %v1941_v43 }
 0x343   :  { %v1944_v53 = vrot.slane %v1943_v45, 1 }
 0x345   :  { %v1945_v18 = vadd.f32 %v1944_v53, %v1943_v45  ;;  %2241 = vadd.xlane.f32.xlu1 %v2240_v5 }
 0x347   :  { %v1998_v42 = vsel %vm1209_vm9, %v1945_v18, %v1997_v49 }
 0x348   :  { %v7296_v11 = vadd.f32 %v1998_v42, %v7193_v63 }
 0x34a   :  { %9498 = vst [vmem:[#allocation26_spill] sm:$0xff] %v7296_v11  ;;  %v2018_v39 = vsel %vm932_vm0, %v7296_v11, -inf }
 0x34b   :  { %v2020_v47 = vmax.f32 %v2018_v39, %v2019_v58 }
 0x34d   :  { %v2021_v57 = vrot.slane %v2020_v47, 4 }
 0x34f   :  { %v2022_v32 = vmax.f32 %v2020_v47, %v2021_v57 }
 0x351   :  { %v2023_v44 = vrot.slane %v2022_v32, 2 }
 0x353   :  { %v2024_v38 = vmax.f32 %v2022_v32, %v2023_v44  ;;  %v2093_v32 = vrot.slane %v7269_v27, 1 }
 0x355   :  { %v2025_v37 = vrot.slane %v2024_v38, 1 }
 0x357   :  { %v2026_v9 = vmax.f32 %v2024_v38, %v2025_v37 }
 0x359   :  { %v2029_v26 = vsub.f32 %v7296_v11, %v2026_v9  ;;  %v2030_v28 = vsub.f32 %v7291_v8, %v2026_v9 }
 0x35b   :  { %v2035_v19 = vmul.f32 1.442695, %v2029_v26  ;;  %v2037_v63 = vmul.f32 1.442695, %v2030_v28 }
 0x35d   :  { %5323 = vpow2.f32 %v2035_v19  ;;  %v2110_v19 = vperm.slane %v2093_v32, 0 }
 0x35e   :  { %5325 = vpow2.f32 %v2037_v63 }
 0x35f   :  { %v2151_v63 = vmul.f32 %v2110_v19, %v9459_v30 }
 0x363   :  { %v5324_v24 = vpop.eup %5323 }
 0x364   :  { %v5326_v43 = vpop.eup %5325  ;;  %v2048_v35 = vsel %vm932_vm0, %v5324_v24, 0.0 }
 0x365   :  { %v2049_v59 = vsel %vm2009_vm15, %v5326_v43, 0.0 }
 0x366   :  { %v2050_v50 = vadd.f32 %v2049_v59, %v2048_v35  ;;  %v2094_v35 = vrot.slane %v7269_v27, 2  ;;  %v2152_v59 = vmul.f32 %v2110_v19, %v9455_v12 }
 0x368   :  { %v2051_v33 = vrot.slane %v2050_v50, 4 }
 0x36a   :  { %v2052_v17 = vadd.f32 %v2051_v33, %v2050_v50  ;;  %v2195_v50 = vsel %vm932_vm0, %v2151_v63, 0.0  ;;  %v2099_v63 = vrot.slane %v7269_v27, 7 }
 0x36c   :  { %v2053_v46 = vrot.slane %v2052_v17, 2 }
 0x36e   :  { %v2054_v55 = vadd.f32 %v2053_v46, %v2052_v17  ;;  %v2111_v46 = vperm.slane %v2094_v35, 0 }
 0x370   :  { %v2055_v6 = vrot.slane %v2054_v55, 1 }
 0x372   :  { %v2056_v60 = vadd.f32 %v2055_v6, %v2054_v55  ;;  %v2198_v55 = vsel %vm932_vm0, %v2152_v59, 0.0 }
 0x374   :  { %5327 = vrcp.f32 %v2056_v60  ;;  %v2084_v34 = vand.u32 2147483648, %v2056_v60  ;;  %v2082_v53 = vand.u32 2147483647, %v2056_v60  ;;  %vm2078_vm12 = vweird.f32 %v2056_v60 }
 0x376   :  { %v2085_v18 = vor.u32 1.1754944e-38, %v2084_v34  ;;  %vm2083_vm14 = vcmp.eq.f32.partialorder %v2082_v53, 8.507059e+37 }
 0x37a   :  { %v5328_v45 = vpop.eup %5327 }
 0x37b   :  { %v2074_v40 = vmul.f32 %v5328_v45, %v2056_v60  ;;  %vm2079_vm11 = vweird.f32 %v5328_v45  ;;  %v2153_v60 = vmul.f32 %v2111_v46, %v9457_v2 }
 0x37c   :  { %vm2080_vm13 = vmor %vm2078_vm12, %vm2079_vm11 }
 0x37d   :  { %v2075_v51 = vsub.f32 1.0, %v2074_v40  ;;  %v2154_v40 = vmul.f32 %v2111_v46, %v9463_v36 }
 0x37f   :  { %v2076_v23 = vmul.f32 %v5328_v45, %v2075_v51  ;;  %v2096_v51 = vrot.slane %v7269_v27, 4 }
 0x381   :  { %v2077_v5 = vadd.f32 %v5328_v45, %v2076_v23  ;;  %v2201_v23 = vsel %vm932_vm0, %v2153_v60, 0.0 }
 0x383   :  { %v2081_v49 = vsel %vm2080_vm13, %v5328_v45, %v2077_v5  ;;  %v2097_v45 = vrot.slane %v7269_v27, 5  ;;  %v2204_v5 = vsel %vm932_vm0, %v2154_v40, 0.0 }
 0x384   :  { %v2086_v42 = vsel %vm2083_vm14, %v2085_v18, %v2081_v49  ;;  %v2113_v18 = vperm.slane %v2096_v51, 0 }
 0x385   :  { %v7306_v58 = vmul.f32 %v5326_v43, %v2086_v42  ;;  %v7308_v39 = vmul.f32 %v5324_v24, %v2086_v42  ;;  %v2095_v43 = vrot.slane %v7269_v27, 3  ;;  %v2114_v53 = vperm.slane %v2097_v45, 0 }
 0x387   :  { %v2127_v47 = vperm.slane %v7306_v58, 0  ;;  %v2119_v57 = vperm.slane %v7308_v39, 0  ;;  %v2112_v17 = vperm.slane %v2095_v43, 0  ;;  %v2159_v49 = vmul.f32 %v2114_v53, %v9469_v15 }
 0x388   :  { %v2160_v19 = vmul.f32 %v2114_v53, %v9471_v20  ;;  %v2102_v51 = vrot.slane %v7308_v39, 2 }
 0x389   :  { %v2186_v44 = vmul.f32 %v2127_v47, %v9478_v41  ;;  %v2170_v38 = vmul.f32 %v2119_v57, %v9480_v0  ;;  %v2169_v37 = vmul.f32 %v2119_v57, %v9484_v62  ;;  %v2185_v24 = vmul.f32 %v2127_v47, %v9477_v14 }
 0x38a   :  { %v2156_v6 = vmul.f32 %v2112_v17, %v9466_v4  ;;  %v2155_v42 = vmul.f32 %v2112_v17, %v9461_v29  ;;  %v2098_v47 = vrot.slane %v7269_v27, 6  ;;  %v2157_v57 = vmul.f32 %v2113_v18, %v9468_v1 }
 0x38b   :  { %v2300_v9 = vsel %vm932_vm0, %v2186_v44, 0.0  ;;  %v2252_v26 = vsel %vm932_vm0, %v2170_v38, 0.0  ;;  %v2249_v28 = vsel %vm932_vm0, %v2169_v37, 0.0  ;;  %v2297_v33 = vsel %vm932_vm0, %v2185_v24, 0.0 }
 0x38c   :  { %2301 = vadd.xlane.f32.xlu0 %v2300_v9  ;;  %2253 = vadd.xlane.f32.xlu2 %v2252_v26  ;;  %v2210_v34 = vsel %vm932_vm0, %v2156_v6, 0.0  ;;  %v2219_v32 = vsel %vm932_vm0, %v2159_v49, 0.0  ;;  %v2207_v44 = vsel %vm932_vm0, %v2155_v42, 0.0  ;;  %v2115_v38 = vperm.slane %v2098_v47, 0  ;;  %v9499_v47 = vld [vmem:[#allocation127_spill] sm:$0xff] }
 0x38d   :  { %2250 = vadd.xlane.f32.xlu1 %v2249_v28  ;;  %v2213_v37 = vsel %vm932_vm0, %v2157_v57, 0.0  ;;  %v2158_v26 = vmul.f32 %v2113_v18, %v9464_v13  ;;  %v2100_v28 = vrot.slane %v7266_v7, 1  ;;  %v2222_v59 = vsel %vm932_vm0, %v2160_v19, 0.0 }
 0x38e   :  { %v2162_v9 = vmul.f32 %v2115_v38, %v9472_v56  ;;  %v2161_v17 = vmul.f32 %v2115_v38, %v9470_v61  ;;  %v2101_v7 = vrot.slane %v7308_v39, 1  ;;  %v2121_v18 = vperm.slane %v2102_v51, 0  ;;  %v9506_v51 = vld [vmem:[#allocation34_spill] sm:$0xff] }
 0x38f   :  { %v2216_v43 = vsel %vm932_vm0, %v2158_v26, 0.0  ;;  %v2118_v35 = vperm.slane %v2100_v28, 0  ;;  %v2104_v38 = vrot.slane %v7308_v39, 4 }
 0x390   :  { %v2228_v24 = vsel %vm932_vm0, %v2162_v9, 0.0  ;;  %v2120_v6 = vperm.slane %v2101_v7, 0  ;;  %v2106_v7 = vrot.slane %v7308_v39, 6 }
 0x391   :  { %v2167_v57 = vmul.f32 %v2118_v35, %v9499_v47  ;;  %v2123_v19 = vperm.slane %v2104_v38, 0  ;;  %v9508_v38 = vld [vmem:[#allocation38_spill] sm:$0xff] }
 0x392   :  { %v2171_v40 = vmul.f32 %v2120_v6, %v9481_v21 }
 0x393   :  { %v2243_v26 = vsel %vm932_vm0, %v2167_v57, 0.0 }
 0x394   :  { %2196 = vadd.xlane.f32.xlu0 %v2195_v50  ;;  %2298 = vadd.xlane.f32.xlu2 %v2297_v33  ;;  %v2116_v50 = vperm.slane %v2099_v63, 0  ;;  %v2168_v33 = vmul.f32 %v2118_v35, %v9456_v52 }
 0x395   :  { %2199 = vadd.xlane.f32.xlu1 %v2198_v55  ;;  %v2225_v55 = vsel %vm932_vm0, %v2161_v17, 0.0 }
 0x396   :  { %v2163_v46 = vmul.f32 %v2116_v50, %v9474_v10  ;;  %v2246_v27 = vsel %vm932_vm0, %v2168_v33, 0.0  ;;  %v2164_v45 = vmul.f32 %v2116_v50, %v9473_v22  ;;  %v2105_v50 = vrot.slane %v7308_v39, 5  ;;  %v9504_v33 = vld [vmem:[#allocation33_spill] sm:$0xff] }
 0x397   :  { %v2178_v17 = vmul.f32 %v2123_v19, %v9504_v33  ;;  %v9513_v33 = vld [vmem:[#allocation29_spill] sm:$0xff] }
 0x398   :  { %v2231_v60 = vsel %vm932_vm0, %v2163_v46, 0.0  ;;  %v2234_v53 = vsel %vm932_vm0, %v2164_v45, 0.0  ;;  %v9505_v45 = vld [vmem:[#allocation31_spill] sm:$0xff] }
 0x39c   :  { %2211 = vadd.xlane.f32.xlu0 %v2210_v34  ;;  %2202 = vadd.xlane.f32.xlu2 %v2201_v23  ;;  %v2172_v34 = vmul.f32 %v2120_v6, %v9483_v54  ;;  %v2103_v23 = vrot.slane %v7308_v39, 3  ;;  %v2276_v6 = vsel %vm932_vm0, %v2178_v17, 0.0  ;;  %v9510_v17 = vld [vmem:[#allocation57_spill] sm:$0xff] }
 0x39d   :  { %2205 = vadd.xlane.f32.xlu1 %v2204_v5  ;;  %v2255_v5 = vsel %vm932_vm0, %v2171_v40, 0.0 }
 0x39e   :  { %v2258_v49 = vsel %vm932_vm0, %v2172_v34, 0.0  ;;  %v2122_v42 = vperm.slane %v2103_v23, 0  ;;  %v2107_v23 = vrot.slane %v7308_v39, 7  ;;  %v2108_v39 = vrot.slane %v7306_v58, 1  ;;  %v9511_v58 = vld [vmem:[#allocation24_spill] sm:$0xff] }
 0x3a0   :  { %v2176_v40 = vmul.f32 %v2122_v42, %v9505_v45  ;;  %v2126_v57 = vperm.slane %v2107_v23, 0 }
 0x3a4   :  { %2220 = vadd.xlane.f32.xlu0 %v2219_v32  ;;  %2208 = vadd.xlane.f32.xlu2 %v2207_v44  ;;  %v9500_v32 = vld [vmem:[#allocation13_spill] sm:$0xff] }
 0x3a5   :  { %2214 = vadd.xlane.f32.xlu1 %v2213_v37  ;;  %v2174_v44 = vmul.f32 %v2121_v18, %v9500_v32  ;;  %v9501_v37 = vld [vmem:[#allocation27_spill] sm:$0xff] }
 0x3a6   :  { %v2175_v9 = vmul.f32 %v2122_v42, %v9501_v37  ;;  %v2183_v42 = vmul.f32 %v2126_v57, %v9496_v3 }
 0x3a7   :  { %v2264_v28 = vsel %vm932_vm0, %v2174_v44, 0.0 }
 0x3a8   :  { %v2267_v63 = vsel %vm932_vm0, %v2175_v9, 0.0 }
 0x3ac   :  { %2229 = vadd.xlane.f32.xlu0 %v2228_v24  ;;  %2217 = vadd.xlane.f32.xlu2 %v2216_v43  ;;  %v9502_v24 = vld [vmem:[#allocation25_spill] sm:$0xff] }
 0x3ad   :  { %2223 = vadd.xlane.f32.xlu1 %v2222_v59  ;;  %v2173_v43 = vmul.f32 %v2121_v18, %v9502_v24  ;;  %v9503_v59 = vld [vmem:[#allocation28_spill] sm:$0xff]  ;;  %v2270_v18 = vsel %vm932_vm0, %v2176_v40, 0.0 }
 0x3ae   :  { %v2177_v35 = vmul.f32 %v2123_v19, %v9503_v59  ;;  %v2291_v19 = vsel %vm932_vm0, %v2183_v42, 0.0 }
 0x3af   :  { %v2261_v46 = vsel %vm932_vm0, %v2173_v43, 0.0  ;;  %v2128_v43 = vperm.slane %v2108_v39, 0  ;;  %v7404_v23 = vpop.xlane.xlu0 %2238 }
 0x3b0   :  { %v7400_v40 = vpop.xlane.xlu1 %2190 }
 0x3b4   :  { %2247 = vadd.xlane.f32.xlu0 %v2246_v27  ;;  %2226 = vadd.xlane.f32.xlu2 %v2225_v55  ;;  %v2273_v27 = vsel %vm932_vm0, %v2177_v35, 0.0  ;;  %v2124_v55 = vperm.slane %v2105_v50, 0  ;;  %v9509_v35 = vld [vmem:[#allocation21_spill] sm:$0xff] }
 0x3b5   :  { %2232 = vadd.xlane.f32.xlu1 %v2231_v60  ;;  %v2125_v60 = vperm.slane %v2106_v7, 0  ;;  %v2187_v7 = vmul.f32 %v2128_v43, %v9510_v17 }
 0x3b6   :  { %v2180_v34 = vmul.f32 %v2124_v55, %v9506_v51  ;;  %v2179_v9 = vmul.f32 %v2124_v55, %v9508_v38  ;;  %v2188_v55 = vmul.f32 %v2128_v43, %v9511_v58 }
 0x3b7   :  { %v2182_v50 = vmul.f32 %v2125_v60, %v9509_v35 }
 0x3bc   :  { %2235 = vadd.xlane.f32.xlu2 %v2234_v53  ;;  %2256 = vadd.xlane.f32.xlu0 %v2255_v5  ;;  %v9507_v53 = vld [vmem:[#allocation39_spill] sm:$0xff] }
 0x3bd   :  { %2259 = vadd.xlane.f32.xlu1 %v2258_v49  ;;  %v2181_v5 = vmul.f32 %v2125_v60, %v9507_v53  ;;  %v2282_v49 = vsel %vm932_vm0, %v2180_v34, 0.0  ;;  %v7402_v34 = vpop.xlane.xlu2 %2193  ;;  %v7406_v60 = vpop.xlane.xlu1 %2241  ;;  %v9512_v53 = vld [vmem:[#allocation36_spill] sm:$0xff] }
 0x3be   :  { %v2326_v3 = vmul.f32 %v7406_v60, %v7406_v60 }
 0x3bf   :  { %v2285_v44 = vsel %vm932_vm0, %v2181_v5, 0.0 }
 0x3c0   :  { %v2414_v38 = vperm.slane %v2326_v3, %v9512_v53 }
 0x3c4   :  { %2244 = vadd.xlane.f32.xlu2 %v2243_v26  ;;  %2265 = vadd.xlane.f32.xlu0 %v2264_v28  ;;  %v2184_v26 = vmul.f32 %v2126_v57, %v9495_v48  ;;  %v2279_v28 = vsel %vm932_vm0, %v2179_v9, 0.0  ;;  %v2325_v48 = vmul.f32 %v7404_v23, %v7404_v23 }
 0x3c5   :  { %2268 = vadd.xlane.f32.xlu1 %v2267_v63 }
 0x3c6   :  { %v2294_v63 = vsel %vm932_vm0, %v2184_v26, 0.0  ;;  %v2413_v59 = vperm.slane %v2325_v48, %v9513_v33 }
 0x3c8   :  { %v2415_v37 = vsel %vm1138_vm1, %v2414_v38, %v2413_v59 }
 0x3cc   :  { %2262 = vadd.xlane.f32.xlu2 %v2261_v46  ;;  %2274 = vadd.xlane.f32.xlu0 %v2273_v27  ;;  %v2288_v46 = vsel %vm932_vm0, %v2182_v50, 0.0  ;;  %v2303_v27 = vsel %vm932_vm0, %v2187_v7, 0.0 }
 0x3cd   :  { %2277 = vadd.xlane.f32.xlu1 %v2276_v6  ;;  %v2306_v6 = vsel %vm932_vm0, %v2188_v55, 0.0 }
 0x3d4   :  { %2271 = vadd.xlane.f32.xlu2 %v2270_v18  ;;  %2283 = vadd.xlane.f32.xlu0 %v2282_v49 }
 0x3d5   :  { %2286 = vadd.xlane.f32.xlu1 %v2285_v44 }
 0x3dc   :  { %2280 = vadd.xlane.f32.xlu2 %v2279_v28  ;;  %2292 = vadd.xlane.f32.xlu0 %v2291_v19 }
 0x3dd   :  { %2295 = vadd.xlane.f32.xlu1 %v2294_v63 }
 0x3e4   :  { %2289 = vadd.xlane.f32.xlu2 %v2288_v46 }
 0x3e5   :  { %2304 = vadd.xlane.f32.xlu1 %v2303_v27 }
 0x3ec   :  { %2307 = vadd.xlane.f32.xlu2 %v2306_v6 }
 0x3ff   :  { %v7408_v5 = vpop.xlane.xlu2 %2253  ;;  %v7410_v18 = vpop.xlane.xlu0 %2301 }
 0x400   :  { %v7412_v49 = vpop.xlane.xlu1 %2250 }
 0x401   :  { %v2329_v59 = vmul.f32 %v7412_v49, %v7412_v49 }
 0x403   :  { %v2419_v1 = vperm.slane %v2329_v59, %v9513_v33 }
 0x407   :  { %v7414_v57 = vpop.xlane.xlu2 %2298  ;;  %v7416_v44 = vpop.xlane.xlu0 %2196 }
 0x408   :  { %v7418_v9 = vpop.xlane.xlu1 %2199  ;;  %v2311_v29 = vmul.f32 %v7416_v44, %v7416_v44 }
 0x40a   :  { %v2392_v25 = vperm.slane %v2311_v29, %v9513_v33 }
 0x40f   :  { %v7420_v42 = vpop.xlane.xlu2 %2202  ;;  %v7422_v26 = vpop.xlane.xlu0 %2211 }
 0x410   :  { %v7424_v39 = vpop.xlane.xlu1 %2205 }
 0x417   :  { %v7426_v28 = vpop.xlane.xlu2 %2208  ;;  %v7428_v19 = vpop.xlane.xlu0 %2220 }
 0x418   :  { %v7430_v63 = vpop.xlane.xlu1 %2214  ;;  %v2315_v30 = vmul.f32 %v7426_v28, %v7426_v28 }
 0x41f   :  { %v7432_v43 = vpop.xlane.xlu2 %2217  ;;  %v7434_v50 = vpop.xlane.xlu0 %2229 }
 0x420   :  { %v7436_v7 = vpop.xlane.xlu1 %2223 }
 0x427   :  { %v7438_v46 = vpop.xlane.xlu2 %2226  ;;  %v7440_v27 = vpop.xlane.xlu0 %2247 }
 0x428   :  { %v7442_v55 = vpop.xlane.xlu1 %2232  ;;  %v2328_v58 = vmul.f32 %v7440_v27, %v7440_v27 }
 0x42a   :  { %v2417_v32 = vperm.slane %v2328_v58, %v9512_v53 }
 0x42f   :  { %v7444_v6 = vpop.xlane.xlu2 %2235  ;;  %v7446_v11 = vpop.xlane.xlu0 %2256 }
 0x430   :  { %v7448_v8 = vpop.xlane.xlu1 %2259 }
 0x437   :  { %v7456_v35 = vpop.xlane.xlu2 %2244  ;;  %v7458_v17 = vpop.xlane.xlu0 %2265 }
 0x438   :  { %v2327_v41 = vmul.f32 %v7456_v35, %v7456_v35  ;;  %v7463_v51 = vpop.xlane.xlu1 %2268  ;;  %v2334_v10 = vmul.f32 %v7458_v17, %v7458_v17 }
 0x439   :  { %v2335_v61 = vmul.f32 %v7463_v51, %v7463_v51 }
 0x43a   :  { %v2416_v45 = vperm.slane %v2327_v41, %v9513_v33  ;;  %v2426_v36 = vperm.slane %v2334_v10, %v9512_v53 }
 0x43c   :  { %v2418_v24 = vsel %vm1138_vm1, %v2417_v32, %v2416_v45  ;;  %v2310_v32 = vmul.f32 %v7402_v34, %v7402_v34 }
 0x43d   :  { %v2456_v62 = vsel %vm1197_vm3, %v2418_v24, %v2415_v37  ;;  %v2309_v37 = vmul.f32 %v7400_v40, %v7400_v40  ;;  %v2330_v24 = vmul.f32 %v7408_v5, %v7408_v5 }
 0x43e   :  { %v2472_v14 = vsel %vm9181_vm2, %v2456_v62, 0.0  ;;  %v2332_v62 = vmul.f32 %v7448_v8, %v7448_v8  ;;  %v2390_v54 = vperm.slane %v2310_v32, %v9512_v53  ;;  %v7514_v32 = vmul.f32 %v7410_v18, %v7410_v18 }
 0x43f   :  { %v7472_v3 = vpop.xlane.xlu2 %2262  ;;  %2473 = vadd.xlane.f32.xlu1 %v2472_v14  ;;  %v7474_v0 = vpop.xlane.xlu0 %2274  ;;  %v2331_v14 = vmul.f32 %v7446_v11, %v7446_v11  ;;  %v2389_v22 = vperm.slane %v2309_v37, %v9513_v33  ;;  %v2420_v47 = vperm.slane %v2330_v24, %v9512_v53 }
 0x440   :  { %v7476_v21 = vpop.xlane.xlu1 %2277  ;;  %v2333_v45 = vmul.f32 %v7472_v3, %v7472_v3  ;;  %v2423_v56 = vperm.slane %v2332_v62, %v9512_v53  ;;  %v2337_v59 = vmul.f32 %v7474_v0, %v7474_v0 }
 0x441   :  { %v2422_v20 = vperm.slane %v2331_v14, %v9513_v33  ;;  %v2338_v24 = vmul.f32 %v7476_v21, %v7476_v21  ;;  %v7530_v2 = vsel %vm1138_vm1, %v2390_v54, %v2389_v22  ;;  %v2421_v10 = vsel %vm1138_vm1, %v2420_v47, %v2419_v1 }
 0x442   :  { %v2425_v4 = vperm.slane %v2333_v45, %v9513_v33  ;;  %v2431_v47 = vperm.slane %v2337_v59, %v9513_v33  ;;  %v2314_v59 = vmul.f32 %v7424_v39, %v7424_v39 }
 0x443   :  { %v2424_v45 = vsel %vm1138_vm1, %v2423_v56, %v2422_v20  ;;  %v2432_v56 = vperm.slane %v2338_v24, %v9512_v53  ;;  %v2313_v24 = vmul.f32 %v7420_v42, %v7420_v42 }
 0x444   :  { %v2427_v16 = vsel %vm1138_vm1, %v2426_v36, %v2425_v4  ;;  %v2457_v1 = vsel %vm1197_vm3, %v2424_v45, %v2421_v10  ;;  %v2345_v36 = vmul.f32 %v7414_v57, %v7414_v57  ;;  %v2312_v4 = vmul.f32 %v7418_v9, %v7418_v9 }
 0x445   :  { %v2433_v12 = vsel %vm1138_vm1, %v2432_v56, %v2431_v47  ;;  %v2395_v29 = vperm.slane %v2313_v24, %v9513_v33  ;;  %v2398_v47 = vperm.slane %v2315_v30, %v9513_v33 }
 0x447   :  { %v7478_v48 = vpop.xlane.xlu2 %2271  ;;  %v7482_v41 = vpop.xlane.xlu0 %2283 }
 0x448   :  { %v7480_v58 = vpop.xlane.xlu1 %2286  ;;  %9515 = vst [vmem:[#allocation46_spill] sm:$0xff] %v7482_v41  ;;  %v2336_v38 = vmul.f32 %v7478_v48, %v7478_v48  ;;  %v2340_v52 = vmul.f32 %v7482_v41, %v7482_v41  ;;  %v2443_v41 = vperm.slane %v2345_v36, %v9513_v33 }
 0x449   :  { %9514 = vst [vmem:[#allocation44_spill] sm:$0xff] %v7480_v58  ;;  %v2341_v31 = vmul.f32 %v7480_v58, %v7480_v58  ;;  %v2393_v58 = vperm.slane %v2312_v4, %v9512_v53  ;;  %v2317_v4 = vmul.f32 %v7430_v63, %v7430_v63 }
 0x44a   :  { %v2429_v37 = vperm.slane %v2336_v38, %v9512_v53  ;;  %v2428_v38 = vperm.slane %v2335_v61, %v9513_v33 }
 0x44b   :  { %v2394_v36 = vsel %vm1138_vm1, %v2393_v58, %v2392_v25  ;;  %v2323_v58 = vmul.f32 %v7442_v55, %v7442_v55 }
 0x44c   :  { %v2430_v22 = vsel %vm1138_vm1, %v2429_v37, %v2428_v38  ;;  %v2458_v37 = vsel %vm1199_vm4, %v2427_v16, %v2457_v1 }
 0x44d   :  { %v2459_v10 = vsel %vm1201_vm5, %v2430_v22, %v2458_v37  ;;  %v2316_v22 = vmul.f32 %v7422_v26, %v7422_v26 }
 0x44f   :  { %v7508_v15 = vpop.xlane.xlu2 %2280  ;;  %v7527_v13 = vpop.xlane.xlu0 %2292 }
 0x450   :  { %v2339_v62 = vmul.f32 %v7508_v15, %v7508_v15  ;;  %v7520_v14 = vpop.xlane.xlu1 %2295  ;;  %9517 = vst [vmem:[#allocation48_spill] sm:$0xff] %v7527_v13  ;;  %v2343_v20 = vmul.f32 %v7527_v13, %v7527_v13  ;;  %v2437_v13 = vperm.slane %v2341_v31, %v9513_v33 }
 0x451   :  { %9516 = vst [vmem:[#allocation47_spill] sm:$0xff] %v7520_v14  ;;  %v2344_v61 = vmul.f32 %v7520_v14, %v7520_v14 }
 0x452   :  { %v2434_v54 = vperm.slane %v2339_v62, %v9513_v33  ;;  %v2435_v62 = vperm.slane %v2340_v52, %v9512_v53  ;;  %v2440_v52 = vperm.slane %v2343_v20, %v9513_v33  ;;  %v2396_v20 = vperm.slane %v2314_v59, %v9512_v53 }
 0x453   :  { %v2441_v16 = vperm.slane %v2344_v61, %v9512_v53  ;;  %v2318_v61 = vmul.f32 %v7432_v43, %v7432_v43  ;;  %v2321_v59 = vmul.f32 %v7438_v46, %v7438_v46 }
 0x454   :  { %v2436_v1 = vsel %vm1138_vm1, %v2435_v62, %v2434_v54  ;;  %v2460_v54 = vsel %vm1203_vm6, %v2433_v12, %v2459_v10  ;;  %v2320_v12 = vmul.f32 %v7436_v7, %v7436_v7 }
 0x455   :  { %v2461_v56 = vsel %vm1205_vm7, %v2436_v1, %v2460_v54  ;;  %v2442_v62 = vsel %vm1138_vm1, %v2441_v16, %v2440_v52  ;;  %v2402_v30 = vperm.slane %v2318_v61, %v9512_v53  ;;  %v2319_v52 = vmul.f32 %v7428_v19, %v7428_v19 }
 0x456   :  { %v2324_v1 = vmul.f32 %v7444_v6, %v7444_v6  ;;  %v2397_v61 = vsel %vm1138_vm1, %v2396_v20, %v2395_v29  ;;  %v2405_v25 = vperm.slane %v2320_v12, %v9512_v53  ;;  %v2407_v20 = vperm.slane %v2321_v59, %v9513_v33 }
 0x457   :  { %v7559_v38 = vpop.xlane.xlu2 %2289  ;;  %v2410_v59 = vperm.slane %v2323_v58, %v9513_v33 }
 0x458   :  { %v2342_v45 = vmul.f32 %v7559_v38, %v7559_v38  ;;  %v7582_v37 = vpop.xlane.xlu1 %2304 }
 0x459   :  { %v2347_v24 = vmul.f32 %v7582_v37, %v7582_v37 }
 0x45a   :  { %v2438_v14 = vperm.slane %v2342_v45, %v9512_v53 }
 0x45c   :  { %v2439_v31 = vsel %vm1138_vm1, %v2438_v14, %v2437_v13  ;;  %v2399_v14 = vperm.slane %v2316_v22, %v9512_v53 }
 0x45d   :  { %v2462_v45 = vsel %vm1207_vm8, %v2439_v31, %v2461_v56  ;;  %v2401_v31 = vperm.slane %v2317_v4, %v9513_v33  ;;  %v2322_v56 = vmul.f32 %v7434_v50, %v7434_v50 }
 0x45e   :  { %v2463_v13 = vsel %vm1209_vm9, %v2442_v62, %v2462_v45  ;;  %v2400_v54 = vsel %vm1138_vm1, %v2399_v14, %v2398_v47  ;;  %v2446_v62 = vperm.slane %v2347_v24, %v9513_v33  ;;  %v9518_v47 = vperm.slane %v7514_v32, %v9512_v53 }
 0x45f   :  { %v7604_v10 = vpop.xlane.xlu2 %2307  ;;  %v2475_v16 = vsel %vm9180_vm10, %v2463_v13, 0.0  ;;  %v2449_v13 = vsel %vm1197_vm3, %v2394_v36, %v7530_v2  ;;  %v2403_v29 = vsel %vm1138_vm1, %v2402_v30, %v2401_v31  ;;  %v2404_v14 = vperm.slane %v2319_v52, %v9513_v33 }
 0x460   :  { %v2348_v22 = vmul.f32 %v7604_v10, %v7604_v10  ;;  %2476 = vadd.xlane.f32.xlu2 %v2475_v16  ;;  %v2445_v4 = vsel %vm1138_vm1, %v9518_v47, %v2443_v41  ;;  %v2450_v12 = vsel %vm1199_vm4, %v2397_v61, %v2449_v13  ;;  %v2411_v24 = vperm.slane %v2324_v1, %v9512_v53 }
 0x461   :  { %v2451_v30 = vsel %vm1201_vm5, %v2400_v54, %v2450_v12  ;;  %v2406_v41 = vsel %vm1138_vm1, %v2405_v25, %v2404_v14 }
 0x462   :  { %v2447_v45 = vperm.slane %v2348_v22, %v9512_v53  ;;  %v2408_v22 = vperm.slane %v2322_v56, %v9512_v53  ;;  %v2452_v36 = vsel %vm1203_vm6, %v2403_v29, %v2451_v30  ;;  %v2412_v1 = vsel %vm1138_vm1, %v2411_v24, %v2410_v59 }
 0x463   :  { %v2453_v61 = vsel %vm1205_vm7, %v2406_v41, %v2452_v36  ;;  %v2668_v41 = vperm.slane %v7456_v35, %v9513_v33 }
 0x464   :  { %v2448_v16 = vsel %vm1138_vm1, %v2447_v45, %v2446_v62  ;;  %v2409_v52 = vsel %vm1138_vm1, %v2408_v22, %v2407_v20 }
 0x465   :  { %v2464_v2 = vsel %vm1197_vm3, %v2448_v16, %v2445_v4  ;;  %v2454_v31 = vsel %vm1207_vm8, %v2409_v52, %v2453_v61 }
 0x466   :  { %v2478_v32 = vsel %vm9181_vm2, %v2464_v2, 0.0  ;;  %v2455_v56 = vsel %vm1209_vm9, %v2412_v1, %v2454_v31  ;;  %v2666_v1 = vperm.slane %v7406_v60, %v9512_v53  ;;  %v2669_v31 = vperm.slane %v7440_v27, %v9512_v53 }
 0x467   :  { %2479 = vadd.xlane.f32.xlu0 %v2478_v32  ;;  %v2469_v54 = vsel %vm9180_vm10, %v2455_v56, 0.0 }
 0x468   :  { %v2670_v35 = vsel %vm1138_vm1, %v2669_v31, %v2668_v41 }
 0x46f   :  { %2470 = vadd.xlane.f32.xlu0 %v2469_v54 }
 0x4b2   :  { %v2474_v58 = vpop.xlane.xlu1 %2473 }
 0x4b3   :  { %5329 = vrsqrt.f32 %v2474_v58  ;;  %vm2500_vm11 = vcmp.eq.f32.partialorder %v2474_v58, inf  ;;  %v2503_v4 = vand.u32 2147483648, %v2474_v58  ;;  %vm2502_vm12 = vcmp.eq.f32.partialorder %v2474_v58, 0.0 }
 0x4b9   :  { %v5330_v62 = vpop.eup %5329 }
 0x4ba   :  { %v2494_v25 = vmul.f32 %v5330_v62, %v2474_v58 }
 0x4bc   :  { %v2495_v45 = vmul.f32 %v5330_v62, %v2494_v25 }
 0x4be   :  { %v2496_v13 = vmul.f32 0.5, %v2495_v45 }
 0x4c0   :  { %v2497_v29 = vsub.f32 1.5, %v2496_v13 }
 0x4c2   :  { %v2498_v47 = vmul.f32 %v5330_v62, %v2497_v29 }
 0x4c4   :  { %v2499_v20 = vmul.f32 %v2498_v47, %v2474_v58 }
 0x4c6   :  { %v2501_v12 = vsel %vm2500_vm11, %v2474_v58, %v2499_v20  ;;  %v2665_v58 = vperm.slane %v7404_v23, %v9513_v33 }
 0x4c7   :  { %v2504_v14 = vsel %vm2502_vm12, %v2503_v4, %v2501_v12 }
 0x4c8   :  { %v2530_v24 = vmul.f32 %v2504_v14, %v2504_v14  ;;  %v2667_v45 = vsel %vm1138_vm1, %v2666_v1, %v2665_v58 }
 0x4c9   :  { %v2708_v13 = vsel %vm1197_vm3, %v2670_v35, %v2667_v45 }
 0x4ca   :  { %v2534_v16 = vadd.f32 1.0, %v2530_v24 }
 0x4cc   :  { %v2538_v22 = vadd.f32 1e-08, %v2534_v16 }
 0x4ce   :  { %5331 = vrcp.f32 %v2538_v22  ;;  %v2567_v32 = vand.u32 2147483648, %v2538_v22  ;;  %v2565_v52 = vand.u32 2147483647, %v2538_v22  ;;  %vm2561_vm14 = vweird.f32 %v2538_v22 }
 0x4d0   :  { %v2568_v54 = vor.u32 1.1754944e-38, %v2567_v32  ;;  %vm2566_vm12 = vcmp.eq.f32.partialorder %v2565_v52, 8.507059e+37  ;;  %v9520_v52 = vld [vmem:[#allocation41_spill] sm:$0xff] }
 0x4d3   :  { %v7660_v16 = vpop.xlane.xlu2 %2476 }
 0x4d4   :  { %v5332_v2 = vpop.eup %5331  ;;  %vm2512_vm10 = vcmp.eq.f32.partialorder %v7660_v16, inf }
 0x4d5   :  { %v2557_v30 = vmul.f32 %v5332_v2, %v2538_v22  ;;  %vm2562_vm13 = vweird.f32 %v5332_v2 }
 0x4d6   :  { %vm2563_vm11 = vmor %vm2561_vm14, %vm2562_vm13 }
 0x4d7   :  { %v2558_v59 = vsub.f32 1.0, %v2557_v30 }
 0x4d9   :  { %v2559_v36 = vmul.f32 %v5332_v2, %v2558_v59 }
 0x4da   :  { %v2480_v61 = vpop.xlane.xlu0 %2479 }
 0x4db   :  { %5333 = vrsqrt.f32 %v2480_v61  ;;  %v2560_v56 = vadd.f32 %v5332_v2, %v2559_v36  ;;  %vm2524_vm13 = vcmp.eq.f32.partialorder %v2480_v61, inf  ;;  %v9519_v36 = vld [vmem:[#allocation66_spill] sm:$0xff]  ;;  %v2527_v31 = vand.u32 2147483648, %v2480_v61 }
 0x4dc   :  { %vm2526_vm14 = vcmp.eq.f32.partialorder %v2480_v61, 0.0 }
 0x4dd   :  { %v2564_v62 = vsel %vm2563_vm11, %v5332_v2, %v2560_v56 }
 0x4de   :  { %v2569_v25 = vsel %vm2566_vm12, %v2568_v54, %v2564_v62 }
 0x4df   :  { %v2570_v60 = vmul.f32 %v2569_v25, %v2504_v14 }
 0x4e1   :  { %v5334_v29 = vpop.eup %5333  ;;  %v2722_v27 = vmul.f32 %v2708_v13, %v2570_v60 }
 0x4e2   :  { %v2518_v47 = vmul.f32 %v5334_v29, %v2480_v61  ;;  %v2471_v20 = vpop.xlane.xlu0 %2470 }
 0x4e3   :  { %5335 = vrsqrt.f32 %v2471_v20  ;;  %v2829_v12 = vperm.slane %v2722_v27, 0  ;;  %v2842_v24 = vperm.slane %v2722_v27, 1  ;;  %vm2488_vm11 = vcmp.eq.f32.partialorder %v2471_v20, inf }
 0x4e4   :  { %v2519_v4 = vmul.f32 %v5334_v29, %v2518_v47  ;;  %5337 = vrsqrt.f32 %v7660_v16  ;;  %v2491_v13 = vand.u32 2147483648, %v2471_v20  ;;  %vm2490_vm12 = vcmp.eq.f32.partialorder %v2471_v20, 0.0 }
 0x4e5   :  { %2840 = vperm.xlu0 %5255, %v2829_v12   ;;  %2834 = vperm.xlu1 %5258, %v2829_v12   ;;  %v2645_v12 = vperm.slane %v7418_v9, %v9512_v53 }
 0x4e6   :  { %v2520_v23 = vmul.f32 0.5, %v2519_v4  ;;  %2847 = vperm.xlu2 %5256, %v2842_v24  }
 0x4e8   :  { %v2521_v22 = vsub.f32 1.5, %v2520_v23  ;;  %v2644_v23 = vperm.slane %v7416_v44, %v9513_v33  ;;  %v2695_v44 = vperm.slane %v7414_v57, %v9513_v33  ;;  %v2651_v57 = vperm.slane %v7422_v26, %v9512_v53 }
 0x4e9   :  { %v5336_v2 = vpop.eup %5335  ;;  %v2699_v26 = vperm.slane %v7604_v10, %v9512_v53 }
 0x4ea   :  { %v2522_v14 = vmul.f32 %v5334_v29, %v2521_v22  ;;  %v2482_v30 = vmul.f32 %v5336_v2, %v2471_v20  ;;  %v5338_v56 = vpop.eup %5337 }
 0x4eb   :  { %v2506_v62 = vmul.f32 %v5338_v56, %v7660_v16 }
 0x4ec   :  { %v2523_v59 = vmul.f32 %v2522_v14, %v2480_v61  ;;  %v2483_v32 = vmul.f32 %v5336_v2, %v2482_v30  ;;  %v2647_v14 = vperm.slane %v7420_v42, %v9513_v33  ;;  %v2641_v30 = vperm.slane %v7400_v40, %v9513_v33 }
 0x4ed   :  { %5259 = vset.pattern.permute.xlu1 %v9519_v36  ;;  %5262 = vset.pattern.permute.xlu0 %v9520_v52  ;;  %v2507_v27 = vmul.f32 %v5338_v56, %v2506_v62  ;;  %v2646_v42 = vsel %vm1138_vm1, %v2645_v12, %v2644_v23  ;;  %v2696_v40 = vperm.slane %v7410_v18, %v9512_v53 }
 0x4ee   :  { %v2484_v41 = vmul.f32 0.5, %v2483_v32  ;;  %v2525_v1 = vsel %vm2524_vm13, %v2480_v61, %v2523_v59  ;;  %5261 = vset.pattern.permute.xlu2 %v9519_v36  ;;  %v2650_v32 = vperm.slane %v7426_v28, %v9513_v33  ;;  %v2657_v12 = vperm.slane %v7436_v7, %v9512_v53 }
 0x4ef   :  { %v7666_v58 = vsel %vm2526_vm14, %v2527_v31, %v2525_v1  ;;  %v2508_v22 = vmul.f32 0.5, %v2507_v27  ;;  %v2653_v31 = vperm.slane %v7430_v63, %v9513_v33  ;;  %v2660_v23 = vperm.slane %v7434_v50, %v9512_v53 }
 0x4f0   :  { %v2485_v54 = vsub.f32 1.5, %v2484_v41  ;;  %v2532_v35 = vmul.f32 %v7666_v58, %v7666_v58 }
 0x4f1   :  { %v2509_v41 = vsub.f32 1.5, %v2508_v22 }
 0x4f2   :  { %v2486_v25 = vmul.f32 %v5336_v2, %v2485_v54  ;;  %v2536_v45 = vadd.f32 1.0, %v2532_v35  ;;  %v2652_v35 = vsel %vm1138_vm1, %v2651_v57, %v2650_v32 }
 0x4f4   :  { %v2487_v60 = vmul.f32 %v2486_v25, %v2471_v20  ;;  %v2540_v29 = vadd.f32 1e-08, %v2536_v45  ;;  %v2510_v45 = vmul.f32 %v5338_v56, %v2509_v41  ;;  %v2698_v56 = vperm.slane %v7582_v37, %v9513_v33 }
 0x4f5   :  { %2853 = vperm.xlu1 %5259, %v2842_v24   ;;  %v2642_v24 = vperm.slane %v7402_v34, %v9512_v53  ;;  %v2663_v37 = vperm.slane %v7444_v6, %v9512_v53  ;;  %v2515_v41 = vand.u32 2147483648, %v7660_v16 }
 0x4f6   :  { %v2489_v47 = vsel %vm2488_vm11, %v2471_v20, %v2487_v60  ;;  %5339 = vrcp.f32 %v2540_v29  ;;  %v2648_v20 = vperm.slane %v7424_v39, %v9512_v53  ;;  %v2654_v39 = vperm.slane %v7432_v43, %v9512_v53 }
 0x4f7   :  { %v7671_v4 = vsel %vm2490_vm12, %v2491_v13, %v2489_v47  ;;  %v2643_v28 = vsel %vm1138_vm1, %v2642_v24, %v2641_v30  ;;  %v2697_v43 = vsel %vm1138_vm1, %v2696_v40, %v2695_v44  ;;  %v2597_v60 = vand.u32 2147483648, %v2540_v29 }
 0x4f8   :  { %v2529_v61 = vmul.f32 %v7671_v4, %v7671_v4  ;;  %v2649_v34 = vsel %vm1138_vm1, %v2648_v20, %v2647_v14  ;;  %v2701_v54 = vsel %vm1197_vm3, %v2646_v42, %v2643_v28  ;;  %v2655_v25 = vsel %vm1138_vm1, %v2654_v39, %v2653_v31 }
 0x4f9   :  { %v2702_v18 = vsel %vm1199_vm4, %v2649_v34, %v2701_v54  ;;  %v2595_v27 = vand.u32 2147483647, %v2540_v29  ;;  %vm2591_vm14 = vweird.f32 %v2540_v29  ;;  %v2659_v14 = vperm.slane %v7438_v46, %v9513_v33 }
 0x4fa   :  { %v2533_v2 = vadd.f32 1.0, %v2529_v61  ;;  %v2703_v47 = vsel %vm1201_vm5, %v2652_v35, %v2702_v18  ;;  %v2656_v61 = vperm.slane %v7428_v19, %v9513_v33  ;;  %v2511_v19 = vmul.f32 %v2510_v45, %v7660_v16 }
 0x4fb   :  { %v2598_v20 = vor.u32 1.1754944e-38, %v2597_v60  ;;  %v2700_v7 = vsel %vm1138_vm1, %v2699_v26, %v2698_v56  ;;  %vm2596_vm12 = vcmp.eq.f32.partialorder %v2595_v27, 8.507059e+37  ;;  %v2661_v57 = vsel %vm1138_vm1, %v2660_v23, %v2659_v14 }
 0x4fc   :  { %v7687_v59 = vadd.f32 1e-08, %v2533_v2  ;;  %v5340_v9 = vpop.eup %5339  ;;  %v2704_v2 = vsel %vm1203_vm6, %v2655_v25, %v2703_v47  ;;  %v2658_v42 = vsel %vm1138_vm1, %v2657_v12, %v2656_v61  ;;  %v2513_v39 = vsel %vm2512_vm10, %v7660_v16, %v2511_v19 }
 0x4fd   :  { %5260 = vset.pattern.permute.xlu1 %v9520_v52  ;;  %v2587_v1 = vmul.f32 %v5340_v9, %v2540_v29  ;;  %vm2592_vm13 = vweird.f32 %v5340_v9  ;;  %v2716_v6 = vsel %vm1197_vm3, %v2700_v7, %v2697_v43  ;;  %v2705_v43 = vsel %vm1205_vm7, %v2658_v42, %v2704_v2 }
 0x4fe   :  { %5341 = vrcp.f32 %v7687_v59  ;;  %vm2593_vm11 = vmor %vm2591_vm14, %vm2592_vm13  ;;  %v2552_v29 = vand.u32 2147483648, %v7687_v59  ;;  %v2550_v46 = vand.u32 2147483647, %v7687_v59  ;;  %vm2546_vm13 = vweird.f32 %v7687_v59 }
 0x4ff   :  { %v2588_v62 = vsub.f32 1.0, %v2587_v1  ;;  %vm2514_vm14 = vcmp.eq.f32.partialorder %v7660_v16, 0.0  ;;  %v2675_v12 = vperm.slane %v7448_v8, %v9512_v53  ;;  %v2674_v23 = vperm.slane %v7446_v11, %v9513_v33 }
 0x500   :  { %v2553_v1 = vor.u32 1.1754944e-38, %v2552_v29  ;;  %vm2551_vm10 = vcmp.eq.f32.partialorder %v2550_v46, 8.507059e+37  ;;  %v2677_v2 = vperm.slane %v7472_v3, %v9513_v33  ;;  %v2681_v14 = vperm.slane %v7478_v48, %v9512_v53 }
 0x501   :  { %v2589_v13 = vmul.f32 %v5340_v9, %v2588_v62  ;;  %v2680_v8 = vperm.slane %v7463_v51, %v9513_v33  ;;  %v2678_v11 = vperm.slane %v7458_v17, %v9512_v53  ;;  %v2676_v19 = vsel %vm1138_vm1, %v2675_v12, %v2674_v23 }
 0x502   :  { %v2686_v48 = vperm.slane %v7508_v15, %v9513_v33  ;;  %v2690_v29 = vperm.slane %v7559_v38, %v9512_v53  ;;  %v9521_v15 = vld [vmem:[#allocation46_spill] sm:$0xff] }
 0x503   :  { %v2590_v22 = vadd.f32 %v5340_v9, %v2589_v13  ;;  %v2682_v3 = vsel %vm1138_vm1, %v2681_v14, %v2680_v8 }
 0x504   :  { %v5342_v63 = vpop.eup %5341 }
 0x505   :  { %v2542_v10 = vmul.f32 %v5342_v63, %v7687_v59  ;;  %v2594_v50 = vsel %vm2593_vm11, %v5340_v9, %v2590_v22  ;;  %vm2547_vm2 = vweird.f32 %v5342_v63  ;;  %v2662_v9 = vperm.slane %v7442_v55, %v9513_v33 }
 0x506   :  { %v2599_v30 = vsel %vm2596_vm12, %v2598_v20, %v2594_v50  ;;  %vm2548_vm11 = vmor %vm2546_vm13, %vm2547_vm2  ;;  %v7746_v55 = vsel %vm2514_vm14, %v2515_v41, %v2513_v39  ;;  %v2706_v59 = vsel %vm1207_vm8, %v2661_v57, %v2705_v43  ;;  %v2671_v22 = vperm.slane %v7412_v49, %v9513_v33 }
 0x507   :  { %v2543_v24 = vsub.f32 1.0, %v2542_v10  ;;  %v2600_v32 = vmul.f32 %v2599_v30, %v7666_v58  ;;  %v2664_v58 = vsel %vm1138_vm1, %v2663_v37, %v2662_v9  ;;  %v2531_v62 = vmul.f32 %v7746_v55, %v7746_v55 }
 0x508   :  { %v2707_v16 = vsel %vm1209_vm9, %v2664_v58, %v2706_v59  ;;  %v2672_v10 = vperm.slane %v7408_v5, %v9512_v53  ;;  %v2679_v20 = vsel %vm1138_vm1, %v2678_v11, %v2677_v2  ;;  %v2684_v50 = vperm.slane %v7476_v21, %v9512_v53  ;;  %v9522_v21 = vld [vmem:[#allocation44_spill] sm:$0xff] }
 0x509   :  { %v2544_v44 = vmul.f32 %v5342_v63, %v2543_v24  ;;  %v7741_v34 = vmul.f32 %v2716_v6, %v2600_v32  ;;  %v2535_v60 = vadd.f32 1.0, %v2531_v62  ;;  %v2683_v37 = vperm.slane %v7474_v0, %v9513_v33  ;;  %v9524_v58 = vld [vmem:[#allocation48_spill] sm:$0xff] }
 0x50a   :  { %v2673_v49 = vsel %vm1138_vm1, %v2672_v10, %v2671_v22  ;;  %v2689_v42 = vperm.slane %v9522_v21, %v9513_v33  ;;  %v9532_v21 = vld [vmem:[#allocation126_spill] sm:$0xff] }
 0x50b   :  { %v2545_v40 = vadd.f32 %v5342_v63, %v2544_v44  ;;  %v2959_v31 = vperm.slane %v7741_v34, 0  ;;  %v2539_v26 = vadd.f32 1e-08, %v2535_v60  ;;  %v2709_v17 = vsel %vm1197_vm3, %v2676_v19, %v2673_v49  ;;  %v9525_v19 = vld [vmem:[#allocation22_spill] sm:$0xff] }
 0x50c   :  { %v2710_v30 = vsel %vm1199_vm4, %v2679_v20, %v2709_v17  ;;  %v2687_v44 = vperm.slane %v9521_v15, %v9512_v53  ;;  %v2685_v38 = vsel %vm1138_vm1, %v2684_v50, %v2683_v37  ;;  %v2691_v39 = vsel %vm1138_vm1, %v2690_v29, %v2689_v42  ;;  %v9526_v20 = vld [vmem:[#allocation17_spill] sm:$0xff]  ;;  %v9528_v17 = vld [vmem:[#allocation120_spill] sm:$0xff]  ;;  %v9530_v15 = vld [vmem:[#allocation63_spill] sm:$0xff] }
 0x50d   :  { %v2549_v28 = vsel %vm2548_vm11, %v5342_v63, %v2545_v40  ;;  %2964 = vperm.xlu1 %5260, %v2959_v31   ;;  %5343 = vrcp.f32 %v2539_v26  ;;  %v2582_v7 = vand.u32 2147483648, %v2539_v26  ;;  %vm2576_vm12 = vweird.f32 %v2539_v26  ;;  %v9523_v40 = vld [vmem:[#allocation47_spill] sm:$0xff]  ;;  %v9529_v37 = vld [vmem:[#allocation32_spill] sm:$0xff] }
 0x50e   :  { %v2554_v54 = vsel %vm2551_vm10, %v2553_v1, %v2549_v28  ;;  %v2580_v24 = vand.u32 2147483647, %v2539_v26  ;;  %v2711_v32 = vsel %vm1201_vm5, %v2682_v3, %v2710_v30  ;;  %v2688_v0 = vsel %vm1138_vm1, %v2687_v44, %v2686_v48 }
 0x50f   :  { %v2555_v35 = vmul.f32 %v2554_v54, %v7671_v4  ;;  %v2583_v9 = vor.u32 1.1754944e-38, %v2582_v7  ;;  %v2712_v41 = vsel %vm1203_vm6, %v2685_v38, %v2711_v32  ;;  %v2693_v57 = vperm.slane %v9523_v40, %v9512_v53  ;;  %v9527_v7 = vld [vmem:[#allocation15_spill] sm:$0xff] }
 0x510   :  { %vm2581_vm14 = vcmp.eq.f32.partialorder %v2580_v24, 8.507059e+37  ;;  %v2692_v1 = vperm.slane %v9524_v58, %v9513_v33  ;;  %v2713_v28 = vsel %vm1205_vm7, %v2688_v0, %v2712_v41  ;;  %v9534_v38 = vld [vmem:[#allocation87_spill] sm:$0xff]  ;;  %v9536_v58 = vld [vmem:[#allocation52_spill] sm:$0xff]  ;;  %v9562_v33 = vld [vmem:[#allocation38_spill] sm:$0xff] }
 0x511   :  { %v7757_v18 = vmul.f32 %v2707_v16, %v2555_v35  ;;  %v2714_v43 = vsel %vm1207_vm8, %v2691_v39, %v2713_v28  ;;  %v9537_v28 = vld [vmem:[#allocation42_spill] sm:$0xff] }
 0x512   :  { %v2694_v35 = vsel %vm1138_vm1, %v2693_v57, %v2692_v1 }
 0x513   :  { %v2738_v25 = vperm.slane %v7757_v18, 1  ;;  %v2725_v45 = vperm.slane %v7757_v18, 0  ;;  %v2751_v4 = vperm.slane %v7757_v18, 2  ;;  %v5344_v13 = vpop.eup %5343  ;;  %v2764_v47 = vperm.slane %v7757_v18, 3 }
 0x514   :  { %v2572_v27 = vmul.f32 %v5344_v13, %v2539_v26  ;;  %v2777_v61 = vperm.slane %v7757_v18, 4  ;;  %vm2577_vm2 = vweird.f32 %v5344_v13  ;;  %v2790_v51 = vperm.slane %v7757_v18, 5 }
 0x515   :  { %2743 = vperm.xlu0 %5262, %v2738_v25   ;;  %2736 = vperm.xlu2 %5261, %v2725_v45   ;;  %vm2578_vm13 = vmor %vm2576_vm12, %vm2577_vm2  ;;  %v2803_v59 = vperm.slane %v7757_v18, 6  ;;  %v2715_v16 = vsel %vm1209_vm9, %v2694_v35, %v2714_v43 }
 0x516   :  { %2730 = vperm.xlu1 %5260, %v2725_v45   ;;  %v2573_v63 = vsub.f32 1.0, %v2572_v27 }
 0x518   :  { %v2574_v56 = vmul.f32 %v5344_v13, %v2573_v63 }
 0x51a   :  { %v2575_v5 = vadd.f32 %v5344_v13, %v2574_v56 }
 0x51c   :  { %v2579_v46 = vsel %vm2578_vm13, %v5344_v13, %v2575_v5 }
 0x51d   :  { %2756 = vperm.xlu0 %5262, %v2751_v4   ;;  %2762 = vperm.xlu2 %5261, %v2751_v4   ;;  %v2584_v6 = vsel %vm2581_vm14, %v2583_v9, %v2579_v46  ;;  %v9531_v46 = vld [vmem:[#allocation117_spill] sm:$0xff]  ;;  %v9533_v9 = vld [vmem:[#allocation14_spill] sm:$0xff] }
 0x51e   :  { %5263 = vset.pattern.permute.xlu1 %v9519_v36  ;;  %v2585_v54 = vmul.f32 %v2584_v6, %v7746_v55  ;;  %v2816_v55 = vperm.slane %v7757_v18, 7  ;;  %v9535_v6 = vld [vmem:[#allocation20_spill] sm:$0xff] }
 0x520   :  { %v7820_v62 = vmul.f32 %v2715_v16, %v2585_v54 }
 0x522   :  { %v2894_v45 = vperm.slane %v7820_v62, 3  ;;  %v2855_v60 = vperm.slane %v7820_v62, 0  ;;  %v2933_v26 = vperm.slane %v7820_v62, 6  ;;  %v2881_v18 = vperm.slane %v7820_v62, 2 }
 0x523   :  { %v2907_v4 = vperm.slane %v7820_v62, 4  ;;  %v2920_v27 = vperm.slane %v7820_v62, 5  ;;  %v2946_v14 = vperm.slane %v7820_v62, 7 }
 0x525   :  { %5265 = vset.pattern.permute.xlu0 %v9519_v36  ;;  %5266 = vset.pattern.permute.xlu2 %v9520_v52 }
 0x526   :  { %2749 = vperm.xlu1 %5263, %v2738_v25   ;;  %v2868_v25 = vperm.slane %v7820_v62, 1 }
 0x52d   :  { %2775 = vperm.xlu0 %5265, %v2764_v47   ;;  %2782 = vperm.xlu2 %5266, %v2777_v61  }
 0x52e   :  { %5264 = vset.pattern.permute.xlu1 %v9520_v52 }
 0x535   :  { %5268 = vset.pattern.permute.xlu0 %v9520_v52  ;;  %2795 = vperm.xlu2 %5266, %v2790_v51  }
 0x536   :  { %2769 = vperm.xlu1 %5264, %v2764_v47  }
 0x53d   :  { %2808 = vperm.xlu0 %5268, %v2803_v59   ;;  %5269 = vset.pattern.permute.xlu2 %v9519_v36 }
 0x53e   :  { %5267 = vset.pattern.permute.xlu1 %v9519_v36 }
 0x540   :  { %v2848_v47 = vpop.permute.xlu2 %2847 }
 0x545   :  { %2873 = vperm.xlu0 %5268, %v2868_v25   ;;  %2814 = vperm.xlu2 %5269, %v2803_v59   ;;  %v9538_v59 = vld [vmem:[#allocation127_spill] sm:$0xff] }
 0x546   :  { %2788 = vperm.xlu1 %5267, %v2777_v61   ;;  %v3003_v35 = vmul.f32 %v2848_v47, %v9538_v59 }
 0x54d   :  { %5275 = vset.pattern.permute.xlu0 %v9519_v36  ;;  %2827 = vperm.xlu2 %5269, %v2816_v55  }
 0x54e   :  { %2801 = vperm.xlu1 %5267, %v2790_v51  }
 0x555   :  { %2905 = vperm.xlu0 %5275, %v2894_v45   ;;  %5271 = vset.pattern.permute.xlu2 %v9520_v52 }
 0x556   :  { %5270 = vset.pattern.permute.xlu1 %v9520_v52 }
 0x557   :  { %v2835_v13 = vpop.permute.xlu1 %2834  ;;  %v2841_v12 = vpop.permute.xlu0 %2840 }
 0x558   :  { %v3001_v50 = vmul.f32 %v2835_v13, %v9528_v17  ;;  %v3002_v32 = vmul.f32 %v2841_v12, %v9531_v46 }
 0x55a   :  { %v3097_v16 = vsel %vm932_vm0, %v3001_v50, 0.0 }
 0x55d   :  { %5278 = vset.pattern.permute.xlu0 %v9520_v52  ;;  %2860 = vperm.xlu2 %5271, %v2855_v60  }
 0x55e   :  { %2821 = vperm.xlu1 %5270, %v2816_v55  }
 0x565   :  { %2938 = vperm.xlu0 %5278, %v2933_v26   ;;  %5273 = vset.pattern.permute.xlu2 %v9519_v36 }
 0x566   :  { %5272 = vset.pattern.permute.xlu1 %v9519_v36 }
 0x567   :  { %v2854_v63 = vpop.permute.xlu1 %2853 }
 0x568   :  { %v3004_v42 = vmul.f32 %v2854_v63, %v9532_v21 }
 0x56d   :  { %5279 = vset.pattern.permute.xlu0 %v9519_v36  ;;  %2879 = vperm.xlu2 %5273, %v2868_v25  }
 0x56e   :  { %2866 = vperm.xlu1 %5272, %v2855_v60  }
 0x56f   :  { %v2737_v23 = vpop.permute.xlu2 %2736 }
 0x570   :  { %v2986_v29 = vmul.f32 %v2737_v23, %v9529_v37 }
 0x572   :  { %v3026_v62 = vsel %vm932_vm0, %v2986_v29, 0.0 }
 0x575   :  { %2970 = vperm.xlu0 %5279, %v2959_v31   ;;  %2892 = vperm.xlu2 %5273, %v2881_v18   ;;  %v2972_v31 = vperm.slane %v7741_v34, 1 }
 0x576   :  { %5274 = vset.pattern.permute.xlu1 %v9520_v52 }
 0x577   :  { %v2763_v22 = vpop.permute.xlu2 %2762 }
 0x578   :  { %v2990_v41 = vmul.f32 %v2763_v22, %v9535_v6 }
 0x57a   :  { %v3044_v13 = vsel %vm932_vm0, %v2990_v41, 0.0 }
 0x57d   :  { %5276 = vset.pattern.permute.xlu2 %v9520_v52  ;;  %5285 = vset.pattern.permute.xlu0 %v9520_v52 }
 0x57e   :  { %2886 = vperm.xlu1 %5274, %v2881_v18  }
 0x57f   :  { %v7845_v61 = vpop.permute.xlu1 %2964 }
 0x585   :  { %2912 = vperm.xlu2 %5276, %v2907_v4  }
 0x586   :  { %2899 = vperm.xlu1 %5274, %v2894_v45   ;;  %v3098_v45 = vsel %vm932_vm0, %v3002_v32, 0.0 }
 0x587   :  { %v2744_v10 = vpop.permute.xlu0 %2743  ;;  %v2783_v34 = vpop.permute.xlu2 %2782 }
 0x588   :  { %v2731_v56 = vpop.permute.xlu1 %2730  ;;  %v2987_v48 = vmul.f32 %v2744_v10, %v9527_v7  ;;  %v2993_v43 = vmul.f32 %v2783_v34, %v9537_v28  ;;  %v9540_v10 = vld [vmem:[#allocation114_spill] sm:$0xff] }
 0x589   :  { %v2985_v3 = vmul.f32 %v2731_v56, %v9526_v20 }
 0x58a   :  { %v3034_v57 = vsel %vm932_vm0, %v2987_v48, 0.0  ;;  %v3061_v12 = vsel %vm932_vm0, %v2993_v43, 0.0  ;;  %v9542_v48 = vld [vmem:[#allocation107_spill] sm:$0xff] }
 0x58b   :  { %v3025_v40 = vsel %vm932_vm0, %v2985_v3, 0.0 }
 0x58c   :  { %v3027_v60 = vadd.f32 %v3026_v62, %v3025_v40 }
 0x58d   :  { %2925 = vperm.xlu2 %5276, %v2920_v27  }
 0x58e   :  { %5277 = vset.pattern.permute.xlu1 %v9519_v36  ;;  %v3028_v3 = vrot.slane %v3027_v60, 4 }
 0x58f   :  { %v2757_v8 = vpop.permute.xlu0 %2756  ;;  %v2796_v24 = vpop.permute.xlu2 %2795 }
 0x590   :  { %v2989_v0 = vmul.f32 %v2757_v8, %v9533_v9  ;;  %v3029_v40 = vadd.f32 %v3028_v3, %v3027_v60 }
 0x595   :  { %2977 = vperm.xlu2 %5276, %v2972_v31  }
 0x596   :  { %2918 = vperm.xlu1 %5277, %v2907_v4   ;;  %v3107_v4 = vsel %vm932_vm0, %v3004_v42, 0.0 }
 0x598   :  { %v2750_v2 = vpop.permute.xlu1 %2749 }
 0x599   :  { %v2988_v5 = vmul.f32 %v2750_v2, %v9525_v19 }
 0x59b   :  { %v3035_v30 = vsel %vm932_vm0, %v2988_v5, 0.0 }
 0x59c   :  { %v3036_v54 = vadd.f32 %v3035_v30, %v3034_v57 }
 0x59d   :  { %5280 = vset.pattern.permute.xlu2 %v9519_v36 }
 0x59e   :  { %2931 = vperm.xlu1 %5277, %v2920_v27   ;;  %v9539_v27 = vld [vmem:[#allocation80_spill] sm:$0xff]  ;;  %v3037_v23 = vrot.slane %v3036_v54, 4 }
 0x59f   :  { %v2776_v49 = vpop.permute.xlu0 %2775  ;;  %v2995_v63 = vmul.f32 %v2796_v24, %v9539_v27 }
 0x5a0   :  { %v2992_v1 = vmul.f32 %v2776_v49, %v9536_v58  ;;  %v3038_v30 = vadd.f32 %v3037_v23, %v3036_v54 }
 0x5a1   :  { %v3070_v50 = vsel %vm932_vm0, %v2995_v63, 0.0 }
 0x5a2   :  { %v3053_v47 = vsel %vm932_vm0, %v2992_v1, 0.0  ;;  %v3039_v62 = vrot.slane %v3038_v30, 2 }
 0x5a5   :  { %2944 = vperm.xlu2 %5280, %v2933_v26   ;;  %v3043_v26 = vsel %vm932_vm0, %v2989_v0, 0.0 }
 0x5a6   :  { %2983 = vperm.xlu1 %5277, %v2972_v31   ;;  %v2815_v31 = vpop.permute.xlu2 %2814  ;;  %v3045_v34 = vadd.f32 %v3044_v13, %v3043_v26  ;;  %v3030_v26 = vrot.slane %v3029_v40, 2  ;;  %v3040_v13 = vadd.f32 %v3039_v62, %v3038_v30 }
 0x5a7   :  { %v2998_v24 = vmul.f32 %v2815_v31, %v9542_v48 }
 0x5a8   :  { %v2770_v11 = vpop.permute.xlu1 %2769  ;;  %v3046_v0 = vrot.slane %v3045_v34, 4  ;;  %v3031_v23 = vadd.f32 %v3030_v26, %v3029_v40 }
 0x5a9   :  { %v2991_v44 = vmul.f32 %v2770_v11, %v9530_v15  ;;  %v9541_v11 = vld [vmem:[#allocation71_spill] sm:$0xff]  ;;  %v3080_v57 = vsel %vm932_vm0, %v2998_v24, 0.0 }
 0x5aa   :  { %v3032_v30 = vrot.slane %v3031_v23, 1 }
 0x5ab   :  { %v3052_v25 = vsel %vm932_vm0, %v2991_v44, 0.0 }
 0x5ac   :  { %v3054_v56 = vadd.f32 %v3053_v47, %v3052_v25  ;;  %v3047_v25 = vadd.f32 %v3046_v0, %v3045_v34  ;;  %v3033_v62 = vadd.f32 %v3032_v30, %v3031_v23 }
 0x5ad   :  { %2957 = vperm.xlu2 %5280, %v2946_v14  }
 0x5ae   :  { %5281 = vset.pattern.permute.xlu1 %v9520_v52  ;;  %v3055_v44 = vrot.slane %v3054_v56, 4  ;;  %v2828_v63 = vpop.permute.xlu2 %2827  ;;  %v3048_v47 = vrot.slane %v3047_v25, 2 }
 0x5af   :  { %v2809_v55 = vpop.permute.xlu0 %2808 }
 0x5b0   :  { %v2997_v22 = vmul.f32 %v2809_v55, %v9540_v10 }
 0x5b2   :  { %v3079_v32 = vsel %vm932_vm0, %v2997_v22, 0.0 }
 0x5b3   :  { %v3081_v43 = vadd.f32 %v3080_v57, %v3079_v32 }
 0x5b5   :  { %5282 = vset.pattern.permute.xlu2 %v9520_v52  ;;  %v9561_v52 = vld [vmem:[#allocation54_spill] sm:$0xff] }
 0x5b6   :  { %2951 = vperm.xlu1 %5281, %v2946_v14   ;;  %v3106_v14 = vsel %vm932_vm0, %v3003_v35, 0.0 }
 0x5b7   :  { %v3108_v49 = vadd.f32 %v3107_v4, %v3106_v14 }
 0x5b8   :  { %v2789_v51 = vpop.permute.xlu1 %2788 }
 0x5b9   :  { %v2994_v39 = vmul.f32 %v2789_v51, %v9534_v38  ;;  %v3099_v51 = vadd.f32 %v3098_v45, %v3097_v16  ;;  %v3109_v41 = vrot.slane %v3108_v49, 4  ;;  %v3056_v16 = vadd.f32 %v3055_v44, %v3054_v56 }
 0x5ba   :  { %v3041_v56 = vrot.slane %v3040_v13, 1 }
 0x5bb   :  { %v3062_v18 = vsel %vm932_vm0, %v2994_v39, 0.0  ;;  %v3100_v35 = vrot.slane %v3099_v51, 4  ;;  %v3110_v45 = vadd.f32 %v3109_v41, %v3108_v49  ;;  %v3057_v31 = vrot.slane %v3056_v16, 2 }
 0x5bc   :  { %v3063_v8 = vadd.f32 %v3062_v18, %v3061_v12  ;;  %v3082_v18 = vrot.slane %v3081_v43, 4  ;;  %v3049_v49 = vadd.f32 %v3048_v47, %v3047_v25  ;;  %v3042_v41 = vadd.f32 %v3041_v56, %v3040_v13 }
 0x5bd   :  { %v3101_v4 = vadd.f32 %v3100_v35, %v3099_v51  ;;  %v3111_v60 = vrot.slane %v3110_v45, 2  ;;  %v3058_v34 = vadd.f32 %v3057_v31, %v3056_v16 }
 0x5be   :  { %v3064_v39 = vrot.slane %v3063_v8, 4 }
 0x5bf   :  { %v3102_v3 = vrot.slane %v3101_v4, 2  ;;  %v3112_v51 = vadd.f32 %v3111_v60, %v3110_v45  ;;  %v3059_v40 = vrot.slane %v3058_v34, 1  ;;  %v3225_v45 = vsel %vm1197_vm3, %v3042_v41, %v3033_v62 }
 0x5c0   :  { %v2802_v2 = vpop.permute.xlu1 %2801  ;;  %v3065_v55 = vadd.f32 %v3064_v39, %v3063_v8 }
 0x5c1   :  { %v2996_v5 = vmul.f32 %v2802_v2, %v9541_v11  ;;  %v9543_v2 = vld [vmem:[#allocation123_spill] sm:$0xff]  ;;  %v3103_v39 = vadd.f32 %v3102_v3, %v3101_v4  ;;  %v3113_v35 = vrot.slane %v3112_v51, 1 }
 0x5c2   :  { %v3066_v12 = vrot.slane %v3065_v55, 2  ;;  %v3000_v14 = vmul.f32 %v2828_v63, %v9543_v2 }
 0x5c3   :  { %v3071_v29 = vsel %vm932_vm0, %v2996_v5, 0.0  ;;  %v3083_v5 = vadd.f32 %v3082_v18, %v3081_v43  ;;  %v3104_v26 = vrot.slane %v3103_v39, 1  ;;  %v3114_v47 = vadd.f32 %v3113_v35, %v3112_v51 }
 0x5c4   :  { %v3072_v42 = vadd.f32 %v3071_v29, %v3070_v50  ;;  %v3067_v24 = vadd.f32 %v3066_v12, %v3065_v55  ;;  %v9544_v50 = vld [vmem:[#allocation97_spill] sm:$0xff]  ;;  %v3089_v32 = vsel %vm932_vm0, %v3000_v14, 0.0 }
 0x5c6   :  { %v3073_v1 = vrot.slane %v3072_v42, 4  ;;  %v3068_v43 = vrot.slane %v3067_v24, 1 }
 0x5c8   :  { %v3074_v54 = vadd.f32 %v3073_v1, %v3072_v42  ;;  %v3084_v42 = vrot.slane %v3083_v5, 2  ;;  %v3050_v1 = vrot.slane %v3049_v49, 1  ;;  %v3069_v31 = vadd.f32 %v3068_v43, %v3067_v24 }
 0x5ca   :  { %v3075_v22 = vrot.slane %v3074_v54, 2  ;;  %v3085_v55 = vadd.f32 %v3084_v42, %v3083_v5  ;;  %v3051_v63 = vadd.f32 %v3050_v1, %v3049_v49  ;;  %v2861_v49 = vpop.permute.xlu2 %2860 }
 0x5cc   :  { %v3076_v44 = vadd.f32 %v3075_v22, %v3074_v54  ;;  %v3060_v54 = vadd.f32 %v3059_v40, %v3058_v34  ;;  %v3226_v13 = vsel %vm1199_vm4, %v3051_v63, %v3225_v45  ;;  %v3086_v60 = vrot.slane %v3085_v55, 1 }
 0x5cd   :  { %v3105_v22 = vadd.f32 %v3104_v26, %v3103_v39 }
 0x5ce   :  { %v3077_v16 = vrot.slane %v3076_v44, 1  ;;  %v3227_v14 = vsel %vm1201_vm5, %v3060_v54, %v3226_v13 }
 0x5cf   :  { %v3228_v3 = vsel %vm1203_vm6, %v3069_v31, %v3227_v14  ;;  %v3232_v5 = vsel %vm1197_vm3, %v3114_v47, %v3105_v22  ;;  %v2874_v31 = vpop.permute.xlu0 %2873 }
 0x5d0   :  { %v2822_v8 = vpop.permute.xlu1 %2821  ;;  %v3078_v12 = vadd.f32 %v3077_v16, %v3076_v44 }
 0x5d1   :  { %v2999_v29 = vmul.f32 %v2822_v8, %v9544_v50  ;;  %v3087_v8 = vadd.f32 %v3086_v60, %v3085_v55 }
 0x5d2   :  { %v3229_v56 = vsel %vm1205_vm7, %v3078_v12, %v3228_v3  ;;  %v2880_v40 = vpop.permute.xlu2 %2879 }
 0x5d3   :  { %v3088_v0 = vsel %vm932_vm0, %v2999_v29, 0.0  ;;  %v9545_v29 = vld [vmem:[#allocation67_spill] sm:$0xff]  ;;  %v3230_v30 = vsel %vm1207_vm8, %v3087_v8, %v3229_v56 }
 0x5d4   :  { %v3090_v57 = vadd.f32 %v3089_v32, %v3088_v0  ;;  %v7898_v51 = vadd.f32 %v3232_v5, %v9545_v29  ;;  %v9547_v32 = vld [vmem:[#allocation43_spill] sm:$0xff]  ;;  %v9550_v29 = vld [vmem:[#allocation18_spill] sm:$0xff] }
 0x5d6   :  { %v3091_v25 = vrot.slane %v3090_v57, 4  ;;  %9546 = vst [vmem:[#allocation49_spill] sm:$0xff] %v7898_v51  ;;  %v3250_v0 = vsel %vm2009_vm15, %v7898_v51, -inf }
 0x5d7   :  { %v2906_v60 = vpop.permute.xlu0 %2905 }
 0x5d8   :  { %v3092_v18 = vadd.f32 %v3091_v25, %v3090_v57 }
 0x5da   :  { %v3093_v4 = vrot.slane %v3092_v18, 2  ;;  %v2893_v25 = vpop.permute.xlu2 %2892 }
 0x5dc   :  { %v3094_v23 = vadd.f32 %v3093_v4, %v3092_v18 }
 0x5de   :  { %v3095_v34 = vrot.slane %v3094_v23, 1 }
 0x5e0   :  { %v3096_v24 = vadd.f32 %v3095_v34, %v3094_v23  ;;  %v2867_v35 = vpop.permute.xlu1 %2866  ;;  %v9549_v34 = vld [vmem:[#allocation16_spill] sm:$0xff] }
 0x5e1   :  { %v3008_v8 = vmul.f32 %v2880_v40, %v9549_v34 }
 0x5e2   :  { %v3231_v44 = vsel %vm1209_vm9, %v3096_v24, %v3230_v30  ;;  %v2913_v47 = vpop.permute.xlu2 %2912  ;;  %v3007_v30 = vmul.f32 %v2874_v31, %v9550_v29  ;;  %v9554_v31 = vld [vmem:[#allocation25_spill] sm:$0xff] }
 0x5e3   :  { %v7903_v42 = vadd.f32 %v3231_v44, %v9547_v32  ;;  %v2939_v44 = vpop.permute.xlu0 %2938 }
 0x5e5   :  { %9548 = vst [vmem:[#allocation50_spill] sm:$0xff] %v7903_v42  ;;  %v3249_v39 = vsel %vm932_vm0, %v7903_v42, -inf }
 0x5e6   :  { %v3251_v41 = vmax.f32 %v3249_v39, %v3250_v0  ;;  %v3125_v39 = vsel %vm932_vm0, %v3008_v8, 0.0  ;;  %v9556_v8 = vld [vmem:[#allocation31_spill] sm:$0xff] }
 0x5e8   :  { %v3252_v57 = vrot.slane %v3251_v41, 4 }
 0x5ea   :  { %v3253_v1 = vmax.f32 %v3251_v41, %v3252_v57  ;;  %v2926_v3 = vpop.permute.xlu2 %2925  ;;  %v3124_v57 = vsel %vm932_vm0, %v3007_v30, 0.0 }
 0x5eb   :  { %v3015_v53 = vmul.f32 %v2926_v3, %v9562_v33  ;;  %v9565_v33 = vld [vmem:[#allocation21_spill] sm:$0xff] }
 0x5ec   :  { %v3254_v43 = vrot.slane %v3253_v1, 2 }
 0x5ee   :  { %v3255_v62 = vmax.f32 %v3253_v1, %v3254_v43  ;;  %v3126_v1 = vadd.f32 %v3125_v39, %v3124_v57  ;;  %v9551_v43 = vld [vmem:[#allocation19_spill] sm:$0xff]  ;;  %v9558_v39 = vld [vmem:[#allocation28_spill] sm:$0xff] }
 0x5f0   :  { %v3256_v16 = vrot.slane %v3255_v62, 1  ;;  %v2887_v54 = vpop.permute.xlu1 %2886 }
 0x5f2   :  { %v3257_v55 = vmax.f32 %v3255_v62, %v3256_v16  ;;  %v3006_v62 = vmul.f32 %v2867_v35, %v9551_v43  ;;  %v2978_v16 = vpop.permute.xlu2 %2977  ;;  %v9557_v35 = vld [vmem:[#allocation13_spill] sm:$0xff] }
 0x5f3   :  { %v3010_v30 = vmul.f32 %v2893_v25, %v9557_v35 }
 0x5f4   :  { %v3267_v26 = vsub.f32 %v7903_v42, %v3257_v55  ;;  %v3268_v45 = vsub.f32 %v7898_v51, %v3257_v55 }
 0x5f6   :  { %v3271_v18 = vmul.f32 1.442695, %v3267_v26  ;;  %v3273_v63 = vmul.f32 1.442695, %v3268_v45  ;;  %v9552_v26 = vld [vmem:[#allocation56_spill] sm:$0xff]  ;;  %v9553_v45 = vld [vmem:[#allocation125_spill] sm:$0xff] }
 0x5f7   :  { %v3021_v40 = vmul.f32 %v7845_v61, %v9552_v26  ;;  %v9559_v61 = vld [vmem:[#allocation33_spill] sm:$0xff] }
 0x5f8   :  { %5345 = vpow2.f32 %v3271_v18  ;;  %v2900_v22 = vpop.permute.xlu1 %2899  ;;  %v3005_v18 = vmul.f32 %v2861_v49, %v9553_v45  ;;  %v9560_v49 = vld [vmem:[#allocation34_spill] sm:$0xff] }
 0x5f9   :  { %5347 = vpow2.f32 %v3273_v63  ;;  %v2971_v63 = vpop.permute.xlu0 %2970  ;;  %v3187_v51 = vsel %vm932_vm0, %v3021_v40, 0.0 }
 0x5fe   :  { %v7911_v12 = vpop.eup %5345 }
 0x5ff   :  { %v7913_v4 = vpop.eup %5347  ;;  %v3279_v13 = vsel %vm932_vm0, %v7911_v12, 0.0 }
 0x600   :  { %v3280_v14 = vsel %vm2009_vm15, %v7913_v4, 0.0 }
 0x601   :  { %v3281_v23 = vadd.f32 %v3280_v14, %v3279_v13  ;;  %v3009_v13 = vmul.f32 %v2887_v54, %v9554_v31  ;;  %v9555_v14 = vld [vmem:[#allocation27_spill] sm:$0xff]  ;;  %v3115_v54 = vsel %vm932_vm0, %v3005_v18, 0.0 }
 0x603   :  { %v3282_v5 = vrot.slane %v3281_v23, 4 }
 0x605   :  { %v3283_v56 = vadd.f32 %v3282_v5, %v3281_v23  ;;  %v3011_v23 = vmul.f32 %v2900_v22, %v9555_v14  ;;  %v3022_v22 = vmul.f32 %v2971_v63, %v9561_v52 }
 0x607   :  { %v3284_v24 = vrot.slane %v3283_v56, 2  ;;  %v3142_v25 = vsel %vm932_vm0, %v3011_v23, 0.0  ;;  %v3188_v23 = vsel %vm932_vm0, %v3022_v22, 0.0 }
 0x608   :  { %v2919_v32 = vpop.permute.xlu1 %2918  ;;  %v3189_v14 = vadd.f32 %v3188_v23, %v3187_v51 }
 0x609   :  { %v3285_v0 = vadd.f32 %v3284_v24, %v3283_v56  ;;  %v3127_v56 = vrot.slane %v3126_v1, 4  ;;  %v3012_v24 = vmul.f32 %v2906_v60, %v9556_v8  ;;  %v3014_v57 = vmul.f32 %v2919_v32, %v9559_v61 }
 0x60a   :  { %v3133_v60 = vsel %vm932_vm0, %v3009_v13, 0.0  ;;  %v3134_v32 = vsel %vm932_vm0, %v3010_v30, 0.0  ;;  %v3160_v30 = vsel %vm932_vm0, %v3015_v53, 0.0  ;;  %v3190_v23 = vrot.slane %v3189_v14, 4 }
 0x60b   :  { %v3286_v41 = vrot.slane %v3285_v0, 1  ;;  %v7944_v8 = vadd.f32 %v3127_v56, %v3126_v1  ;;  %v3152_v63 = vsel %vm932_vm0, %v3014_v57, 0.0  ;;  %v3135_v56 = vadd.f32 %v3134_v32, %v3133_v60  ;;  %v9566_v57 = vld [vmem:[#allocation24_spill] sm:$0xff] }
 0x60d   :  { %v7924_v55 = vadd.f32 %v3286_v41, %v3285_v0  ;;  %v3116_v0 = vsel %vm932_vm0, %v3006_v62, 0.0  ;;  %v3013_v41 = vmul.f32 %v2913_v47, %v9558_v39  ;;  %v3143_v47 = vsel %vm932_vm0, %v3012_v24, 0.0 }
 0x60e   :  { %v3117_v36 = vadd.f32 %v3116_v0, %v3115_v54  ;;  %v9564_v0 = vld [vmem:[#allocation57_spill] sm:$0xff]  ;;  %v3144_v54 = vadd.f32 %v3143_v47, %v3142_v25  ;;  %v3136_v60 = vrot.slane %v3135_v56, 4 }
 0x60f   :  { %5349 = vrcp.f32 %v7924_v55  ;;  %v3151_v18 = vsel %vm932_vm0, %v3013_v41, 0.0  ;;  %v3023_v1 = vmul.f32 %v2978_v16, %v9564_v0  ;;  %v3306_v16 = vand.u32 2147483647, %v7924_v55 }
 0x610   :  { %v2932_v5 = vpop.permute.xlu1 %2931  ;;  %v3118_v24 = vrot.slane %v3117_v36, 4  ;;  %v3153_v41 = vadd.f32 %v3152_v63, %v3151_v18  ;;  %v3145_v25 = vrot.slane %v3144_v54, 4  ;;  %vm3302_vm10 = vweird.f32 %v7924_v55 }
 0x611   :  { %v3016_v42 = vmul.f32 %v2932_v5, %v9560_v49  ;;  %v9563_v5 = vld [vmem:[#allocation39_spill] sm:$0xff]  ;;  %v2945_v49 = vpop.permute.xlu2 %2944  ;;  %v3196_v22 = vsel %vm932_vm0, %v3023_v1, 0.0  ;;  %vm3307_vm12 = vcmp.eq.f32.partialorder %v3306_v16, 8.507059e+37  ;;  %v3137_v1 = vadd.f32 %v3136_v60, %v3135_v56 }
 0x612   :  { %v3017_v40 = vmul.f32 %v2939_v44, %v9563_v5  ;;  %v3018_v44 = vmul.f32 %v2945_v49, %v9565_v33  ;;  %v3154_v18 = vrot.slane %v3153_v41, 4  ;;  %v3129_v16 = vrot.slane %v7944_v8, 2 }
 0x613   :  { %v3161_v3 = vsel %vm932_vm0, %v3016_v42, 0.0  ;;  %v3308_v42 = vand.u32 2147483648, %v7924_v55  ;;  %v3191_v56 = vadd.f32 %v3190_v23, %v3189_v14 }
 0x614   :  { %v3162_v39 = vadd.f32 %v3161_v3, %v3160_v30  ;;  %v3170_v49 = vsel %vm932_vm0, %v3018_v44, 0.0 }
 0x615   :  { %v5350_v62 = vpop.eup %5349  ;;  %v3309_v51 = vor.u32 1.1754944e-38, %v3308_v42  ;;  %v3192_v23 = vrot.slane %v3191_v56, 2 }
 0x616   :  { %v3298_v13 = vmul.f32 %v5350_v62, %v7924_v55  ;;  %vm3303_vm11 = vweird.f32 %v5350_v62  ;;  %v3163_v63 = vrot.slane %v3162_v39, 4 }
 0x617   :  { %vm3304_vm2 = vmor %vm3302_vm10, %vm3303_vm11 }
 0x618   :  { %v2984_v5 = vpop.permute.xlu1 %2983  ;;  %v3299_v61 = vsub.f32 1.0, %v3298_v13 }
 0x619   :  { %v3024_v31 = vmul.f32 %v2984_v5, %v9566_v57  ;;  %v3119_v5 = vadd.f32 %v3118_v24, %v3117_v36  ;;  %v3146_v57 = vadd.f32 %v3145_v25, %v3144_v54  ;;  %v3164_v24 = vadd.f32 %v3163_v63, %v3162_v39  ;;  %v2958_v25 = vpop.permute.xlu2 %2957 }
 0x61a   :  { %v3300_v35 = vmul.f32 %v5350_v62, %v3299_v61  ;;  %v3169_v61 = vsel %vm932_vm0, %v3017_v40, 0.0 }
 0x61b   :  { %v3197_v53 = vsel %vm932_vm0, %v3024_v31, 0.0  ;;  %v3171_v30 = vadd.f32 %v3170_v49, %v3169_v61  ;;  %v3120_v36 = vrot.slane %v3119_v5, 2  ;;  %v3147_v54 = vrot.slane %v3146_v57, 2  ;;  %v9567_v61 = vld [vmem:[#allocation23_spill] sm:$0xff] }
 0x61c   :  { %v3198_v47 = vadd.f32 %v3197_v53, %v3196_v22  ;;  %v3301_v32 = vadd.f32 %v5350_v62, %v3300_v35  ;;  %v3155_v35 = vadd.f32 %v3154_v18, %v3153_v41  ;;  %v3138_v22 = vrot.slane %v3137_v1, 2 }
 0x61d   :  { %v3172_v60 = vrot.slane %v3171_v30, 4  ;;  %v3121_v41 = vadd.f32 %v3120_v36, %v3119_v5  ;;  %v3165_v49 = vrot.slane %v3164_v24, 2 }
 0x61e   :  { %v3199_v3 = vrot.slane %v3198_v47, 4  ;;  %v3305_v13 = vsel %vm3304_vm2, %v5350_v62, %v3301_v32  ;;  %v3156_v39 = vrot.slane %v3155_v35, 2  ;;  %v3139_v63 = vadd.f32 %v3138_v22, %v3137_v1 }
 0x61f   :  { %v3310_v31 = vsel %vm3307_vm12, %v3309_v51, %v3305_v13  ;;  %v3173_v51 = vadd.f32 %v3172_v60, %v3171_v30  ;;  %v3130_v13 = vadd.f32 %v3129_v16, %v7944_v8  ;;  %v3122_v36 = vrot.slane %v3121_v41, 1 }
 0x620   :  { %v7966_v44 = vmul.f32 %v7913_v4, %v3310_v31  ;;  %v7969_v55 = vmul.f32 %v7911_v12, %v3310_v31  ;;  %v3200_v42 = vadd.f32 %v3199_v3, %v3198_v47  ;;  %v3020_v3 = vmul.f32 %v2958_v25, %v9567_v61 }
 0x621   :  { %v3148_v31 = vadd.f32 %v3147_v54, %v3146_v57  ;;  %v3140_v1 = vrot.slane %v3139_v63, 1  ;;  %v3174_v30 = vrot.slane %v3173_v51, 2  ;;  %v3131_v25 = vrot.slane %v3130_v13, 1 }
 0x622   :  { %v3357_v40 = vperm.slane %v7966_v44, 0  ;;  %v3349_v62 = vperm.slane %v7969_v55, 0  ;;  %v3201_v47 = vrot.slane %v3200_v42, 2  ;;  %v3179_v22 = vsel %vm932_vm0, %v3020_v3, 0.0 }
 0x623   :  { %v3193_v8 = vadd.f32 %v3192_v23, %v3191_v56  ;;  %v3149_v16 = vrot.slane %v3148_v31, 1  ;;  %v3123_v54 = vadd.f32 %v3122_v36, %v3121_v41  ;;  %vm9585_vm2 = vcmask 123904  }
 0x624   :  { %v3406_v4 = vmul.f32 %v3357_v40, %v9531_v46  ;;  %v3390_v12 = vmul.f32 %v3349_v62, %v9529_v37  ;;  %v3389_v53 = vmul.f32 %v3349_v62, %v9526_v20  ;;  %v3157_v62 = vadd.f32 %v3156_v39, %v3155_v35  ;;  %v9568_v46 = vld [vmem:[#allocation12_spill] sm:$0xff] }
 0x625   :  { %v3166_v37 = vadd.f32 %v3165_v49, %v3164_v24  ;;  %v3175_v49 = vadd.f32 %v3174_v30, %v3173_v51  ;;  %v9569_v30 = vld [vmem:[#allocation45_spill] sm:$0xff]  ;;  %vm9586_vm12 = vcmask 130048  }
 0x626   :  { %v3480_v32 = vsel %vm932_vm0, %v3406_v4, 0.0  ;;  %v3432_v18 = vsel %vm932_vm0, %v3390_v12, 0.0  ;;  %v3429_v14 = vsel %vm932_vm0, %v3389_v53, 0.0  ;;  %v3202_v12 = vadd.f32 %v3201_v47, %v3200_v42 }
 0x627   :  { %3481 = vadd.xlane.f32.xlu0 %v3480_v32  ;;  %3433 = vadd.xlane.f32.xlu1 %v3432_v18  ;;  %v3405_v53 = vmul.f32 %v3357_v40, %v9528_v17  ;;  %v3158_v32 = vrot.slane %v3157_v62, 1  ;;  %v3167_v18 = vrot.slane %v3166_v37, 1  ;;  %v3141_v42 = vadd.f32 %v3140_v1, %v3139_v63 }
 0x628   :  { %3430 = vadd.xlane.f32.xlu2 %v3429_v14  ;;  %v2952_v5 = vpop.permute.xlu1 %2951  ;;  %v3203_v35 = vrot.slane %v3202_v12, 1  ;;  %v3132_v40 = vadd.f32 %v3131_v25, %v3130_v13  ;;  %v3194_v47 = vrot.slane %v3193_v8, 1  ;;  %v3150_v14 = vadd.f32 %v3149_v16, %v3148_v31 }
 0x629   :  { %v3019_v4 = vmul.f32 %v2952_v5, %v9568_v46  ;;  %v3477_v24 = vsel %vm932_vm0, %v3405_v53, 0.0  ;;  %v3159_v5 = vadd.f32 %v3158_v32, %v3157_v62  ;;  %v3168_v56 = vadd.f32 %v3167_v18, %v3166_v37 }
 0x62a   :  { %v3204_v23 = vadd.f32 %v3203_v35, %v3202_v12  ;;  %v3176_v36 = vrot.slane %v3175_v49, 1 }
 0x62b   :  { %v3178_v60 = vsel %vm932_vm0, %v3019_v4, 0.0  ;;  %v3233_v4 = vsel %vm1197_vm3, %v3132_v40, %v3123_v54 }
 0x62c   :  { %v3180_v57 = vadd.f32 %v3179_v22, %v3178_v60  ;;  %v3234_v41 = vsel %vm1199_vm4, %v3141_v42, %v3233_v4  ;;  %v3195_v60 = vadd.f32 %v3194_v47, %v3193_v8  ;;  %v3177_v62 = vadd.f32 %v3176_v36, %v3175_v49  ;;  %v9571_v8 = vld [vmem:[#allocation26_spill] sm:$0xff] }
 0x62d   :  { %v3235_v17 = vsel %vm1201_vm5, %v3150_v14, %v3234_v41 }
 0x62e   :  { %v3181_v39 = vrot.slane %v3180_v57, 4  ;;  %v3236_v63 = vsel %vm1203_vm6, %v3159_v5, %v3235_v17  ;;  %v3240_v13 = vsel %vm1197_vm3, %v3204_v23, %v3195_v60 }
 0x62f   :  { %3478 = vadd.xlane.f32.xlu1 %v3477_v24  ;;  %v3237_v51 = vsel %vm1205_vm7, %v3168_v56, %v3236_v63  ;;  %v7994_v37 = vadd.f32 %v3240_v13, %v9569_v30 }
 0x630   :  { %v3182_v3 = vadd.f32 %v3181_v39, %v3180_v57  ;;  %v3238_v12 = vsel %vm1207_vm8, %v3177_v62, %v3237_v51 }
 0x631   :  { %9570 = vst [vmem:[#allocation51_spill] sm:$0xff] %v7994_v37  ;;  %v3259_v17 = vsel %vm2009_vm15, %v7994_v37, -inf }
 0x632   :  { %v3183_v22 = vrot.slane %v3182_v3, 2 }
 0x634   :  { %v3184_v53 = vadd.f32 %v3183_v22, %v3182_v3 }
 0x636   :  { %v3185_v31 = vrot.slane %v3184_v53, 1 }
 0x638   :  { %v3186_v1 = vadd.f32 %v3185_v31, %v3184_v53 }
 0x63a   :  { %v3239_v25 = vsel %vm1209_vm9, %v3186_v1, %v3238_v12 }
 0x63b   :  { %v7999_v16 = vadd.f32 %v3239_v25, %v9571_v8 }
 0x63d   :  { %9572 = vst [vmem:[#allocation81_spill] sm:$0xff] %v7999_v16  ;;  %v3258_v57 = vsel %vm932_vm0, %v7999_v16, -inf }
 0x63e   :  { %v3260_v54 = vmax.f32 %v3258_v57, %v3259_v17 }
 0x640   :  { %v3261_v32 = vrot.slane %v3260_v54, 4 }
 0x642   :  { %v3262_v18 = vmax.f32 %v3260_v54, %v3261_v32 }
 0x644   :  { %v3263_v35 = vrot.slane %v3262_v18, 2 }
 0x646   :  { %v3264_v39 = vmax.f32 %v3262_v18, %v3263_v35  ;;  %v3334_v35 = vrot.slane %v7969_v55, 2 }
 0x648   :  { %v3265_v24 = vrot.slane %v3264_v39, 1 }
 0x64a   :  { %v3266_v42 = vmax.f32 %v3264_v39, %v3265_v24  ;;  %v3333_v39 = vrot.slane %v7969_v55, 1 }
 0x64c   :  { %v3269_v49 = vsub.f32 %v7999_v16, %v3266_v42  ;;  %v3270_v40 = vsub.f32 %v7994_v37, %v3266_v42 }
 0x64e   :  { %v3275_v47 = vmul.f32 1.442695, %v3269_v49  ;;  %v3277_v14 = vmul.f32 1.442695, %v3270_v40 }
 0x650   :  { %5351 = vpow2.f32 %v3275_v47 }
 0x651   :  { %5353 = vpow2.f32 %v3277_v14 }
 0x656   :  { %v5352_v3 = vpop.eup %5351 }
 0x657   :  { %v5354_v5 = vpop.eup %5353  ;;  %v3288_v4 = vsel %vm932_vm0, %v5352_v3, 0.0 }
 0x658   :  { %v3289_v56 = vsel %vm2009_vm15, %v5354_v5, 0.0 }
 0x659   :  { %v3290_v23 = vadd.f32 %v3289_v56, %v3288_v4 }
 0x65b   :  { %v3291_v22 = vrot.slane %v3290_v23, 4 }
 0x65d   :  { %v3292_v41 = vadd.f32 %v3291_v22, %v3290_v23  ;;  %v3335_v23 = vrot.slane %v7969_v55, 3 }
 0x65f   :  { %v3293_v36 = vrot.slane %v3292_v41, 2 }
 0x661   :  { %v3294_v60 = vadd.f32 %v3293_v36, %v3292_v41 }
 0x663   :  { %v3295_v53 = vrot.slane %v3294_v60, 1 }
 0x665   :  { %v3296_v63 = vadd.f32 %v3295_v53, %v3294_v60  ;;  %v3352_v60 = vperm.slane %v3335_v23, 0 }
 0x667   :  { %5355 = vrcp.f32 %v3296_v63  ;;  %v3324_v62 = vand.u32 2147483648, %v3296_v63  ;;  %v3322_v30 = vand.u32 2147483647, %v3296_v63  ;;  %vm3318_vm14 = vweird.f32 %v3296_v63 }
 0x669   :  { %v3325_v25 = vor.u32 1.1754944e-38, %v3324_v62  ;;  %vm3323_vm10 = vcmp.eq.f32.partialorder %v3322_v30, 8.507059e+37  ;;  %v3336_v62 = vrot.slane %v7969_v55, 4 }
 0x66d   :  { %v5356_v51 = vpop.eup %5355 }
 0x66e   :  { %v3314_v13 = vmul.f32 %v5356_v51, %v3296_v63  ;;  %vm3319_vm13 = vweird.f32 %v5356_v51  ;;  %v3396_v63 = vmul.f32 %v3352_v60, %v9536_v58 }
 0x66f   :  { %vm3320_vm11 = vmor %vm3318_vm14, %vm3319_vm13 }
 0x670   :  { %v3315_v31 = vsub.f32 1.0, %v3314_v13  ;;  %v3337_v13 = vrot.slane %v7969_v55, 5  ;;  %vm9587_vm13 = vmmov %vm9585_vm2 }
 0x671   :  { %vm9588_vm14 = vmmov %vm9586_vm12 }
 0x672   :  { %v3316_v1 = vmul.f32 %v5356_v51, %v3315_v31 }
 0x674   :  { %v3317_v12 = vadd.f32 %v5356_v51, %v3316_v1  ;;  %v3450_v1 = vsel %vm932_vm0, %v3396_v63, 0.0 }
 0x676   :  { %v3321_v8 = vsel %vm3320_vm11, %v5356_v51, %v3317_v12  ;;  %v3354_v12 = vperm.slane %v3337_v13, 0 }
 0x677   :  { %v3326_v17 = vsel %vm3323_vm10, %v3325_v25, %v3321_v8  ;;  %v3353_v8 = vperm.slane %v3336_v62, 0 }
 0x678   :  { %v8009_v57 = vmul.f32 %v5354_v5, %v3326_v17  ;;  %v8011_v54 = vmul.f32 %v5352_v3, %v3326_v17  ;;  %v3351_v3 = vperm.slane %v3334_v35, 0  ;;  %v3350_v5 = vperm.slane %v3333_v39, 0 }
 0x679   :  { %v3399_v17 = vmul.f32 %v3354_v12, %v9539_v27  ;;  %v3397_v35 = vmul.f32 %v3353_v8, %v9537_v28 }
 0x67a   :  { %v3367_v32 = vperm.slane %v8009_v57, 0  ;;  %v3359_v18 = vperm.slane %v8011_v54, 0  ;;  %v3393_v4 = vmul.f32 %v3351_v3, %v9533_v9  ;;  %v3391_v22 = vmul.f32 %v3350_v5, %v9527_v7 }
 0x67b   :  { %v3392_v51 = vmul.f32 %v3350_v5, %v9525_v19  ;;  %v3394_v31 = vmul.f32 %v3351_v3, %v9535_v6  ;;  %v3459_v39 = vsel %vm932_vm0, %v3399_v17, 0.0  ;;  %v3400_v3 = vmul.f32 %v3354_v12, %v9541_v11 }
 0x67c   :  { %v3426_v24 = vmul.f32 %v3367_v32, %v9561_v52  ;;  %v3410_v42 = vmul.f32 %v3359_v18, %v9551_v43  ;;  %v3409_v49 = vmul.f32 %v3359_v18, %v9553_v45  ;;  %v3425_v56 = vmul.f32 %v3367_v32, %v9552_v26 }
 0x67d   :  { %v3441_v41 = vsel %vm932_vm0, %v3393_v4, 0.0  ;;  %v3435_v53 = vsel %vm932_vm0, %v3391_v22, 0.0  ;;  %v3438_v30 = vsel %vm932_vm0, %v3392_v51, 0.0  ;;  %v3444_v25 = vsel %vm932_vm0, %v3394_v31, 0.0 }
 0x67e   :  { %v3540_v40 = vsel %vm932_vm0, %v3426_v24, 0.0  ;;  %v3492_v47 = vsel %vm932_vm0, %v3410_v42, 0.0  ;;  %v3489_v14 = vsel %vm932_vm0, %v3409_v49, 0.0  ;;  %v3537_v36 = vsel %vm932_vm0, %v3425_v56, 0.0 }
 0x67f   :  { %3541 = vadd.xlane.f32.xlu1 %v3540_v40  ;;  %3493 = vadd.xlane.f32.xlu2 %v3492_v47  ;;  %v3395_v32 = vmul.f32 %v3352_v60, %v9530_v15  ;;  %v3338_v18 = vrot.slane %v7969_v55, 6  ;;  %v3453_v49 = vsel %vm932_vm0, %v3397_v35, 0.0  ;;  %v3398_v47 = vmul.f32 %v3353_v8, %v9534_v38 }
 0x680   :  { %3490 = vadd.xlane.f32.xlu0 %v3489_v14  ;;  %v3340_v14 = vrot.slane %v7966_v44, 1  ;;  %v3339_v5 = vrot.slane %v7969_v55, 7  ;;  %v3462_v22 = vsel %vm932_vm0, %v3400_v3, 0.0  ;;  %v3341_v44 = vrot.slane %v8011_v54, 1 }
 0x681   :  { %v3447_v24 = vsel %vm932_vm0, %v3395_v32, 0.0  ;;  %v3355_v42 = vperm.slane %v3338_v18, 0  ;;  %v3456_v56 = vsel %vm932_vm0, %v3398_v47, 0.0  ;;  %v3343_v12 = vrot.slane %v8011_v54, 3 }
 0x682   :  { %v3358_v23 = vperm.slane %v3340_v14, 0  ;;  %v3360_v51 = vperm.slane %v3341_v44, 0  ;;  %v3346_v44 = vrot.slane %v8011_v54, 6 }
 0x683   :  { %v3402_v40 = vmul.f32 %v3355_v42, %v9542_v48  ;;  %v3401_v60 = vmul.f32 %v3355_v42, %v9540_v10  ;;  %v3362_v18 = vperm.slane %v3343_v12, 0  ;;  %v3344_v42 = vrot.slane %v8011_v54, 4 }
 0x684   :  { %v3411_v62 = vmul.f32 %v3360_v51, %v9550_v29  ;;  %v3407_v35 = vmul.f32 %v3358_v23, %v9538_v59  ;;  %v3347_v12 = vrot.slane %v8011_v54, 7 }
 0x685   :  { %v3468_v4 = vsel %vm932_vm0, %v3402_v40, 0.0  ;;  %v3465_v63 = vsel %vm932_vm0, %v3401_v60, 0.0  ;;  %v3363_v3 = vperm.slane %v3344_v42, 0  ;;  %v9581_v42 = vld [vmem:[#allocation38_spill] sm:$0xff] }
 0x686   :  { %v3495_v8 = vsel %vm932_vm0, %v3411_v62, 0.0  ;;  %v3483_v47 = vsel %vm932_vm0, %v3407_v35, 0.0  ;;  %v3366_v35 = vperm.slane %v3347_v12, 0 }
 0x687   :  { %3442 = vadd.xlane.f32.xlu1 %v3441_v41  ;;  %3538 = vadd.xlane.f32.xlu2 %v3537_v36  ;;  %v3356_v41 = vperm.slane %v3339_v5, 0  ;;  %v3408_v36 = vmul.f32 %v3358_v23, %v9532_v21 }
 0x688   :  { %3436 = vadd.xlane.f32.xlu0 %v3435_v53 }
 0x689   :  { %v3403_v53 = vmul.f32 %v3356_v41, %v9544_v50  ;;  %v3486_v55 = vsel %vm932_vm0, %v3408_v36, 0.0  ;;  %v3404_v31 = vmul.f32 %v3356_v41, %v9543_v2  ;;  %v3345_v41 = vrot.slane %v8011_v54, 5  ;;  %v9577_v36 = vld [vmem:[#allocation33_spill] sm:$0xff] }
 0x68a   :  { %v3418_v60 = vmul.f32 %v3363_v3, %v9577_v36 }
 0x68b   :  { %v3471_v13 = vsel %vm932_vm0, %v3403_v53, 0.0 }
 0x68f   :  { %3451 = vadd.xlane.f32.xlu1 %v3450_v1  ;;  %3439 = vadd.xlane.f32.xlu2 %v3438_v30  ;;  %v3342_v1 = vrot.slane %v8011_v54, 2  ;;  %v3412_v30 = vmul.f32 %v3360_v51, %v9549_v34  ;;  %v3516_v51 = vsel %vm932_vm0, %v3418_v60, 0.0  ;;  %v3348_v54 = vrot.slane %v8009_v57, 1  ;;  %v9582_v57 = vld [vmem:[#allocation24_spill] sm:$0xff] }
 0x690   :  { %3445 = vadd.xlane.f32.xlu0 %v3444_v25  ;;  %v3474_v25 = vsel %vm932_vm0, %v3404_v31, 0.0  ;;  %v9578_v31 = vld [vmem:[#allocation31_spill] sm:$0xff] }
 0x691   :  { %v3361_v17 = vperm.slane %v3342_v1, 0  ;;  %v3498_v32 = vsel %vm932_vm0, %v3412_v30, 0.0  ;;  %v3416_v62 = vmul.f32 %v3362_v18, %v9578_v31  ;;  %v9579_v1 = vld [vmem:[#allocation34_spill] sm:$0xff] }
 0x697   :  { %3460 = vadd.xlane.f32.xlu1 %v3459_v39  ;;  %3448 = vadd.xlane.f32.xlu2 %v3447_v24  ;;  %v9573_v39 = vld [vmem:[#allocation13_spill] sm:$0xff] }
 0x698   :  { %3454 = vadd.xlane.f32.xlu0 %v3453_v49  ;;  %v3414_v24 = vmul.f32 %v3361_v17, %v9573_v39  ;;  %v9574_v49 = vld [vmem:[#allocation27_spill] sm:$0xff] }
 0x699   :  { %v3415_v40 = vmul.f32 %v3362_v18, %v9574_v49  ;;  %v3423_v18 = vmul.f32 %v3366_v35, %v9568_v46 }
 0x69a   :  { %v3504_v14 = vsel %vm932_vm0, %v3414_v24, 0.0 }
 0x69b   :  { %v3507_v5 = vsel %vm932_vm0, %v3415_v40, 0.0 }
 0x69f   :  { %3469 = vadd.xlane.f32.xlu1 %v3468_v4  ;;  %3457 = vadd.xlane.f32.xlu2 %v3456_v56  ;;  %v9575_v4 = vld [vmem:[#allocation25_spill] sm:$0xff] }
 0x6a0   :  { %3463 = vadd.xlane.f32.xlu0 %v3462_v22  ;;  %v3413_v56 = vmul.f32 %v3361_v17, %v9575_v4  ;;  %v9576_v22 = vld [vmem:[#allocation28_spill] sm:$0xff]  ;;  %v3510_v17 = vsel %vm932_vm0, %v3416_v62, 0.0 }
 0x6a1   :  { %v3417_v23 = vmul.f32 %v3363_v3, %v9576_v22  ;;  %v3531_v3 = vsel %vm932_vm0, %v3423_v18, 0.0 }
 0x6a2   :  { %v3501_v53 = vsel %vm932_vm0, %v3413_v56, 0.0  ;;  %v3368_v56 = vperm.slane %v3348_v54, 0 }
 0x6a7   :  { %3487 = vadd.xlane.f32.xlu1 %v3486_v55  ;;  %3466 = vadd.xlane.f32.xlu2 %v3465_v63  ;;  %v3513_v55 = vsel %vm932_vm0, %v3417_v23, 0.0  ;;  %v3364_v63 = vperm.slane %v3345_v41, 0  ;;  %v3427_v41 = vmul.f32 %v3368_v56, %v9564_v0 }
 0x6a8   :  { %3472 = vadd.xlane.f32.xlu0 %v3471_v13  ;;  %v3365_v13 = vperm.slane %v3346_v44, 0 }
 0x6a9   :  { %v3420_v30 = vmul.f32 %v3364_v63, %v9579_v1  ;;  %v3419_v40 = vmul.f32 %v3364_v63, %v9581_v42  ;;  %v3543_v44 = vsel %vm932_vm0, %v3427_v41, 0.0  ;;  %v3434_v63 = vpop.xlane.xlu1 %3433 }
 0x6aa   :  { %v3422_v23 = vmul.f32 %v3365_v13, %v9565_v33 }
 0x6ac   :  { %v3528_v60 = vsel %vm932_vm0, %v3422_v23, 0.0 }
 0x6af   :  { %3475 = vadd.xlane.f32.xlu2 %v3474_v25  ;;  %3496 = vadd.xlane.f32.xlu1 %v3495_v8  ;;  %v9580_v25 = vld [vmem:[#allocation39_spill] sm:$0xff] }
 0x6b0   :  { %3499 = vadd.xlane.f32.xlu0 %v3498_v32  ;;  %v3421_v8 = vmul.f32 %v3365_v13, %v9580_v25  ;;  %v3522_v32 = vsel %vm932_vm0, %v3420_v30, 0.0  ;;  %v8105_v30 = vpop.xlane.xlu0 %3481 }
 0x6b1   :  { %v8103_v62 = vpop.xlane.xlu1 %3478 }
 0x6b2   :  { %v3525_v24 = vsel %vm932_vm0, %v3421_v8, 0.0 }
 0x6b7   :  { %3484 = vadd.xlane.f32.xlu2 %v3483_v47  ;;  %3505 = vadd.xlane.f32.xlu1 %v3504_v14  ;;  %v3424_v47 = vmul.f32 %v3366_v35, %v9567_v61  ;;  %v3519_v14 = vsel %vm932_vm0, %v3419_v40, 0.0  ;;  %v9584_v40 = vld [vmem:[#allocation29_spill] sm:$0xff] }
 0x6b8   :  { %3508 = vadd.xlane.f32.xlu0 %v3507_v5 }
 0x6b9   :  { %v3534_v5 = vsel %vm932_vm0, %v3424_v47, 0.0 }
 0x6bf   :  { %3502 = vadd.xlane.f32.xlu2 %v3501_v53  ;;  %3514 = vadd.xlane.f32.xlu1 %v3513_v55  ;;  %v3428_v53 = vmul.f32 %v3368_v56, %v9582_v57 }
 0x6c0   :  { %3517 = vadd.xlane.f32.xlu0 %v3516_v51  ;;  %v3431_v51 = vpop.xlane.xlu2 %3430 }
 0x6c1   :  { %v3546_v55 = vsel %vm932_vm0, %v3428_v53, 0.0 }
 0x6c7   :  { %3511 = vadd.xlane.f32.xlu2 %v3510_v17  ;;  %3523 = vadd.xlane.f32.xlu1 %v3522_v32  ;;  %v9583_v17 = vld [vmem:[#allocation36_spill] sm:$0xff] }
 0x6c8   :  { %3526 = vadd.xlane.f32.xlu0 %v3525_v24 }
 0x6cf   :  { %3520 = vadd.xlane.f32.xlu2 %v3519_v14  ;;  %3532 = vadd.xlane.f32.xlu1 %v3531_v3 }
 0x6d0   :  { %3535 = vadd.xlane.f32.xlu0 %v3534_v5 }
 0x6d7   :  { %3529 = vadd.xlane.f32.xlu2 %v3528_v60 }
 0x6d8   :  { %3544 = vadd.xlane.f32.xlu0 %v3543_v44 }
 0x6df   :  { %3547 = vadd.xlane.f32.xlu2 %v3546_v55 }
 0x6f2   :  { %v3542_v13 = vpop.xlane.xlu1 %3541  ;;  %v3494_v12 = vpop.xlane.xlu2 %3493 }
 0x6f3   :  { %v3570_v8 = vmul.f32 %v3494_v12, %v3494_v12  ;;  %v3912_v32 = vperm.slane %v3494_v12, %v9583_v17  ;;  %v3491_v35 = vpop.xlane.xlu0 %3490  ;;  %v3586_v5 = vmul.f32 %v3542_v13, %v3542_v13  ;;  %v3936_v41 = vperm.slane %v3542_v13, %v9583_v17 }
 0x6f4   :  { %v3569_v24 = vmul.f32 %v3491_v35, %v3491_v35  ;;  %v3911_v18 = vperm.slane %v3491_v35, %v9584_v40  ;;  %v3549_v35 = vmul.f32 %v3431_v51, %v3431_v51  ;;  %v3881_v13 = vperm.slane %v3431_v51, %v9584_v40 }
 0x6f5   :  { %v3660_v47 = vperm.slane %v3570_v8, %v9583_v17  ;;  %v3684_v55 = vperm.slane %v3586_v5, %v9583_v17 }
 0x6f6   :  { %v3659_v54 = vperm.slane %v3569_v24, %v9584_v40  ;;  %v8112_v14 = vsel %vm1138_vm1, %v3912_v32, %v3911_v18  ;;  %v3550_v32 = vmul.f32 %v3434_v63, %v3434_v63  ;;  %v3882_v18 = vperm.slane %v3434_v63, %v9583_v17 }
 0x6f8   :  { %v8115_v3 = vsel %vm1138_vm1, %v3660_v47, %v3659_v54  ;;  %v3630_v54 = vperm.slane %v3550_v32, %v9583_v17  ;;  %v3883_v51 = vsel %vm1138_vm1, %v3882_v18, %v3881_v13 }
 0x6fa   :  { %v3443_v56 = vpop.xlane.xlu1 %3442  ;;  %v3539_v23 = vpop.xlane.xlu2 %3538 }
 0x6fb   :  { %v3585_v60 = vmul.f32 %v3539_v23, %v3539_v23  ;;  %v3935_v44 = vperm.slane %v3539_v23, %v9584_v40  ;;  %v3437_v53 = vpop.xlane.xlu0 %3436  ;;  %v3553_v23 = vmul.f32 %v3443_v56, %v3443_v56 }
 0x6fc   :  { %v3551_v47 = vmul.f32 %v3437_v53, %v3437_v53 }
 0x6fd   :  { %v3683_v12 = vperm.slane %v3585_v60, %v9584_v40  ;;  %v8122_v8 = vsel %vm1138_vm1, %v3936_v41, %v3935_v44  ;;  %v3629_v60 = vperm.slane %v3549_v35, %v9584_v40  ;;  %v3884_v41 = vperm.slane %v3437_v53, %v9584_v40 }
 0x6fe   :  { %v3632_v32 = vperm.slane %v3551_v47, %v9584_v40  ;;  %v3635_v35 = vperm.slane %v3553_v23, %v9584_v40 }
 0x6ff   :  { %v8125_v24 = vsel %vm1138_vm1, %v3684_v55, %v3683_v12  ;;  %v3887_v55 = vperm.slane %v3443_v56, %v9584_v40  ;;  %v3631_v56 = vsel %vm1138_vm1, %v3630_v54, %v3629_v60 }
 0x702   :  { %v3452_v37 = vpop.xlane.xlu1 %3451  ;;  %v3440_v5 = vpop.xlane.xlu2 %3439 }
 0x703   :  { %v3552_v44 = vmul.f32 %v3440_v5, %v3440_v5  ;;  %v3885_v16 = vperm.slane %v3440_v5, %v9583_v17  ;;  %v3446_v52 = vpop.xlane.xlu0 %3445 }
 0x704   :  { %v3554_v12 = vmul.f32 %v3446_v52, %v3446_v52  ;;  %v3888_v63 = vperm.slane %v3446_v52, %v9583_v17 }
 0x705   :  { %v3633_v26 = vperm.slane %v3552_v44, %v9583_v17  ;;  %v3886_v0 = vsel %vm1138_vm1, %v3885_v16, %v3884_v41  ;;  %v3556_v44 = vmul.f32 %v3452_v37, %v3452_v37 }
 0x706   :  { %v3941_v53 = vsel %vm1197_vm3, %v3886_v0, %v3883_v51  ;;  %v3636_v5 = vperm.slane %v3554_v12, %v9583_v17  ;;  %v3889_v46 = vsel %vm1138_vm1, %v3888_v63, %v3887_v55  ;;  %v3891_v0 = vperm.slane %v3452_v37, %v9583_v17 }
 0x707   :  { %v3634_v52 = vsel %vm1138_vm1, %v3633_v26, %v3632_v32  ;;  %v3942_v18 = vsel %vm1199_vm4, %v3889_v46, %v3941_v53  ;;  %v3639_v54 = vperm.slane %v3556_v44, %v9583_v17 }
 0x708   :  { %v3689_v13 = vsel %vm1197_vm3, %v3634_v52, %v3631_v56  ;;  %v3637_v47 = vsel %vm1138_vm1, %v3636_v5, %v3635_v35 }
 0x709   :  { %v3690_v16 = vsel %vm1199_vm4, %v3637_v47, %v3689_v13 }
 0x70a   :  { %v3461_v23 = vpop.xlane.xlu1 %3460  ;;  %v3449_v41 = vpop.xlane.xlu2 %3448 }
 0x70b   :  { %v3555_v12 = vmul.f32 %v3449_v41, %v3449_v41  ;;  %v3890_v55 = vperm.slane %v3449_v41, %v9584_v40  ;;  %v3455_v63 = vpop.xlane.xlu0 %3454  ;;  %v3559_v53 = vmul.f32 %v3461_v23, %v3461_v23  ;;  %v3896_v44 = vperm.slane %v3461_v23, %v9584_v40 }
 0x70c   :  { %v3557_v35 = vmul.f32 %v3455_v63, %v3455_v63  ;;  %v3893_v56 = vperm.slane %v3455_v63, %v9584_v40 }
 0x70d   :  { %v3638_v26 = vperm.slane %v3555_v12, %v9584_v40  ;;  %v3892_v46 = vsel %vm1138_vm1, %v3891_v0, %v3890_v55  ;;  %v3644_v55 = vperm.slane %v3559_v53, %v9584_v40 }
 0x70e   :  { %v3943_v60 = vsel %vm1201_vm5, %v3892_v46, %v3942_v18  ;;  %v3641_v0 = vperm.slane %v3557_v35, %v9584_v40 }
 0x70f   :  { %v3640_v51 = vsel %vm1138_vm1, %v3639_v54, %v3638_v26 }
 0x710   :  { %v3691_v32 = vsel %vm1201_vm5, %v3640_v51, %v3690_v16 }
 0x712   :  { %v8157_v5 = vpop.xlane.xlu1 %3469  ;;  %v3458_v37 = vpop.xlane.xlu2 %3457 }
 0x713   :  { %v3558_v52 = vmul.f32 %v3458_v37, %v3458_v37  ;;  %v3894_v13 = vperm.slane %v3458_v37, %v9583_v17  ;;  %v3464_v47 = vpop.xlane.xlu0 %3463 }
 0x714   :  { %v3560_v41 = vmul.f32 %v3464_v47, %v3464_v47  ;;  %v3897_v18 = vperm.slane %v3464_v47, %v9583_v17 }
 0x715   :  { %v3642_v16 = vperm.slane %v3558_v52, %v9583_v17  ;;  %v3895_v12 = vsel %vm1138_vm1, %v3894_v13, %v3893_v56 }
 0x716   :  { %v3944_v54 = vsel %vm1203_vm6, %v3895_v12, %v3943_v60  ;;  %v3645_v63 = vperm.slane %v3560_v41, %v9583_v17  ;;  %v3898_v26 = vsel %vm1138_vm1, %v3897_v18, %v3896_v44  ;;  %v3900_v60 = vperm.slane %v8157_v5, %v9583_v17 }
 0x717   :  { %v3643_v46 = vsel %vm1138_vm1, %v3642_v16, %v3641_v0  ;;  %v3945_v23 = vsel %vm1205_vm7, %v3898_v26, %v3944_v54 }
 0x718   :  { %v3646_v51 = vsel %vm1138_vm1, %v3645_v63, %v3644_v55  ;;  %v3692_v35 = vsel %vm1203_vm6, %v3643_v46, %v3691_v32  ;;  %v3565_v46 = vmul.f32 %v8103_v62, %v8103_v62 }
 0x719   :  { %v8175_v37 = vsel %vm1205_vm7, %v3646_v51, %v3692_v35  ;;  %v3566_v51 = vmul.f32 %v8105_v30, %v8105_v30 }
 0x71a   :  { %v3488_v56 = vpop.xlane.xlu1 %3487  ;;  %v8177_v52 = vpop.xlane.xlu2 %3466 }
 0x71b   :  { %v3899_v53 = vperm.slane %v8177_v52, %v9584_v40  ;;  %v8183_v13 = vpop.xlane.xlu0 %3472  ;;  %v3568_v35 = vmul.f32 %v3488_v56, %v3488_v56 }
 0x71c   :  { %v3902_v18 = vperm.slane %v8183_v13, %v9584_v40 }
 0x71d   :  { %v3901_v47 = vsel %vm1138_vm1, %v3900_v60, %v3899_v53 }
 0x71e   :  { %v3946_v44 = vsel %vm1207_vm8, %v3901_v47, %v3945_v23  ;;  %v3653_v47 = vperm.slane %v3565_v46, %v9584_v40 }
 0x722   :  { %v8187_v41 = vpop.xlane.xlu2 %3475  ;;  %v3497_v32 = vpop.xlane.xlu1 %3496 }
 0x723   :  { %v3903_v0 = vperm.slane %v8187_v41, %v9583_v17  ;;  %v3914_v16 = vperm.slane %v3497_v32, %v9584_v40  ;;  %v3500_v12 = vpop.xlane.xlu0 %3499  ;;  %v3571_v36 = vmul.f32 %v3497_v32, %v3497_v32 }
 0x724   :  { %v3915_v55 = vperm.slane %v3500_v12, %v9583_v17  ;;  %v3572_v42 = vmul.f32 %v3500_v12, %v3500_v12 }
 0x725   :  { %v3904_v54 = vsel %vm1138_vm1, %v3903_v0, %v3902_v18  ;;  %v3909_v18 = vperm.slane %v3488_v56, %v9583_v17 }
 0x726   :  { %v8197_v63 = vsel %vm1209_vm9, %v3904_v54, %v3946_v44  ;;  %v3916_v26 = vsel %vm1138_vm1, %v3915_v55, %v3914_v16  ;;  %v3654_v55 = vperm.slane %v3566_v51, %v9583_v17  ;;  %v3657_v54 = vperm.slane %v3568_v35, %v9583_v17 }
 0x727   :  { %v3949_v23 = vsel %vm1197_vm3, %v3916_v26, %v8112_v14 }
 0x728   :  { %v3655_v57 = vsel %vm1138_vm1, %v3654_v55, %v3653_v47 }
 0x72a   :  { %v3485_v60 = vpop.xlane.xlu2 %3484  ;;  %v3506_v53 = vpop.xlane.xlu1 %3505 }
 0x72b   :  { %v3567_v44 = vmul.f32 %v3485_v60, %v3485_v60  ;;  %v3908_v0 = vperm.slane %v3485_v60, %v9584_v40  ;;  %v3509_v16 = vpop.xlane.xlu0 %3508  ;;  %v3918_v51 = vperm.slane %v3506_v53, %v9583_v17 }
 0x72c   :  { %v3920_v55 = vperm.slane %v3509_v16, %v9584_v40 }
 0x72d   :  { %v3656_v14 = vperm.slane %v3567_v44, %v9584_v40  ;;  %v8213_v26 = vsel %vm1138_vm1, %v3909_v18, %v3908_v0 }
 0x72f   :  { %v3658_v61 = vsel %vm1138_vm1, %v3657_v54, %v3656_v14 }
 0x730   :  { %v3696_v46 = vsel %vm1197_vm3, %v3658_v61, %v3655_v57 }
 0x731   :  { %v3712_v56 = vsel %vm9585_vm2, %v3696_v46, 0.0 }
 0x732   :  { %v3503_v25 = vpop.xlane.xlu2 %3502  ;;  %v3515_v60 = vpop.xlane.xlu1 %3514  ;;  %3713 = vadd.xlane.f32.xlu0 %v3712_v56 }
 0x733   :  { %v3917_v35 = vperm.slane %v3503_v25, %v9584_v40  ;;  %v3923_v44 = vperm.slane %v3515_v60, %v9584_v40  ;;  %v3518_v33 = vpop.xlane.xlu0 %3517  ;;  %v3573_v1 = vmul.f32 %v3503_v25, %v3503_v25 }
 0x734   :  { %v3924_v18 = vperm.slane %v3518_v33, %v9583_v17 }
 0x735   :  { %v3919_v47 = vsel %vm1138_vm1, %v3918_v51, %v3917_v35  ;;  %v3665_v4 = vperm.slane %v3573_v1, %v9584_v40 }
 0x736   :  { %v3950_v0 = vsel %vm1199_vm4, %v3919_v47, %v3949_v23  ;;  %v3925_v61 = vsel %vm1138_vm1, %v3924_v18, %v3923_v44  ;;  %v3574_v23 = vmul.f32 %v3506_v53, %v3506_v53  ;;  %v3662_v44 = vperm.slane %v3571_v36, %v9584_v40 }
 0x737   :  { %v3663_v18 = vperm.slane %v3572_v42, %v9583_v17  ;;  %v3575_v47 = vmul.f32 %v3509_v16, %v3509_v16  ;;  %v3578_v53 = vmul.f32 %v3518_v33, %v3518_v33 }
 0x739   :  { %v3664_v42 = vsel %vm1138_vm1, %v3663_v18, %v3662_v44  ;;  %v3668_v16 = vperm.slane %v3575_v47, %v9584_v40 }
 0x73a   :  { %v3512_v57 = vpop.xlane.xlu2 %3511  ;;  %v3524_v14 = vpop.xlane.xlu1 %3523  ;;  %v3697_v33 = vsel %vm1197_vm3, %v3664_v42, %v8115_v3 }
 0x73b   :  { %v3921_v54 = vperm.slane %v3512_v57, %v9583_v17  ;;  %v3527_v46 = vpop.xlane.xlu0 %3526  ;;  %v3576_v35 = vmul.f32 %v3512_v57, %v3512_v57  ;;  %v3927_v49 = vperm.slane %v3524_v14, %v9583_v17  ;;  %v3580_v1 = vmul.f32 %v3524_v14, %v3524_v14 }
 0x73c   :  { %v3581_v44 = vmul.f32 %v3527_v46, %v3527_v46 }
 0x73d   :  { %v3922_v56 = vsel %vm1138_vm1, %v3921_v54, %v3920_v55  ;;  %v3669_v12 = vperm.slane %v3576_v35, %v9583_v17 }
 0x73e   :  { %v3951_v22 = vsel %vm1201_vm5, %v3922_v56, %v3950_v0 }
 0x73f   :  { %v3952_v51 = vsel %vm1203_vm6, %v3925_v61, %v3951_v22  ;;  %v3666_v22 = vperm.slane %v3574_v23, %v9583_v17  ;;  %v3577_v61 = vmul.f32 %v3515_v60, %v3515_v60  ;;  %v3670_v56 = vsel %vm1138_vm1, %v3669_v12, %v3668_v16 }
 0x740   :  { %v3672_v60 = vperm.slane %v3578_v53, %v9583_v17  ;;  %v3929_v12 = vperm.slane %v3527_v46, %v9584_v40 }
 0x741   :  { %v3667_v54 = vsel %vm1138_vm1, %v3666_v22, %v3665_v4 }
 0x742   :  { %v3521_v31 = vpop.xlane.xlu2 %3520  ;;  %v3533_v57 = vpop.xlane.xlu1 %3532  ;;  %v3698_v14 = vsel %vm1199_vm4, %v3667_v54, %v3697_v33 }
 0x743   :  { %v3926_v32 = vperm.slane %v3521_v31, %v9584_v40  ;;  %v3579_v0 = vmul.f32 %v3521_v31, %v3521_v31  ;;  %v3536_v25 = vpop.xlane.xlu0 %3535  ;;  %v3583_v35 = vmul.f32 %v3533_v57, %v3533_v57  ;;  %v3932_v4 = vperm.slane %v3533_v57, %v9584_v40 }
 0x744   :  { %v3584_v23 = vmul.f32 %v3536_v25, %v3536_v25  ;;  %v3933_v18 = vperm.slane %v3536_v25, %v9583_v17  ;;  %v3677_v57 = vperm.slane %v3581_v44, %v9584_v40 }
 0x745   :  { %v3928_v36 = vsel %vm1138_vm1, %v3927_v49, %v3926_v32  ;;  %v3674_v31 = vperm.slane %v3579_v0, %v9584_v40  ;;  %v3671_v49 = vperm.slane %v3577_v61, %v9584_v40  ;;  %v3699_v32 = vsel %vm1201_vm5, %v3670_v56, %v3698_v14 }
 0x746   :  { %v3953_v55 = vsel %vm1205_vm7, %v3928_v36, %v3952_v51  ;;  %v3675_v51 = vperm.slane %v3580_v1, %v9583_v17  ;;  %v3680_v61 = vperm.slane %v3583_v35, %v9584_v40  ;;  %v3681_v53 = vperm.slane %v3584_v23, %v9583_v17 }
 0x747   :  { %v3673_v36 = vsel %vm1138_vm1, %v3672_v60, %v3671_v49  ;;  %v3934_v16 = vsel %vm1138_vm1, %v3933_v18, %v3932_v4  ;;  %v3561_v60 = vmul.f32 %v8177_v52, %v8177_v52  ;;  %v3562_v18 = vmul.f32 %v8157_v5, %v8157_v5 }
 0x748   :  { %v3676_v22 = vsel %vm1138_vm1, %v3675_v51, %v3674_v31  ;;  %v3700_v54 = vsel %vm1203_vm6, %v3673_v36, %v3699_v32  ;;  %v3682_v23 = vsel %vm1138_vm1, %v3681_v53, %v3680_v61  ;;  %v3564_v51 = vmul.f32 %v8187_v41, %v8187_v41 }
 0x749   :  { %v3701_v35 = vsel %vm1205_vm7, %v3676_v22, %v3700_v54 }
 0x74a   :  { %v3530_v47 = vpop.xlane.xlu2 %3529 }
 0x74b   :  { %v3582_v0 = vmul.f32 %v3530_v47, %v3530_v47  ;;  %v3930_v3 = vperm.slane %v3530_v47, %v9583_v17  ;;  %v8265_v1 = vpop.xlane.xlu0 %3544  ;;  %v3563_v47 = vmul.f32 %v8183_v13, %v8183_v13 }
 0x74c   :  { %v3587_v49 = vmul.f32 %v8265_v1, %v8265_v1 }
 0x74d   :  { %v3678_v25 = vperm.slane %v3582_v0, %v9583_v17  ;;  %v3931_v42 = vsel %vm1138_vm1, %v3930_v3, %v3929_v12  ;;  %v3647_v12 = vperm.slane %v3561_v60, %v9584_v40  ;;  %v3651_v0 = vperm.slane %v3564_v51, %v9583_v17 }
 0x74e   :  { %v3954_v46 = vsel %vm1207_vm8, %v3931_v42, %v3953_v55  ;;  %v3686_v32 = vperm.slane %v3587_v49, %v9584_v40  ;;  %v3648_v3 = vperm.slane %v3562_v18, %v9583_v17  ;;  %v3650_v5 = vperm.slane %v3563_v47, %v9584_v40 }
 0x74f   :  { %v8269_v56 = vsel %vm1209_vm9, %v3934_v16, %v3954_v46  ;;  %v3679_v31 = vsel %vm1138_vm1, %v3678_v25, %v3677_v57 }
 0x750   :  { %v3702_v33 = vsel %vm1207_vm8, %v3679_v31, %v3701_v35  ;;  %v3649_v13 = vsel %vm1138_vm1, %v3648_v3, %v3647_v12  ;;  %v3652_v53 = vsel %vm1138_vm1, %v3651_v0, %v3650_v5 }
 0x751   :  { %v3703_v55 = vsel %vm1209_vm9, %v3682_v23, %v3702_v33  ;;  %v3694_v36 = vsel %vm1207_vm8, %v3649_v13, %v8175_v37 }
 0x752   :  { %v8280_v44 = vpop.xlane.xlu2 %3547  ;;  %v3715_v14 = vsel %vm9586_vm12, %v3703_v55, 0.0  ;;  %v3695_v57 = vsel %vm1209_vm9, %v3652_v53, %v3694_v36  ;;  %v3906_v53 = vperm.slane %v8105_v30, %v9583_v17 }
 0x753   :  { %v3588_v4 = vmul.f32 %v8280_v44, %v8280_v44  ;;  %3716 = vadd.xlane.f32.xlu2 %v3715_v14  ;;  %v3709_v25 = vsel %vm9588_vm14, %v3695_v57, 0.0 }
 0x755   :  { %v3687_v52 = vperm.slane %v3588_v4, %v9583_v17 }
 0x757   :  { %v3688_v41 = vsel %vm1138_vm1, %v3687_v52, %v3686_v32 }
 0x758   :  { %v3704_v22 = vsel %vm1197_vm3, %v3688_v41, %v8125_v24 }
 0x759   :  { %v3718_v61 = vsel %vm9587_vm13, %v3704_v22, 0.0  ;;  %v3905_v22 = vperm.slane %v8103_v62, %v9584_v40 }
 0x75a   :  { %3719 = vadd.xlane.f32.xlu1 %v3718_v61 }
 0x762   :  { %3710 = vadd.xlane.f32.xlu1 %v3709_v25 }
 0x7a5   :  { %v3714_v42 = vpop.xlane.xlu0 %3713 }
 0x7a6   :  { %5357 = vrsqrt.f32 %v3714_v42  ;;  %vm3740_vm11 = vcmp.eq.f32.partialorder %v3714_v42, inf  ;;  %v3743_v33 = vand.u32 2147483648, %v3714_v42  ;;  %vm3742_vm10 = vcmp.eq.f32.partialorder %v3714_v42, 0.0 }
 0x7ac   :  { %v5358_v24 = vpop.eup %5357 }
 0x7ad   :  { %v3734_v16 = vmul.f32 %v5358_v24, %v3714_v42 }
 0x7af   :  { %v3735_v46 = vmul.f32 %v5358_v24, %v3734_v16 }
 0x7b1   :  { %v3736_v54 = vmul.f32 0.5, %v3735_v46 }
 0x7b3   :  { %v3737_v31 = vsub.f32 1.5, %v3736_v54 }
 0x7b5   :  { %v3738_v35 = vmul.f32 %v5358_v24, %v3737_v31 }
 0x7b7   :  { %v3739_v23 = vmul.f32 %v3738_v35, %v3714_v42 }
 0x7b9   :  { %v3741_v49 = vsel %vm3740_vm11, %v3714_v42, %v3739_v23  ;;  %v3907_v42 = vsel %vm1138_vm1, %v3906_v53, %v3905_v22  ;;  %v9589_v22 = vld [vmem:[#allocation66_spill] sm:$0xff] }
 0x7ba   :  { %v3744_v55 = vsel %vm3742_vm10, %v3743_v33, %v3741_v49  ;;  %v3948_v46 = vsel %vm1197_vm3, %v8213_v26, %v3907_v42 }
 0x7bb   :  { %v3770_v37 = vmul.f32 %v3744_v55, %v3744_v55 }
 0x7bd   :  { %v3774_v60 = vadd.f32 1.0, %v3770_v37 }
 0x7bf   :  { %v3778_v14 = vadd.f32 1e-08, %v3774_v60 }
 0x7c1   :  { %5359 = vrcp.f32 %v3778_v14  ;;  %v3807_v52 = vand.u32 2147483648, %v3778_v14  ;;  %v3805_v41 = vand.u32 2147483647, %v3778_v14  ;;  %vm3801_vm12 = vweird.f32 %v3778_v14 }
 0x7c3   :  { %v3808_v13 = vor.u32 1.1754944e-38, %v3807_v52  ;;  %vm3806_vm14 = vcmp.eq.f32.partialorder %v3805_v41, 8.507059e+37 }
 0x7c6   :  { %v3717_v51 = vpop.xlane.xlu2 %3716 }
 0x7c7   :  { %v5360_v4 = vpop.eup %5359  ;;  %5361 = vrsqrt.f32 %v3717_v51  ;;  %vm3752_vm11 = vcmp.eq.f32.partialorder %v3717_v51, inf  ;;  %vm3754_vm10 = vcmp.eq.f32.partialorder %v3717_v51, 0.0 }
 0x7c8   :  { %v3797_v18 = vmul.f32 %v5360_v4, %v3778_v14  ;;  %vm3802_vm2 = vweird.f32 %v5360_v4 }
 0x7c9   :  { %vm3803_vm13 = vmor %vm3801_vm12, %vm3802_vm2 }
 0x7ca   :  { %v3798_v47 = vsub.f32 1.0, %v3797_v18 }
 0x7cc   :  { %v3799_v32 = vmul.f32 %v5360_v4, %v3798_v47 }
 0x7cd   :  { %v5362_v12 = vpop.eup %5361  ;;  %v3720_v0 = vpop.xlane.xlu1 %3719 }
 0x7ce   :  { %v3746_v3 = vmul.f32 %v5362_v12, %v3717_v51  ;;  %5363 = vrsqrt.f32 %v3720_v0  ;;  %v3800_v5 = vadd.f32 %v5360_v4, %v3799_v32  ;;  %vm3764_vm2 = vcmp.eq.f32.partialorder %v3720_v0, inf }
 0x7cf   :  { %v3767_v41 = vand.u32 2147483648, %v3720_v0  ;;  %vm3766_vm12 = vcmp.eq.f32.partialorder %v3720_v0, 0.0 }
 0x7d0   :  { %v3747_v61 = vmul.f32 %v5362_v12, %v3746_v3  ;;  %v3804_v36 = vsel %vm3803_vm13, %v5360_v4, %v3800_v5  ;;  %v3755_v4 = vand.u32 2147483648, %v3717_v51 }
 0x7d1   :  { %v3809_v25 = vsel %vm3806_vm14, %v3808_v13, %v3804_v36 }
 0x7d2   :  { %v3748_v57 = vmul.f32 0.5, %v3747_v61  ;;  %v3810_v24 = vmul.f32 %v3809_v25, %v3744_v55 }
 0x7d4   :  { %v5364_v16 = vpop.eup %5363  ;;  %v3749_v62 = vsub.f32 1.5, %v3748_v57  ;;  %v8314_v35 = vmul.f32 %v3948_v46, %v3810_v24 }
 0x7d5   :  { %v3758_v54 = vmul.f32 %v5364_v16, %v3720_v0  ;;  %v3711_v31 = vpop.xlane.xlu1 %3710 }
 0x7d6   :  { %v3750_v23 = vmul.f32 %v5362_v12, %v3749_v62  ;;  %5365 = vrsqrt.f32 %v3711_v31  ;;  %v4082_v30 = vperm.slane %v8314_v35, 1  ;;  %v4069_v49 = vperm.slane %v8314_v35, 0 }
 0x7d7   :  { %v3759_v33 = vmul.f32 %v5364_v16, %v3758_v54  ;;  %vm3728_vm13 = vcmp.eq.f32.partialorder %v3711_v31, inf  ;;  %v3731_v24 = vand.u32 2147483648, %v3711_v31  ;;  %vm3730_vm14 = vcmp.eq.f32.partialorder %v3711_v31, 0.0 }
 0x7d8   :  { %v3751_v37 = vmul.f32 %v3750_v23, %v3717_v51  ;;  %4087 = vperm.xlu2 %5282, %v4082_v30   ;;  %4074 = vperm.xlu1 %5281, %v4069_v49  }
 0x7d9   :  { %v3760_v60 = vmul.f32 0.5, %v3759_v33 }
 0x7da   :  { %v3753_v14 = vsel %vm3752_vm11, %v3717_v51, %v3751_v37 }
 0x7db   :  { %v3761_v26 = vsub.f32 1.5, %v3760_v60  ;;  %v8320_v32 = vsel %vm3754_vm10, %v3755_v4, %v3753_v14  ;;  %v9590_v60 = vld [vmem:[#allocation41_spill] sm:$0xff] }
 0x7dc   :  { %v5366_v55 = vpop.eup %5365  ;;  %v3771_v61 = vmul.f32 %v8320_v32, %v8320_v32 }
 0x7dd   :  { %v3762_v18 = vmul.f32 %v5364_v16, %v3761_v26  ;;  %v3722_v47 = vmul.f32 %v5366_v55, %v3711_v31 }
 0x7de   :  { %v3775_v25 = vadd.f32 1.0, %v3771_v61 }
 0x7df   :  { %v3763_v52 = vmul.f32 %v3762_v18, %v3720_v0  ;;  %v3723_v12 = vmul.f32 %v5366_v55, %v3722_v47 }
 0x7e0   :  { %5283 = vset.pattern.permute.xlu2 %v9589_v22  ;;  %v8325_v62 = vadd.f32 1e-08, %v3775_v25 }
 0x7e1   :  { %v3724_v3 = vmul.f32 0.5, %v3723_v12  ;;  %v3765_v5 = vsel %vm3764_vm2, %v3720_v0, %v3763_v52  ;;  %v3938_v12 = vperm.slane %v8265_v1, %v9584_v40 }
 0x7e2   :  { %v3768_v53 = vsel %vm3766_vm12, %v3767_v41, %v3765_v5 }
 0x7e3   :  { %v3725_v13 = vsub.f32 1.5, %v3724_v3  ;;  %v3772_v36 = vmul.f32 %v3768_v53, %v3768_v53 }
 0x7e5   :  { %v3726_v57 = vmul.f32 %v5366_v55, %v3725_v13  ;;  %v3776_v51 = vadd.f32 1.0, %v3772_v36 }
 0x7e7   :  { %v3727_v42 = vmul.f32 %v3726_v57, %v3711_v31  ;;  %v3780_v16 = vadd.f32 1e-08, %v3776_v51 }
 0x7e8   :  { %4093 = vperm.xlu2 %5283, %v4082_v30  }
 0x7e9   :  { %v3729_v46 = vsel %vm3728_vm13, %v3711_v31, %v3727_v42  ;;  %5367 = vrcp.f32 %v3780_v16  ;;  %v3837_v4 = vand.u32 2147483648, %v3780_v16  ;;  %v3939_v31 = vperm.slane %v8280_v44, %v9583_v17 }
 0x7ea   :  { %v3732_v54 = vsel %vm3730_vm14, %v3731_v24, %v3729_v46  ;;  %5369 = vrcp.f32 %v8325_v62  ;;  %v3835_v18 = vand.u32 2147483647, %v3780_v16  ;;  %vm3831_vm10 = vweird.f32 %v3780_v16 }
 0x7eb   :  { %v3769_v23 = vmul.f32 %v3732_v54, %v3732_v54  ;;  %v3838_v5 = vor.u32 1.1754944e-38, %v3837_v4  ;;  %v3940_v61 = vsel %vm1138_vm1, %v3939_v31, %v3938_v12  ;;  %v3820_v31 = vand.u32 2147483647, %v8325_v62 }
 0x7ec   :  { %vm3836_vm12 = vcmp.eq.f32.partialorder %v3835_v18, 8.507059e+37  ;;  %v3956_v1 = vsel %vm1197_vm3, %v3940_v61, %v8122_v8 }
 0x7ed   :  { %v3773_v33 = vadd.f32 1.0, %v3769_v23 }
 0x7ef   :  { %v3777_v0 = vadd.f32 1e-08, %v3773_v33  ;;  %v5368_v37 = vpop.eup %5367 }
 0x7f0   :  { %5284 = vset.pattern.permute.xlu2 %v9590_v60  ;;  %v3827_v26 = vmul.f32 %v5368_v37, %v3780_v16  ;;  %v5370_v55 = vpop.eup %5369  ;;  %vm3832_vm11 = vweird.f32 %v5368_v37 }
 0x7f1   :  { %5371 = vrcp.f32 %v3777_v0  ;;  %v3812_v52 = vmul.f32 %v5370_v55, %v8325_v62  ;;  %vm3833_vm2 = vmor %vm3831_vm10, %vm3832_vm11  ;;  %v3792_v57 = vand.u32 2147483648, %v3777_v0  ;;  %v3790_v42 = vand.u32 2147483647, %v3777_v0 }
 0x7f2   :  { %v3828_v14 = vsub.f32 1.0, %v3827_v26  ;;  %vm3786_vm14 = vweird.f32 %v3777_v0 }
 0x7f3   :  { %v3813_v44 = vsub.f32 1.0, %v3812_v52  ;;  %v3793_v23 = vor.u32 1.1754944e-38, %v3792_v57  ;;  %vm3791_vm10 = vcmp.eq.f32.partialorder %v3790_v42, 8.507059e+37 }
 0x7f4   :  { %v3829_v30 = vmul.f32 %v5368_v37, %v3828_v14 }
 0x7f5   :  { %v3814_v33 = vmul.f32 %v5370_v55, %v3813_v44 }
 0x7f6   :  { %v3830_v3 = vadd.f32 %v5368_v37, %v3829_v30 }
 0x7f7   :  { %v5372_v47 = vpop.eup %5371 }
 0x7f8   :  { %v3782_v41 = vmul.f32 %v5372_v47, %v3777_v0  ;;  %v3834_v36 = vsel %vm3833_vm2, %v5368_v37, %v3830_v3  ;;  %vm3787_vm13 = vweird.f32 %v5372_v47  ;;  %vm3817_vm2 = vweird.f32 %v5370_v55 }
 0x7f9   :  { %v3839_v25 = vsel %vm3836_vm12, %v3838_v5, %v3834_v36  ;;  %vm3788_vm11 = vmor %vm3786_vm14, %vm3787_vm13  ;;  %v3822_v0 = vand.u32 2147483648, %v8325_v62  ;;  %vm3816_vm12 = vweird.f32 %v8325_v62  ;;  %vm3821_vm14 = vcmp.eq.f32.partialorder %v3820_v31, 8.507059e+37 }
 0x7fa   :  { %v3783_v13 = vsub.f32 1.0, %v3782_v41  ;;  %v3840_v24 = vmul.f32 %v3839_v25, %v3768_v53  ;;  %v3815_v53 = vadd.f32 %v5370_v55, %v3814_v33  ;;  %vm3818_vm13 = vmor %vm3816_vm12, %vm3817_vm2 }
 0x7fc   :  { %v3784_v51 = vmul.f32 %v5372_v47, %v3783_v13  ;;  %v8337_v16 = vmul.f32 %v3956_v1, %v3840_v24 }
 0x7fe   :  { %v3785_v46 = vadd.f32 %v5372_v47, %v3784_v51  ;;  %v4199_v37 = vperm.slane %v8337_v16, 0  ;;  %v4212_v5 = vperm.slane %v8337_v16, 1 }
 0x800   :  { %v3789_v26 = vsel %vm3788_vm11, %v5372_v47, %v3785_v46  ;;  %4204 = vperm.xlu2 %5284, %v4199_v37   ;;  %v3819_v47 = vsel %vm3818_vm13, %v5370_v55, %v3815_v53 }
 0x801   :  { %v3794_v14 = vsel %vm3791_vm10, %v3793_v23, %v3789_v26 }
 0x802   :  { %v3795_v4 = vmul.f32 %v3794_v14, %v3732_v54  ;;  %v3823_v54 = vor.u32 1.1754944e-38, %v3822_v0 }
 0x804   :  { %v3961_v8 = vmul.f32 %v8197_v63, %v3795_v4  ;;  %v3824_v52 = vsel %vm3821_vm14, %v3823_v54, %v3819_v47 }
 0x805   :  { %v3825_v12 = vmul.f32 %v3824_v52, %v8320_v32 }
 0x806   :  { %v3965_v30 = vperm.slane %v3961_v8, 0  ;;  %v3978_v18 = vperm.slane %v3961_v8, 1  ;;  %v4043_v63 = vperm.slane %v3961_v8, 6  ;;  %v3991_v41 = vperm.slane %v3961_v8, 2 }
 0x807   :  { %v8349_v3 = vmul.f32 %v8269_v56, %v3825_v12  ;;  %v4004_v55 = vperm.slane %v3961_v8, 3  ;;  %v4017_v32 = vperm.slane %v3961_v8, 4  ;;  %v4030_v56 = vperm.slane %v3961_v8, 5 }
 0x808   :  { %3970 = vperm.xlu0 %5285, %v3965_v30   ;;  %3983 = vperm.xlu1 %5281, %v3978_v18   ;;  %v4056_v36 = vperm.slane %v3961_v8, 7 }
 0x809   :  { %5286 = vset.pattern.permute.xlu2 %v9589_v22  ;;  %v4134_v62 = vperm.slane %v8349_v3, 3  ;;  %v4108_v13 = vperm.slane %v8349_v3, 1  ;;  %v4095_v42 = vperm.slane %v8349_v3, 0  ;;  %v4186_v1 = vperm.slane %v8349_v3, 7 }
 0x80a   :  { %v4121_v46 = vperm.slane %v8349_v3, 2  ;;  %v4147_v33 = vperm.slane %v8349_v3, 4  ;;  %v4173_v31 = vperm.slane %v8349_v3, 6 }
 0x810   :  { %4048 = vperm.xlu0 %5285, %v4043_v63   ;;  %3996 = vperm.xlu1 %5281, %v3991_v41  }
 0x811   :  { %3976 = vperm.xlu2 %5286, %v3965_v30  }
 0x818   :  { %4139 = vperm.xlu0 %5285, %v4134_v62   ;;  %4009 = vperm.xlu1 %5281, %v4004_v55  }
 0x819   :  { %3989 = vperm.xlu2 %5286, %v3978_v18  }
 0x820   :  { %4217 = vperm.xlu0 %5285, %v4212_v5   ;;  %5288 = vset.pattern.permute.xlu1 %v9589_v22 }
 0x821   :  { %4002 = vperm.xlu2 %5286, %v3991_v41  }
 0x828   :  { %5299 = vset.pattern.permute.xlu0 %v9589_v22  ;;  %4028 = vperm.xlu1 %5288, %v4017_v32  }
 0x829   :  { %5287 = vset.pattern.permute.xlu2 %v9590_v60 }
 0x830   :  { %4015 = vperm.xlu0 %5299, %v4004_v55   ;;  %4041 = vperm.xlu1 %5288, %v4030_v56  }
 0x831   :  { %4022 = vperm.xlu2 %5287, %v4017_v32  }
 0x832   :  { %v4088_v61 = vpop.permute.xlu2 %4087 }
 0x833   :  { %v4243_v44 = vmul.f32 %v4088_v61, %v9538_v59 }
 0x835   :  { %v4346_v51 = vsel %vm932_vm0, %v4243_v44, 0.0 }
 0x838   :  { %4080 = vperm.xlu0 %5299, %v4069_v49   ;;  %5290 = vset.pattern.permute.xlu1 %v9590_v60  ;;  %v4160_v49 = vperm.slane %v8349_v3, 5 }
 0x839   :  { %4035 = vperm.xlu2 %5287, %v4030_v56  }
 0x840   :  { %4119 = vperm.xlu0 %5299, %v4108_v13   ;;  %4061 = vperm.xlu1 %5290, %v4056_v36  }
 0x841   :  { %5289 = vset.pattern.permute.xlu2 %v9589_v22 }
 0x842   :  { %v4094_v57 = vpop.permute.xlu2 %4093 }
 0x843   :  { %v4244_v25 = vmul.f32 %v4094_v57, %v9532_v21 }
 0x845   :  { %v4347_v35 = vsel %vm932_vm0, %v4244_v25, 0.0 }
 0x846   :  { %v8369_v24 = vadd.f32 %v4347_v35, %v4346_v51 }
 0x848   :  { %4171 = vperm.xlu0 %5299, %v4160_v49   ;;  %4100 = vperm.xlu1 %5290, %v4095_v42  }
 0x849   :  { %4054 = vperm.xlu2 %5289, %v4043_v63  }
 0x84a   :  { %v8380_v26 = vpop.permute.xlu1 %4074 }
 0x850   :  { %4197 = vperm.xlu0 %5299, %v4186_v1   ;;  %4113 = vperm.xlu1 %5290, %v4108_v13  }
 0x851   :  { %4067 = vperm.xlu2 %5289, %v4056_v36  }
 0x858   :  { %5292 = vset.pattern.permute.xlu1 %v9589_v22 }
 0x859   :  { %4106 = vperm.xlu2 %5289, %v4095_v42  }
 0x85a   :  { %v8376_v23 = vpop.permute.xlu2 %4204 }
 0x860   :  { %4132 = vperm.xlu1 %5292, %v4121_v46  }
 0x861   :  { %5291 = vset.pattern.permute.xlu2 %v9590_v60 }
 0x868   :  { %5294 = vset.pattern.permute.xlu1 %v9590_v60 }
 0x869   :  { %4126 = vperm.xlu2 %5291, %v4121_v46  }
 0x86b   :  { %v3977_v14 = vpop.permute.xlu2 %3976 }
 0x870   :  { %4152 = vperm.xlu1 %5294, %v4147_v33  }
 0x871   :  { %5293 = vset.pattern.permute.xlu2 %v9589_v22 }
 0x873   :  { %v3990_v8 = vpop.permute.xlu2 %3989 }
 0x874   :  { %v4228_v3 = vmul.f32 %v3990_v8, %v9525_v19 }
 0x876   :  { %v4275_v13 = vsel %vm932_vm0, %v4228_v3, 0.0 }
 0x878   :  { %4165 = vperm.xlu1 %5294, %v4160_v49  }
 0x879   :  { %4145 = vperm.xlu2 %5293, %v4134_v62   ;;  %v9591_v62 = vld [vmem:[#allocation32_spill] sm:$0xff] }
 0x87a   :  { %v3971_v4 = vpop.permute.xlu0 %3970  ;;  %v3984_v53 = vpop.permute.xlu1 %3983  ;;  %v4226_v55 = vmul.f32 %v3977_v14, %v9591_v62 }
 0x87b   :  { %v4003_v18 = vpop.permute.xlu2 %4002  ;;  %v4227_v12 = vmul.f32 %v3984_v53, %v9527_v7  ;;  %v4225_v63 = vmul.f32 %v3971_v4, %v9526_v20 }
 0x87c   :  { %v4230_v32 = vmul.f32 %v4003_v18, %v9535_v6  ;;  %v4266_v57 = vsel %vm932_vm0, %v4226_v55, 0.0 }
 0x87d   :  { %v4274_v56 = vsel %vm932_vm0, %v4227_v12, 0.0 }
 0x87e   :  { %v4284_v25 = vsel %vm932_vm0, %v4230_v32, 0.0  ;;  %v4276_v51 = vadd.f32 %v4275_v13, %v4274_v56 }
 0x880   :  { %5296 = vset.pattern.permute.xlu1 %v9589_v22 }
 0x881   :  { %4158 = vperm.xlu2 %5293, %v4147_v33   ;;  %v4277_v33 = vrot.slane %v4276_v51, 4 }
 0x882   :  { %v4049_v0 = vpop.permute.xlu0 %4048  ;;  %v3997_v30 = vpop.permute.xlu1 %3996 }
 0x883   :  { %v4229_v41 = vmul.f32 %v3997_v30, %v9533_v9  ;;  %v4237_v32 = vmul.f32 %v4049_v0, %v9540_v10 }
 0x885   :  { %v4283_v61 = vsel %vm932_vm0, %v4229_v41, 0.0 }
 0x886   :  { %v4285_v49 = vadd.f32 %v4284_v25, %v4283_v61  ;;  %v4349_v25 = vrot.slane %v8369_v24, 4 }
 0x888   :  { %4184 = vperm.xlu1 %5296, %v4173_v31   ;;  %v4286_v4 = vrot.slane %v4285_v49, 4 }
 0x889   :  { %5295 = vset.pattern.permute.xlu2 %v9590_v60 }
 0x88a   :  { %v8385_v47 = vpop.permute.xlu0 %4139  ;;  %v4010_v52 = vpop.permute.xlu1 %4009  ;;  %v4287_v55 = vadd.f32 %v4286_v4, %v4285_v49 }
 0x88b   :  { %v4023_v54 = vpop.permute.xlu2 %4022  ;;  %v4231_v53 = vmul.f32 %v4010_v52, %v9530_v15 }
 0x88c   :  { %v4233_v46 = vmul.f32 %v4023_v54, %v9537_v28 }
 0x88e   :  { %v4301_v30 = vsel %vm932_vm0, %v4233_v46, 0.0  ;;  %v9592_v46 = vld [vmem:[#allocation120_spill] sm:$0xff] }
 0x890   :  { %5297 = vset.pattern.permute.xlu1 %v9590_v60  ;;  %v4265_v60 = vsel %vm932_vm0, %v4225_v63, 0.0  ;;  %v4278_v63 = vadd.f32 %v4277_v33, %v4276_v51  ;;  %v4241_v33 = vmul.f32 %v8380_v26, %v9592_v46 }
 0x891   :  { %4178 = vperm.xlu2 %5295, %v4173_v31   ;;  %v4267_v35 = vadd.f32 %v4266_v57, %v4265_v60 }
 0x892   :  { %v8398_v36 = vpop.permute.xlu0 %4217  ;;  %v4279_v49 = vrot.slane %v4278_v63, 2 }
 0x893   :  { %v4036_v42 = vpop.permute.xlu2 %4035  ;;  %v4268_v14 = vrot.slane %v4267_v35, 4 }
 0x894   :  { %v4235_v31 = vmul.f32 %v4036_v42, %v9539_v27  ;;  %v4319_v42 = vsel %vm932_vm0, %v4237_v32, 0.0 }
 0x895   :  { %v4269_v52 = vadd.f32 %v4268_v14, %v4267_v35  ;;  %v4288_v14 = vrot.slane %v4287_v55, 2 }
 0x896   :  { %v4310_v60 = vsel %vm932_vm0, %v4235_v31, 0.0 }
 0x897   :  { %v4270_v0 = vrot.slane %v4269_v52, 2  ;;  %v4289_v16 = vadd.f32 %v4288_v14, %v4287_v55 }
 0x898   :  { %4191 = vperm.xlu1 %5297, %v4186_v1  }
 0x899   :  { %5300 = vset.pattern.permute.xlu2 %v9589_v22 }
 0x89a   :  { %v4029_v44 = vpop.permute.xlu1 %4028 }
 0x89b   :  { %v4234_v1 = vmul.f32 %v4029_v44, %v9534_v38 }
 0x89d   :  { %v4302_v8 = vsel %vm932_vm0, %v4234_v1, 0.0 }
 0x89e   :  { %v4303_v54 = vadd.f32 %v4302_v8, %v4301_v30 }
 0x8a0   :  { %5298 = vset.pattern.permute.xlu1 %v9589_v22  ;;  %v4292_v22 = vsel %vm932_vm0, %v4231_v53, 0.0  ;;  %v4304_v51 = vrot.slane %v4303_v54, 4 }
 0x8a1   :  { %4223 = vperm.xlu2 %5300, %v4212_v5  }
 0x8a2   :  { %v4042_v18 = vpop.permute.xlu1 %4041  ;;  %v4016_v12 = vpop.permute.xlu0 %4015  ;;  %v4305_v30 = vadd.f32 %v4304_v51, %v4303_v54 }
 0x8a3   :  { %v4236_v41 = vmul.f32 %v4042_v18, %v9541_v11  ;;  %v4232_v3 = vmul.f32 %v4016_v12, %v9536_v58  ;;  %v4055_v56 = vpop.permute.xlu2 %4054  ;;  %v9593_v18 = vld [vmem:[#allocation117_spill] sm:$0xff] }
 0x8a4   :  { %v4238_v61 = vmul.f32 %v4055_v56, %v9542_v48  ;;  %v4337_v56 = vsel %vm932_vm0, %v4241_v33, 0.0 }
 0x8a5   :  { %v4311_v5 = vsel %vm932_vm0, %v4236_v41, 0.0  ;;  %v4293_v13 = vsel %vm932_vm0, %v4232_v3, 0.0  ;;  %v4350_v41 = vadd.f32 %v4349_v25, %v8369_v24  ;;  %v4280_v3 = vadd.f32 %v4279_v49, %v4278_v63 }
 0x8a6   :  { %v4312_v44 = vadd.f32 %v4311_v5, %v4310_v60  ;;  %v4294_v57 = vadd.f32 %v4293_v13, %v4292_v22  ;;  %v4320_v35 = vsel %vm932_vm0, %v4238_v61, 0.0  ;;  %v4271_v22 = vadd.f32 %v4270_v0, %v4269_v52 }
 0x8a7   :  { %v4321_v4 = vadd.f32 %v4320_v35, %v4319_v42  ;;  %v4351_v35 = vrot.slane %v4350_v41, 2  ;;  %v4281_v54 = vrot.slane %v4280_v3, 1 }
 0x8a8   :  { %v4295_v1 = vrot.slane %v4294_v57, 4  ;;  %4210 = vperm.xlu1 %5298, %v4199_v37   ;;  %v4313_v53 = vrot.slane %v4312_v44, 4  ;;  %v4272_v51 = vrot.slane %v4271_v22, 1 }
 0x8a9   :  { %v4322_v37 = vrot.slane %v4321_v4, 4  ;;  %v4282_v14 = vadd.f32 %v4281_v54, %v4280_v3 }
 0x8aa   :  { %v4296_v8 = vadd.f32 %v4295_v1, %v4294_v57  ;;  %v4081_v31 = vpop.permute.xlu0 %4080  ;;  %v4314_v26 = vadd.f32 %v4313_v53, %v4312_v44  ;;  %v4306_v57 = vrot.slane %v4305_v30, 2  ;;  %v4290_v1 = vrot.slane %v4289_v16, 1 }
 0x8ab   :  { %v4242_v12 = vmul.f32 %v4081_v31, %v9593_v18  ;;  %v4068_v5 = vpop.permute.xlu2 %4067  ;;  %v4323_v24 = vadd.f32 %v4322_v37, %v4321_v4  ;;  %v4352_v44 = vadd.f32 %v4351_v35, %v4350_v41  ;;  %v4273_v53 = vadd.f32 %v4272_v51, %v4271_v22 }
 0x8ac   :  { %v4297_v32 = vrot.slane %v4296_v8, 2  ;;  %v4240_v63 = vmul.f32 %v4068_v5, %v9543_v2  ;;  %v4315_v52 = vrot.slane %v4314_v26, 2  ;;  %v4307_v0 = vadd.f32 %v4306_v57, %v4305_v30  ;;  %v9609_v2 = vld [vmem:[#allocation56_spill] sm:$0xff] }
 0x8ad   :  { %v4338_v60 = vsel %vm932_vm0, %v4242_v12, 0.0  ;;  %v4291_v31 = vadd.f32 %v4290_v1, %v4289_v16  ;;  %v4324_v12 = vrot.slane %v4323_v24, 2  ;;  %v4353_v22 = vrot.slane %v4352_v44, 1 }
 0x8ae   :  { %v4298_v61 = vadd.f32 %v4297_v32, %v4296_v8  ;;  %v4339_v13 = vadd.f32 %v4338_v60, %v4337_v56  ;;  %v4329_v32 = vsel %vm932_vm0, %v4240_v63, 0.0  ;;  %v4316_v4 = vadd.f32 %v4315_v52, %v4314_v26 }
 0x8af   :  { %v4308_v40 = vrot.slane %v4307_v0, 1  ;;  %v4325_v3 = vadd.f32 %v4324_v12, %v4323_v24  ;;  %v4354_v63 = vadd.f32 %v4353_v22, %v4352_v44 }
 0x8b0   :  { %v4340_v42 = vrot.slane %v4339_v13, 4  ;;  %v4299_v25 = vrot.slane %v4298_v61, 1  ;;  %v4317_v35 = vrot.slane %v4316_v4, 1 }
 0x8b1   :  { %v4309_v51 = vadd.f32 %v4308_v40, %v4307_v0  ;;  %v4326_v26 = vrot.slane %v4325_v3, 1  ;;  %v9595_v0 = vld [vmem:[#allocation50_spill] sm:$0xff] }
 0x8b2   :  { %v4341_v49 = vadd.f32 %v4340_v42, %v4339_v13  ;;  %v4062_v55 = vpop.permute.xlu1 %4061  ;;  %v4300_v37 = vadd.f32 %v4299_v25, %v4298_v61  ;;  %v4465_v13 = vsel %vm1197_vm3, %v4282_v14, %v4273_v53  ;;  %v4318_v52 = vadd.f32 %v4317_v35, %v4316_v4  ;;  %v9594_v53 = vld [vmem:[#allocation49_spill] sm:$0xff] }
 0x8b3   :  { %v4239_v33 = vmul.f32 %v4062_v55, %v9544_v50  ;;  %v4466_v41 = vsel %vm1199_vm4, %v4291_v31, %v4465_v13  ;;  %v4327_v24 = vadd.f32 %v4326_v26, %v4325_v3 }
 0x8b4   :  { %v4342_v8 = vrot.slane %v4341_v49, 2  ;;  %v4467_v16 = vsel %vm1201_vm5, %v4300_v37, %v4466_v41 }
 0x8b5   :  { %v4328_v56 = vsel %vm932_vm0, %v4239_v33, 0.0  ;;  %v4468_v61 = vsel %vm1203_vm6, %v4309_v51, %v4467_v16  ;;  %v4107_v16 = vpop.permute.xlu2 %4106 }
 0x8b6   :  { %v4343_v60 = vadd.f32 %v4342_v8, %v4341_v49  ;;  %v4330_v5 = vadd.f32 %v4329_v32, %v4328_v56  ;;  %v4469_v33 = vsel %vm1205_vm7, %v4318_v52, %v4468_v61 }
 0x8b7   :  { %v4470_v31 = vsel %vm1207_vm8, %v4327_v24, %v4469_v33 }
 0x8b8   :  { %v4344_v30 = vrot.slane %v4343_v60, 1  ;;  %v4331_v57 = vrot.slane %v4330_v5, 4 }
 0x8ba   :  { %v4332_v54 = vadd.f32 %v4331_v57, %v4330_v5  ;;  %v4345_v42 = vadd.f32 %v4344_v30, %v4343_v60  ;;  %v4101_v57 = vpop.permute.xlu1 %4100 }
 0x8bc   :  { %v4333_v1 = vrot.slane %v4332_v54, 2  ;;  %v4472_v49 = vsel %vm1197_vm3, %v4354_v63, %v4345_v42 }
 0x8bd   :  { %v4486_v8 = vadd.f32 %v4472_v49, %v9594_v53 }
 0x8be   :  { %v4334_v25 = vadd.f32 %v4333_v1, %v4332_v54 }
 0x8bf   :  { %v4490_v32 = vsel %vm2009_vm15, %v4486_v8, -inf }
 0x8c0   :  { %v4335_v55 = vrot.slane %v4334_v25, 1 }
 0x8c2   :  { %v4336_v14 = vadd.f32 %v4335_v55, %v4334_v25  ;;  %v4114_v54 = vpop.permute.xlu1 %4113 }
 0x8c3   :  { %v4127_v52 = vpop.permute.xlu2 %4126 }
 0x8c4   :  { %v4471_v40 = vsel %vm1209_vm9, %v4336_v14, %v4470_v31  ;;  %v4120_v31 = vpop.permute.xlu0 %4119 }
 0x8c5   :  { %v4485_v12 = vadd.f32 %v4471_v40, %v9595_v0 }
 0x8c7   :  { %v4489_v44 = vsel %vm932_vm0, %v4485_v12, -inf }
 0x8c8   :  { %v4491_v56 = vmax.f32 %v4489_v44, %v4490_v32 }
 0x8ca   :  { %v4492_v4 = vrot.slane %v4491_v56, 4 }
 0x8cc   :  { %v4493_v37 = vmax.f32 %v4491_v56, %v4492_v4  ;;  %v4248_v56 = vmul.f32 %v4120_v31, %v9549_v34 }
 0x8ce   :  { %v4494_v60 = vrot.slane %v4493_v37, 2 }
 0x8d0   :  { %v4495_v5 = vmax.f32 %v4493_v37, %v4494_v60  ;;  %v4172_v37 = vpop.permute.xlu0 %4171  ;;  %v4247_v60 = vmul.f32 %v4114_v54, %v9550_v29 }
 0x8d2   :  { %v4496_v13 = vrot.slane %v4495_v5, 1  ;;  %v4133_v25 = vpop.permute.xlu1 %4132 }
 0x8d3   :  { %v4146_v14 = vpop.permute.xlu2 %4145 }
 0x8d4   :  { %v4497_v30 = vmax.f32 %v4495_v5, %v4496_v13 }
 0x8d6   :  { %v4507_v41 = vsub.f32 %v4485_v12, %v4497_v30  ;;  %v4508_v3 = vsub.f32 %v4486_v8, %v4497_v30  ;;  %v4246_v30 = vmul.f32 %v4107_v16, %v9551_v43 }
 0x8d8   :  { %v4511_v22 = vmul.f32 1.442695, %v4507_v41  ;;  %v4513_v35 = vmul.f32 1.442695, %v4508_v3  ;;  %v4245_v41 = vmul.f32 %v4101_v57, %v9553_v45  ;;  %v4250_v3 = vmul.f32 %v4133_v25, %v9573_v39 }
 0x8d9   :  { %v4356_v57 = vsel %vm932_vm0, %v4246_v30, 0.0 }
 0x8da   :  { %5373 = vpow2.f32 %v4511_v22  ;;  %v4355_v25 = vsel %vm932_vm0, %v4245_v41, 0.0  ;;  %v9602_v41 = vld [vmem:[#allocation33_spill] sm:$0xff] }
 0x8db   :  { %5375 = vpow2.f32 %v4513_v35  ;;  %v4159_v0 = vpop.permute.xlu2 %4158  ;;  %v9596_v35 = vld [vmem:[#allocation27_spill] sm:$0xff] }
 0x8e0   :  { %v5374_v51 = vpop.eup %5373 }
 0x8e1   :  { %v5376_v42 = vpop.eup %5375  ;;  %v4519_v1 = vsel %vm932_vm0, %v5374_v51, 0.0 }
 0x8e2   :  { %v4520_v26 = vsel %vm2009_vm15, %v5376_v42, 0.0  ;;  %v4153_v53 = vpop.permute.xlu1 %4152 }
 0x8e3   :  { %v4521_v61 = vadd.f32 %v4520_v26, %v4519_v1  ;;  %v4251_v1 = vmul.f32 %v8385_v47, %v9596_v35  ;;  %v9597_v26 = vld [vmem:[#allocation25_spill] sm:$0xff] }
 0x8e5   :  { %v4522_v63 = vrot.slane %v4521_v61, 4 }
 0x8e7   :  { %v4523_v49 = vadd.f32 %v4522_v63, %v4521_v61  ;;  %v4249_v61 = vmul.f32 %v4127_v52, %v9597_v26  ;;  %v9598_v63 = vld [vmem:[#allocation31_spill] sm:$0xff]  ;;  %v4374_v52 = vsel %vm932_vm0, %v4250_v3, 0.0 }
 0x8e9   :  { %v4524_v55 = vrot.slane %v4523_v49, 2 }
 0x8ea   :  { %v4166_v32 = vpop.permute.xlu1 %4165 }
 0x8eb   :  { %v4525_v33 = vadd.f32 %v4524_v55, %v4523_v49  ;;  %v4252_v49 = vmul.f32 %v4146_v14, %v9598_v63  ;;  %v4365_v55 = vsel %vm932_vm0, %v4248_v56, 0.0  ;;  %v4179_v16 = vpop.permute.xlu2 %4178  ;;  %v9600_v14 = vld [vmem:[#allocation28_spill] sm:$0xff] }
 0x8ed   :  { %v4526_v24 = vrot.slane %v4525_v33, 1 }
 0x8ef   :  { %v4527_v8 = vadd.f32 %v4526_v24, %v4525_v33  ;;  %v4364_v33 = vsel %vm932_vm0, %v4247_v60, 0.0  ;;  %v4373_v60 = vsel %vm932_vm0, %v4249_v61, 0.0 }
 0x8f1   :  { %5377 = vrcp.f32 %v4527_v8  ;;  %v4548_v4 = vand.u32 2147483648, %v4527_v8  ;;  %v4546_v13 = vand.u32 2147483647, %v4527_v8  ;;  %vm4542_vm10 = vweird.f32 %v4527_v8 }
 0x8f3   :  { %v4549_v54 = vor.u32 1.1754944e-38, %v4548_v4  ;;  %vm4547_vm12 = vcmp.eq.f32.partialorder %v4546_v13, 8.507059e+37  ;;  %v9601_v13 = vld [vmem:[#allocation38_spill] sm:$0xff] }
 0x8f4   :  { %v4255_v30 = vmul.f32 %v4166_v32, %v9601_v13  ;;  %v4375_v32 = vadd.f32 %v4374_v52, %v4373_v60  ;;  %v9605_v60 = vld [vmem:[#allocation23_spill] sm:$0xff] }
 0x8f7   :  { %v5378_v40 = vpop.eup %5377 }
 0x8f8   :  { %v4538_v12 = vmul.f32 %v5378_v40, %v4527_v8  ;;  %vm4543_vm11 = vweird.f32 %v5378_v40  ;;  %v9599_v8 = vld [vmem:[#allocation34_spill] sm:$0xff] }
 0x8f9   :  { %vm4544_vm2 = vmor %vm4542_vm10, %vm4543_vm11  ;;  %v4256_v31 = vmul.f32 %v4172_v37, %v9599_v8  ;;  %v9603_v37 = vld [vmem:[#allocation21_spill] sm:$0xff] }
 0x8fa   :  { %v4539_v44 = vsub.f32 1.0, %v4538_v12  ;;  %v4185_v47 = vpop.permute.xlu1 %4184 }
 0x8fb   :  { %v4258_v17 = vmul.f32 %v4185_v47, %v9603_v37  ;;  %v4401_v3 = vsel %vm932_vm0, %v4256_v31, 0.0 }
 0x8fc   :  { %v4540_v5 = vmul.f32 %v5378_v40, %v4539_v44  ;;  %v4253_v44 = vmul.f32 %v4153_v53, %v9600_v14  ;;  %v4357_v53 = vadd.f32 %v4356_v57, %v4355_v25  ;;  %v4400_v25 = vsel %vm932_vm0, %v4255_v30, 0.0 }
 0x8fd   :  { %v4410_v52 = vsel %vm932_vm0, %v4258_v17, 0.0  ;;  %v4402_v30 = vadd.f32 %v4401_v3, %v4400_v25 }
 0x8fe   :  { %v4541_v22 = vadd.f32 %v5378_v40, %v4540_v5  ;;  %v4383_v5 = vsel %vm932_vm0, %v4252_v49, 0.0  ;;  %v4391_v61 = vsel %vm932_vm0, %v4253_v44, 0.0  ;;  %v9604_v49 = vld [vmem:[#allocation39_spill] sm:$0xff] }
 0x8ff   :  { %v4403_v3 = vrot.slane %v4402_v30, 4 }
 0x900   :  { %v4545_v24 = vsel %vm4544_vm2, %v5378_v40, %v4541_v22  ;;  %v4366_v40 = vadd.f32 %v4365_v55, %v4364_v33  ;;  %v4254_v22 = vmul.f32 %v4159_v0, %v9602_v41  ;;  %v4198_v0 = vpop.permute.xlu0 %4197  ;;  %v4257_v55 = vmul.f32 %v4179_v16, %v9604_v49 }
 0x901   :  { %v4550_v12 = vsel %vm4547_vm12, %v4549_v54, %v4545_v24  ;;  %v4260_v21 = vmul.f32 %v4198_v0, %v9605_v60 }
 0x902   :  { %v8465_v4 = vmul.f32 %v5376_v42, %v4550_v12  ;;  %v8467_v56 = vmul.f32 %v5374_v51, %v4550_v12  ;;  %v4382_v42 = vsel %vm932_vm0, %v4251_v1, 0.0  ;;  %v4367_v24 = vrot.slane %v4366_v40, 4  ;;  %v4224_v12 = vpop.permute.xlu2 %4223 }
 0x903   :  { %v4384_v57 = vadd.f32 %v4383_v5, %v4382_v42  ;;  %v4392_v47 = vsel %vm932_vm0, %v4254_v22, 0.0  ;;  %v4358_v5 = vrot.slane %v4357_v53, 4 }
 0x904   :  { %v9202_v54 = vperm.slane %v8465_v4, 0  ;;  %5210 = vst.msk [vmem:[%s8947_s5 + $0x8] sm:$0x3] %vm2009_vm15, %v8465_v4  ;;  %v4589_v51 = vperm.slane %v8467_v56, 0  ;;  %v4368_v60 = vadd.f32 %v4367_v24, %v4366_v40 }
 0x905   :  { %5209 = vst.msk [vmem:[%s8947_s5] sm:$0xff] %vm932_vm0, %v8467_v56 }
 0x906   :  { %v4645_v33 = vmul.f32 %v9202_v54, %v9592_v46  ;;  %v4630_v1 = vmul.f32 %v4589_v51, %v9591_v62  ;;  %v4629_v31 = vmul.f32 %v4589_v51, %v9526_v20  ;;  %v4376_v46 = vrot.slane %v4375_v32, 4  ;;  %v9606_v51 = vld [vmem:[#allocation24_spill] sm:$0xff] }
 0x907   :  { %v4393_v54 = vadd.f32 %v4392_v47, %v4391_v61  ;;  %v4409_v20 = vsel %vm932_vm0, %v4257_v55, 0.0  ;;  %v4264_v17 = vmul.f32 %v4224_v12, %v9606_v51  ;;  %v4385_v61 = vrot.slane %v4384_v57, 4 }
 0x908   :  { %v4717_v44 = vsel %vm932_vm0, %v4645_v33, 0.0  ;;  %v4672_v16 = vsel %vm932_vm0, %v4630_v1, 0.0  ;;  %v4669_v62 = vsel %vm932_vm0, %v4629_v31, 0.0  ;;  %v4411_v42 = vadd.f32 %v4410_v52, %v4409_v20  ;;  %v9607_v33 = vld [vmem:[#allocation12_spill] sm:$0xff]  ;;  %v9608_v1 = vld [vmem:[#allocation57_spill] sm:$0xff] }
 0x909   :  { %4718 = vadd.xlane.f32.xlu0 %v4717_v44  ;;  %4673 = vadd.xlane.f32.xlu2 %v4672_v16  ;;  %v4263_v0 = vmul.f32 %v8398_v36, %v9608_v1  ;;  %v4419_v47 = vsel %vm932_vm0, %v4260_v21, 0.0  ;;  %v4377_v44 = vadd.f32 %v4376_v46, %v4375_v32  ;;  %v4394_v31 = vrot.slane %v4393_v54, 4 }
 0x90a   :  { %4670 = vadd.xlane.f32.xlu1 %v4669_v62  ;;  %v4192_v22 = vpop.permute.xlu1 %4191  ;;  %v4359_v55 = vadd.f32 %v4358_v5, %v4357_v53  ;;  %v4437_v62 = vsel %vm932_vm0, %v4264_v17, 0.0  ;;  %v4412_v12 = vrot.slane %v4411_v42, 4  ;;  %v4369_v52 = vrot.slane %v4368_v60, 2 }
 0x90b   :  { %v4259_v59 = vmul.f32 %v4192_v22, %v9607_v33  ;;  %v4386_v20 = vadd.f32 %v4385_v61, %v4384_v57  ;;  %v4436_v51 = vsel %vm932_vm0, %v4263_v0, 0.0  ;;  %v4378_v36 = vrot.slane %v4377_v44, 2 }
 0x90c   :  { %v4395_v40 = vadd.f32 %v4394_v31, %v4393_v54  ;;  %v4360_v24 = vrot.slane %v4359_v55, 2  ;;  %v4404_v1 = vadd.f32 %v4403_v3, %v4402_v30  ;;  %v4438_v21 = vadd.f32 %v4437_v62, %v4436_v51 }
 0x90d   :  { %v4418_v16 = vsel %vm932_vm0, %v4259_v59, 0.0  ;;  %v4413_v32 = vadd.f32 %v4412_v12, %v4411_v42  ;;  %v4370_v46 = vadd.f32 %v4369_v52, %v4368_v60  ;;  %v4387_v33 = vrot.slane %v4386_v20, 2 }
 0x90e   :  { %v4420_v25 = vadd.f32 %v4419_v47, %v4418_v16  ;;  %v4379_v53 = vadd.f32 %v4378_v36, %v4377_v44  ;;  %v4396_v5 = vrot.slane %v4395_v40, 2  ;;  %v4361_v47 = vadd.f32 %v4360_v24, %v4359_v55 }
 0x90f   :  { %v4405_v16 = vrot.slane %v4404_v1, 2  ;;  %v4439_v17 = vrot.slane %v4438_v21, 4  ;;  %v4414_v50 = vrot.slane %v4413_v32, 2  ;;  %v4371_v37 = vrot.slane %v4370_v46, 1 }
 0x910   :  { %v4421_v22 = vrot.slane %v4420_v25, 4  ;;  %v4388_v57 = vadd.f32 %v4387_v33, %v4386_v20  ;;  %v4261_v0 = vmul.f32 %v8376_v23, %v9609_v2  ;;  %v4380_v54 = vrot.slane %v4379_v53, 1 }
 0x911   :  { %v4397_v31 = vadd.f32 %v4396_v5, %v4395_v40  ;;  %v4362_v30 = vrot.slane %v4361_v47, 1  ;;  %v4406_v51 = vadd.f32 %v4405_v16, %v4404_v1  ;;  %v4440_v42 = vadd.f32 %v4439_v17, %v4438_v21 }
 0x912   :  { %v4422_v59 = vadd.f32 %v4421_v22, %v4420_v25  ;;  %v4415_v3 = vadd.f32 %v4414_v50, %v4413_v32  ;;  %v9610_v25 = vld [vmem:[#allocation54_spill] sm:$0xff]  ;;  %v4372_v62 = vadd.f32 %v4371_v37, %v4370_v46  ;;  %v4389_v55 = vrot.slane %v4388_v57, 1 }
 0x913   :  { %v4427_v52 = vsel %vm932_vm0, %v4261_v0, 0.0  ;;  %v4381_v22 = vadd.f32 %v4380_v54, %v4379_v53  ;;  %v4398_v33 = vrot.slane %v4397_v31, 1  ;;  %v4363_v36 = vadd.f32 %v4362_v30, %v4361_v47 }
 0x914   :  { %v4423_v61 = vrot.slane %v4422_v59, 2  ;;  %v4407_v23 = vrot.slane %v4406_v51, 1  ;;  %v4441_v24 = vrot.slane %v4440_v42, 2  ;;  %v4416_v5 = vrot.slane %v4415_v3, 1 }
 0x915   :  { %v4473_v1 = vsel %vm1197_vm3, %v4372_v62, %v4363_v36  ;;  %v4390_v21 = vadd.f32 %v4389_v55, %v4388_v57  ;;  %v4399_v46 = vadd.f32 %v4398_v33, %v4397_v31 }
 0x916   :  { %v4424_v12 = vadd.f32 %v4423_v61, %v4422_v59  ;;  %v4474_v37 = vsel %vm1199_vm4, %v4381_v22, %v4473_v1  ;;  %v4408_v59 = vadd.f32 %v4407_v23, %v4406_v51  ;;  %v4442_v16 = vadd.f32 %v4441_v24, %v4440_v42  ;;  %v9611_v42 = vld [vmem:[#allocation81_spill] sm:$0xff]  ;;  %v9612_v22 = vld [vmem:[#allocation51_spill] sm:$0xff] }
 0x917   :  { %v4417_v53 = vadd.f32 %v4416_v5, %v4415_v3  ;;  %v4475_v61 = vsel %vm1201_vm5, %v4390_v21, %v4474_v37 }
 0x918   :  { %v4425_v50 = vrot.slane %v4424_v12, 1  ;;  %v4476_v54 = vsel %vm1203_vm6, %v4399_v46, %v4475_v61 }
 0x919   :  { %v4477_v30 = vsel %vm1205_vm7, %v4408_v59, %v4476_v54 }
 0x91a   :  { %v4211_v60 = vpop.permute.xlu1 %4210  ;;  %v4426_v0 = vadd.f32 %v4425_v50, %v4424_v12  ;;  %v4478_v57 = vsel %vm1207_vm8, %v4417_v53, %v4477_v30 }
 0x91b   :  { %v4262_v44 = vmul.f32 %v4211_v60, %v9610_v25  ;;  %v4443_v60 = vrot.slane %v4442_v16, 1 }
 0x91c   :  { %v4479_v62 = vsel %vm1209_vm9, %v4426_v0, %v4478_v57 }
 0x91d   :  { %v4428_v20 = vsel %vm932_vm0, %v4262_v44, 0.0  ;;  %v4444_v31 = vadd.f32 %v4443_v60, %v4442_v16 }
 0x91e   :  { %v4429_v40 = vadd.f32 %v4428_v20, %v4427_v52  ;;  %v4487_v52 = vadd.f32 %v4479_v62, %v9611_v42 }
 0x920   :  { %v4430_v32 = vrot.slane %v4429_v40, 4  ;;  %v4498_v33 = vsel %vm932_vm0, %v4487_v52, -inf }
 0x922   :  { %v4431_v17 = vadd.f32 %v4430_v32, %v4429_v40 }
 0x924   :  { %v4432_v47 = vrot.slane %v4431_v17, 2 }
 0x926   :  { %v4433_v44 = vadd.f32 %v4432_v47, %v4431_v17 }
 0x928   :  { %v4434_v55 = vrot.slane %v4433_v44, 1 }
 0x92a   :  { %v4435_v51 = vadd.f32 %v4434_v55, %v4433_v44 }
 0x92c   :  { %v4480_v3 = vsel %vm1197_vm3, %v4444_v31, %v4435_v51 }
 0x92d   :  { %v4488_v12 = vadd.f32 %v4480_v3, %v9612_v22 }
 0x92f   :  { %v4499_v20 = vsel %vm2009_vm15, %v4488_v12, -inf }
 0x930   :  { %v4500_v36 = vmax.f32 %v4498_v33, %v4499_v20 }
 0x932   :  { %v4501_v23 = vrot.slane %v4500_v36, 4 }
 0x934   :  { %v4502_v24 = vmax.f32 %v4500_v36, %v4501_v23 }
 0x936   :  { %v4503_v40 = vrot.slane %v4502_v24, 2 }
 0x938   :  { %v4504_v5 = vmax.f32 %v4502_v24, %v4503_v40  ;;  %v4573_v24 = vrot.slane %v8467_v56, 1 }
 0x93a   :  { %v4505_v1 = vrot.slane %v4504_v5, 1 }
 0x93c   :  { %v4506_v21 = vmax.f32 %v4504_v5, %v4505_v1 }
 0x93e   :  { %v4510_v50 = vsub.f32 %v4488_v12, %v4506_v21  ;;  %v4509_v32 = vsub.f32 %v4487_v52, %v4506_v21 }
 0x940   :  { %v4517_v37 = vmul.f32 1.442695, %v4510_v50  ;;  %v4515_v46 = vmul.f32 1.442695, %v4509_v32 }
 0x942   :  { %5379 = vpow2.f32 %v4515_v46 }
 0x943   :  { %5381 = vpow2.f32 %v4517_v37  ;;  %v4590_v37 = vperm.slane %v4573_v24, 0 }
 0x945   :  { %v4631_v46 = vmul.f32 %v4590_v37, %v9527_v7 }
 0x948   :  { %v5380_v59 = vpop.eup %5379 }
 0x949   :  { %v5382_v16 = vpop.eup %5381  ;;  %v4528_v17 = vsel %vm932_vm0, %v5380_v59, 0.0 }
 0x94a   :  { %v4529_v53 = vsel %vm2009_vm15, %v5382_v16, 0.0 }
 0x94b   :  { %v4530_v61 = vadd.f32 %v4529_v53, %v4528_v17  ;;  %v4675_v17 = vsel %vm932_vm0, %v4631_v46, 0.0 }
 0x94d   :  { %v4531_v0 = vrot.slane %v4530_v61, 4 }
 0x94f   :  { %v4532_v47 = vadd.f32 %v4531_v0, %v4530_v61 }
 0x951   :  { %v4533_v54 = vrot.slane %v4532_v47, 2 }
 0x953   :  { %v4534_v30 = vadd.f32 %v4533_v54, %v4532_v47 }
 0x955   :  { %v4535_v60 = vrot.slane %v4534_v30, 1 }
 0x957   :  { %v4536_v44 = vadd.f32 %v4535_v60, %v4534_v30 }
 0x959   :  { %5383 = vrcp.f32 %v4536_v44  ;;  %v4564_v31 = vand.u32 2147483648, %v4536_v44  ;;  %v4562_v42 = vand.u32 2147483647, %v4536_v44  ;;  %vm4558_vm14 = vweird.f32 %v4536_v44 }
 0x95b   :  { %v4565_v3 = vor.u32 1.1754944e-38, %v4564_v31  ;;  %vm4563_vm10 = vcmp.eq.f32.partialorder %v4562_v42, 8.507059e+37 }
 0x95f   :  { %v5384_v57 = vpop.eup %5383 }
 0x960   :  { %v4554_v62 = vmul.f32 %v5384_v57, %v4536_v44  ;;  %vm4559_vm13 = vweird.f32 %v5384_v57 }
 0x961   :  { %vm4560_vm11 = vmor %vm4558_vm14, %vm4559_vm13 }
 0x962   :  { %v4555_v55 = vsub.f32 1.0, %v4554_v62 }
 0x964   :  { %v4556_v51 = vmul.f32 %v5384_v57, %v4555_v55  ;;  %v4575_v55 = vrot.slane %v8467_v56, 3 }
 0x966   :  { %v4557_v52 = vadd.f32 %v5384_v57, %v4556_v51 }
 0x968   :  { %v4561_v22 = vsel %vm4560_vm11, %v5384_v57, %v4557_v52  ;;  %v4592_v52 = vperm.slane %v4575_v55, 0 }
 0x969   :  { %v4566_v12 = vsel %vm4563_vm10, %v4565_v3, %v4561_v22  ;;  %v4576_v22 = vrot.slane %v8467_v56, 4 }
 0x96a   :  { %v8530_v33 = vmul.f32 %v5382_v16, %v4566_v12  ;;  %v8532_v20 = vmul.f32 %v5380_v59, %v4566_v12  ;;  %v4632_v59 = vmul.f32 %v4590_v37, %v9525_v19  ;;  %v4636_v12 = vmul.f32 %v4592_v52, %v9536_v58 }
 0x96b   :  { %v4593_v24 = vperm.slane %v4576_v22, 0  ;;  %v9619_v22 = vld [vmem:[#allocation12_spill] sm:$0xff] }
 0x96c   :  { %v4607_v36 = vperm.slane %v8530_v33, 0  ;;  %5212 = vst.msk [vmem:[%s8947_s5 + $0x18] sm:$0x3] %vm2009_vm15, %v8530_v33  ;;  %v4599_v23 = vperm.slane %v8532_v20, 0  ;;  %v4678_v53 = vsel %vm932_vm0, %v4632_v59, 0.0  ;;  %v4582_v54 = vrot.slane %v8532_v20, 2 }
 0x96d   :  { %5211 = vst.msk [vmem:[%s8947_s5 + $0x10] sm:$0xff] %vm932_vm0, %v8532_v20  ;;  %v4637_v58 = vmul.f32 %v4593_v24, %v9537_v28  ;;  %v4585_v59 = vrot.slane %v8532_v20, 5  ;;  %vm9626_vm15 = vcmask 123904  }
 0x96e   :  { %v4665_v40 = vmul.f32 %v4607_v36, %v9609_v2  ;;  %v4650_v5 = vmul.f32 %v4599_v23, %v9551_v43  ;;  %v4649_v1 = vmul.f32 %v4599_v23, %v9553_v45  ;;  %v4574_v2 = vrot.slane %v8467_v56, 2 }
 0x96f   :  { %v4581_v43 = vrot.slane %v8532_v20, 1  ;;  %v9613_v45 = vperm.slane %v8465_v4, 0  ;;  %v4601_v44 = vperm.slane %v4582_v54, 0  ;;  %v4693_v46 = vsel %vm932_vm0, %v4637_v58, 0.0 }
 0x970   :  { %v4777_v21 = vsel %vm932_vm0, %v4665_v40, 0.0  ;;  %v4732_v50 = vsel %vm932_vm0, %v4650_v5, 0.0  ;;  %v4729_v32 = vsel %vm932_vm0, %v4649_v1, 0.0  ;;  %v4591_v61 = vperm.slane %v4574_v2, 0 }
 0x971   :  { %4778 = vadd.xlane.f32.xlu0 %v4777_v21  ;;  %4733 = vadd.xlane.f32.xlu1 %v4732_v50  ;;  %v4646_v16 = vmul.f32 %v9613_v45, %v9593_v18  ;;  %v4600_v0 = vperm.slane %v4581_v43, 0  ;;  %v4654_v62 = vmul.f32 %v4601_v44, %v9573_v39  ;;  %v4690_v40 = vsel %vm932_vm0, %v4636_v12, 0.0 }
 0x972   :  { %4730 = vadd.xlane.f32.xlu2 %v4729_v32  ;;  %v4633_v19 = vmul.f32 %v4591_v61, %v9533_v9  ;;  %v4634_v9 = vmul.f32 %v4591_v61, %v9535_v6  ;;  %v4635_v6 = vmul.f32 %v4592_v52, %v9530_v15  ;;  %v4638_v5 = vmul.f32 %v4593_v24, %v9534_v38  ;;  %v9617_v52 = vld [vmem:[#allocation127_spill] sm:$0xff] }
 0x973   :  { %v4720_v7 = vsel %vm932_vm0, %v4646_v16, 0.0  ;;  %v4651_v47 = vmul.f32 %v4600_v0, %v9550_v29  ;;  %v4652_v30 = vmul.f32 %v4600_v0, %v9549_v34  ;;  %v4583_v29 = vrot.slane %v8532_v20, 3 }
 0x974   :  { %v4681_v18 = vsel %vm932_vm0, %v4633_v19, 0.0  ;;  %v4653_v34 = vmul.f32 %v4601_v44, %v9597_v26  ;;  %v4744_v31 = vsel %vm932_vm0, %v4654_v62, 0.0  ;;  %v4684_v51 = vsel %vm932_vm0, %v4634_v9, 0.0  ;;  %v9615_v9 = vld [vmem:[#allocation21_spill] sm:$0xff] }
 0x975   :  { %v4735_v60 = vsel %vm932_vm0, %v4651_v47, 0.0  ;;  %v4738_v57 = vsel %vm932_vm0, %v4652_v30, 0.0  ;;  %v4602_v42 = vperm.slane %v4583_v29, 0  ;;  %v4687_v23 = vsel %vm932_vm0, %v4635_v6, 0.0  ;;  %v9616_v29 = vld [vmem:[#allocation97_spill] sm:$0xff] }
 0x976   :  { %v4741_v3 = vsel %vm932_vm0, %v4653_v34, 0.0  ;;  %v4577_v15 = vrot.slane %v8467_v56, 5  ;;  %v4584_v1 = vrot.slane %v8532_v20, 4  ;;  %v4696_v21 = vsel %vm932_vm0, %v4638_v5, 0.0 }
 0x977   :  { %v4655_v39 = vmul.f32 %v4602_v42, %v9596_v35  ;;  %v4656_v35 = vmul.f32 %v4602_v42, %v9598_v63  ;;  %v4604_v45 = vperm.slane %v4585_v59, 0  ;;  %v4579_v54 = vrot.slane %v8467_v56, 7 }
 0x978   :  { %v4594_v32 = vperm.slane %v4577_v15, 0  ;;  %v4603_v37 = vperm.slane %v4584_v1, 0  ;;  %v4666_v1 = vmul.f32 %v4607_v36, %v9610_v25 }
 0x979   :  { %4676 = vadd.xlane.f32.xlu0 %v4675_v17  ;;  %4679 = vadd.xlane.f32.xlu1 %v4678_v53  ;;  %v4747_v26 = vsel %vm932_vm0, %v4655_v39, 0.0  ;;  %v4750_v50 = vsel %vm932_vm0, %v4656_v35, 0.0  ;;  %v4660_v17 = vmul.f32 %v4604_v45, %v9599_v8  ;;  %v4578_v53 = vrot.slane %v8467_v56, 6  ;;  %v9618_v39 = vld [vmem:[#allocation126_spill] sm:$0xff]  ;;  %v9621_v35 = vld [vmem:[#allocation24_spill] sm:$0xff] }
 0x97a   :  { %4721 = vadd.xlane.f32.xlu2 %v4720_v7  ;;  %v4639_v38 = vmul.f32 %v4594_v32, %v9539_v27  ;;  %v4657_v63 = vmul.f32 %v4603_v37, %v9600_v14  ;;  %v4658_v2 = vmul.f32 %v4603_v37, %v9602_v41  ;;  %v4640_v27 = vmul.f32 %v4594_v32, %v9541_v11  ;;  %v9622_v32 = vld [vmem:[#allocation57_spill] sm:$0xff] }
 0x97b   :  { %v4586_v14 = vrot.slane %v8532_v20, 6  ;;  %v4659_v41 = vmul.f32 %v4604_v45, %v9601_v13  ;;  %v4762_v61 = vsel %vm932_vm0, %v4660_v17, 0.0  ;;  %v4595_v19 = vperm.slane %v4578_v53, 0 }
 0x97c   :  { %v4699_v28 = vsel %vm932_vm0, %v4639_v38, 0.0  ;;  %v4753_v43 = vsel %vm932_vm0, %v4657_v63, 0.0  ;;  %v4756_v16 = vsel %vm932_vm0, %v4658_v2, 0.0  ;;  %v4702_v0 = vsel %vm932_vm0, %v4640_v27, 0.0  ;;  %v8644_v63 = vpop.xlane.xlu0 %4718  ;;  %v9623_v2 = vld [vmem:[#allocation36_spill] sm:$0xff] }
 0x97d   :  { %v4605_v7 = vperm.slane %v4586_v14, 0  ;;  %v4759_v47 = vsel %vm932_vm0, %v4659_v41, 0.0  ;;  %v4641_v11 = vmul.f32 %v4595_v19, %v9540_v10  ;;  %v4642_v30 = vmul.f32 %v4595_v19, %v9542_v48  ;;  %v8642_v38 = vpop.xlane.xlu1 %4670 }
 0x97e   :  { %v4580_v10 = vrot.slane %v8465_v4, 1  ;;  %v4587_v48 = vrot.slane %v8532_v20, 7  ;;  %v4588_v4 = vrot.slane %v8530_v33, 1  ;;  %v8646_v33 = vpop.xlane.xlu2 %4673 }
 0x97f   :  { %v4661_v8 = vmul.f32 %v4605_v7, %v9604_v49  ;;  %v4708_v44 = vsel %vm932_vm0, %v4642_v30, 0.0  ;;  %v4662_v49 = vmul.f32 %v4605_v7, %v9615_v9 }
 0x980   :  { %v4606_v42 = vperm.slane %v4587_v48, 0 }
 0x981   :  { %4682 = vadd.xlane.f32.xlu1 %v4681_v18  ;;  %4736 = vadd.xlane.f32.xlu0 %v4735_v60  ;;  %v4765_v13 = vsel %vm932_vm0, %v4661_v8, 0.0  ;;  %v4705_v18 = vsel %vm932_vm0, %v4641_v11, 0.0  ;;  %v4596_v60 = vperm.slane %v4579_v54, 0  ;;  %v4768_v34 = vsel %vm932_vm0, %v4662_v49, 0.0 }
 0x982   :  { %4739 = vadd.xlane.f32.xlu2 %v4738_v57  ;;  %v9614_v57 = vld [vmem:[#allocation123_spill] sm:$0xff]  ;;  %v4663_v12 = vmul.f32 %v4606_v42, %v9619_v22 }
 0x983   :  { %v4644_v62 = vmul.f32 %v4596_v60, %v9614_v57  ;;  %v4643_v56 = vmul.f32 %v4596_v60, %v9616_v29 }
 0x984   :  { %v4771_v24 = vsel %vm932_vm0, %v4663_v12, 0.0 }
 0x985   :  { %v4714_v55 = vsel %vm932_vm0, %v4644_v62, 0.0 }
 0x989   :  { %4745 = vadd.xlane.f32.xlu1 %v4744_v31  ;;  %4685 = vadd.xlane.f32.xlu0 %v4684_v51  ;;  %v4598_v31 = vperm.slane %v4580_v10, 0  ;;  %v4711_v51 = vsel %vm932_vm0, %v4643_v56, 0.0  ;;  %v5122_v10 = vperm.slane %v8646_v33, %v9623_v2 }
 0x98a   :  { %4742 = vadd.xlane.f32.xlu2 %v4741_v3 }
 0x98b   :  { %v4647_v3 = vmul.f32 %v4598_v31, %v9617_v52  ;;  %v4648_v6 = vmul.f32 %v4598_v31, %v9618_v39 }
 0x98d   :  { %v4723_v20 = vsel %vm932_vm0, %v4647_v3, 0.0 }
 0x991   :  { %4748 = vadd.xlane.f32.xlu1 %v4747_v26  ;;  %4688 = vadd.xlane.f32.xlu0 %v4687_v23  ;;  %v4726_v26 = vsel %vm932_vm0, %v4648_v6, 0.0  ;;  %v4608_v23 = vperm.slane %v4588_v4, 0 }
 0x992   :  { %4691 = vadd.xlane.f32.xlu2 %v4690_v40  ;;  %v9620_v40 = vld [vmem:[#allocation23_spill] sm:$0xff] }
 0x993   :  { %v4664_v5 = vmul.f32 %v4606_v42, %v9620_v40  ;;  %v4668_v15 = vmul.f32 %v4608_v23, %v9621_v35  ;;  %v4667_v37 = vmul.f32 %v4608_v23, %v9622_v32 }
 0x995   :  { %v4774_v58 = vsel %vm932_vm0, %v4664_v5, 0.0 }
 0x999   :  { %4697 = vadd.xlane.f32.xlu1 %v4696_v21  ;;  %4751 = vadd.xlane.f32.xlu0 %v4750_v50  ;;  %v4786_v21 = vsel %vm932_vm0, %v4668_v15, 0.0  ;;  %v4780_v50 = vsel %vm932_vm0, %v4666_v1, 0.0 }
 0x99a   :  { %4694 = vadd.xlane.f32.xlu2 %v4693_v46  ;;  %v4783_v46 = vsel %vm932_vm0, %v4667_v37, 0.0  ;;  %vm9625_vm0 = vcmask 130048  }
 0x9a1   :  { %4700 = vadd.xlane.f32.xlu1 %v4699_v28  ;;  %4754 = vadd.xlane.f32.xlu0 %v4753_v43 }
 0x9a2   :  { %4757 = vadd.xlane.f32.xlu2 %v4756_v16  ;;  %v9624_v16 = vld [vmem:[#allocation29_spill] sm:$0xff] }
 0x9a3   :  { %v5121_v29 = vperm.slane %v8642_v38, %v9624_v16 }
 0x9a5   :  { %v5123_v3 = vsel %vm1138_vm1, %v5122_v10, %v5121_v29  ;;  %v4790_v10 = vmul.f32 %v8646_v33, %v8646_v33  ;;  %v4789_v29 = vmul.f32 %v8642_v38, %v8642_v38 }
 0x9a7   :  { %v4870_v38 = vperm.slane %v4790_v10, %v9623_v2 }
 0x9a9   :  { %4763 = vadd.xlane.f32.xlu1 %v4762_v61  ;;  %4703 = vadd.xlane.f32.xlu0 %v4702_v0 }
 0x9aa   :  { %4760 = vadd.xlane.f32.xlu2 %v4759_v47 }
 0x9b1   :  { %4766 = vadd.xlane.f32.xlu1 %v4765_v13  ;;  %4706 = vadd.xlane.f32.xlu0 %v4705_v18 }
 0x9b2   :  { %4709 = vadd.xlane.f32.xlu2 %v4708_v44 }
 0x9b9   :  { %4715 = vadd.xlane.f32.xlu1 %v4714_v55  ;;  %4769 = vadd.xlane.f32.xlu0 %v4768_v34 }
 0x9ba   :  { %4712 = vadd.xlane.f32.xlu2 %v4711_v51 }
 0x9c1   :  { %4724 = vadd.xlane.f32.xlu1 %v4723_v20  ;;  %4727 = vadd.xlane.f32.xlu0 %v4726_v26 }
 0x9c2   :  { %4772 = vadd.xlane.f32.xlu2 %v4771_v24 }
 0x9c9   :  { %4775 = vadd.xlane.f32.xlu1 %v4774_v58  ;;  %4787 = vadd.xlane.f32.xlu0 %v4786_v21 }
 0x9ca   :  { %4781 = vadd.xlane.f32.xlu2 %v4780_v50 }
 0x9d1   :  { %4784 = vadd.xlane.f32.xlu1 %v4783_v46 }
 0x9e4   :  { %v4734_v25 = vpop.xlane.xlu1 %4733  ;;  %v8648_v36 = vpop.xlane.xlu0 %4778 }
 0x9e5   :  { %v4810_v59 = vmul.f32 %v4734_v25, %v4734_v25  ;;  %v5152_v28 = vperm.slane %v4734_v25, %v9623_v2  ;;  %v4731_v43 = vpop.xlane.xlu2 %4730 }
 0x9e6   :  { %v4809_v45 = vmul.f32 %v4731_v43, %v4731_v43  ;;  %v5151_v17 = vperm.slane %v4731_v43, %v9624_v16 }
 0x9e7   :  { %v4900_v27 = vperm.slane %v4810_v59, %v9623_v2 }
 0x9e8   :  { %v4899_v14 = vperm.slane %v4809_v45, %v9624_v16  ;;  %v5153_v53 = vsel %vm1138_vm1, %v5152_v28, %v5151_v17 }
 0x9ea   :  { %v4901_v41 = vsel %vm1138_vm1, %v4900_v27, %v4899_v14 }
 0x9ec   :  { %v8656_v61 = vpop.xlane.xlu1 %4679  ;;  %v8658_v0 = vpop.xlane.xlu0 %4676 }
 0x9ed   :  { %v5125_v7 = vperm.slane %v8656_v61, %v9623_v2  ;;  %v8662_v19 = vpop.xlane.xlu2 %4721  ;;  %v5124_v47 = vperm.slane %v8658_v0, %v9624_v16 }
 0x9ef   :  { %v5126_v8 = vsel %vm1138_vm1, %v5125_v7, %v5124_v47 }
 0x9f0   :  { %v5181_v6 = vsel %vm1197_vm3, %v5126_v8, %v5123_v3  ;;  %v8754_v3 = vmul.f32 %v8644_v63, %v8644_v63 }
 0x9f4   :  { %v8667_v11 = vpop.xlane.xlu1 %4682  ;;  %v4737_v54 = vpop.xlane.xlu0 %4736 }
 0x9f5   :  { %v4740_v30 = vpop.xlane.xlu2 %4739  ;;  %v4811_v13 = vmul.f32 %v4737_v54, %v4737_v54  ;;  %v5154_v18 = vperm.slane %v4737_v54, %v9624_v16  ;;  %v5127_v31 = vperm.slane %v8667_v11, %v9624_v16 }
 0x9f6   :  { %v4812_v60 = vmul.f32 %v4740_v30, %v4740_v30  ;;  %v5155_v44 = vperm.slane %v4740_v30, %v9623_v2 }
 0x9f7   :  { %v4902_v57 = vperm.slane %v4811_v13, %v9624_v16 }
 0x9f8   :  { %v4903_v62 = vperm.slane %v4812_v60, %v9623_v2  ;;  %v5156_v9 = vsel %vm1138_vm1, %v5155_v44, %v5154_v18  ;;  %v4792_v60 = vmul.f32 %v8656_v61, %v8656_v61  ;;  %v4791_v44 = vmul.f32 %v8658_v0, %v8658_v0 }
 0x9f9   :  { %v5189_v49 = vsel %vm1197_vm3, %v5156_v9, %v5153_v53 }
 0x9fa   :  { %v4904_v56 = vsel %vm1138_vm1, %v4903_v62, %v4902_v57  ;;  %v4872_v0 = vperm.slane %v4791_v44, %v9624_v16 }
 0x9fb   :  { %v8681_v48 = vsel %vm1197_vm3, %v4904_v56, %v4901_v41  ;;  %v4873_v56 = vperm.slane %v4792_v60, %v9623_v2 }
 0x9fc   :  { %v8683_v55 = vpop.xlane.xlu1 %4745  ;;  %v4686_v34 = vpop.xlane.xlu0 %4685 }
 0x9fd   :  { %v5158_v51 = vperm.slane %v8683_v55, %v9623_v2  ;;  %v8689_v42 = vpop.xlane.xlu2 %4742  ;;  %v5128_v52 = vperm.slane %v4686_v34, %v9623_v2 }
 0x9fe   :  { %v5157_v39 = vperm.slane %v8689_v42, %v9624_v16 }
 0x9ff   :  { %v5129_v4 = vsel %vm1138_vm1, %v5128_v52, %v5127_v31  ;;  %v4794_v31 = vmul.f32 %v4686_v34, %v4686_v34 }
 0xa00   :  { %v5159_v22 = vsel %vm1138_vm1, %v5158_v51, %v5157_v39  ;;  %v5182_v12 = vsel %vm1199_vm4, %v5129_v4, %v5181_v6 }
 0xa01   :  { %v5190_v20 = vsel %vm1199_vm4, %v5159_v22, %v5189_v49  ;;  %v4869_v22 = vperm.slane %v4789_v29, %v9624_v16 }
 0xa04   :  { %v8700_v26 = vpop.xlane.xlu1 %4748  ;;  %v4689_v23 = vpop.xlane.xlu0 %4688 }
 0xa05   :  { %v4692_v24 = vpop.xlane.xlu2 %4691  ;;  %v5130_v40 = vperm.slane %v4689_v23, %v9624_v16  ;;  %v5160_v21 = vperm.slane %v8700_v26, %v9624_v16  ;;  %v4795_v52 = vmul.f32 %v4689_v23, %v4689_v23  ;;  %v4874_v23 = vsel %vm1138_vm1, %v4873_v56, %v4872_v0 }
 0xa06   :  { %v5131_v5 = vperm.slane %v4692_v24, %v9623_v2  ;;  %v4796_v51 = vmul.f32 %v4692_v24, %v4692_v24  ;;  %v4876_v24 = vperm.slane %v4794_v31, %v9623_v2 }
 0xa08   :  { %v5132_v35 = vsel %vm1138_vm1, %v5131_v5, %v5130_v40 }
 0xa09   :  { %v5183_v15 = vsel %vm1201_vm5, %v5132_v35, %v5182_v12  ;;  %v4793_v12 = vmul.f32 %v8667_v11, %v8667_v11  ;;  %v4879_v35 = vperm.slane %v4796_v51, %v9623_v2 }
 0xa0c   :  { %v4698_v1 = vpop.xlane.xlu1 %4697  ;;  %v8706_v58 = vpop.xlane.xlu0 %4751 }
 0xa0d   :  { %v5134_v50 = vperm.slane %v4698_v1, %v9623_v2  ;;  %v4695_v32 = vpop.xlane.xlu2 %4694  ;;  %v5161_v37 = vperm.slane %v8706_v58, %v9623_v2  ;;  %v4798_v39 = vmul.f32 %v4698_v1, %v4698_v1 }
 0xa0e   :  { %v5133_v46 = vperm.slane %v4695_v32, %v9624_v16  ;;  %v4797_v6 = vmul.f32 %v4695_v32, %v4695_v32 }
 0xa0f   :  { %v5162_v25 = vsel %vm1138_vm1, %v5161_v37, %v5160_v21 }
 0xa10   :  { %v5135_v59 = vsel %vm1138_vm1, %v5134_v50, %v5133_v46  ;;  %v5191_v28 = vsel %vm1201_vm5, %v5162_v25, %v5190_v20  ;;  %v4882_v50 = vperm.slane %v4798_v39, %v9623_v2  ;;  %v4881_v11 = vperm.slane %v4797_v6, %v9624_v16 }
 0xa11   :  { %v5184_v43 = vsel %vm1203_vm6, %v5135_v59, %v5183_v15  ;;  %v4878_v15 = vperm.slane %v4795_v52, %v9624_v16  ;;  %v4871_v46 = vsel %vm1138_vm1, %v4870_v38, %v4869_v22  ;;  %v5145_v25 = vperm.slane %v8644_v63, %v9624_v16 }
 0xa12   :  { %v4875_v59 = vperm.slane %v4793_v12, %v9624_v16  ;;  %v5146_v12 = vperm.slane %v8662_v19, %v9623_v2 }
 0xa14   :  { %v4701_v45 = vpop.xlane.xlu1 %4700  ;;  %v8718_v17 = vpop.xlane.xlu0 %4754 }
 0xa15   :  { %v8720_v27 = vpop.xlane.xlu2 %4757  ;;  %v5163_v14 = vperm.slane %v8718_v17, %v9624_v16  ;;  %v5136_v54 = vperm.slane %v4701_v45, %v9624_v16  ;;  %v4799_v32 = vmul.f32 %v4701_v45, %v4701_v45 }
 0xa16   :  { %v5164_v53 = vperm.slane %v8720_v27, %v9623_v2 }
 0xa17   :  { %v4884_v60 = vperm.slane %v4799_v32, %v9624_v16 }
 0xa18   :  { %v5165_v41 = vsel %vm1138_vm1, %v5164_v53, %v5163_v14  ;;  %v4806_v14 = vmul.f32 %v8662_v19, %v8662_v19  ;;  %v4929_v53 = vsel %vm1197_vm3, %v4874_v23, %v4871_v46  ;;  %v4817_v19 = vmul.f32 %v8718_v17, %v8718_v17 }
 0xa19   :  { %v5192_v7 = vsel %vm1203_vm6, %v5165_v41, %v5191_v28  ;;  %v4814_v41 = vmul.f32 %v8683_v55, %v8683_v55 }
 0xa1a   :  { %v4894_v22 = vperm.slane %v4806_v14, %v9623_v2 }
 0xa1b   :  { %v4906_v23 = vperm.slane %v4814_v41, %v9623_v2 }
 0xa1c   :  { %v8728_v47 = vpop.xlane.xlu1 %4763  ;;  %v4704_v8 = vpop.xlane.xlu0 %4703 }
 0xa1d   :  { %v5167_v30 = vperm.slane %v8728_v47, %v9623_v2  ;;  %v8733_v13 = vpop.xlane.xlu2 %4760  ;;  %v5137_v18 = vperm.slane %v4704_v8, %v9623_v2  ;;  %v4800_v40 = vmul.f32 %v4704_v8, %v4704_v8 }
 0xa1e   :  { %v5166_v57 = vperm.slane %v8733_v13, %v9624_v16 }
 0xa1f   :  { %v5138_v62 = vsel %vm1138_vm1, %v5137_v18, %v5136_v54  ;;  %v4885_v45 = vperm.slane %v4800_v40, %v9623_v2  ;;  %v4813_v54 = vmul.f32 %v8689_v42, %v8689_v42  ;;  %v4883_v18 = vsel %vm1138_vm1, %v4882_v50, %v4881_v11 }
 0xa20   :  { %v5168_v9 = vsel %vm1138_vm1, %v5167_v30, %v5166_v57  ;;  %v5185_v49 = vsel %vm1205_vm7, %v5138_v62, %v5184_v43  ;;  %v4893_v43 = vperm.slane %v8754_v3, %v9624_v16  ;;  %v4880_v30 = vsel %vm1138_vm1, %v4879_v35, %v4878_v15 }
 0xa21   :  { %v5193_v61 = vsel %vm1205_vm7, %v5168_v9, %v5192_v7  ;;  %v4877_v7 = vsel %vm1138_vm1, %v4876_v24, %v4875_v59  ;;  %v4886_v42 = vsel %vm1138_vm1, %v4885_v45, %v4884_v60  ;;  %v4905_v24 = vperm.slane %v4813_v54, %v9624_v16 }
 0xa22   :  { %v4930_v29 = vsel %vm1199_vm4, %v4877_v7, %v4929_v53  ;;  %v4816_v35 = vmul.f32 %v8706_v58, %v8706_v58  ;;  %v4819_v50 = vmul.f32 %v8733_v13, %v8733_v13  ;;  %v4895_v14 = vsel %vm1138_vm1, %v4894_v22, %v4893_v43 }
 0xa23   :  { %v4931_v31 = vsel %vm1201_vm5, %v4880_v30, %v4930_v29 }
 0xa24   :  { %v8756_v4 = vpop.xlane.xlu1 %4766  ;;  %v4707_v33 = vpop.xlane.xlu0 %4706  ;;  %v4932_v38 = vsel %vm1203_vm6, %v4883_v18, %v4931_v31  ;;  %v4909_v13 = vperm.slane %v4816_v35, %v9623_v2  ;;  %v4914_v30 = vperm.slane %v4819_v50, %v9624_v16 }
 0xa25   :  { %v4710_v20 = vpop.xlane.xlu2 %4709  ;;  %v5139_v34 = vperm.slane %v4707_v33, %v9624_v16  ;;  %v4801_v21 = vmul.f32 %v4707_v33, %v4707_v33  ;;  %v5169_v55 = vperm.slane %v8756_v4, %v9624_v16 }
 0xa26   :  { %v5140_v5 = vperm.slane %v4710_v20, %v9623_v2  ;;  %v4802_v1 = vmul.f32 %v4710_v20, %v4710_v20 }
 0xa27   :  { %v4887_v8 = vperm.slane %v4801_v21, %v9624_v16  ;;  %v4820_v21 = vmul.f32 %v8728_v47, %v8728_v47 }
 0xa28   :  { %v5141_v37 = vsel %vm1138_vm1, %v5140_v5, %v5139_v34  ;;  %v4888_v63 = vperm.slane %v4802_v1, %v9623_v2  ;;  %v4933_v34 = vsel %vm1205_vm7, %v4886_v42, %v4932_v38  ;;  %v4815_v5 = vmul.f32 %v8700_v26, %v8700_v26 }
 0xa29   :  { %v5186_v28 = vsel %vm1207_vm8, %v5141_v37, %v5185_v49  ;;  %v4818_v1 = vmul.f32 %v8720_v27, %v8720_v27  ;;  %v5147_v27 = vsel %vm1138_vm1, %v5146_v12, %v5145_v25  ;;  %v4821_v25 = vmul.f32 %v8756_v4, %v8756_v4 }
 0xa2a   :  { %v4889_v3 = vsel %vm1138_vm1, %v4888_v63, %v4887_v8  ;;  %v4911_v63 = vperm.slane %v4817_v19, %v9624_v16  ;;  %v4908_v43 = vperm.slane %v4815_v5, %v9624_v16  ;;  %v4915_v54 = vperm.slane %v4820_v21, %v9623_v2 }
 0xa2b   :  { %v4912_v7 = vperm.slane %v4818_v1, %v9623_v2 }
 0xa2c   :  { %v4716_v44 = vpop.xlane.xlu1 %4715  ;;  %v4770_v57 = vpop.xlane.xlu0 %4769  ;;  %v4916_v29 = vsel %vm1138_vm1, %v4915_v54, %v4914_v30 }
 0xa2d   :  { %v4804_v62 = vmul.f32 %v4716_v44, %v4716_v44  ;;  %v5143_v9 = vperm.slane %v4716_v44, %v9623_v2  ;;  %v4713_v49 = vpop.xlane.xlu2 %4712  ;;  %v5170_v10 = vperm.slane %v4770_v57, %v9623_v2  ;;  %v4822_v47 = vmul.f32 %v4770_v57, %v4770_v57 }
 0xa2e   :  { %v4803_v56 = vmul.f32 %v4713_v49, %v4713_v49  ;;  %v5142_v0 = vperm.slane %v4713_v49, %v9624_v16  ;;  %v4910_v57 = vsel %vm1138_vm1, %v4909_v13, %v4908_v43  ;;  %v4917_v49 = vperm.slane %v4821_v25, %v9624_v16 }
 0xa2f   :  { %v4891_v51 = vperm.slane %v4804_v62, %v9623_v2  ;;  %v5171_v52 = vsel %vm1138_vm1, %v5170_v10, %v5169_v55  ;;  %v4918_v60 = vperm.slane %v4822_v47, %v9623_v2 }
 0xa30   :  { %v4890_v39 = vperm.slane %v4803_v56, %v9624_v16  ;;  %v5144_v6 = vsel %vm1138_vm1, %v5143_v9, %v5142_v0  ;;  %v8806_v33 = vsel %vm1207_vm8, %v5171_v52, %v5193_v61  ;;  %v4934_v61 = vsel %vm1207_vm8, %v4889_v3, %v4933_v34 }
 0xa31   :  { %v8813_v20 = vsel %vm1209_vm9, %v5144_v6, %v5186_v28  ;;  %v4907_v28 = vsel %vm1138_vm1, %v4906_v23, %v4905_v24  ;;  %v4913_v9 = vsel %vm1138_vm1, %v4912_v7, %v4911_v63  ;;  %v4919_v52 = vsel %vm1138_vm1, %v4918_v60, %v4917_v49 }
 0xa32   :  { %v4892_v40 = vsel %vm1138_vm1, %v4891_v51, %v4890_v39  ;;  %v4938_v62 = vsel %vm1199_vm4, %v4907_v28, %v8681_v48  ;;  %vm9627_vm4 = vmmov %vm9625_vm0 }
 0xa33   :  { %v4935_v15 = vsel %vm1209_vm9, %v4892_v40, %v4934_v61  ;;  %v4939_v31 = vsel %vm1201_vm5, %v4910_v57, %v4938_v62  ;;  %v4825_v61 = vmul.f32 %v8648_v36, %v8648_v36  ;;  %vm9628_vm5 = vmmov %vm9626_vm15 }
 0xa34   :  { %v4725_v11 = vpop.xlane.xlu1 %4724  ;;  %v4949_v26 = vsel %vm9625_vm0, %v4935_v15, 0.0  ;;  %v4728_v32 = vpop.xlane.xlu0 %4727  ;;  %v4940_v6 = vsel %vm1203_vm6, %v4913_v9, %v4939_v31 }
 0xa35   :  { %v4807_v37 = vmul.f32 %v4725_v11, %v4725_v11  ;;  %v5148_v58 = vperm.slane %v4725_v11, %v9624_v16  ;;  %v4773_v46 = vpop.xlane.xlu2 %4772  ;;  %4950 = vadd.xlane.f32.xlu2 %v4949_v26  ;;  %v4808_v17 = vmul.f32 %v4728_v32, %v4728_v32  ;;  %v5149_v59 = vperm.slane %v4728_v32, %v9623_v2 }
 0xa36   :  { %v4823_v55 = vmul.f32 %v4773_v46, %v4773_v46  ;;  %v5172_v42 = vperm.slane %v4773_v46, %v9624_v16  ;;  %v4941_v12 = vsel %vm1205_vm7, %v4916_v29, %v4940_v6  ;;  %v4923_v1 = vperm.slane %v4825_v61, %v9624_v16 }
 0xa37   :  { %v4896_v53 = vperm.slane %v4807_v37, %v9624_v16  ;;  %v4897_v45 = vperm.slane %v4808_v17, %v9623_v2  ;;  %v5150_v41 = vsel %vm1138_vm1, %v5149_v59, %v5148_v58  ;;  %v4942_v24 = vsel %vm1207_vm8, %v4919_v52, %v4941_v12 }
 0xa38   :  { %v8848_v8 = vsel %vm1197_vm3, %v5150_v41, %v5147_v27  ;;  %v4920_v48 = vperm.slane %v4823_v55, %v9624_v16 }
 0xa39   :  { %v4898_v18 = vsel %vm1138_vm1, %v4897_v45, %v4896_v53 }
 0xa3a   :  { %v4936_v44 = vsel %vm1197_vm3, %v4898_v18, %v4895_v14 }
 0xa3b   :  { %v4952_v4 = vsel %vm9626_vm15, %v4936_v44, 0.0 }
 0xa3c   :  { %v4776_v10 = vpop.xlane.xlu1 %4775  ;;  %4953 = vadd.xlane.f32.xlu1 %v4952_v4  ;;  %v8877_v22 = vpop.xlane.xlu0 %4787 }
 0xa3d   :  { %v4824_v56 = vmul.f32 %v4776_v10, %v4776_v10  ;;  %v5173_v0 = vperm.slane %v4776_v10, %v9623_v2  ;;  %v8866_v51 = vpop.xlane.xlu2 %4781 }
 0xa3e   :  { %v4826_v34 = vmul.f32 %v8866_v51, %v8866_v51 }
 0xa3f   :  { %v4921_v3 = vperm.slane %v4824_v56, %v9623_v2  ;;  %v5174_v39 = vsel %vm1138_vm1, %v5173_v0, %v5172_v42 }
 0xa40   :  { %v8875_v38 = vsel %vm1209_vm9, %v5174_v39, %v8806_v33  ;;  %v4828_v33 = vmul.f32 %v8877_v22, %v8877_v22  ;;  %v4924_v19 = vperm.slane %v4826_v34, %v9623_v2 }
 0xa41   :  { %v4922_v23 = vsel %vm1138_vm1, %v4921_v3, %v4920_v48 }
 0xa42   :  { %v4943_v40 = vsel %vm1209_vm9, %v4922_v23, %v4942_v24  ;;  %v4927_v21 = vperm.slane %v4828_v33, %v9623_v2  ;;  %v4925_v11 = vsel %vm1138_vm1, %v4924_v19, %v4923_v1 }
 0xa43   :  { %v4955_v5 = vsel %vm9627_vm4, %v4943_v40, 0.0 }
 0xa44   :  { %v8890_v35 = vpop.xlane.xlu1 %4784  ;;  %4956 = vadd.xlane.f32.xlu0 %v4955_v5 }
 0xa45   :  { %v4827_v15 = vmul.f32 %v8890_v35, %v8890_v35 }
 0xa47   :  { %v4926_v50 = vperm.slane %v4827_v15, %v9624_v16 }
 0xa49   :  { %v4928_v26 = vsel %vm1138_vm1, %v4927_v21, %v4926_v50 }
 0xa4a   :  { %v4944_v32 = vsel %vm1197_vm3, %v4928_v26, %v4925_v11 }
 0xa4b   :  { %v4958_v37 = vsel %vm9628_vm5, %v4944_v32, 0.0  ;;  %vm9629_vm5 = vcmask 130048  }
 0xa4c   :  { %4959 = vadd.xlane.f32.xlu2 %v4958_v37 }
 0xaa8   :  { %v4951_v58 = vpop.xlane.xlu2 %4950 }
 0xaa9   :  { %5385 = vrsqrt.f32 %v4951_v58  ;;  %vm4968_vm6 = vcmp.eq.f32.partialorder %v4951_v58, inf  ;;  %v4971_v63 = vand.u32 2147483648, %v4951_v58  ;;  %vm4970_vm7 = vcmp.eq.f32.partialorder %v4951_v58, 0.0 }
 0xaaf   :  { %v5386_v46 = vpop.eup %5385  ;;  %v4954_v17 = vpop.xlane.xlu1 %4953 }
 0xab0   :  { %v4962_v59 = vmul.f32 %v5386_v46, %v4951_v58  ;;  %5387 = vrsqrt.f32 %v4954_v17  ;;  %vm4980_vm8 = vcmp.eq.f32.partialorder %v4954_v17, inf  ;;  %v4983_v29 = vand.u32 2147483648, %v4954_v17 }
 0xab1   :  { %vm4982_vm9 = vcmp.eq.f32.partialorder %v4954_v17, 0.0 }
 0xab2   :  { %v4963_v27 = vmul.f32 %v5386_v46, %v4962_v59 }
 0xab4   :  { %v4964_v28 = vmul.f32 0.5, %v4963_v27 }
 0xab6   :  { %v5388_v47 = vpop.eup %5387  ;;  %v4965_v14 = vsub.f32 1.5, %v4964_v28 }
 0xab7   :  { %v4974_v13 = vmul.f32 %v5388_v47, %v4954_v17  ;;  %v4957_v53 = vpop.xlane.xlu0 %4956 }
 0xab8   :  { %v4966_v45 = vmul.f32 %v5386_v46, %v4965_v14  ;;  %5389 = vrsqrt.f32 %v4957_v53  ;;  %vm4992_vm2 = vcmp.eq.f32.partialorder %v4957_v53, inf  ;;  %v4995_v61 = vand.u32 2147483648, %v4957_v53 }
 0xab9   :  { %v4975_v41 = vmul.f32 %v5388_v47, %v4974_v13  ;;  %vm4994_vm12 = vcmp.eq.f32.partialorder %v4957_v53, 0.0 }
 0xaba   :  { %v4967_v7 = vmul.f32 %v4966_v45, %v4951_v58 }
 0xabb   :  { %v4976_v25 = vmul.f32 0.5, %v4975_v41 }
 0xabc   :  { %v4969_v43 = vsel %vm4968_vm6, %v4951_v58, %v4967_v7 }
 0xabd   :  { %v4972_v54 = vsel %vm4970_vm7, %v4971_v63, %v4969_v43  ;;  %v4977_v30 = vsub.f32 1.5, %v4976_v25 }
 0xabe   :  { %v5390_v18 = vpop.eup %5389  ;;  %v5009_v60 = vmul.f32 %v4972_v54, %v4972_v54 }
 0xabf   :  { %v4978_v44 = vmul.f32 %v5388_v47, %v4977_v30  ;;  %v4986_v57 = vmul.f32 %v5390_v18, %v4957_v53  ;;  %v4960_v55 = vpop.xlane.xlu2 %4959 }
 0xac0   :  { %v5013_v4 = vadd.f32 1.0, %v5009_v60  ;;  %5391 = vrsqrt.f32 %v4960_v55  ;;  %vm5004_vm10 = vcmp.eq.f32.partialorder %v4960_v55, inf  ;;  %v5007_v27 = vand.u32 2147483648, %v4960_v55 }
 0xac1   :  { %v4979_v62 = vmul.f32 %v4978_v44, %v4954_v17  ;;  %v4987_v9 = vmul.f32 %v5390_v18, %v4986_v57  ;;  %vm5006_vm15 = vcmp.eq.f32.partialorder %v4960_v55, 0.0 }
 0xac2   :  { %v5017_v49 = vadd.f32 1e-08, %v5013_v4 }
 0xac3   :  { %v4981_v10 = vsel %vm4980_vm8, %v4954_v17, %v4979_v62  ;;  %v4988_v42 = vmul.f32 0.5, %v4987_v9 }
 0xac4   :  { %5393 = vrcp.f32 %v5017_v49  ;;  %v8902_v56 = vsel %vm4982_vm9, %v4983_v29, %v4981_v10  ;;  %v5032_v1 = vand.u32 2147483648, %v5017_v49  ;;  %v5030_v11 = vand.u32 2147483647, %v5017_v49 }
 0xac5   :  { %v4989_v0 = vsub.f32 1.5, %v4988_v42  ;;  %v5010_v52 = vmul.f32 %v8902_v56, %v8902_v56  ;;  %vm5026_vm14 = vweird.f32 %v5017_v49 }
 0xac6   :  { %v5392_v31 = vpop.eup %5391  ;;  %v5033_v17 = vor.u32 1.1754944e-38, %v5032_v1  ;;  %vm5031_vm0 = vcmp.eq.f32.partialorder %v5030_v11, 8.507059e+37 }
 0xac7   :  { %v4990_v48 = vmul.f32 %v5390_v18, %v4989_v0  ;;  %v4998_v3 = vmul.f32 %v5392_v31, %v4960_v55  ;;  %v5014_v39 = vadd.f32 1.0, %v5010_v52 }
 0xac9   :  { %v4991_v6 = vmul.f32 %v4990_v48, %v4957_v53  ;;  %v4999_v12 = vmul.f32 %v5392_v31, %v4998_v3  ;;  %v5018_v23 = vadd.f32 1e-08, %v5014_v39 }
 0xaca   :  { %v5394_v34 = vpop.eup %5393 }
 0xacb   :  { %v5022_v24 = vmul.f32 %v5394_v34, %v5017_v49  ;;  %v4993_v40 = vsel %vm4992_vm2, %v4957_v53, %v4991_v6  ;;  %v5000_v33 = vmul.f32 0.5, %v4999_v12  ;;  %5395 = vrcp.f32 %v5018_v23 }
 0xacc   :  { %v8906_v19 = vsel %vm4994_vm12, %v4995_v61, %v4993_v40  ;;  %vm5027_vm13 = vweird.f32 %v5394_v34  ;;  %v5047_v7 = vand.u32 2147483648, %v5018_v23  ;;  %v5045_v30 = vand.u32 2147483647, %v5018_v23 }
 0xacd   :  { %v5023_v5 = vsub.f32 1.0, %v5022_v24  ;;  %v5001_v15 = vsub.f32 1.5, %v5000_v33  ;;  %v5011_v21 = vmul.f32 %v8906_v19, %v8906_v19  ;;  %vm5028_vm11 = vmor %vm5026_vm14, %vm5027_vm13  ;;  %vm5041_vm6 = vweird.f32 %v5018_v23 }
 0xace   :  { %vm5046_vm8 = vcmp.eq.f32.partialorder %v5045_v30, 8.507059e+37  ;;  %vm9630_vm2 = vcmask 123904   ;;  %v5178_v6 = vperm.slane %v8890_v35, %v9624_v16  ;;  %v5176_v40 = vperm.slane %v8866_v51, %v9623_v2 }
 0xacf   :  { %v5024_v50 = vmul.f32 %v5394_v34, %v5023_v5  ;;  %v5002_v26 = vmul.f32 %v5392_v31, %v5001_v15  ;;  %v5015_v32 = vadd.f32 1.0, %v5011_v21  ;;  %v5179_v61 = vperm.slane %v8877_v22, %v9623_v2 }
 0xad1   :  { %v5025_v37 = vadd.f32 %v5394_v34, %v5024_v50  ;;  %v5003_v58 = vmul.f32 %v5002_v26, %v4960_v55  ;;  %v5396_v46 = vpop.eup %5395  ;;  %v5019_v59 = vadd.f32 1e-08, %v5015_v32  ;;  %v5180_v5 = vsel %vm1138_vm1, %v5179_v61, %v5178_v6 }
 0xad2   :  { %v5037_v47 = vmul.f32 %v5396_v46, %v5018_v23  ;;  %vm5042_vm4 = vweird.f32 %v5396_v46 }
 0xad3   :  { %v5029_v28 = vsel %vm5028_vm11, %v5394_v34, %v5025_v37  ;;  %v5005_v14 = vsel %vm5004_vm10, %v4960_v55, %v5003_v58  ;;  %5397 = vrcp.f32 %v5019_v59  ;;  %vm5043_vm7 = vmor %vm5041_vm6, %vm5042_vm4  ;;  %v5062_v49 = vand.u32 2147483648, %v5019_v59 }
 0xad4   :  { %v5034_v13 = vsel %vm5031_vm0, %v5033_v17, %v5029_v28  ;;  %v5038_v45 = vsub.f32 1.0, %v5037_v47  ;;  %v5008_v41 = vsel %vm5006_vm15, %v5007_v27, %v5005_v14  ;;  %v5060_v42 = vand.u32 2147483647, %v5019_v59  ;;  %vm9631_vm10 = vmmov %vm9629_vm5 }
 0xad5   :  { %v5035_v53 = vmul.f32 %v5034_v13, %v4972_v54  ;;  %v5012_v63 = vmul.f32 %v5008_v41, %v5008_v41  ;;  %v5048_v54 = vor.u32 1.1754944e-38, %v5047_v7  ;;  %vm5056_vm12 = vweird.f32 %v5019_v59 }
 0xad6   :  { %v5039_v43 = vmul.f32 %v5396_v46, %v5038_v45  ;;  %v5063_v52 = vor.u32 1.1754944e-38, %v5062_v49  ;;  %vm5061_vm14 = vcmp.eq.f32.partialorder %v5060_v42, 8.507059e+37 }
 0xad7   :  { %v5201_v25 = vmul.f32 %v8813_v20, %v5035_v53  ;;  %v5016_v18 = vadd.f32 1.0, %v5012_v63 }
 0xad8   :  { %v5040_v60 = vadd.f32 %v5396_v46, %v5039_v43 }
 0xad9   :  { %5205 = vst.msk [vmem:[%s8946_s4] sm:$0xff] %vm9629_vm5, %v5201_v25  ;;  %v5398_v44 = vpop.eup %5397  ;;  %v5020_v57 = vadd.f32 1e-08, %v5016_v18  ;;  %vm9632_vm5 = vmmov %vm9630_vm2 }
 0xada   :  { %v5044_v55 = vsel %vm5043_vm7, %v5396_v46, %v5040_v60  ;;  %v5052_v4 = vmul.f32 %v5398_v44, %v5019_v59  ;;  %vm5057_vm9 = vweird.f32 %v5398_v44 }
 0xadb   :  { %v5049_v62 = vsel %vm5046_vm8, %v5048_v54, %v5044_v55  ;;  %5399 = vrcp.f32 %v5020_v57  ;;  %vm5058_vm13 = vmor %vm5056_vm12, %vm5057_vm9  ;;  %v5077_v12 = vand.u32 2147483648, %v5020_v57  ;;  %v5075_v24 = vand.u32 2147483647, %v5020_v57 }
 0xadc   :  { %v5050_v20 = vmul.f32 %v5049_v62, %v8902_v56  ;;  %v5053_v9 = vsub.f32 1.0, %v5052_v4  ;;  %vm5071_vm0 = vweird.f32 %v5020_v57 }
 0xadd   :  { %v5078_v35 = vor.u32 1.1754944e-38, %v5077_v12  ;;  %vm5076_vm4 = vcmp.eq.f32.partialorder %v5075_v24, 8.507059e+37 }
 0xade   :  { %v5202_v10 = vmul.f32 %v8848_v8, %v5050_v20  ;;  %v5054_v29 = vmul.f32 %v5398_v44, %v5053_v9 }
 0xae0   :  { %5206 = vst.msk [vmem:[%s8946_s4 + $0x8] sm:$0x3] %vm9630_vm2, %v5202_v10  ;;  %v5055_v0 = vadd.f32 %v5398_v44, %v5054_v29 }
 0xae1   :  { %v5400_v31 = vpop.eup %5399 }
 0xae2   :  { %v5059_v48 = vsel %vm5058_vm13, %v5398_v44, %v5055_v0  ;;  %v5067_v56 = vmul.f32 %v5400_v31, %v5020_v57  ;;  %vm5072_vm11 = vweird.f32 %v5400_v31 }
 0xae3   :  { %v5064_v3 = vsel %vm5061_vm14, %v5063_v52, %v5059_v48  ;;  %vm5073_vm15 = vmor %vm5071_vm0, %vm5072_vm11 }
 0xae4   :  { %v5065_v39 = vmul.f32 %v5064_v3, %v8906_v19  ;;  %v5068_v8 = vsub.f32 1.0, %v5067_v56 }
 0xae6   :  { %v5203_v34 = vmul.f32 %v8875_v38, %v5065_v39  ;;  %v5069_v23 = vmul.f32 %v5400_v31, %v5068_v8  ;;  %v5175_v38 = vperm.slane %v8648_v36, %v9624_v16 }
 0xae8   :  { %5207 = vst.msk [vmem:[%s8946_s4 + $0x10] sm:$0xff] %vm9631_vm10, %v5203_v34  ;;  %v5070_v33 = vadd.f32 %v5400_v31, %v5069_v23  ;;  %v5177_v15 = vsel %vm1138_vm1, %v5176_v40, %v5175_v38 }
 0xae9   :  { %v5196_v22 = vsel %vm1197_vm3, %v5180_v5, %v5177_v15 }
 0xaea   :  { %v5074_v19 = vsel %vm5073_vm15, %v5400_v31, %v5070_v33 }
 0xaeb   :  { %v5079_v51 = vsel %vm5076_vm4, %v5078_v35, %v5074_v19 }
 0xaec   :  { %v5080_v2 = vmul.f32 %v5079_v51, %v5008_v41 }
 0xaee   :  { %v5204_v1 = vmul.f32 %v5196_v22, %v5080_v2 }
 0xaf0   :  { %5208 = vst.msk [vmem:[%s8946_s4 + $0x18] sm:$0x3] %vm9632_vm5, %v5204_v1 }
 0xaf1   :  { %5221 = vsyncpa [#allocation3], 1 }
 0xaf2   :  { %5222 = vsyncpa [#allocation5], 1 }
 0xaf3   :  { %5223 = vsyncpa [#allocation8], 1 }

</bundles_post_ra>
